<compile_context>
chip_gen: v7x
topology: tpu7x:2x2x1
jax: 0.10.0
libtpu: 0.0.40
codegen_flags: <defaults>
</compile_context>

<pallas_src>
import functools
import numpy as np
import jax
import jax.numpy as jnp
from jax.experimental import pallas as pl
from jax.experimental.pallas import tpu as pltpu

# ----------------------------- configuration -----------------------------
EMB_DIM = 32          # word / entity embedding dim D
NUM_HEADS = 4         # attention heads H
HEAD_DIM = 8          # per-head dim DK  (H * DK = 32)
ATTN_DIM = 32         # additive-attention hidden dim DA
SIZE_N = 64           # final news embedding size (config.get_size_n())
WORD_VOCAB = 100
ENT_VOCAB = 50
TEXT_LEN = 16
ENT_LEN = 8

HD = NUM_HEADS * HEAD_DIM            # 32
VBLK = HEAD_DIM + ATTN_DIM           # 40: per-head packed [wv_h | wv_h @ wa_h]
PROJ_W = 2 * HD + NUM_HEADS * VBLK   # 224: packed projection width
VOCAB_PAD = 128                      # padded vocab rows (one-hot lane width)
OUT_PAD = 128                        # lane-dense output width (>= SIZE_N)
MAX_TB = 256                         # articles per grid step (batch tile)

assert HD == NUM_HEADS * HEAD_DIM
assert SIZE_N <= OUT_PAD
assert WORD_VOCAB <= VOCAB_PAD and ENT_VOCAB <= VOCAB_PAD


# ----------------------------- Pallas kernel -----------------------------
def _branch(ids_ref, emb_ref, w_ref, va, ba, tb, seq_len):
    """One attention branch over a tile of `tb` articles.

    ids_ref: (tb*seq_len, 1) int32 token ids
    emb_ref: (VOCAB_PAD, EMB_DIM) embedding table (zero-padded rows)
    w_ref:   (EMB_DIM, PROJ_W) packed [wq | wk | per-head (wv_h | wv_h@wa_h)]
    va, ba:  (1, ATTN_DIM) additive-attention params
    returns NUM_HEADS arrays of shape (tb, HEAD_DIM) (head-pooled article reps).
    """
    n = tb * seq_len

    # In-kernel embedding gather: exact one-hot matmul on the MXU.
    # TODO(synk): for production-size vocabularies replace the one-hot matmul
    # with a true gather / DMA row gather.
    ids = ids_ref[...]                                               # (n, 1)
    hot = (jax.lax.broadcasted_iota(jnp.int32, (n, VOCAB_PAD), 1) == ids
           ).astype(jnp.float32)                                     # (n, VOCAB_PAD)
    x = jnp.dot(hot, emb_ref[...], preferred_element_type=jnp.float32)   # (n, D)

    # One full-width packed projection matmul (M = tb*seq_len).
    proj = jnp.dot(x, w_ref[...], preferred_element_type=jnp.float32)    # (n, PROJ_W)
    q = proj[:, 0:HD].reshape(tb, seq_len, HD)
    k = proj[:, HD:2 * HD].reshape(tb, seq_len, HD)

    scale = 1.0 / float(np.sqrt(HEAD_DIM))
    ctx = []
    t_pre = None
    for h in range(NUM_HEADS):                                       # static, 4 iters
        hs = slice(h * HEAD_DIM, (h + 1) * HEAD_DIM)
        s = jnp.einsum('bld,bmd->blm', q[:, :, hs], k[:, :, hs],
                       preferred_element_type=jnp.float32) * scale
        s = s - jnp.max(s, axis=-1, keepdims=True)
        p = jnp.exp(s)
        p = p * pl.reciprocal(jnp.sum(p, axis=-1, keepdims=True), approx=True)
        # Per-head block [v_h | v_h @ wa_h]: one einsum yields both the head
        # context and its additive-attention (y @ wa) contribution, no concat.
        base = 2 * HD + h * VBLK
        vblk = proj[:, base:base + VBLK].reshape(tb, seq_len, VBLK)
        o = jnp.einsum('blm,bmd->bld', p, vblk,
                       preferred_element_type=jnp.float32)           # (tb, L, VBLK)
        ctx.append(o[:, :, :HEAD_DIM])                               # (tb, L, DK)
        tp = o[:, :, HEAD_DIM:]                                      # (tb, L, DA)
        t_pre = tp if t_pre is None else t_pre + tp

    # Additive attention pooling over the sequence axis.
    t = jnp.tanh(t_pre + ba.reshape(1, 1, ATTN_DIM))                 # (tb, L, DA)
    a = jnp.sum(t * va.reshape(1, 1, ATTN_DIM), axis=-1, keepdims=True)  # (tb, L, 1)
    a = a - jnp.max(a, axis=1, keepdims=True)
    e = jnp.exp(a)
    wgt = e * pl.reciprocal(jnp.sum(e, axis=1, keepdims=True), approx=True)
    return [jnp.sum(wgt * c, axis=1) for c in ctx]                   # H x (tb, DK)


def _encoder_kernel(idt_ref, ide_ref, wemb_ref, eemb_ref, wt_ref, we_ref,
                    wo_ref, consts_ref, out_ref):
    """Fused: text branch + entity branch + final dense projection (padded to 128)."""
    tb = out_ref.shape[0]
    pooled = _branch(idt_ref, wemb_ref, wt_ref,
                     consts_ref[0:1, 0:ATTN_DIM], consts_ref[1:2, 0:ATTN_DIM],
                     tb, TEXT_LEN)
    pooled += _branch(ide_ref, eemb_ref, we_ref,
                      consts_ref[2:3, 0:ATTN_DIM], consts_ref[3:4, 0:ATTN_DIM],
                      tb, ENT_LEN)
    # concat([tv, ev]) @ w_out + b_out, computed as per-(branch, head) slices of
    # w_out so no lane-narrow concatenates are ever materialized.
    acc = jnp.zeros((tb, OUT_PAD), jnp.float32) + consts_ref[4:5, :]
    for i, ph in enumerate(pooled):
        acc = acc + jnp.dot(ph, wo_ref[i * HEAD_DIM:(i + 1) * HEAD_DIM, :],
                            preferred_element_type=jnp.float32)
    out_ref[...] = acc                                               # (tb, 128)


# ----------------------------- wrapper -----------------------------
def _round_up(x, m):
    return (x + m - 1) // m * m


def _pack_branch_weights(wq, wk, wv, wa):
    assert wq.shape == (EMB_DIM, HD) and wk.shape == (EMB_DIM, HD)
    assert wv.shape == (EMB_DIM, HD) and wa.shape == (HD, ATTN_DIM)
    cols = [wq, wk]
    for h in range(NUM_HEADS):
        hs = slice(h * HEAD_DIM, (h + 1) * HEAD_DIM)
        cols.append(wv[:, hs])
        cols.append(wv[:, hs] @ wa[hs, :])     # fold wa into the projection
    packed = jnp.concatenate(cols, axis=1)
    assert packed.shape == (EMB_DIM, PROJ_W)
    return packed


def knowledge_aware_news_encoder(params, text_tokens, entity_tokens):
    """Forward: (B, Lt) int32, (B, Le) int32 -> (B, SIZE_N) float32."""
    B = text_tokens.shape[0]

    # ---- weight-sized packing (cheap, done once per call by XLA) ----
    wemb = jnp.zeros((VOCAB_PAD, EMB_DIM), jnp.float32
                     ).at[:WORD_VOCAB].set(params["word_emb"])
    eemb = jnp.zeros((VOCAB_PAD, EMB_DIM), jnp.float32
                     ).at[:ENT_VOCAB].set(params["ent_emb"])
    wt = _pack_branch_weights(params["t_wq"], params["t_wk"],
                              params["t_wv"], params["t_wa"])
    we = _pack_branch_weights(params["e_wq"], params["e_wk"],
                              params["e_wv"], params["e_wa"])
    wo = jnp.zeros((2 * HD, OUT_PAD), jnp.float32).at[:, :SIZE_N].set(params["w_out"])
    consts = jnp.zeros((8, OUT_PAD), jnp.float32)
    consts = consts.at[0, :ATTN_DIM].set(params["t_va"][:, 0])
    consts = consts.at[1, :ATTN_DIM].set(params["t_ba"][0])
    consts = consts.at[2, :ATTN_DIM].set(params["e_va"][:, 0])
    consts = consts.at[3, :ATTN_DIM].set(params["e_ba"][0])
    consts = consts.at[4, :SIZE_N].set(params["b_out"][0])

    # ---- batch tiling: prefer >=2 grid steps so v7x can use both cores ----
    if B >= 16:
        tb = min(MAX_TB, _round_up(pl.cdiv(B, 2), 8))
    else:
        tb = _round_up(B, 8)
    bp = _round_up(B, tb)

    idt, ide = text_tokens, entity_tokens
    if bp != B:
        # Padded articles gather embedding row 0; softmax over identical logits
        # is finite and the padded outputs are sliced off below.
        idt = jnp.pad(idt, ((0, bp - B), (0, 0)))
        ide = jnp.pad(ide, ((0, bp - B), (0, 0)))
    idt = idt.astype(jnp.int32).reshape(bp * TEXT_LEN, 1)
    ide = ide.astype(jnp.int32).reshape(bp * ENT_LEN, 1)

    out = pl.pallas_call(
        _encoder_kernel,
        out_shape=jax.ShapeDtypeStruct((bp, OUT_PAD), jnp.float32),
        grid=(bp // tb,),
        in_specs=[
            pl.BlockSpec((tb * TEXT_LEN, 1), lambda b: (b, 0)),
            pl.BlockSpec((tb * ENT_LEN, 1), lambda b: (b, 0)),
            pl.BlockSpec(wemb.shape, lambda b: (0, 0)),
            pl.BlockSpec(eemb.shape, lambda b: (0, 0)),
            pl.BlockSpec(wt.shape, lambda b: (0, 0)),
            pl.BlockSpec(we.shape, lambda b: (0, 0)),
            pl.BlockSpec(wo.shape, lambda b: (0, 0)),
            pl.BlockSpec(consts.shape, lambda b: (0, 0)),
        ],
        out_specs=pl.BlockSpec((tb, OUT_PAD), lambda b: (b, 0)),
        compiler_params=pltpu.CompilerParams(
            dimension_semantics=("parallel",),
            vmem_limit_bytes=32 * 1024 * 1024),
    )(idt, ide, wemb, eemb, wt, we, wo, consts)
    return out[:B, :SIZE_N]


# ----------------------------- reference (plain JAX) -----------------------------
def _ref_branch(x, wq, wk, wv, wa, ba, va):
    outs = []
    for h in range(NUM_HEADS):
        sl = slice(h * HEAD_DIM, (h + 1) * HEAD_DIM)
        q = x @ wq[:, sl]
        k = x @ wk[:, sl]
        v = x @ wv[:, sl]
        s = jnp.einsum("bld,bmd->blm", q, k) / np.sqrt(HEAD_DIM)
        p = jax.nn.softmax(s, axis=-1)
        outs.append(jnp.einsum("blm,bmd->bld", p, v))
    y = jnp.concatenate(outs, axis=-1)
    t = jnp.tanh(y @ wa + ba)
    a = jax.nn.softmax((t @ va)[..., 0], axis=-1)
    return jnp.einsum("bl,bld->bd", a, y)


def _ref_forward(params, text_tokens, entity_tokens):
    xt = jnp.take(params["word_emb"], text_tokens, axis=0)
    xe = jnp.take(params["ent_emb"], entity_tokens, axis=0)
    tv = _ref_branch(xt, params["t_wq"], params["t_wk"], params["t_wv"],
                     params["t_wa"], params["t_ba"], params["t_va"])
    ev = _ref_branch(xe, params["e_wq"], params["e_wk"], params["e_wv"],
                     params["e_wa"], params["e_ba"], params["e_va"])
    c = jnp.concatenate([tv, ev], axis=-1)
    return c @ params["w_out"] + params["b_out"]


# ----------------------------- param init -----------------------------
def init_params(key):
    ks = jax.random.split(key, 16)
    norm = functools.partial(jax.random.normal, dtype=jnp.float32)
    return {
        "word_emb": norm(ks[0], (WORD_VOCAB, EMB_DIM)) * 0.1,
        "ent_emb":  norm(ks[1], (ENT_VOCAB, EMB_DIM)) * 0.1,
        # text branch
        "t_wq": norm(ks[2], (EMB_DIM, HD)) * 0.1,
        "t_wk": norm(ks[3], (EMB_DIM, HD)) * 0.1,
        "t_wv": norm(ks[4], (EMB_DIM, HD)) * 0.1,
        "t_wa": norm(ks[5], (HD, ATTN_DIM)) * 0.1,
        "t_ba": jnp.zeros((1, ATTN_DIM), jnp.float32),
        "t_va": norm(ks[6], (ATTN_DIM, 1)) * 0.1,
        # entity branch
        "e_wq": norm(ks[7], (EMB_DIM, HD)) * 0.1,
        "e_wk": norm(ks[8], (EMB_DIM, HD)) * 0.1,
        "e_wv": norm(ks[9], (EMB_DIM, HD)) * 0.1,
        "e_wa": norm(ks[10], (HD, ATTN_DIM)) * 0.1,
        "e_ba": jnp.zeros((1, ATTN_DIM), jnp.float32),
        "e_va": norm(ks[11], (ATTN_DIM, 1)) * 0.1,
        # final projection to size_n
        "w_out": norm(ks[12], (2 * HD, SIZE_N)) * 0.1,
        "b_out": jnp.zeros((1, SIZE_N), jnp.float32),
    }


# ----------------------------- main -----------------------------
if __name__ == "__main__":
    key = jax.random.PRNGKey(0)
    k_params, k_text, k_ent = jax.random.split(key, 3)

    params = init_params(k_params)

    batch = 8
    # "texts" / "entities" lists of strings -> deterministic token-id tensors
    # (string tokenization itself has no Pallas equivalent; we start from ids).
    text_tokens = jax.random.randint(k_text, (batch, TEXT_LEN), 0, WORD_VOCAB,
                                     dtype=jnp.int32)
    entity_tokens = jax.random.randint(k_ent, (batch, ENT_LEN), 0, ENT_VOCAB,
                                       dtype=jnp.int32)

    fwd = jax.jit(knowledge_aware_news_encoder)
    out = fwd(params, text_tokens, entity_tokens)
    out = jax.block_until_ready(out)

    ref = _ref_forward(params, text_tokens, entity_tokens)
    assert out.shape == (batch, SIZE_N)
    assert jnp.allclose(out, ref, rtol=5e-2, atol=5e-2)

    print("KERNEL_OK")
</pallas_src>

<mosaic_0001>
module attributes {stable_mosaic.version = 11 : i64} {
  func.func @_encoder_kernel(%arg0: i32, %arg1: memref<128x1xi32, #tpu.memory_space<vmem>>, %arg2: memref<64x1xi32, #tpu.memory_space<vmem>>, %arg3: memref<128x32xf32, #tpu.memory_space<vmem>>, %arg4: memref<128x32xf32, #tpu.memory_space<vmem>>, %arg5: memref<32x224xf32, #tpu.memory_space<vmem>>, %arg6: memref<32x224xf32, #tpu.memory_space<vmem>>, %arg7: memref<64x128xf32, #tpu.memory_space<vmem>>, %arg8: memref<8x128xf32, #tpu.memory_space<vmem>>, %arg9: memref<8x128xf32, #tpu.memory_space<vmem>>) attributes {dimension_semantics = [#tpu.dimension_semantics<parallel>], iteration_bounds = array<i64: 1>, scalar_prefetch = 0 : i64, scratch_operands = 0 : i64, tpu.core_type = #tpu.core_type<tc>, window_params = [{transform_indices = @transform_0, window_bounds = array<i64: 128, 1>}, {transform_indices = @transform_1, window_bounds = array<i64: 64, 1>}, {pipeline_mode = #tpu.pipeline_mode<synchronous>, transform_indices = @transform_2, window_bounds = array<i64: 128, 32>}, {pipeline_mode = #tpu.pipeline_mode<synchronous>, transform_indices = @transform_3, window_bounds = array<i64: 128, 32>}, {pipeline_mode = #tpu.pipeline_mode<synchronous>, transform_indices = @transform_4, window_bounds = array<i64: 32, 224>}, {pipeline_mode = #tpu.pipeline_mode<synchronous>, transform_indices = @transform_5, window_bounds = array<i64: 32, 224>}, {pipeline_mode = #tpu.pipeline_mode<synchronous>, transform_indices = @transform_6, window_bounds = array<i64: 64, 128>}, {pipeline_mode = #tpu.pipeline_mode<synchronous>, transform_indices = @transform_7, window_bounds = array<i64: 8, 128>}, {transform_indices = @transform_8, window_bounds = array<i64: 8, 128>}]} {
    %c0 = arith.constant 0 : index
    %c0_0 = arith.constant 0 : index
    %0 = vector.load %arg8[%c0, %c0_0] : memref<8x128xf32, #tpu.memory_space<vmem>>, vector<1x32xf32>
    %c1 = arith.constant 1 : index
    %c0_1 = arith.constant 0 : index
    %1 = vector.load %arg8[%c1, %c0_1] : memref<8x128xf32, #tpu.memory_space<vmem>>, vector<1x32xf32>
    %c0_2 = arith.constant 0 : index
    %c0_3 = arith.constant 0 : index
    %2 = vector.load %arg1[%c0_2, %c0_3] : memref<128x1xi32, #tpu.memory_space<vmem>>, vector<128x1xi32>
    %3 = tpu.iota {dimensions = array<i32: 1>} : vector<128x128xi32>
    %4 = vector.broadcast %2 : vector<128x1xi32> to vector<128x128xi32>
    %5 = arith.cmpi eq, %3, %4 : vector<128x128xi32>
    %6 = arith.extui %5 : vector<128x128xi1> to vector<128x128xi32>
    %7 = arith.sitofp %6 : vector<128x128xi32> to vector<128x128xf32>
    %c0_4 = arith.constant 0 : index
    %c0_5 = arith.constant 0 : index
    %8 = vector.load %arg3[%c0_4, %c0_5] : memref<128x32xf32, #tpu.memory_space<vmem>>, vector<128x32xf32>
    %cst = arith.constant dense<0.000000e+00> : vector<128x32xf32>
    %9 = tpu.matmul %7, %8, %cst {dimension_numbers = #tpu.dot_dimension_numbers<[1], [0], [0], [1], [0, 0, 1, 1], [], []>} : vector<128x128xf32>, vector<128x32xf32>, vector<128x32xf32> -> vector<128x32xf32>
    %c0_6 = arith.constant 0 : index
    %c0_7 = arith.constant 0 : index
    %10 = vector.load %arg5[%c0_6, %c0_7] : memref<32x224xf32, #tpu.memory_space<vmem>>, vector<32x224xf32>
    %cst_8 = arith.constant dense<0.000000e+00> : vector<128x224xf32>
    %11 = tpu.matmul %9, %10, %cst_8 {dimension_numbers = #tpu.dot_dimension_numbers<[1], [0], [0], [1], [0, 0, 1, 1], [], []>} : vector<128x32xf32>, vector<32x224xf32>, vector<128x224xf32> -> vector<128x224xf32>
    %12 = vector.extract_strided_slice %11 {offsets = [0, 0], sizes = [128, 32], strides = [1, 1]} : vector<128x224xf32> to vector<128x32xf32>
    %13 = vector.shape_cast %12 : vector<128x32xf32> to vector<8x16x32xf32>
    %14 = vector.extract_strided_slice %11 {offsets = [0, 32], sizes = [128, 32], strides = [1, 1]} : vector<128x224xf32> to vector<128x32xf32>
    %15 = vector.shape_cast %14 : vector<128x32xf32> to vector<8x16x32xf32>
    %16 = vector.extract_strided_slice %13 {offsets = [0, 0, 0], sizes = [8, 16, 8], strides = [1, 1, 1]} : vector<8x16x32xf32> to vector<8x16x8xf32>
    %17 = vector.extract_strided_slice %15 {offsets = [0, 0, 0], sizes = [8, 16, 8], strides = [1, 1, 1]} : vector<8x16x32xf32> to vector<8x16x8xf32>
    "tpu.trace_start"() <{level = 10 : i32, message = "bld,bmd->blm"}> : () -> ()
    %cst_9 = arith.constant dense<0.000000e+00> : vector<8x16x16xf32>
    %18 = tpu.matmul %16, %17, %cst_9 {dimension_numbers = #tpu.dot_dimension_numbers<[2], [2], [1], [1], [0, 0, 0, 1, 1, 1], [0], [0]>} : vector<8x16x8xf32>, vector<8x16x8xf32>, vector<8x16x16xf32> -> vector<8x16x16xf32>
    "tpu.trace_stop"() : () -> ()
    %cst_10 = arith.constant 0.353553385 : f32
    %19 = vector.broadcast %cst_10 : f32 to vector<8x16x16xf32>
    %20 = arith.mulf %18, %19 : vector<8x16x16xf32>
    %cst_11 = arith.constant dense<0xFF800000> : vector<8x16xf32>
    %21 = vector.multi_reduction <maximumf>, %20, %cst_11 [2] : vector<8x16x16xf32> to vector<8x16xf32>
    %22 = vector.shape_cast %21 : vector<8x16xf32> to vector<8x16x1xf32>
    %23 = vector.broadcast %22 : vector<8x16x1xf32> to vector<8x16x16xf32>
    %24 = arith.subf %20, %23 : vector<8x16x16xf32>
    %25 = math.exp %24 : vector<8x16x16xf32>
    %cst_12 = arith.constant dense<0.000000e+00> : vector<8x16xf32>
    %26 = vector.multi_reduction <add>, %25, %cst_12 [2] : vector<8x16x16xf32> to vector<8x16xf32>
    %27 = vector.shape_cast %26 : vector<8x16xf32> to vector<8x16x1xf32>
    %28 = tpu.reciprocal %27 {approx = true} : vector<8x16x1xf32> -> vector<8x16x1xf32>
    %29 = vector.broadcast %28 : vector<8x16x1xf32> to vector<8x16x16xf32>
    %30 = arith.mulf %25, %29 : vector<8x16x16xf32>
    %31 = vector.extract_strided_slice %11 {offsets = [0, 64], sizes = [128, 40], strides = [1, 1]} : vector<128x224xf32> to vector<128x40xf32>
    %32 = vector.shape_cast %31 : vector<128x40xf32> to vector<8x16x40xf32>
    "tpu.trace_start"() <{level = 10 : i32, message = "blm,bmd->bld"}> : () -> ()
    %cst_13 = arith.constant dense<0.000000e+00> : vector<8x16x40xf32>
    %33 = tpu.matmul %30, %32, %cst_13 {dimension_numbers = #tpu.dot_dimension_numbers<[2], [1], [1], [2], [0, 0, 0, 1, 1, 2], [0], [0]>} : vector<8x16x16xf32>, vector<8x16x40xf32>, vector<8x16x40xf32> -> vector<8x16x40xf32>
    "tpu.trace_stop"() : () -> ()
    %34 = vector.extract_strided_slice %33 {offsets = [0, 0, 0], sizes = [8, 16, 8], strides = [1, 1, 1]} : vector<8x16x40xf32> to vector<8x16x8xf32>
    %35 = vector.extract_strided_slice %33 {offsets = [0, 0, 8], sizes = [8, 16, 32], strides = [1, 1, 1]} : vector<8x16x40xf32> to vector<8x16x32xf32>
    %36 = vector.extract_strided_slice %13 {offsets = [0, 0, 8], sizes = [8, 16, 8], strides = [1, 1, 1]} : vector<8x16x32xf32> to vector<8x16x8xf32>
    %37 = vector.extract_strided_slice %15 {offsets = [0, 0, 8], sizes = [8, 16, 8], strides = [1, 1, 1]} : vector<8x16x32xf32> to vector<8x16x8xf32>
    "tpu.trace_start"() <{level = 10 : i32, message = "bld,bmd->blm"}> : () -> ()
    %cst_14 = arith.constant dense<0.000000e+00> : vector<8x16x16xf32>
    %38 = tpu.matmul %36, %37, %cst_14 {dimension_numbers = #tpu.dot_dimension_numbers<[2], [2], [1], [1], [0, 0, 0, 1, 1, 1], [0], [0]>} : vector<8x16x8xf32>, vector<8x16x8xf32>, vector<8x16x16xf32> -> vector<8x16x16xf32>
    "tpu.trace_stop"() : () -> ()
    %cst_15 = arith.constant 0.353553385 : f32
    %39 = vector.broadcast %cst_15 : f32 to vector<8x16x16xf32>
    %40 = arith.mulf %38, %39 : vector<8x16x16xf32>
    %cst_16 = arith.constant dense<0xFF800000> : vector<8x16xf32>
    %41 = vector.multi_reduction <maximumf>, %40, %cst_16 [2] : vector<8x16x16xf32> to vector<8x16xf32>
    %42 = vector.shape_cast %41 : vector<8x16xf32> to vector<8x16x1xf32>
    %43 = vector.broadcast %42 : vector<8x16x1xf32> to vector<8x16x16xf32>
    %44 = arith.subf %40, %43 : vector<8x16x16xf32>
    %45 = math.exp %44 : vector<8x16x16xf32>
    %cst_17 = arith.constant dense<0.000000e+00> : vector<8x16xf32>
    %46 = vector.multi_reduction <add>, %45, %cst_17 [2] : vector<8x16x16xf32> to vector<8x16xf32>
    %47 = vector.shape_cast %46 : vector<8x16xf32> to vector<8x16x1xf32>
    %48 = tpu.reciprocal %47 {approx = true} : vector<8x16x1xf32> -> vector<8x16x1xf32>
    %49 = vector.broadcast %48 : vector<8x16x1xf32> to vector<8x16x16xf32>
    %50 = arith.mulf %45, %49 : vector<8x16x16xf32>
    %51 = vector.extract_strided_slice %11 {offsets = [0, 104], sizes = [128, 40], strides = [1, 1]} : vector<128x224xf32> to vector<128x40xf32>
    %52 = vector.shape_cast %51 : vector<128x40xf32> to vector<8x16x40xf32>
    "tpu.trace_start"() <{level = 10 : i32, message = "blm,bmd->bld"}> : () -> ()
    %cst_18 = arith.constant dense<0.000000e+00> : vector<8x16x40xf32>
    %53 = tpu.matmul %50, %52, %cst_18 {dimension_numbers = #tpu.dot_dimension_numbers<[2], [1], [1], [2], [0, 0, 0, 1, 1, 2], [0], [0]>} : vector<8x16x16xf32>, vector<8x16x40xf32>, vector<8x16x40xf32> -> vector<8x16x40xf32>
    "tpu.trace_stop"() : () -> ()
    %54 = vector.extract_strided_slice %53 {offsets = [0, 0, 0], sizes = [8, 16, 8], strides = [1, 1, 1]} : vector<8x16x40xf32> to vector<8x16x8xf32>
    %55 = vector.extract_strided_slice %53 {offsets = [0, 0, 8], sizes = [8, 16, 32], strides = [1, 1, 1]} : vector<8x16x40xf32> to vector<8x16x32xf32>
    %56 = arith.addf %35, %55 : vector<8x16x32xf32>
    %57 = vector.extract_strided_slice %13 {offsets = [0, 0, 16], sizes = [8, 16, 8], strides = [1, 1, 1]} : vector<8x16x32xf32> to vector<8x16x8xf32>
    %58 = vector.extract_strided_slice %15 {offsets = [0, 0, 16], sizes = [8, 16, 8], strides = [1, 1, 1]} : vector<8x16x32xf32> to vector<8x16x8xf32>
    "tpu.trace_start"() <{level = 10 : i32, message = "bld,bmd->blm"}> : () -> ()
    %cst_19 = arith.constant dense<0.000000e+00> : vector<8x16x16xf32>
    %59 = tpu.matmul %57, %58, %cst_19 {dimension_numbers = #tpu.dot_dimension_numbers<[2], [2], [1], [1], [0, 0, 0, 1, 1, 1], [0], [0]>} : vector<8x16x8xf32>, vector<8x16x8xf32>, vector<8x16x16xf32> -> vector<8x16x16xf32>
    "tpu.trace_stop"() : () -> ()
    %cst_20 = arith.constant 0.353553385 : f32
    %60 = vector.broadcast %cst_20 : f32 to vector<8x16x16xf32>
    %61 = arith.mulf %59, %60 : vector<8x16x16xf32>
    %cst_21 = arith.constant dense<0xFF800000> : vector<8x16xf32>
    %62 = vector.multi_reduction <maximumf>, %61, %cst_21 [2] : vector<8x16x16xf32> to vector<8x16xf32>
    %63 = vector.shape_cast %62 : vector<8x16xf32> to vector<8x16x1xf32>
    %64 = vector.broadcast %63 : vector<8x16x1xf32> to vector<8x16x16xf32>
    %65 = arith.subf %61, %64 : vector<8x16x16xf32>
    %66 = math.exp %65 : vector<8x16x16xf32>
    %cst_22 = arith.constant dense<0.000000e+00> : vector<8x16xf32>
    %67 = vector.multi_reduction <add>, %66, %cst_22 [2] : vector<8x16x16xf32> to vector<8x16xf32>
    %68 = vector.shape_cast %67 : vector<8x16xf32> to vector<8x16x1xf32>
    %69 = tpu.reciprocal %68 {approx = true} : vector<8x16x1xf32> -> vector<8x16x1xf32>
    %70 = vector.broadcast %69 : vector<8x16x1xf32> to vector<8x16x16xf32>
    %71 = arith.mulf %66, %70 : vector<8x16x16xf32>
    %72 = vector.extract_strided_slice %11 {offsets = [0, 144], sizes = [128, 40], strides = [1, 1]} : vector<128x224xf32> to vector<128x40xf32>
    %73 = vector.shape_cast %72 : vector<128x40xf32> to vector<8x16x40xf32>
    "tpu.trace_start"() <{level = 10 : i32, message = "blm,bmd->bld"}> : () -> ()
    %cst_23 = arith.constant dense<0.000000e+00> : vector<8x16x40xf32>
    %74 = tpu.matmul %71, %73, %cst_23 {dimension_numbers = #tpu.dot_dimension_numbers<[2], [1], [1], [2], [0, 0, 0, 1, 1, 2], [0], [0]>} : vector<8x16x16xf32>, vector<8x16x40xf32>, vector<8x16x40xf32> -> vector<8x16x40xf32>
    "tpu.trace_stop"() : () -> ()
    %75 = vector.extract_strided_slice %74 {offsets = [0, 0, 0], sizes = [8, 16, 8], strides = [1, 1, 1]} : vector<8x16x40xf32> to vector<8x16x8xf32>
    %76 = vector.extract_strided_slice %74 {offsets = [0, 0, 8], sizes = [8, 16, 32], strides = [1, 1, 1]} : vector<8x16x40xf32> to vector<8x16x32xf32>
    %77 = arith.addf %56, %76 : vector<8x16x32xf32>
    %78 = vector.extract_strided_slice %13 {offsets = [0, 0, 24], sizes = [8, 16, 8], strides = [1, 1, 1]} : vector<8x16x32xf32> to vector<8x16x8xf32>
    %79 = vector.extract_strided_slice %15 {offsets = [0, 0, 24], sizes = [8, 16, 8], strides = [1, 1, 1]} : vector<8x16x32xf32> to vector<8x16x8xf32>
    "tpu.trace_start"() <{level = 10 : i32, message = "bld,bmd->blm"}> : () -> ()
    %cst_24 = arith.constant dense<0.000000e+00> : vector<8x16x16xf32>
    %80 = tpu.matmul %78, %79, %cst_24 {dimension_numbers = #tpu.dot_dimension_numbers<[2], [2], [1], [1], [0, 0, 0, 1, 1, 1], [0], [0]>} : vector<8x16x8xf32>, vector<8x16x8xf32>, vector<8x16x16xf32> -> vector<8x16x16xf32>
    "tpu.trace_stop"() : () -> ()
    %cst_25 = arith.constant 0.353553385 : f32
    %81 = vector.broadcast %cst_25 : f32 to vector<8x16x16xf32>
    %82 = arith.mulf %80, %81 : vector<8x16x16xf32>
    %cst_26 = arith.constant dense<0xFF800000> : vector<8x16xf32>
    %83 = vector.multi_reduction <maximumf>, %82, %cst_26 [2] : vector<8x16x16xf32> to vector<8x16xf32>
    %84 = vector.shape_cast %83 : vector<8x16xf32> to vector<8x16x1xf32>
    %85 = vector.broadcast %84 : vector<8x16x1xf32> to vector<8x16x16xf32>
    %86 = arith.subf %82, %85 : vector<8x16x16xf32>
    %87 = math.exp %86 : vector<8x16x16xf32>
    %cst_27 = arith.constant dense<0.000000e+00> : vector<8x16xf32>
    %88 = vector.multi_reduction <add>, %87, %cst_27 [2] : vector<8x16x16xf32> to vector<8x16xf32>
    %89 = vector.shape_cast %88 : vector<8x16xf32> to vector<8x16x1xf32>
    %90 = tpu.reciprocal %89 {approx = true} : vector<8x16x1xf32> -> vector<8x16x1xf32>
    %91 = vector.broadcast %90 : vector<8x16x1xf32> to vector<8x16x16xf32>
    %92 = arith.mulf %87, %91 : vector<8x16x16xf32>
    %93 = vector.extract_strided_slice %11 {offsets = [0, 184], sizes = [128, 40], strides = [1, 1]} : vector<128x224xf32> to vector<128x40xf32>
    %94 = vector.shape_cast %93 : vector<128x40xf32> to vector<8x16x40xf32>
    "tpu.trace_start"() <{level = 10 : i32, message = "blm,bmd->bld"}> : () -> ()
    %cst_28 = arith.constant dense<0.000000e+00> : vector<8x16x40xf32>
    %95 = tpu.matmul %92, %94, %cst_28 {dimension_numbers = #tpu.dot_dimension_numbers<[2], [1], [1], [2], [0, 0, 0, 1, 1, 2], [0], [0]>} : vector<8x16x16xf32>, vector<8x16x40xf32>, vector<8x16x40xf32> -> vector<8x16x40xf32>
    "tpu.trace_stop"() : () -> ()
    %96 = vector.extract_strided_slice %95 {offsets = [0, 0, 0], sizes = [8, 16, 8], strides = [1, 1, 1]} : vector<8x16x40xf32> to vector<8x16x8xf32>
    %97 = vector.extract_strided_slice %95 {offsets = [0, 0, 8], sizes = [8, 16, 32], strides = [1, 1, 1]} : vector<8x16x40xf32> to vector<8x16x32xf32>
    %98 = arith.addf %77, %97 : vector<8x16x32xf32>
    %99 = vector.shape_cast %1 : vector<1x32xf32> to vector<1x1x32xf32>
    %100 = vector.broadcast %99 : vector<1x1x32xf32> to vector<8x16x32xf32>
    %101 = arith.addf %98, %100 : vector<8x16x32xf32>
    %102 = math.tanh %101 : vector<8x16x32xf32>
    %103 = vector.shape_cast %0 : vector<1x32xf32> to vector<1x1x32xf32>
    %104 = vector.broadcast %103 : vector<1x1x32xf32> to vector<8x16x32xf32>
    %105 = arith.mulf %102, %104 : vector<8x16x32xf32>
    %cst_29 = arith.constant dense<0.000000e+00> : vector<8x16xf32>
    %106 = vector.multi_reduction <add>, %105, %cst_29 [2] : vector<8x16x32xf32> to vector<8x16xf32>
    %107 = vector.shape_cast %106 : vector<8x16xf32> to vector<8x16x1xf32>
    %cst_30 = arith.constant dense<0xFF800000> : vector<8x1xf32>
    %108 = vector.multi_reduction <maximumf>, %107, %cst_30 [1] : vector<8x16x1xf32> to vector<8x1xf32>
    %109 = vector.shape_cast %108 : vector<8x1xf32> to vector<8x1x1xf32>
    %110 = vector.broadcast %109 : vector<8x1x1xf32> to vector<8x16x1xf32>
    %111 = arith.subf %107, %110 : vector<8x16x1xf32>
    %112 = math.exp %111 : vector<8x16x1xf32>
    %cst_31 = arith.constant dense<0.000000e+00> : vector<8x1xf32>
    %113 = vector.multi_reduction <add>, %112, %cst_31 [1] : vector<8x16x1xf32> to vector<8x1xf32>
    %114 = vector.shape_cast %113 : vector<8x1xf32> to vector<8x1x1xf32>
    %115 = tpu.reciprocal %114 {approx = true} : vector<8x1x1xf32> -> vector<8x1x1xf32>
    %116 = vector.broadcast %115 : vector<8x1x1xf32> to vector<8x16x1xf32>
    %117 = arith.mulf %112, %116 : vector<8x16x1xf32>
    %118 = vector.broadcast %117 : vector<8x16x1xf32> to vector<8x16x8xf32>
    %119 = arith.mulf %118, %34 : vector<8x16x8xf32>
    %cst_32 = arith.constant dense<0.000000e+00> : vector<8x8xf32>
    %120 = vector.multi_reduction <add>, %119, %cst_32 [1] : vector<8x16x8xf32> to vector<8x8xf32>
    %121 = vector.broadcast %117 : vector<8x16x1xf32> to vector<8x16x8xf32>
    %122 = arith.mulf %121, %54 : vector<8x16x8xf32>
    %cst_33 = arith.constant dense<0.000000e+00> : vector<8x8xf32>
    %123 = vector.multi_reduction <add>, %122, %cst_33 [1] : vector<8x16x8xf32> to vector<8x8xf32>
    %124 = vector.broadcast %117 : vector<8x16x1xf32> to vector<8x16x8xf32>
    %125 = arith.mulf %124, %75 : vector<8x16x8xf32>
    %cst_34 = arith.constant dense<0.000000e+00> : vector<8x8xf32>
    %126 = vector.multi_reduction <add>, %125, %cst_34 [1] : vector<8x16x8xf32> to vector<8x8xf32>
    %127 = vector.broadcast %117 : vector<8x16x1xf32> to vector<8x16x8xf32>
    %128 = arith.mulf %127, %96 : vector<8x16x8xf32>
    %cst_35 = arith.constant dense<0.000000e+00> : vector<8x8xf32>
    %129 = vector.multi_reduction <add>, %128, %cst_35 [1] : vector<8x16x8xf32> to vector<8x8xf32>
    %c2 = arith.constant 2 : index
    %c0_36 = arith.constant 0 : index
    %130 = vector.load %arg8[%c2, %c0_36] : memref<8x128xf32, #tpu.memory_space<vmem>>, vector<1x32xf32>
    %c3 = arith.constant 3 : index
    %c0_37 = arith.constant 0 : index
    %131 = vector.load %arg8[%c3, %c0_37] : memref<8x128xf32, #tpu.memory_space<vmem>>, vector<1x32xf32>
    %c0_38 = arith.constant 0 : index
    %c0_39 = arith.constant 0 : index
    %132 = vector.load %arg2[%c0_38, %c0_39] : memref<64x1xi32, #tpu.memory_space<vmem>>, vector<64x1xi32>
    %133 = tpu.iota {dimensions = array<i32: 1>} : vector<64x128xi32>
    %134 = vector.broadcast %132 : vector<64x1xi32> to vector<64x128xi32>
    %135 = arith.cmpi eq, %133, %134 : vector<64x128xi32>
    %136 = arith.extui %135 : vector<64x128xi1> to vector<64x128xi32>
    %137 = arith.sitofp %136 : vector<64x128xi32> to vector<64x128xf32>
    %c0_40 = arith.constant 0 : index
    %c0_41 = arith.constant 0 : index
    %138 = vector.load %arg4[%c0_40, %c0_41] : memref<128x32xf32, #tpu.memory_space<vmem>>, vector<128x32xf32>
    %cst_42 = arith.constant dense<0.000000e+00> : vector<64x32xf32>
    %139 = tpu.matmul %137, %138, %cst_42 {dimension_numbers = #tpu.dot_dimension_numbers<[1], [0], [0], [1], [0, 0, 1, 1], [], []>} : vector<64x128xf32>, vector<128x32xf32>, vector<64x32xf32> -> vector<64x32xf32>
    %c0_43 = arith.constant 0 : index
    %c0_44 = arith.constant 0 : index
    %140 = vector.load %arg6[%c0_43, %c0_44] : memref<32x224xf32, #tpu.memory_space<vmem>>, vector<32x224xf32>
    %cst_45 = arith.constant dense<0.000000e+00> : vector<64x224xf32>
    %141 = tpu.matmul %139, %140, %cst_45 {dimension_numbers = #tpu.dot_dimension_numbers<[1], [0], [0], [1], [0, 0, 1, 1], [], []>} : vector<64x32xf32>, vector<32x224xf32>, vector<64x224xf32> -> vector<64x224xf32>
    %142 = vector.extract_strided_slice %141 {offsets = [0, 0], sizes = [64, 32], strides = [1, 1]} : vector<64x224xf32> to vector<64x32xf32>
    %143 = vector.shape_cast %142 : vector<64x32xf32> to vector<8x8x32xf32>
    %144 = vector.extract_strided_slice %141 {offsets = [0, 32], sizes = [64, 32], strides = [1, 1]} : vector<64x224xf32> to vector<64x32xf32>
    %145 = vector.shape_cast %144 : vector<64x32xf32> to vector<8x8x32xf32>
    %146 = vector.extract_strided_slice %143 {offsets = [0, 0, 0], sizes = [8, 8, 8], strides = [1, 1, 1]} : vector<8x8x32xf32> to vector<8x8x8xf32>
    %147 = vector.extract_strided_slice %145 {offsets = [0, 0, 0], sizes = [8, 8, 8], strides = [1, 1, 1]} : vector<8x8x32xf32> to vector<8x8x8xf32>
    "tpu.trace_start"() <{level = 10 : i32, message = "bld,bmd->blm"}> : () -> ()
    %cst_46 = arith.constant dense<0.000000e+00> : vector<8x8x8xf32>
    %148 = tpu.matmul %146, %147, %cst_46 {dimension_numbers = #tpu.dot_dimension_numbers<[2], [2], [1], [1], [0, 0, 0, 1, 1, 1], [0], [0]>} : vector<8x8x8xf32>, vector<8x8x8xf32>, vector<8x8x8xf32> -> vector<8x8x8xf32>
    "tpu.trace_stop"() : () -> ()
    %cst_47 = arith.constant 0.353553385 : f32
    %149 = vector.broadcast %cst_47 : f32 to vector<8x8x8xf32>
    %150 = arith.mulf %148, %149 : vector<8x8x8xf32>
    %cst_48 = arith.constant dense<0xFF800000> : vector<8x8xf32>
    %151 = vector.multi_reduction <maximumf>, %150, %cst_48 [2] : vector<8x8x8xf32> to vector<8x8xf32>
    %152 = vector.shape_cast %151 : vector<8x8xf32> to vector<8x8x1xf32>
    %153 = vector.broadcast %152 : vector<8x8x1xf32> to vector<8x8x8xf32>
    %154 = arith.subf %150, %153 : vector<8x8x8xf32>
    %155 = math.exp %154 : vector<8x8x8xf32>
    %cst_49 = arith.constant dense<0.000000e+00> : vector<8x8xf32>
    %156 = vector.multi_reduction <add>, %155, %cst_49 [2] : vector<8x8x8xf32> to vector<8x8xf32>
    %157 = vector.shape_cast %156 : vector<8x8xf32> to vector<8x8x1xf32>
    %158 = tpu.reciprocal %157 {approx = true} : vector<8x8x1xf32> -> vector<8x8x1xf32>
    %159 = vector.broadcast %158 : vector<8x8x1xf32> to vector<8x8x8xf32>
    %160 = arith.mulf %155, %159 : vector<8x8x8xf32>
    %161 = vector.extract_strided_slice %141 {offsets = [0, 64], sizes = [64, 40], strides = [1, 1]} : vector<64x224xf32> to vector<64x40xf32>
    %162 = vector.shape_cast %161 : vector<64x40xf32> to vector<8x8x40xf32>
    "tpu.trace_start"() <{level = 10 : i32, message = "blm,bmd->bld"}> : () -> ()
    %cst_50 = arith.constant dense<0.000000e+00> : vector<8x8x40xf32>
    %163 = tpu.matmul %160, %162, %cst_50 {dimension_numbers = #tpu.dot_dimension_numbers<[2], [1], [1], [2], [0, 0, 0, 1, 1, 2], [0], [0]>} : vector<8x8x8xf32>, vector<8x8x40xf32>, vector<8x8x40xf32> -> vector<8x8x40xf32>
    "tpu.trace_stop"() : () -> ()
    %164 = vector.extract_strided_slice %163 {offsets = [0, 0, 0], sizes = [8, 8, 8], strides = [1, 1, 1]} : vector<8x8x40xf32> to vector<8x8x8xf32>
    %165 = vector.extract_strided_slice %163 {offsets = [0, 0, 8], sizes = [8, 8, 32], strides = [1, 1, 1]} : vector<8x8x40xf32> to vector<8x8x32xf32>
    %166 = vector.extract_strided_slice %143 {offsets = [0, 0, 8], sizes = [8, 8, 8], strides = [1, 1, 1]} : vector<8x8x32xf32> to vector<8x8x8xf32>
    %167 = vector.extract_strided_slice %145 {offsets = [0, 0, 8], sizes = [8, 8, 8], strides = [1, 1, 1]} : vector<8x8x32xf32> to vector<8x8x8xf32>
    "tpu.trace_start"() <{level = 10 : i32, message = "bld,bmd->blm"}> : () -> ()
    %cst_51 = arith.constant dense<0.000000e+00> : vector<8x8x8xf32>
    %168 = tpu.matmul %166, %167, %cst_51 {dimension_numbers = #tpu.dot_dimension_numbers<[2], [2], [1], [1], [0, 0, 0, 1, 1, 1], [0], [0]>} : vector<8x8x8xf32>, vector<8x8x8xf32>, vector<8x8x8xf32> -> vector<8x8x8xf32>
    "tpu.trace_stop"() : () -> ()
    %cst_52 = arith.constant 0.353553385 : f32
    %169 = vector.broadcast %cst_52 : f32 to vector<8x8x8xf32>
    %170 = arith.mulf %168, %169 : vector<8x8x8xf32>
    %cst_53 = arith.constant dense<0xFF800000> : vector<8x8xf32>
    %171 = vector.multi_reduction <maximumf>, %170, %cst_53 [2] : vector<8x8x8xf32> to vector<8x8xf32>
    %172 = vector.shape_cast %171 : vector<8x8xf32> to vector<8x8x1xf32>
    %173 = vector.broadcast %172 : vector<8x8x1xf32> to vector<8x8x8xf32>
    %174 = arith.subf %170, %173 : vector<8x8x8xf32>
    %175 = math.exp %174 : vector<8x8x8xf32>
    %cst_54 = arith.constant dense<0.000000e+00> : vector<8x8xf32>
    %176 = vector.multi_reduction <add>, %175, %cst_54 [2] : vector<8x8x8xf32> to vector<8x8xf32>
    %177 = vector.shape_cast %176 : vector<8x8xf32> to vector<8x8x1xf32>
    %178 = tpu.reciprocal %177 {approx = true} : vector<8x8x1xf32> -> vector<8x8x1xf32>
    %179 = vector.broadcast %178 : vector<8x8x1xf32> to vector<8x8x8xf32>
    %180 = arith.mulf %175, %179 : vector<8x8x8xf32>
    %181 = vector.extract_strided_slice %141 {offsets = [0, 104], sizes = [64, 40], strides = [1, 1]} : vector<64x224xf32> to vector<64x40xf32>
    %182 = vector.shape_cast %181 : vector<64x40xf32> to vector<8x8x40xf32>
    "tpu.trace_start"() <{level = 10 : i32, message = "blm,bmd->bld"}> : () -> ()
    %cst_55 = arith.constant dense<0.000000e+00> : vector<8x8x40xf32>
    %183 = tpu.matmul %180, %182, %cst_55 {dimension_numbers = #tpu.dot_dimension_numbers<[2], [1], [1], [2], [0, 0, 0, 1, 1, 2], [0], [0]>} : vector<8x8x8xf32>, vector<8x8x40xf32>, vector<8x8x40xf32> -> vector<8x8x40xf32>
    "tpu.trace_stop"() : () -> ()
    %184 = vector.extract_strided_slice %183 {offsets = [0, 0, 0], sizes = [8, 8, 8], strides = [1, 1, 1]} : vector<8x8x40xf32> to vector<8x8x8xf32>
    %185 = vector.extract_strided_slice %183 {offsets = [0, 0, 8], sizes = [8, 8, 32], strides = [1, 1, 1]} : vector<8x8x40xf32> to vector<8x8x32xf32>
    %186 = arith.addf %165, %185 : vector<8x8x32xf32>
    %187 = vector.extract_strided_slice %143 {offsets = [0, 0, 16], sizes = [8, 8, 8], strides = [1, 1, 1]} : vector<8x8x32xf32> to vector<8x8x8xf32>
    %188 = vector.extract_strided_slice %145 {offsets = [0, 0, 16], sizes = [8, 8, 8], strides = [1, 1, 1]} : vector<8x8x32xf32> to vector<8x8x8xf32>
    "tpu.trace_start"() <{level = 10 : i32, message = "bld,bmd->blm"}> : () -> ()
    %cst_56 = arith.constant dense<0.000000e+00> : vector<8x8x8xf32>
    %189 = tpu.matmul %187, %188, %cst_56 {dimension_numbers = #tpu.dot_dimension_numbers<[2], [2], [1], [1], [0, 0, 0, 1, 1, 1], [0], [0]>} : vector<8x8x8xf32>, vector<8x8x8xf32>, vector<8x8x8xf32> -> vector<8x8x8xf32>
    "tpu.trace_stop"() : () -> ()
    %cst_57 = arith.constant 0.353553385 : f32
    %190 = vector.broadcast %cst_57 : f32 to vector<8x8x8xf32>
    %191 = arith.mulf %189, %190 : vector<8x8x8xf32>
    %cst_58 = arith.constant dense<0xFF800000> : vector<8x8xf32>
    %192 = vector.multi_reduction <maximumf>, %191, %cst_58 [2] : vector<8x8x8xf32> to vector<8x8xf32>
    %193 = vector.shape_cast %192 : vector<8x8xf32> to vector<8x8x1xf32>
    %194 = vector.broadcast %193 : vector<8x8x1xf32> to vector<8x8x8xf32>
    %195 = arith.subf %191, %194 : vector<8x8x8xf32>
    %196 = math.exp %195 : vector<8x8x8xf32>
    %cst_59 = arith.constant dense<0.000000e+00> : vector<8x8xf32>
    %197 = vector.multi_reduction <add>, %196, %cst_59 [2] : vector<8x8x8xf32> to vector<8x8xf32>
    %198 = vector.shape_cast %197 : vector<8x8xf32> to vector<8x8x1xf32>
    %199 = tpu.reciprocal %198 {approx = true} : vector<8x8x1xf32> -> vector<8x8x1xf32>
    %200 = vector.broadcast %199 : vector<8x8x1xf32> to vector<8x8x8xf32>
    %201 = arith.mulf %196, %200 : vector<8x8x8xf32>
    %202 = vector.extract_strided_slice %141 {offsets = [0, 144], sizes = [64, 40], strides = [1, 1]} : vector<64x224xf32> to vector<64x40xf32>
    %203 = vector.shape_cast %202 : vector<64x40xf32> to vector<8x8x40xf32>
    "tpu.trace_start"() <{level = 10 : i32, message = "blm,bmd->bld"}> : () -> ()
    %cst_60 = arith.constant dense<0.000000e+00> : vector<8x8x40xf32>
    %204 = tpu.matmul %201, %203, %cst_60 {dimension_numbers = #tpu.dot_dimension_numbers<[2], [1], [1], [2], [0, 0, 0, 1, 1, 2], [0], [0]>} : vector<8x8x8xf32>, vector<8x8x40xf32>, vector<8x8x40xf32> -> vector<8x8x40xf32>
    "tpu.trace_stop"() : () -> ()
    %205 = vector.extract_strided_slice %204 {offsets = [0, 0, 0], sizes = [8, 8, 8], strides = [1, 1, 1]} : vector<8x8x40xf32> to vector<8x8x8xf32>
    %206 = vector.extract_strided_slice %204 {offsets = [0, 0, 8], sizes = [8, 8, 32], strides = [1, 1, 1]} : vector<8x8x40xf32> to vector<8x8x32xf32>
    %207 = arith.addf %186, %206 : vector<8x8x32xf32>
    %208 = vector.extract_strided_slice %143 {offsets = [0, 0, 24], sizes = [8, 8, 8], strides = [1, 1, 1]} : vector<8x8x32xf32> to vector<8x8x8xf32>
    %209 = vector.extract_strided_slice %145 {offsets = [0, 0, 24], sizes = [8, 8, 8], strides = [1, 1, 1]} : vector<8x8x32xf32> to vector<8x8x8xf32>
    "tpu.trace_start"() <{level = 10 : i32, message = "bld,bmd->blm"}> : () -> ()
    %cst_61 = arith.constant dense<0.000000e+00> : vector<8x8x8xf32>
    %210 = tpu.matmul %208, %209, %cst_61 {dimension_numbers = #tpu.dot_dimension_numbers<[2], [2], [1], [1], [0, 0, 0, 1, 1, 1], [0], [0]>} : vector<8x8x8xf32>, vector<8x8x8xf32>, vector<8x8x8xf32> -> vector<8x8x8xf32>
    "tpu.trace_stop"() : () -> ()
    %cst_62 = arith.constant 0.353553385 : f32
    %211 = vector.broadcast %cst_62 : f32 to vector<8x8x8xf32>
    %212 = arith.mulf %210, %211 : vector<8x8x8xf32>
    %cst_63 = arith.constant dense<0xFF800000> : vector<8x8xf32>
    %213 = vector.multi_reduction <maximumf>, %212, %cst_63 [2] : vector<8x8x8xf32> to vector<8x8xf32>
    %214 = vector.shape_cast %213 : vector<8x8xf32> to vector<8x8x1xf32>
    %215 = vector.broadcast %214 : vector<8x8x1xf32> to vector<8x8x8xf32>
    %216 = arith.subf %212, %215 : vector<8x8x8xf32>
    %217 = math.exp %216 : vector<8x8x8xf32>
    %cst_64 = arith.constant dense<0.000000e+00> : vector<8x8xf32>
    %218 = vector.multi_reduction <add>, %217, %cst_64 [2] : vector<8x8x8xf32> to vector<8x8xf32>
    %219 = vector.shape_cast %218 : vector<8x8xf32> to vector<8x8x1xf32>
    %220 = tpu.reciprocal %219 {approx = true} : vector<8x8x1xf32> -> vector<8x8x1xf32>
    %221 = vector.broadcast %220 : vector<8x8x1xf32> to vector<8x8x8xf32>
    %222 = arith.mulf %217, %221 : vector<8x8x8xf32>
    %223 = vector.extract_strided_slice %141 {offsets = [0, 184], sizes = [64, 40], strides = [1, 1]} : vector<64x224xf32> to vector<64x40xf32>
    %224 = vector.shape_cast %223 : vector<64x40xf32> to vector<8x8x40xf32>
    "tpu.trace_start"() <{level = 10 : i32, message = "blm,bmd->bld"}> : () -> ()
    %cst_65 = arith.constant dense<0.000000e+00> : vector<8x8x40xf32>
    %225 = tpu.matmul %222, %224, %cst_65 {dimension_numbers = #tpu.dot_dimension_numbers<[2], [1], [1], [2], [0, 0, 0, 1, 1, 2], [0], [0]>} : vector<8x8x8xf32>, vector<8x8x40xf32>, vector<8x8x40xf32> -> vector<8x8x40xf32>
    "tpu.trace_stop"() : () -> ()
    %226 = vector.extract_strided_slice %225 {offsets = [0, 0, 0], sizes = [8, 8, 8], strides = [1, 1, 1]} : vector<8x8x40xf32> to vector<8x8x8xf32>
    %227 = vector.extract_strided_slice %225 {offsets = [0, 0, 8], sizes = [8, 8, 32], strides = [1, 1, 1]} : vector<8x8x40xf32> to vector<8x8x32xf32>
    %228 = arith.addf %207, %227 : vector<8x8x32xf32>
    %229 = vector.shape_cast %131 : vector<1x32xf32> to vector<1x1x32xf32>
    %230 = vector.broadcast %229 : vector<1x1x32xf32> to vector<8x8x32xf32>
    %231 = arith.addf %228, %230 : vector<8x8x32xf32>
    %232 = math.tanh %231 : vector<8x8x32xf32>
    %233 = vector.shape_cast %130 : vector<1x32xf32> to vector<1x1x32xf32>
    %234 = vector.broadcast %233 : vector<1x1x32xf32> to vector<8x8x32xf32>
    %235 = arith.mulf %232, %234 : vector<8x8x32xf32>
    %cst_66 = arith.constant dense<0.000000e+00> : vector<8x8xf32>
    %236 = vector.multi_reduction <add>, %235, %cst_66 [2] : vector<8x8x32xf32> to vector<8x8xf32>
    %237 = vector.shape_cast %236 : vector<8x8xf32> to vector<8x8x1xf32>
    %cst_67 = arith.constant dense<0xFF800000> : vector<8x1xf32>
    %238 = vector.multi_reduction <maximumf>, %237, %cst_67 [1] : vector<8x8x1xf32> to vector<8x1xf32>
    %239 = vector.shape_cast %238 : vector<8x1xf32> to vector<8x1x1xf32>
    %240 = vector.broadcast %239 : vector<8x1x1xf32> to vector<8x8x1xf32>
    %241 = arith.subf %237, %240 : vector<8x8x1xf32>
    %242 = math.exp %241 : vector<8x8x1xf32>
    %cst_68 = arith.constant dense<0.000000e+00> : vector<8x1xf32>
    %243 = vector.multi_reduction <add>, %242, %cst_68 [1] : vector<8x8x1xf32> to vector<8x1xf32>
    %244 = vector.shape_cast %243 : vector<8x1xf32> to vector<8x1x1xf32>
    %245 = tpu.reciprocal %244 {approx = true} : vector<8x1x1xf32> -> vector<8x1x1xf32>
    %246 = vector.broadcast %245 : vector<8x1x1xf32> to vector<8x8x1xf32>
    %247 = arith.mulf %242, %246 : vector<8x8x1xf32>
    %248 = vector.broadcast %247 : vector<8x8x1xf32> to vector<8x8x8xf32>
    %249 = arith.mulf %248, %164 : vector<8x8x8xf32>
    %cst_69 = arith.constant dense<0.000000e+00> : vector<8x8xf32>
    %250 = vector.multi_reduction <add>, %249, %cst_69 [1] : vector<8x8x8xf32> to vector<8x8xf32>
    %251 = vector.broadcast %247 : vector<8x8x1xf32> to vector<8x8x8xf32>
    %252 = arith.mulf %251, %184 : vector<8x8x8xf32>
    %cst_70 = arith.constant dense<0.000000e+00> : vector<8x8xf32>
    %253 = vector.multi_reduction <add>, %252, %cst_70 [1] : vector<8x8x8xf32> to vector<8x8xf32>
    %254 = vector.broadcast %247 : vector<8x8x1xf32> to vector<8x8x8xf32>
    %255 = arith.mulf %254, %205 : vector<8x8x8xf32>
    %cst_71 = arith.constant dense<0.000000e+00> : vector<8x8xf32>
    %256 = vector.multi_reduction <add>, %255, %cst_71 [1] : vector<8x8x8xf32> to vector<8x8xf32>
    %257 = vector.broadcast %247 : vector<8x8x1xf32> to vector<8x8x8xf32>
    %258 = arith.mulf %257, %226 : vector<8x8x8xf32>
    %cst_72 = arith.constant dense<0.000000e+00> : vector<8x8xf32>
    %259 = vector.multi_reduction <add>, %258, %cst_72 [1] : vector<8x8x8xf32> to vector<8x8xf32>
    %cst_73 = arith.constant 0.000000e+00 : f32
    %260 = vector.broadcast %cst_73 : f32 to vector<8x128xf32>
    %c4 = arith.constant 4 : index
    %c0_74 = arith.constant 0 : index
    %261 = vector.load %arg8[%c4, %c0_74] : memref<8x128xf32, #tpu.memory_space<vmem>>, vector<1x128xf32>
    %262 = vector.broadcast %261 : vector<1x128xf32> to vector<8x128xf32>
    %263 = arith.addf %260, %262 : vector<8x128xf32>
    %c0_75 = arith.constant 0 : index
    %c0_76 = arith.constant 0 : index
    %264 = vector.load %arg7[%c0_75, %c0_76] : memref<64x128xf32, #tpu.memory_space<vmem>>, vector<8x128xf32>
    %cst_77 = arith.constant dense<0.000000e+00> : vector<8x128xf32>
    %265 = tpu.matmul %120, %264, %cst_77 {dimension_numbers = #tpu.dot_dimension_numbers<[1], [0], [0], [1], [0, 0, 1, 1], [], []>} : vector<8x8xf32>, vector<8x128xf32>, vector<8x128xf32> -> vector<8x128xf32>
    %266 = arith.addf %263, %265 : vector<8x128xf32>
    %c8 = arith.constant 8 : index
    %c0_78 = arith.constant 0 : index
    %267 = vector.load %arg7[%c8, %c0_78] : memref<64x128xf32, #tpu.memory_space<vmem>>, vector<8x128xf32>
    %cst_79 = arith.constant dense<0.000000e+00> : vector<8x128xf32>
    %268 = tpu.matmul %123, %267, %cst_79 {dimension_numbers = #tpu.dot_dimension_numbers<[1], [0], [0], [1], [0, 0, 1, 1], [], []>} : vector<8x8xf32>, vector<8x128xf32>, vector<8x128xf32> -> vector<8x128xf32>
    %269 = arith.addf %266, %268 : vector<8x128xf32>
    %c16 = arith.constant 16 : index
    %c0_80 = arith.constant 0 : index
    %270 = vector.load %arg7[%c16, %c0_80] : memref<64x128xf32, #tpu.memory_space<vmem>>, vector<8x128xf32>
    %cst_81 = arith.constant dense<0.000000e+00> : vector<8x128xf32>
    %271 = tpu.matmul %126, %270, %cst_81 {dimension_numbers = #tpu.dot_dimension_numbers<[1], [0], [0], [1], [0, 0, 1, 1], [], []>} : vector<8x8xf32>, vector<8x128xf32>, vector<8x128xf32> -> vector<8x128xf32>
    %272 = arith.addf %269, %271 : vector<8x128xf32>
    %c24 = arith.constant 24 : index
    %c0_82 = arith.constant 0 : index
    %273 = vector.load %arg7[%c24, %c0_82] : memref<64x128xf32, #tpu.memory_space<vmem>>, vector<8x128xf32>
    %cst_83 = arith.constant dense<0.000000e+00> : vector<8x128xf32>
    %274 = tpu.matmul %129, %273, %cst_83 {dimension_numbers = #tpu.dot_dimension_numbers<[1], [0], [0], [1], [0, 0, 1, 1], [], []>} : vector<8x8xf32>, vector<8x128xf32>, vector<8x128xf32> -> vector<8x128xf32>
    %275 = arith.addf %272, %274 : vector<8x128xf32>
    %c32 = arith.constant 32 : index
    %c0_84 = arith.constant 0 : index
    %276 = vector.load %arg7[%c32, %c0_84] : memref<64x128xf32, #tpu.memory_space<vmem>>, vector<8x128xf32>
    %cst_85 = arith.constant dense<0.000000e+00> : vector<8x128xf32>
    %277 = tpu.matmul %250, %276, %cst_85 {dimension_numbers = #tpu.dot_dimension_numbers<[1], [0], [0], [1], [0, 0, 1, 1], [], []>} : vector<8x8xf32>, vector<8x128xf32>, vector<8x128xf32> -> vector<8x128xf32>
    %278 = arith.addf %275, %277 : vector<8x128xf32>
    %c40 = arith.constant 40 : index
    %c0_86 = arith.constant 0 : index
    %279 = vector.load %arg7[%c40, %c0_86] : memref<64x128xf32, #tpu.memory_space<vmem>>, vector<8x128xf32>
    %cst_87 = arith.constant dense<0.000000e+00> : vector<8x128xf32>
    %280 = tpu.matmul %253, %279, %cst_87 {dimension_numbers = #tpu.dot_dimension_numbers<[1], [0], [0], [1], [0, 0, 1, 1], [], []>} : vector<8x8xf32>, vector<8x128xf32>, vector<8x128xf32> -> vector<8x128xf32>
    %281 = arith.addf %278, %280 : vector<8x128xf32>
    %c48 = arith.constant 48 : index
    %c0_88 = arith.constant 0 : index
    %282 = vector.load %arg7[%c48, %c0_88] : memref<64x128xf32, #tpu.memory_space<vmem>>, vector<8x128xf32>
    %cst_89 = arith.constant dense<0.000000e+00> : vector<8x128xf32>
    %283 = tpu.matmul %256, %282, %cst_89 {dimension_numbers = #tpu.dot_dimension_numbers<[1], [0], [0], [1], [0, 0, 1, 1], [], []>} : vector<8x8xf32>, vector<8x128xf32>, vector<8x128xf32> -> vector<8x128xf32>
    %284 = arith.addf %281, %283 : vector<8x128xf32>
    %c56 = arith.constant 56 : index
    %c0_90 = arith.constant 0 : index
    %285 = vector.load %arg7[%c56, %c0_90] : memref<64x128xf32, #tpu.memory_space<vmem>>, vector<8x128xf32>
    %cst_91 = arith.constant dense<0.000000e+00> : vector<8x128xf32>
    %286 = tpu.matmul %259, %285, %cst_91 {dimension_numbers = #tpu.dot_dimension_numbers<[1], [0], [0], [1], [0, 0, 1, 1], [], []>} : vector<8x8xf32>, vector<8x128xf32>, vector<8x128xf32> -> vector<8x128xf32>
    %287 = arith.addf %284, %286 : vector<8x128xf32>
    %c0_92 = arith.constant 0 : index
    %c0_93 = arith.constant 0 : index
    %288 = vector.load %arg9[%c0_92, %c0_93] : memref<8x128xf32, #tpu.memory_space<vmem>>, vector<8x128xf32>
    tpu.vector_store %arg9[%c0_92, %c0_93], %287 {strides = array<i32>} : memref<8x128xf32, #tpu.memory_space<vmem>>, vector<8x128xf32>,
    return
  }
  func.func @transform_0(%arg0: i32) -> (i32, i32) {
    %c0_i32 = arith.constant 0 : i32
    %c0_i32_0 = arith.constant 0 : i32
    return %arg0, %c0_i32 : i32, i32
  }
  func.func @transform_1(%arg0: i32) -> (i32, i32) {
    %c0_i32 = arith.constant 0 : i32
    %c0_i32_0 = arith.constant 0 : i32
    return %arg0, %c0_i32 : i32, i32
  }
  func.func @transform_2(%arg0: i32) -> (i32, i32) {
    %c0_i32 = arith.constant 0 : i32
    %c0_i32_0 = arith.constant 0 : i32
    %c0_i32_1 = arith.constant 0 : i32
    return %c0_i32, %c0_i32_0 : i32, i32
  }
  func.func @transform_3(%arg0: i32) -> (i32, i32) {
    %c0_i32 = arith.constant 0 : i32
    %c0_i32_0 = arith.constant 0 : i32
    %c0_i32_1 = arith.constant 0 : i32
    return %c0_i32, %c0_i32_0 : i32, i32
  }
  func.func @transform_4(%arg0: i32) -> (i32, i32) {
    %c0_i32 = arith.constant 0 : i32
    %c0_i32_0 = arith.constant 0 : i32
    %c0_i32_1 = arith.constant 0 : i32
    return %c0_i32, %c0_i32_0 : i32, i32
  }
  func.func @transform_5(%arg0: i32) -> (i32, i32) {
    %c0_i32 = arith.constant 0 : i32
    %c0_i32_0 = arith.constant 0 : i32
    %c0_i32_1 = arith.constant 0 : i32
    return %c0_i32, %c0_i32_0 : i32, i32
  }
  func.func @transform_6(%arg0: i32) -> (i32, i32) {
    %c0_i32 = arith.constant 0 : i32
    %c0_i32_0 = arith.constant 0 : i32
    %c0_i32_1 = arith.constant 0 : i32
    return %c0_i32, %c0_i32_0 : i32, i32
  }
  func.func @transform_7(%arg0: i32) -> (i32, i32) {
    %c0_i32 = arith.constant 0 : i32
    %c0_i32_0 = arith.constant 0 : i32
    %c0_i32_1 = arith.constant 0 : i32
    return %c0_i32, %c0_i32_0 : i32, i32
  }
  func.func @transform_8(%arg0: i32) -> (i32, i32) {
    %c0_i32 = arith.constant 0 : i32
    %c0_i32_0 = arith.constant 0 : i32
    return %arg0, %c0_i32 : i32, i32
  }
}

</mosaic_0001>

<bundles_post_ra>
// kernel: knowledge_aware_news_encoder.1
= control target key start
LH: loop header
LB: loop body
LE: loop exit
PB: predicated region body
PF: predicated region fallthrough
CT: control target
= control target key end

     0   :  { %v17777_v2 = vmov 0   ;;  %s21595_s0 = inlined_call_operand.vmem [shape: s32[128,1], index: 0, kind: input, shape index: {}]   ;;  %s21596_s1 = inlined_call_operand.vmem [shape: s32[64,1], index: 1, kind: input, shape index: {}]   ;;  %s21597_s2 = inlined_call_operand.vmem [shape: f32[128,32], index: 2, kind: input, shape index: {}]   ;;  %s21598_s3 = inlined_call_operand.vmem [shape: f32[128,32], index: 3, kind: input, shape index: {}]   ;;  %s21599_s4 = inlined_call_operand.vmem [shape: f32[32,224], index: 4, kind: input, shape index: {}]   ;;  %s21600_s5 = inlined_call_operand.vmem [shape: f32[32,224], index: 5, kind: input, shape index: {}]   ;;  %s21601_s6 = inlined_call_operand.vmem [shape: f32[64,128], index: 6, kind: input, shape index: {}]   ;;  %s21602_s7 = inlined_call_operand.vmem [shape: f32[8,128], index: 7, kind: input, shape index: {}]   ;;  %s21603_s8 = inlined_call_operand.hbm [shape: f32[8,128], index: 8, kind: output, shape index: {}]  }
   0x1   :  { %v32_v0 = vld [vmem:[%s21595_s0] sm:$0xff]  ;;  %v34_v1 = vld [vmem:[%s21595_s0 + $0x10] sm:$0xff]  ;;  %16879 = vset.pattern.permute.xlu0 %v17777_v2  ;;  %16880 = vset.pattern.permute.xlu1 %v17777_v2  ;;  %v33_v3 = vld [vmem:[%s21595_s0 + $0x8] sm:$0xff] }
   0x2   :  { %51 = vperm.xlu0 %16879, %v32_v0   ;;  %57 = vperm.xlu1 %16880, %v34_v1   ;;  %v35_v4 = vld [vmem:[%s21595_s0 + $0x18] sm:$0xff]  ;;  %v146_v5 = vld [vmem:[%s21597_s2] sm:$0xff]  ;;  %v147_v6 = vld [vmem:[%s21597_s2 + $0x8] sm:$0xff] }
   0x3   :  { %v16449_v7 = vpack.c.bf16 %v147_v6, %v146_v5  ;;  %v148_v8 = vld [vmem:[%s21597_s2 + $0x10] sm:$0xff]  ;;  %v149_v9 = vld [vmem:[%s21597_s2 + $0x18] sm:$0xff]  ;;  %v36_v10 = vld [vmem:[%s21595_s0 + $0x20] sm:$0xff] }
   0x4   :  { %v37_v11 = vld [vmem:[%s21595_s0 + $0x28] sm:$0xff]  ;;  %v16453_v12 = vpack.c.bf16 %v149_v9, %v148_v8  ;;  %v150_v13 = vld [vmem:[%s21597_s2 + $0x20] sm:$0xff] }
   0x5   :  { %16450 = vmatprep.subr.bf16.mxu0 %v16449_v7  ;;  %v151_v14 = vld [vmem:[%s21597_s2 + $0x28] sm:$0xff] }
   0x6   :  { %54 = vperm.xlu0 %16879, %v33_v3   ;;  %60 = vperm.xlu1 %16880, %v35_v4  }
   0x7   :  { %16452 = vmatpush3.bf16.msra.mxu0 %v16449_v7 }
   0xa   :  { %63 = vperm.xlu0 %16879, %v36_v10   ;;  %66 = vperm.xlu1 %16880, %v37_v11  }
   0xb   :  { %13 = vsyncpa [#allocation3], 0  ;;  %v38_v15 = vld [vmem:[%s21595_s0 + $0x30] sm:$0xff]  ;;  %v39_v16 = vld [vmem:[%s21595_s0 + $0x38] sm:$0xff]  ;;  %16454 = vmatprep.subr.bf16.mxu0 %v16453_v12  ;;  %v16457_v17 = vpack.c.bf16 %v151_v14, %v150_v13  ;;  %v48_v53 = vlaneseq  ;;  %v21606_v57 = vmov 1.0   ;;  %v21604_v8 = vmov 0.0  }
   0xc   :  { %v152_v18 = vld [vmem:[%s21597_s2 + $0x30] sm:$0xff]  ;;  %v153_v19 = vld [vmem:[%s21597_s2 + $0x38] sm:$0xff]  ;;  %16456 = vmatpush3.bf16.msra.mxu0 %v16453_v12  ;;  %v40_v20 = vld [vmem:[%s21595_s0 + $0x40] sm:$0xff]  ;;  %428 = vmatprep.mubr.f32.mxu1 %v21604_v8  ;;  %s17781_s17 = smov 64   ;;  %s17782_s18 = smov 88  }
   0xd   :  { %v41_v21 = vld [vmem:[%s21595_s0 + $0x48] sm:$0xff]  ;;  %16458 = vmatprep.subr.bf16.mxu0 %v16457_v17  ;;  %v16461_v22 = vpack.c.bf16 %v153_v19, %v152_v18  ;;  %v154_v23 = vld [vmem:[%s21597_s2 + $0x40] sm:$0xff]  ;;  %v42_v25 = vld [vmem:[%s21595_s0 + $0x50] sm:$0xff]  ;;  %v17957_v54 = vand.u32 127, %v48_v53  ;;  %s17783_s19 = smov 120   ;;  %s17784_s20 = smov 24  }
   0xe   :  { %69 = vperm.xlu0 %16879, %v38_v15   ;;  %72 = vperm.xlu1 %16880, %v39_v16   ;;  %v155_v24 = vld [vmem:[%s21597_s2 + $0x48] sm:$0xff]  ;;  %v43_v26 = vld [vmem:[%s21595_s0 + $0x58] sm:$0xff]  ;;  %v156_v28 = vld [vmem:[%s21597_s2 + $0x50] sm:$0xff]  ;;  %s17785_s21 = smov 80   ;;  %s17786_s22 = smov 112  }
   0xf   :  { %v16465_v27 = vpack.c.bf16 %v155_v24, %v154_v23  ;;  %v157_v29 = vld [vmem:[%s21597_s2 + $0x58] sm:$0xff]  ;;  %v44_v30 = vld [vmem:[%s21595_s0 + $0x60] sm:$0xff]  ;;  %v45_v31 = vld [vmem:[%s21595_s0 + $0x68] sm:$0xff]  ;;  %21717 = vst [vmem:[#allocation5_spill] sm:$0xff] %v17957_v54  ;;  %s17787_s23 = smov 72   ;;  %s17788_s24 = smov 104  }
  0x10   :  { %16460 = vmatpush3.bf16.msra.mxu0 %v16457_v17  ;;  %v16469_v32 = vpack.c.bf16 %v157_v29, %v156_v28  ;;  %v158_v33 = vld [vmem:[%s21597_s2 + $0x60] sm:$0xff]  ;;  %v159_v34 = vld [vmem:[%s21597_s2 + $0x68] sm:$0xff]  ;;  %v46_v35 = vld [vmem:[%s21595_s0 + $0x70] sm:$0xff]  ;;  %s17791_s11 = smov [#allocation2]  }
  0x11   :  { %16462 = vmatprep.subr.bf16.mxu0 %v16461_v22  ;;  %v47_v36 = vld [vmem:[%s21595_s0 + $0x78] sm:$0xff]  ;;  %v16473_v37 = vpack.c.bf16 %v159_v34, %v158_v33  ;;  %v160_v38 = vld [vmem:[%s21597_s2 + $0x70] sm:$0xff]  ;;  %v308_v41 = vld [vmem:[%s21599_s4 + $0x8] sm:$0xff]  ;;  %s14704_s12 = sshll.u32 %s17791_s11, 4  ;;  %s14705_s12 = int_to_ptr.vmem [resolvable:$true] %s14704_s12 }
  0x12   :  { %75 = vperm.xlu0 %16879, %v40_v20   ;;  %78 = vperm.xlu1 %16880, %v41_v21   ;;  %v161_v39 = vld [vmem:[%s21597_s2 + $0x78] sm:$0xff]  ;;  %v307_v43 = vld [vmem:[%s21599_s4] sm:$0xff]  ;;  %v309_v45 = vld [vmem:[%s21599_s4 + $0x10] sm:$0xff]  ;;  %p17758_p1 = scmp.lt.s32.totalorder %s14705_s12, %s14705_s12 }
  0x13   :  { %v16477_v40 = vpack.c.bf16 %v161_v39, %v160_v38  ;;  %v310_v42 = vld [vmem:[%s21599_s4 + $0x18] sm:$0xff]  ;;  %v312_v46 = vld [vmem:[%s21599_s4 + $0x28] sm:$0xff]  ;;  %v16483_v48 = vpack.c.bf16 %v309_v45, %v307_v43  ;;  %v311_v50 = vld [vmem:[%s21599_s4 + $0x20] sm:$0xff] }
  0x14   :  { %16464 = vmatpush3.bf16.msra.mxu0 %v16461_v22  ;;  %v16481_v44 = vpack.c.bf16 %v310_v42, %v308_v41  ;;  %v314_v47 = vld [vmem:[%s21599_s4 + $0x38] sm:$0xff]  ;;  %v313_v51 = vld [vmem:[%s21599_s4 + $0x30] sm:$0xff]  ;;  %s17780_s4 = smov 96  }
  0x15   :  { %16466 = vmatprep.subr.bf16.mxu0 %v16465_v27  ;;  %v16485_v49 = vpack.c.bf16 %v314_v47, %v312_v46  ;;  %v16487_v52 = vpack.c.bf16 %v313_v51, %v311_v50 }
  0x16   :  { %81 = vperm.xlu0 %16879, %v42_v25   ;;  %84 = vperm.xlu1 %16880, %v43_v26  }
  0x17   :  { %16482 = vmatprep.subr.bf16.mxu1 %v16481_v44 }
  0x18   :  { %16468 = vmatpush3.bf16.msra.mxu0 %v16465_v27  ;;  %16484 = vmatpush1.bf16.msra.mxu1 %v16483_v48 }
  0x19   :  { %16470 = vmatprep.subr.bf16.mxu0 %v16469_v32  ;;  %16486 = vmatprep.subr.bf16.mxu1 %v16485_v49 }
  0x1a   :  { %87 = vperm.xlu0 %16879, %v44_v30   ;;  %90 = vperm.xlu1 %16880, %v45_v31  }
  0x1c   :  { %16472 = vmatpush3.bf16.msra.mxu0 %v16469_v32  ;;  %16488 = vmatpush1.bf16.msra.mxu1 %v16487_v52 }
  0x1d   :  { %16474 = vmatprep.subr.bf16.mxu0 %v16473_v37 }
  0x1e   :  { %93 = vperm.xlu0 %16879, %v46_v35   ;;  %96 = vperm.xlu1 %16880, %v47_v36  }
  0x20   :  { %16476 = vmatpush3.bf16.msra.mxu0 %v16473_v37 }
  0x21   :  { %16478 = vmatprep.subr.bf16.mxu0 %v16477_v40 }
  0x24   :  { %16480 = vmatpush3.bf16.msra.mxu0 %v16477_v40 }
  0x81   :  { %v52_v55 = vpop.permute.xlu0 %51  ;;  %v58_v56 = vpop.permute.xlu1 %57 }
  0x82   :  { %vm98_vm0 = vcmp.eq.s32.totalorder %v17957_v54, %v52_v55  ;;  %vm100_vm1 = vcmp.eq.s32.totalorder %v17957_v54, %v58_v56 }
  0x83   :  { %15573 = vmatprep.mubr.msk.f32.mxu0 %vm98_vm0, %v21606_v57  ;;  %vm315_vm0 = vcmask 261120  }
  0x85   :  { %v55_v58 = vpop.permute.xlu0 %54  ;;  %v61_v59 = vpop.permute.xlu1 %60 }
  0x86   :  { %vm99_vm2 = vcmp.eq.s32.totalorder %v17957_v54, %v55_v58  ;;  %vm101_vm3 = vcmp.eq.s32.totalorder %v17957_v54, %v61_v59 }
  0x87   :  { %15574 = vmatmul.mubr.msk.f32.vlgmr.msra.gmra.mrb[0].mxu0 %vm99_vm2, %v21606_v57 }
  0x88   :  { %15576 = vmatprep.mubr.msk.f32.mxu0 %vm100_vm1, %v21606_v57  ;;  %vm531_vm1 = vcmask 64512  }
  0x89   :  { %v64_v60 = vpop.permute.xlu0 %63  ;;  %v67_v61 = vpop.permute.xlu1 %66  ;;  %vm18205_vm2 = vmpackc.low %vm531_vm1, %vm531_vm1 }
  0x8a   :  { %vm102_vm4 = vcmp.eq.s32.totalorder %v17957_v54, %v64_v60  ;;  %vm103_vm5 = vcmp.eq.s32.totalorder %v17957_v54, %v67_v61 }
  0x8b   :  { %15577 = vmatmul.mubr.msk.f32.gmra.mrb[2].mxu0 %vm101_vm3, %v21606_v57  ;;  %vm1254_vm3 = vcmask 130048  }
  0x8c   :  { %15579 = vmatprep.mubr.msk.f32.mxu0 %vm102_vm4, %v21606_v57  ;;  %vm3057_vm4 = vcmask 195584  }
  0x8d   :  { %v70_v62 = vpop.permute.xlu0 %69  ;;  %v73_v63 = vpop.permute.xlu1 %72 }
  0x8e   :  { %vm104_vm6 = vcmp.eq.s32.totalorder %v17957_v54, %v70_v62  ;;  %vm105_vm7 = vcmp.eq.s32.totalorder %v17957_v54, %v73_v63 }
  0x8f   :  { %15580 = vmatmul.mubr.msk.f32.gmra.mrb[4].mxu0 %vm103_vm5, %v21606_v57 }
  0x90   :  { %15582 = vmatprep.mubr.msk.f32.mxu0 %vm104_vm6, %v21606_v57 }
  0x91   :  { %v76_v0 = vpop.permute.xlu0 %75  ;;  %v79_v1 = vpop.permute.xlu1 %78 }
  0x92   :  { %vm106_vm8 = vcmp.eq.s32.totalorder %v17957_v54, %v76_v0  ;;  %vm107_vm9 = vcmp.eq.s32.totalorder %v17957_v54, %v79_v1 }
  0x93   :  { %15583 = vmatmul.mubr.msk.f32.gmra.mrb[6].mxu0 %vm105_vm7, %v21606_v57 }
  0x94   :  { %15585 = vmatprep.mubr.msk.f32.mxu0 %vm106_vm8, %v21606_v57 }
  0x95   :  { %v82_v2 = vpop.permute.xlu0 %81  ;;  %v85_v3 = vpop.permute.xlu1 %84 }
  0x96   :  { %vm108_vm10 = vcmp.eq.s32.totalorder %v17957_v54, %v82_v2  ;;  %vm109_vm11 = vcmp.eq.s32.totalorder %v17957_v54, %v85_v3 }
  0x97   :  { %15586 = vmatmul.mubr.msk.f32.gmra.mrb[8].mxu0 %vm107_vm9, %v21606_v57 }
  0x98   :  { %15588 = vmatprep.mubr.msk.f32.mxu0 %vm108_vm10, %v21606_v57 }
  0x99   :  { %v88_v4 = vpop.permute.xlu0 %87  ;;  %v91_v5 = vpop.permute.xlu1 %90 }
  0x9a   :  { %vm110_vm12 = vcmp.eq.s32.totalorder %v17957_v54, %v88_v4  ;;  %vm111_vm13 = vcmp.eq.s32.totalorder %v17957_v54, %v91_v5 }
  0x9b   :  { %15589 = vmatmul.mubr.msk.f32.gmra.mrb[10].mxu0 %vm109_vm11, %v21606_v57 }
  0x9c   :  { %15591 = vmatprep.mubr.msk.f32.mxu0 %vm110_vm12, %v21606_v57 }
  0x9d   :  { %v94_v6 = vpop.permute.xlu0 %93  ;;  %v97_v7 = vpop.permute.xlu1 %96 }
  0x9e   :  { %vm112_vm14 = vcmp.eq.s32.totalorder %v17957_v54, %v94_v6  ;;  %vm113_vm15 = vcmp.eq.s32.totalorder %v17957_v54, %v97_v7 }
  0x9f   :  { %15592 = vmatmul.mubr.msk.f32.gmra.mrb[12].mxu0 %vm111_vm13, %v21606_v57  ;;  %vm17789_vm13 = vmmov 0  }
  0xa0   :  { %15594 = vmatprep.mubr.msk.f32.mxu0 %vm112_vm14, %v21606_v57  ;;  %vm13987_vm14 = vcmask 1041409  }
  0xa3   :  { %15595 = vmatmul.mubr.msk.f32.gmra.mrb[14].mxu0 %vm113_vm15, %v21606_v57  ;;  %vm13989_vm15 = vcmask 1042434  }
 0x15a   :  { %v15575_v9 = vpop.f32.mrb[0].mxu0 }
 0x15b   :  { %v228_v10 = vpop.f32.mrb[1].mxu0 }
 0x15c   :  { %14744 = vmatmul.mubr.msk.f32.vlgmr.msra.gmra.mrb[0].mxu1 %vm315_vm0, %v228_v10 }
 0x15d   :  { %434 = vmatprep.mubr.f32.mxu1 %v21604_v8 }
 0x15e   :  { %v15578_v11 = vpop.f32.mrb[2].mxu0 }
 0x15f   :  { %v238_v12 = vpop.f32.mrb[3].mxu0 }
 0x160   :  { %14745 = vmatmul.mubr.msk.f32.gmra.mrb[2].mxu1 %vm315_vm0, %v15575_v9 }
 0x161   :  { %440 = vmatprep.mubr.f32.mxu1 %v21604_v8 }
 0x162   :  { %v15581_v13 = vpop.f32.mrb[4].mxu0 }
 0x163   :  { %v248_v14 = vpop.f32.mrb[5].mxu0 }
 0x164   :  { %14746 = vmatmul.mubr.msk.f32.gmra.mrb[4].mxu1 %vm315_vm0, %v238_v12 }
 0x165   :  { %446 = vmatprep.mubr.f32.mxu1 %v21604_v8 }
 0x166   :  { %v15584_v15 = vpop.f32.mrb[6].mxu0 }
 0x167   :  { %v258_v16 = vpop.f32.mrb[7].mxu0 }
 0x168   :  { %14747 = vmatmul.mubr.msk.f32.gmra.mrb[6].mxu1 %vm315_vm0, %v15578_v11 }
 0x169   :  { %452 = vmatprep.mubr.f32.mxu1 %v21604_v8 }
 0x16a   :  { %v15587_v17 = vpop.f32.mrb[8].mxu0 }
 0x16b   :  { %v268_v18 = vpop.f32.mrb[9].mxu0 }
 0x16c   :  { %14748 = vmatmul.mubr.msk.f32.gmra.mrb[8].mxu1 %vm315_vm0, %v248_v14 }
 0x16d   :  { %458 = vmatprep.mubr.f32.mxu1 %v21604_v8 }
 0x16e   :  { %v15590_v19 = vpop.f32.mrb[10].mxu0 }
 0x16f   :  { %v278_v20 = vpop.f32.mrb[11].mxu0 }
 0x170   :  { %14749 = vmatmul.mubr.msk.f32.gmra.mrb[10].mxu1 %vm315_vm0, %v15581_v13 }
 0x171   :  { %464 = vmatprep.mubr.f32.mxu1 %v21604_v8 }
 0x172   :  { %v15593_v21 = vpop.f32.mrb[12].mxu0 }
 0x173   :  { %v288_v22 = vpop.f32.mrb[13].mxu0 }
 0x174   :  { %14750 = vmatmul.mubr.msk.f32.gmra.mrb[12].mxu1 %vm315_vm0, %v258_v16 }
 0x175   :  { %470 = vmatprep.mubr.f32.mxu1 %v21604_v8 }
 0x176   :  { %v15596_v23 = vpop.f32.mrb[14].mxu0 }
 0x177   :  { %v298_v24 = vpop.f32.mrb[15].mxu0 }
 0x178   :  { %14751 = vmatmul.mubr.msk.f32.gmra.mrb[14].mxu1 %vm315_vm0, %v15584_v15 }
 0x179   :  { %476 = vmatprep.mubr.f32.mxu1 %v21604_v8 }
 0x17c   :  { %14752 = vmatmul.mubr.msk.f32.gmra.mrb[16].mxu1 %vm315_vm0, %v268_v18 }
 0x17d   :  { %482 = vmatprep.mubr.f32.mxu1 %v21604_v8 }
 0x180   :  { %14753 = vmatmul.mubr.msk.f32.gmra.mrb[18].mxu1 %vm315_vm0, %v15587_v17 }
 0x181   :  { %488 = vmatprep.mubr.f32.mxu1 %v21604_v8 }
 0x184   :  { %14754 = vmatmul.mubr.msk.f32.gmra.mrb[20].mxu1 %vm315_vm0, %v278_v20 }
 0x185   :  { %494 = vmatprep.mubr.f32.mxu1 %v21604_v8 }
 0x188   :  { %14755 = vmatmul.mubr.msk.f32.gmra.mrb[22].mxu1 %vm315_vm0, %v15590_v19 }
 0x189   :  { %500 = vmatprep.mubr.f32.mxu1 %v21604_v8 }
 0x18c   :  { %14756 = vmatmul.mubr.msk.f32.gmra.mrb[24].mxu1 %vm315_vm0, %v288_v22 }
 0x18d   :  { %506 = vmatprep.mubr.f32.mxu1 %v21604_v8 }
 0x190   :  { %14757 = vmatmul.mubr.msk.f32.gmra.mrb[26].mxu1 %vm315_vm0, %v15593_v21 }
 0x191   :  { %512 = vmatprep.mubr.f32.mxu1 %v21604_v8 }
 0x194   :  { %14758 = vmatmul.mubr.msk.f32.gmra.mrb[28].mxu1 %vm315_vm0, %v298_v24 }
 0x195   :  { %518 = vmatprep.mubr.f32.mxu1 %v21604_v8 }
 0x198   :  { %14759 = vmatmul.mubr.msk.f32.gmra.mrb[30].mxu1 %vm315_vm0, %v15596_v23 }
 0x22f   :  { %v18023_v25 = vpop.f32.mrb[0].mxu1 }
 0x230   :  { %v18025_v26 = vpop.f32.mrb[1].mxu1  ;;  %15601 = vmatprep.mubr.msk.f32.mxu1 %vm531_vm1, %v18023_v25 }
 0x233   :  { %v18031_v28 = vpop.f32.mrb[2].mxu1 }
 0x234   :  { %v18033_v29 = vpop.f32.mrb[3].mxu1  ;;  %v18037_v30 = vpack.i.bf16 %v18031_v28, %v18023_v25 }
 0x235   :  { %v18041_v31 = vpack.i.bf16 %v18033_v29, %v18025_v26 }
 0x236   :  { %16882 = vrot.lane.b32.xlu0 %v18037_v30, %s17780_s4 }
 0x237   :  { %21718 = vst [vmem:[#allocation6_spill] sm:$0xff] %v18041_v31  ;;  %v18047_v33 = vpop.f32.mrb[4].mxu1 }
 0x238   :  { %v18049_v34 = vpop.f32.mrb[5].mxu1 }
 0x23b   :  { %v18053_v36 = vpop.f32.mrb[6].mxu1 }
 0x23c   :  { %v18057_v37 = vpack.i.bf16 %v18053_v36, %v18047_v33  ;;  %v18059_v38 = vpop.f32.mrb[7].mxu1 }
 0x23d   :  { %21720 = vst [vmem:[#allocation8_spill] sm:$0xff] %v18059_v38  ;;  %v18063_v39 = vpack.i.bf16 %v18059_v38, %v18049_v34 }
 0x23e   :  { %21719 = vst [vmem:[#allocation7_spill] sm:$0xff] %v18057_v37  ;;  %16887 = vrot.lane.b32.xlu1 %v18057_v37, %s17780_s4 }
 0x23f   :  { %21721 = vst [vmem:[#allocation9_spill] sm:$0xff] %v18063_v39  ;;  %v18069_v41 = vpop.f32.mrb[8].mxu1 }
 0x240   :  { %v18071_v42 = vpop.f32.mrb[9].mxu1 }
 0x243   :  { %v18075_v44 = vpop.f32.mrb[10].mxu1 }
 0x244   :  { %v18079_v45 = vpack.i.bf16 %v18075_v44, %v18069_v41  ;;  %v18081_v46 = vpop.f32.mrb[11].mxu1 }
 0x245   :  { %v18085_v47 = vpack.i.bf16 %v18081_v46, %v18071_v42 }
 0x246   :  { %16892 = vrot.lane.b32.xlu0 %v18079_v45, %s17780_s4 }
 0x247   :  { %21722 = vst [vmem:[#allocation10_spill] sm:$0xff] %v18085_v47  ;;  %v18091_v49 = vpop.f32.mrb[12].mxu1 }
 0x248   :  { %v18093_v50 = vpop.f32.mrb[13].mxu1  ;;  %15622 = vmatprep.mubr.msk.f32.mxu0 %vm531_vm1, %v18091_v49 }
 0x24b   :  { %v18099_v52 = vpop.f32.mrb[14].mxu1 }
 0x24c   :  { %v18101_v53 = vpop.f32.mrb[15].mxu1  ;;  %v18105_v55 = vpack.i.bf16 %v18099_v52, %v18091_v49 }
 0x24d   :  { %21723 = vst [vmem:[#allocation11_spill] sm:$0xff] %v18101_v53  ;;  %v18109_v56 = vpack.i.bf16 %v18101_v53, %v18093_v50 }
 0x24e   :  { %21724 = vst [vmem:[#allocation12_spill] sm:$0xff] %v18105_v55 }
 0x24f   :  { %21725 = vst [vmem:[#allocation13_spill] sm:$0xff] %v18109_v56  ;;  %v18113_v59 = vpop.f32.mrb[16].mxu1 }
 0x250   :  { %v18115_v60 = vpop.f32.mrb[17].mxu1 }
 0x253   :  { %v18119_v62 = vpop.f32.mrb[18].mxu1 }
 0x254   :  { %21726 = vst [vmem:[#allocation14_spill] sm:$0xff] %v18119_v62  ;;  %v18121_v63 = vpop.f32.mrb[19].mxu1  ;;  %v18125_v0 = vpack.i.bf16 %v18119_v62, %v18113_v59 }
 0x255   :  { %v18129_v1 = vpack.i.bf16 %v18121_v63, %v18115_v60 }
 0x256   :  { %16897 = vrot.lane.b32.xlu1 %v18125_v0, %s17780_s4 }
 0x257   :  { %21727 = vst [vmem:[#allocation15_spill] sm:$0xff] %v18129_v1  ;;  %v18135_v3 = vpop.f32.mrb[20].mxu1 }
 0x258   :  { %21728 = vst [vmem:[#allocation16_spill] sm:$0xff] %v18135_v3  ;;  %v18137_v4 = vpop.f32.mrb[21].mxu1 }
 0x259   :  { %21729 = vst [vmem:[#allocation17_spill] sm:$0xff] %v18137_v4 }
 0x25a   :  { %16907 = vrot.lane.b32.xlu1 %v18105_v55, %s17780_s4 }
 0x25b   :  { %v18143_v6 = vpop.f32.mrb[22].mxu1 }
 0x25c   :  { %v18145_v7 = vpop.f32.mrb[23].mxu1  ;;  %v18149_v9 = vpack.i.bf16 %v18143_v6, %v18135_v3 }
 0x25d   :  { %21730 = vst [vmem:[#allocation18_spill] sm:$0xff] %v18145_v7  ;;  %v18153_v10 = vpack.i.bf16 %v18145_v7, %v18137_v4 }
 0x25e   :  { %21731 = vst [vmem:[#allocation19_spill] sm:$0xff] %v18149_v9 }
 0x25f   :  { %21732 = vst [vmem:[#allocation20_spill] sm:$0xff] %v18153_v10  ;;  %v18157_v12 = vpop.f32.mrb[24].mxu1 }
 0x260   :  { %v18159_v13 = vpop.f32.mrb[25].mxu1 }
 0x263   :  { %v18163_v15 = vpop.f32.mrb[26].mxu1 }
 0x264   :  { %21733 = vst [vmem:[#allocation21_spill] sm:$0xff] %v18163_v15  ;;  %v18165_v16 = vpop.f32.mrb[27].mxu1  ;;  %v18169_v17 = vpack.i.bf16 %v18163_v15, %v18157_v12 }
 0x265   :  { %v18173_v18 = vpack.i.bf16 %v18165_v16, %v18159_v13 }
 0x266   :  { %16902 = vrot.lane.b32.xlu0 %v18169_v17, %s17780_s4 }
 0x267   :  { %21734 = vst [vmem:[#allocation22_spill] sm:$0xff] %v18173_v18  ;;  %v18179_v20 = vpop.f32.mrb[28].mxu1 }
 0x268   :  { %21735 = vst [vmem:[#allocation23_spill] sm:$0xff] %v18179_v20  ;;  %v18181_v21 = vpop.f32.mrb[29].mxu1 }
 0x269   :  { %21736 = vst [vmem:[#allocation24_spill] sm:$0xff] %v18181_v21 }
 0x26a   :  { %16912 = vrot.lane.b32.xlu0 %v18149_v9, %s17780_s4 }
 0x26b   :  { %v18187_v23 = vpop.f32.mrb[30].mxu1 }
 0x26c   :  { %21737 = vst [vmem:[#allocation25_spill] sm:$0xff] %v18187_v23  ;;  %v18189_v24 = vpop.f32.mrb[31].mxu1  ;;  %v18193_v8 = vpack.i.bf16 %v18187_v23, %v18179_v20 }
 0x26d   :  { %21738 = vst [vmem:[#allocation26_spill] sm:$0xff] %v18189_v24  ;;  %v18197_v57 = vpack.i.bf16 %v18189_v24, %v18181_v21 }
 0x26e   :  { %21739 = vst [vmem:[#allocation27_spill] sm:$0xff] %v18193_v8  ;;  %16917 = vrot.lane.b32.xlu1 %v18193_v8, %s17780_s4 }
 0x26f   :  { %21740 = vst [vmem:[#allocation28_spill] sm:$0xff] %v18197_v57 }
 0x2a8   :  { %v16883_v22 = vpop.permute.xlu0 %16882 }
 0x2a9   :  { %v16885_v40 = vunpack.i.h.bf16 %v16883_v22  ;;  %v16884_v11 = vunpack.i.l.bf16 %v16883_v22 }
 0x2ab   :  { %v16489_v51 = vpack.c.bf16 %v16885_v40, %v16884_v11 }
 0x2ad   :  { %16491 = vmatprep.subr.msk.bf16.mxu1 %vm18205_vm2, %v16489_v51 }
 0x2ae   :  { %16494 = vmatpush3.bf16.xpose.msk.msra.mxu1 %vm18205_vm2, %v16489_v51 }
 0x2b0   :  { %v16888_v5 = vpop.permute.xlu1 %16887 }
 0x2b1   :  { %v16890_v35 = vunpack.i.h.bf16 %v16888_v5  ;;  %v16889_v14 = vunpack.i.l.bf16 %v16888_v5 }
 0x2b3   :  { %v16495_v61 = vpack.c.bf16 %v16890_v35, %v16889_v14 }
 0x2b5   :  { %15602 = vmatmul.mubr.msk.f32.vlgmr.msra.gmra.mrb[32].mxu1 %vm531_vm1, %v18031_v28  ;;  %16497 = vmatprep.subr.msk.bf16.mxu1 %vm18205_vm2, %v16495_v61 }
 0x2b6   :  { %16500 = vmatpush3.bf16.xpose.msk.msra.mxu1 %vm18205_vm2, %v16495_v61  ;;  %15608 = vmatprep.mubr.msk.f32.mxu1 %vm531_vm1, %v18047_v33 }
 0x2b8   :  { %v16893_v40 = vpop.permute.xlu0 %16892 }
 0x2b9   :  { %v16895_v11 = vunpack.i.h.bf16 %v16893_v40  ;;  %v16894_v22 = vunpack.i.l.bf16 %v16893_v40 }
 0x2bb   :  { %v16501_v51 = vpack.c.bf16 %v16895_v11, %v16894_v22 }
 0x2bd   :  { %15609 = vmatmul.mubr.msk.f32.vlgmr.msra.gmra.mrb[34].mxu1 %vm531_vm1, %v18053_v36  ;;  %16503 = vmatprep.subr.msk.bf16.mxu1 %vm18205_vm2, %v16501_v51 }
 0x2be   :  { %16506 = vmatpush3.bf16.xpose.msk.msra.mxu1 %vm18205_vm2, %v16501_v51  ;;  %15615 = vmatprep.mubr.msk.f32.mxu1 %vm531_vm1, %v18069_v41 }
 0x2c5   :  { %15616 = vmatmul.mubr.msk.f32.vlgmr.msra.gmra.mrb[36].mxu1 %vm531_vm1, %v18075_v44 }
 0x2c6   :  { %15629 = vmatprep.mubr.msk.f32.mxu1 %vm531_vm1, %v18113_v59 }
 0x2c8   :  { %v16898_v35 = vpop.permute.xlu1 %16897 }
 0x2c9   :  { %v16900_v61 = vunpack.i.h.bf16 %v16898_v35  ;;  %v16899_v5 = vunpack.i.l.bf16 %v16898_v35 }
 0x2cb   :  { %v16513_v14 = vpack.c.bf16 %v16900_v61, %v16899_v5 }
 0x2cc   :  { %v16908_v40 = vpop.permute.xlu1 %16907 }
 0x2cd   :  { %v16910_v11 = vunpack.i.h.bf16 %v16908_v40  ;;  %v16909_v22 = vunpack.i.l.bf16 %v16908_v40  ;;  %16515 = vmatprep.subr.msk.bf16.mxu1 %vm18205_vm2, %v16513_v14 }
 0x2ce   :  { %16518 = vmatpush3.bf16.xpose.msk.msra.mxu1 %vm18205_vm2, %v16513_v14 }
 0x2cf   :  { %v16507_v51 = vpack.c.bf16 %v16910_v11, %v16909_v22 }
 0x2d1   :  { %16509 = vmatprep.subr.msk.bf16.mxu0 %vm18205_vm2, %v16507_v51 }
 0x2d2   :  { %16512 = vmatpush3.bf16.xpose.msk.msra.mxu0 %vm18205_vm2, %v16507_v51 }
 0x2d5   :  { %15630 = vmatmul.mubr.msk.f32.vlgmr.msra.gmra.mrb[38].mxu1 %vm531_vm1, %v18119_v62 }
 0x2d6   :  { %15643 = vmatprep.mubr.msk.f32.mxu1 %vm531_vm1, %v18157_v12 }
 0x2d8   :  { %v16903_v35 = vpop.permute.xlu0 %16902 }
 0x2d9   :  { %v16905_v61 = vunpack.i.h.bf16 %v16903_v35  ;;  %v16904_v5 = vunpack.i.l.bf16 %v16903_v35  ;;  %15623 = vmatmul.mubr.msk.f32.vlgmr.msra.gmra.mrb[16].mxu0 %vm531_vm1, %v18099_v52 }
 0x2da   :  { %15636 = vmatprep.mubr.msk.f32.mxu0 %vm531_vm1, %v18135_v3 }
 0x2db   :  { %v16525_v14 = vpack.c.bf16 %v16905_v61, %v16904_v5 }
 0x2dc   :  { %v16913_v40 = vpop.permute.xlu0 %16912 }
 0x2dd   :  { %v16915_v11 = vunpack.i.h.bf16 %v16913_v40  ;;  %v16914_v22 = vunpack.i.l.bf16 %v16913_v40  ;;  %16527 = vmatprep.subr.msk.bf16.mxu1 %vm18205_vm2, %v16525_v14 }
 0x2de   :  { %16530 = vmatpush3.bf16.xpose.msk.msra.mxu1 %vm18205_vm2, %v16525_v14 }
 0x2df   :  { %v16519_v51 = vpack.c.bf16 %v16915_v11, %v16914_v22 }
 0x2e0   :  { %v16918_v19 = vpop.permute.xlu1 %16917 }
 0x2e1   :  { %v16920_v32 = vunpack.i.h.bf16 %v16918_v19  ;;  %v16919_v35 = vunpack.i.l.bf16 %v16918_v19  ;;  %16521 = vmatprep.subr.msk.bf16.mxu0 %vm18205_vm2, %v16519_v51 }
 0x2e2   :  { %16524 = vmatpush3.bf16.xpose.msk.msra.mxu0 %vm18205_vm2, %v16519_v51 }
 0x2e3   :  { %v16531_v61 = vpack.c.bf16 %v16920_v32, %v16919_v35 }
 0x2e5   :  { %15644 = vmatmul.mubr.msk.f32.vlgmr.msra.gmra.mrb[40].mxu1 %vm531_vm1, %v18163_v15  ;;  %16533 = vmatprep.subr.msk.bf16.mxu0 %vm18205_vm2, %v16531_v61 }
 0x2e9   :  { %15637 = vmatmul.mubr.msk.f32.vlgmr.msra.gmra.mrb[18].mxu0 %vm531_vm1, %v18143_v6 }
 0x2ea   :  { %16536 = vmatpush3.bf16.xpose.msk.msra.mxu0 %vm18205_vm2, %v16531_v61  ;;  %15650 = vmatprep.mubr.msk.f32.mxu0 %vm531_vm1, %v18179_v20 }
 0x2f1   :  { %15651 = vmatmul.mubr.msk.f32.vlgmr.msra.gmra.mrb[20].mxu0 %vm531_vm1, %v18187_v23 }
 0x388   :  { %v18269_v19 = vpop.f32.mrb[32].mxu1 }
 0x389   :  { %v18271_v32 = vpop.f32.mrb[33].mxu1 }
 0x390   :  { %v18273_v5 = vpop.f32.mrb[34].mxu1 }
 0x391   :  { %v18275_v14 = vpop.f32.mrb[35].mxu1 }
 0x398   :  { %v15617_v40 = vpop.f32.mrb[36].mxu1 }
 0x399   :  { %v1243_v11 = vmul.f32 0.35355338, %v15617_v40  ;;  %v784_v22 = vpop.f32.mrb[37].mxu1 }
 0x39a   :  { %v1242_v51 = vmul.f32 0.35355338, %v784_v22 }
 0x39b   :  { %v1270_v35 = vsel %vm1254_vm3, %v1243_v11, -inf }
 0x39c   :  { %1271 = vmax.xlane.f32.xlu1 %v1270_v35  ;;  %v1267_v61 = vsel %vm1254_vm3, %v1242_v51, -inf }
 0x39d   :  { %1268 = vmax.xlane.f32.xlu0 %v1267_v61 }
 0x3a8   :  { %v15631_v2 = vpop.f32.mrb[38].mxu1 }
 0x3a9   :  { %v962_v48 = vpop.f32.mrb[39].mxu1  ;;  %v1247_v27 = vmul.f32 0.35355338, %v15631_v2 }
 0x3aa   :  { %v1246_v43 = vmul.f32 0.35355338, %v962_v48 }
 0x3ab   :  { %v1282_v40 = vsel %vm1254_vm3, %v1247_v27, -inf }
 0x3ac   :  { %v18279_v54 = vpop.f32.mrb[16].mxu0  ;;  %v1279_v56 = vsel %vm1254_vm3, %v1246_v43, -inf }
 0x3ad   :  { %v18282_v57 = vpop.f32.mrb[17].mxu0  ;;  %16922 = vrot.lane.b32.xlu1 %v18079_v45, %s17781_s17  ;;  %1280 = vmax.xlane.f32.xlu0 %v1279_v56 }
 0x3b1   :  { %1283 = vmax.xlane.f32.xlu0 %v1282_v40 }
 0x3b8   :  { %v15645_v22 = vpop.f32.mrb[40].mxu1 }
 0x3b9   :  { %v1251_v35 = vmul.f32 0.35355338, %v15645_v22  ;;  %v1140_v61 = vpop.f32.mrb[41].mxu1 }
 0x3ba   :  { %v1250_v1 = vmul.f32 0.35355338, %v1140_v61 }
 0x3bb   :  { %v1294_v48 = vsel %vm1254_vm3, %v1251_v35, -inf }
 0x3bc   :  { %v18288_v2 = vpop.f32.mrb[18].mxu0  ;;  %1295 = vmax.xlane.f32.xlu0 %v1294_v48  ;;  %v1291_v56 = vsel %vm1254_vm3, %v1250_v1, -inf }
 0x3bd   :  { %v18290_v10 = vpop.f32.mrb[19].mxu0 }
 0x3c4   :  { %v18292_v39 = vpop.f32.mrb[20].mxu0 }
 0x3c5   :  { %v18294_v18 = vpop.f32.mrb[21].mxu0 }
 0x3d1   :  { %1292 = vmax.xlane.f32.xlu1 %v1291_v56 }
 0x429   :  { %v1272_v31 = vpop.xlane.xlu1 %1271 }
 0x42a   :  { %v1308_v40 = vsub.f32 %v1243_v11, %v1272_v31  ;;  %v1269_v47 = vpop.xlane.xlu0 %1268 }
 0x42b   :  { %v1307_v22 = vsub.f32 %v1242_v51, %v1269_v47 }
 0x42c   :  { %v1329_v21 = vmul.f32 1.442695, %v1308_v40 }
 0x42d   :  { %v1327_v4 = vmul.f32 1.442695, %v1307_v22  ;;  %v16923_v24 = vpop.permute.xlu1 %16922 }
 0x42e   :  { %17241 = vpow2.f32 %v1329_v21  ;;  %v16925_v38 = vunpack.i.h.bf16 %v16923_v24  ;;  %v16924_v48 = vunpack.i.l.bf16 %v16923_v24 }
 0x42f   :  { %17243 = vpow2.f32 %v1327_v4 }
 0x430   :  { %v16545_v7 = vpack.c.bf16 %v16925_v38, %v16924_v48 }
 0x432   :  { %16546 = vmatprep.subr.bf16.mxu0 %v16545_v7 }
 0x433   :  { %16548 = vmatpush3.bf16.msra.mxu0 %v16545_v7 }
 0x438   :  { %v18297_v53 = vpop.eup %17241 }
 0x439   :  { %v18299_v61 = vpop.eup %17243  ;;  %v1366_v56 = vsel %vm1254_vm3, %v18297_v53, 0.0 }
 0x43a   :  { %v1281_v31 = vpop.xlane.xlu0 %1280  ;;  %1367 = vadd.xlane.f32.xlu0 %v1366_v56  ;;  %v1363_v47 = vsel %vm1254_vm3, %v18299_v61, 0.0 }
 0x43b   :  { %1364 = vadd.xlane.f32.xlu1 %v1363_v47  ;;  %v1311_v7 = vsub.f32 %v1246_v43, %v1281_v31 }
 0x43d   :  { %v1335_v51 = vmul.f32 1.442695, %v1311_v7 }
 0x43e   :  { %v1284_v21 = vpop.xlane.xlu0 %1283 }
 0x43f   :  { %v1312_v11 = vsub.f32 %v1247_v27, %v1284_v21 }
 0x441   :  { %v1337_v24 = vmul.f32 1.442695, %v1312_v11 }
 0x443   :  { %17245 = vpow2.f32 %v1337_v24 }
 0x444   :  { %17247 = vpow2.f32 %v1335_v51  ;;  %v18353_v51 = vmul.f32 0.35355338, %v18275_v14 }
 0x449   :  { %v1296_v40 = vpop.xlane.xlu0 %1295 }
 0x44a   :  { %v1316_v27 = vsub.f32 %v1251_v35, %v1296_v40 }
 0x44c   :  { %16932 = vrot.lane.b32.xlu1 %v18169_v17, %s17781_s17  ;;  %v1345_v56 = vmul.f32 1.442695, %v1316_v27  ;;  %v18358_v27 = vmul.f32 0.35355338, %v18282_v57  ;;  %v18372_v57 = vmul.f32 0.35355338, %v18294_v18 }
 0x44d   :  { %v18307_v38 = vpop.eup %17245 }
 0x44e   :  { %v1378_v4 = vsel %vm1254_vm3, %v18307_v38, 0.0  ;;  %v18313_v22 = vpop.eup %17247  ;;  %17249 = vpow2.f32 %v1345_v56  ;;  %v1273_v14 = vsel %vm1254_vm3, %v18358_v27, -inf }
 0x44f   :  { %1379 = vadd.xlane.f32.xlu0 %v1378_v4  ;;  %v1375_v48 = vsel %vm1254_vm3, %v18313_v22, 0.0  ;;  %v18350_v4 = vmul.f32 0.35355338, %v18269_v19 }
 0x451   :  { %v1258_v40 = vsel %vm1254_vm3, %v18350_v4, -inf }
 0x458   :  { %v18317_v47 = vpop.eup %17249 }
 0x459   :  { %v1390_v43 = vsel %vm1254_vm3, %v18317_v47, 0.0 }
 0x45e   :  { %v1293_v31 = vpop.xlane.xlu1 %1292 }
 0x45f   :  { %v1315_v21 = vsub.f32 %v1250_v1, %v1293_v31 }
 0x461   :  { %v1343_v11 = vmul.f32 1.442695, %v1315_v21 }
 0x463   :  { %17251 = vpow2.f32 %v1343_v11 }
 0x465   :  { %16927 = vrot.lane.b32.xlu0 %v18125_v0, %s17781_s17 }
 0x46d   :  { %v18327_v35 = vpop.eup %17251 }
 0x46e   :  { %v1387_v24 = vsel %vm1254_vm3, %v18327_v35, 0.0 }
 0x470   :  { %1376 = vadd.xlane.f32.xlu1 %v1375_v48  ;;  %v1261_v48 = vsel %vm1254_vm3, %v18353_v51, -inf }
 0x481   :  { %16937 = vrot.lane.b32.xlu1 %v18037_v30, %s17782_s18 }
 0x484   :  { %1391 = vadd.xlane.f32.xlu0 %v1390_v43  ;;  %v18363_v43 = vmul.f32 0.35355338, %v18290_v10 }
 0x486   :  { %v1285_v11 = vsel %vm1254_vm3, %v18363_v43, -inf }
 0x49a   :  { %16942 = vrot.lane.b32.xlu0 %v18079_v45, %s17782_s18 }
 0x49e   :  { %2129 = vrot.lane.b32.xlu0 %v18031_v28, %s17783_s19 }
 0x4a2   :  { %2309 = vrot.lane.b32.xlu0 %v18069_v41, %s17783_s19 }
 0x4a5   :  { %1388 = vadd.xlane.f32.xlu1 %v1387_v24  ;;  %v1297_v24 = vsel %vm1254_vm3, %v18372_v57, -inf }
 0x4a6   :  { %2491 = vrot.lane.b32.xlu0 %v18113_v59, %s17783_s19 }
 0x4aa   :  { %2493 = vrot.lane.b32.xlu0 %v18119_v62, %s17783_s19 }
 0x4ae   :  { %2675 = vrot.lane.b32.xlu0 %v18163_v15, %s17783_s19 }
 0x4b6   :  { %2127 = vrot.lane.b32.xlu1 %v18023_v25, %s17783_s19 }
 0x4ba   :  { %16947 = vrot.lane.b32.xlu1 %v18125_v0, %s17782_s18 }
 0x4be   :  { %2311 = vrot.lane.b32.xlu1 %v18075_v44, %s17783_s19 }
 0x4c2   :  { %16952 = vrot.lane.b32.xlu1 %v18169_v17, %s17782_s18 }
 0x4c6   :  { %2673 = vrot.lane.b32.xlu1 %v18157_v12, %s17783_s19 }
 0x4c7   :  { %v1368_v1 = vpop.xlane.xlu0 %1367 }
 0x4c8   :  { %17253 = vrcp.f32 %v1368_v1  ;;  %v1365_v7 = vpop.xlane.xlu1 %1364 }
 0x4c9   :  { %17255 = vrcp.f32 %v1365_v7 }
 0x4cd   :  { %1259 = vmax.xlane.f32.xlu0 %v1258_v40 }
 0x4d1   :  { %1262 = vmax.xlane.f32.xlu0 %v1261_v48 }
 0x4d2   :  { %v17254_v56 = vpop.eup %17253 }
 0x4d3   :  { %v17256_v19 = vpop.eup %17255  ;;  %v1420_v21 = vmul.f32 %v17254_v56, %v18297_v53 }
 0x4d4   :  { %v1419_v31 = vmul.f32 %v17256_v19, %v18299_v61  ;;  %v16933_v61 = vpop.permute.xlu1 %16932  ;;  %v18379_v19 = vmul.f32 0.35355338, %v18271_v32  ;;  %v18392_v32 = vmul.f32 0.35355338, %v18288_v2 }
 0x4d5   :  { %1274 = vmax.xlane.f32.xlu0 %v1273_v14  ;;  %v16935_v7 = vunpack.i.h.bf16 %v16933_v61  ;;  %v16934_v53 = vunpack.i.l.bf16 %v16933_v61  ;;  %v18382_v14 = vmul.f32 0.35355338, %v18273_v5  ;;  %v18397_v5 = vmul.f32 0.35355338, %v18292_v39 }
 0x4d6   :  { %15671 = vmatprep.mubr.msk.f32.mxu0 %vm1254_vm3, %v1419_v31  ;;  %v1255_v31 = vsel %vm1254_vm3, %v18379_v19, -inf  ;;  %v1288_v61 = vsel %vm1254_vm3, %v18392_v32, -inf }
 0x4d7   :  { %15672 = vmatmul.mubr.msk.f32.vlgmr.msra.gmra.mrb[22].mxu0 %vm1254_vm3, %v1420_v21  ;;  %v16561_v18 = vpack.c.bf16 %v16935_v7, %v16934_v53  ;;  %v18387_v21 = vmul.f32 0.35355338, %v18279_v54  ;;  %v1300_v54 = vsel %vm1254_vm3, %v18397_v5, -inf }
 0x4d9   :  { %1286 = vmax.xlane.f32.xlu0 %v1285_v11  ;;  %v1264_v11 = vsel %vm1254_vm3, %v18382_v14, -inf }
 0x4dc   :  { %v1380_v10 = vpop.xlane.xlu0 %1379 }
 0x4dd   :  { %1298 = vmax.xlane.f32.xlu0 %v1297_v24  ;;  %v1276_v24 = vsel %vm1254_vm3, %v18387_v21, -inf  ;;  %17257 = vrcp.f32 %v1380_v10 }
 0x4e0   :  { %v16928_v1 = vpop.permute.xlu0 %16927 }
 0x4e1   :  { %v16930_v40 = vunpack.i.h.bf16 %v16928_v1  ;;  %v16929_v48 = vunpack.i.l.bf16 %v16928_v1 }
 0x4e3   :  { %v16553_v56 = vpack.c.bf16 %v16930_v40, %v16929_v48 }
 0x4e5   :  { %16554 = vmatprep.subr.bf16.mxu0 %v16553_v56 }
 0x4e6   :  { %16556 = vmatpush3.bf16.msra.mxu0 %v16553_v56 }
 0x4e7   :  { %16562 = vmatprep.subr.bf16.mxu0 %v16561_v18  ;;  %v17258_v7 = vpop.eup %17257 }
 0x4e8   :  { %v1424_v39 = vmul.f32 %v17258_v7, %v18307_v38 }
 0x4ea   :  { %1256 = vmax.xlane.f32.xlu1 %v1255_v31 }
 0x4ee   :  { %1265 = vmax.xlane.f32.xlu1 %v1264_v11 }
 0x4f2   :  { %1277 = vmax.xlane.f32.xlu1 %v1276_v24 }
 0x4f6   :  { %1289 = vmax.xlane.f32.xlu1 %v1288_v61 }
 0x4fa   :  { %1301 = vmax.xlane.f32.xlu1 %v1300_v54 }
 0x4fd   :  { %v1377_v1 = vpop.xlane.xlu1 %1376 }
 0x4fe   :  { %17259 = vrcp.f32 %v1377_v1 }
 0x501   :  { %v16938_v2 = vpop.permute.xlu1 %16937 }
 0x502   :  { %v16940_v40 = vunpack.i.h.bf16 %v16938_v2  ;;  %v16939_v48 = vunpack.i.l.bf16 %v16938_v2 }
 0x504   :  { %v16569_v31 = vpack.c.bf16 %v16940_v40, %v16939_v48 }
 0x508   :  { %v17260_v53 = vpop.eup %17259 }
 0x509   :  { %v1423_v56 = vmul.f32 %v17260_v53, %v18313_v22 }
 0x50b   :  { %15685 = vmatprep.mubr.msk.f32.mxu0 %vm1254_vm3, %v1423_v56 }
 0x50c   :  { %15686 = vmatmul.mubr.msk.f32.vlgmr.msra.gmra.mrb[24].mxu0 %vm1254_vm3, %v1424_v39 }
 0x50d   :  { %16564 = vmatpush3.bf16.msra.mxu0 %v16561_v18 }
 0x50e   :  { %16571 = vmatprep.subr.msk.bf16.mxu0 %vm18205_vm2, %v16569_v31 }
 0x511   :  { %v1392_v10 = vpop.xlane.xlu0 %1391 }
 0x512   :  { %17261 = vrcp.f32 %v1392_v10 }
 0x515   :  { %v16943_v24 = vpop.permute.xlu0 %16942 }
 0x516   :  { %v16945_v22 = vunpack.i.h.bf16 %v16943_v24  ;;  %v16944_v2 = vunpack.i.l.bf16 %v16943_v24 }
 0x518   :  { %v16581_v18 = vpack.c.bf16 %v16945_v22, %v16944_v2 }
 0x519   :  { %v2130_v38 = vpop.permute.xlu0 %2129 }
 0x51c   :  { %v17262_v54 = vpop.eup %17261 }
 0x51d   :  { %v1428_v40 = vmul.f32 %v17262_v54, %v18317_v47  ;;  %v2310_v48 = vpop.permute.xlu0 %2309 }
 0x521   :  { %v2492_v47 = vpop.permute.xlu0 %2491 }
 0x532   :  { %v1389_v11 = vpop.xlane.xlu1 %1388 }
 0x533   :  { %17263 = vrcp.f32 %v1389_v11 }
 0x536   :  { %v2128_v61 = vpop.permute.xlu1 %2127 }
 0x53a   :  { %v16948_v7 = vpop.permute.xlu1 %16947 }
 0x53b   :  { %v16950_v39 = vunpack.i.h.bf16 %v16948_v7  ;;  %v16949_v10 = vunpack.i.l.bf16 %v16948_v7 }
 0x53d   :  { %v17264_v1 = vpop.eup %17263 }
 0x53e   :  { %v1427_v53 = vmul.f32 %v17264_v1, %v18327_v35  ;;  %v2312_v56 = vpop.permute.xlu1 %2311  ;;  %v16593_v35 = vpack.c.bf16 %v16950_v39, %v16949_v10 }
 0x540   :  { %15699 = vmatprep.mubr.msk.f32.mxu0 %vm1254_vm3, %v1427_v53 }
 0x541   :  { %15700 = vmatmul.mubr.msk.f32.vlgmr.msra.gmra.mrb[26].mxu0 %vm1254_vm3, %v1428_v40 }
 0x542   :  { %16574 = vmatpush3.bf16.xpose.msk.msra.mxu0 %vm18205_vm2, %v16569_v31  ;;  %15713 = vmatprep.mubr.msk.f32.mxu0 %vm531_vm1, %v2128_v61  ;;  %v16953_v11 = vpop.permute.xlu1 %16952  ;;  %v2494_v61 = vpop.permute.xlu0 %2493 }
 0x543   :  { %16583 = vmatprep.subr.msk.bf16.mxu0 %vm18205_vm2, %v16581_v18  ;;  %v16955_v31 = vunpack.i.h.bf16 %v16953_v11  ;;  %v16954_v24 = vunpack.i.l.bf16 %v16953_v11 }
 0x545   :  { %v16605_v54 = vpack.c.bf16 %v16955_v31, %v16954_v24 }
 0x546   :  { %v2676_v1 = vpop.permute.xlu0 %2675  ;;  %v2674_v22 = vpop.permute.xlu1 %2673 }
 0x549   :  { %15714 = vmatmul.mubr.msk.f32.vlgmr.msra.gmra.mrb[28].mxu0 %vm531_vm1, %v2130_v38 }
 0x54a   :  { %16586 = vmatpush3.bf16.xpose.msk.msra.mxu0 %vm18205_vm2, %v16581_v18  ;;  %15727 = vmatprep.mubr.msk.f32.mxu0 %vm531_vm1, %v2310_v48 }
 0x54b   :  { %16595 = vmatprep.subr.msk.bf16.mxu0 %vm18205_vm2, %v16593_v35 }
 0x551   :  { %15728 = vmatmul.mubr.msk.f32.vlgmr.msra.gmra.mrb[30].mxu0 %vm531_vm1, %v2312_v56 }
 0x552   :  { %16598 = vmatpush3.bf16.xpose.msk.msra.mxu0 %vm18205_vm2, %v16593_v35  ;;  %15741 = vmatprep.mubr.msk.f32.mxu0 %vm531_vm1, %v2492_v47 }
 0x553   :  { %16607 = vmatprep.subr.msk.bf16.mxu0 %vm18205_vm2, %v16605_v54 }
 0x559   :  { %15742 = vmatmul.mubr.msk.f32.vlgmr.msra.gmra.mrb[32].mxu0 %vm531_vm1, %v2494_v61 }
 0x55a   :  { %16610 = vmatpush3.bf16.xpose.msk.msra.mxu0 %vm18205_vm2, %v16605_v54  ;;  %15755 = vmatprep.mubr.msk.f32.mxu0 %vm531_vm1, %v2674_v22  ;;  %v1260_v2 = vpop.xlane.xlu0 %1259 }
 0x55b   :  { %v1304_v38 = vsub.f32 %v18350_v4, %v1260_v2 }
 0x55d   :  { %v1321_v7 = vmul.f32 1.442695, %v1304_v38 }
 0x55e   :  { %v1263_v18 = vpop.xlane.xlu0 %1262 }
 0x55f   :  { %17265 = vpow2.f32 %v1321_v7  ;;  %v1305_v56 = vsub.f32 %v18353_v51, %v1263_v18 }
 0x561   :  { %15756 = vmatmul.mubr.msk.f32.vlgmr.msra.gmra.mrb[34].mxu0 %vm531_vm1, %v2676_v1  ;;  %v1323_v35 = vmul.f32 1.442695, %v1305_v56 }
 0x562   :  { %v1275_v48 = vpop.xlane.xlu0 %1274 }
 0x563   :  { %v1309_v4 = vsub.f32 %v18358_v27, %v1275_v48 }
 0x565   :  { %v1331_v61 = vmul.f32 1.442695, %v1309_v4 }
 0x566   :  { %v1287_v11 = vpop.xlane.xlu0 %1286 }
 0x567   :  { %v1313_v54 = vsub.f32 %v18363_v43, %v1287_v11 }
 0x569   :  { %v18436_v53 = vpop.eup %17265 }
 0x56a   :  { %v1354_v40 = vsel %vm1254_vm3, %v18436_v53, 0.0 }
 0x56b   :  { %1355 = vadd.xlane.f32.xlu1 %v1354_v40 }
 0x577   :  { %v1257_v39 = vpop.xlane.xlu1 %1256 }
 0x578   :  { %v1303_v10 = vsub.f32 %v18379_v19, %v1257_v39  ;;  %v1339_v19 = vmul.f32 1.442695, %v1313_v54 }
 0x57a   :  { %v1319_v47 = vmul.f32 1.442695, %v1303_v10 }
 0x57b   :  { %v1266_v31 = vpop.xlane.xlu1 %1265 }
 0x57c   :  { %17267 = vpow2.f32 %v1319_v47  ;;  %v1306_v24 = vsub.f32 %v18382_v14, %v1266_v31 }
 0x57d   :  { %17269 = vpow2.f32 %v1323_v35 }
 0x57e   :  { %v1325_v1 = vmul.f32 1.442695, %v1306_v24 }
 0x57f   :  { %v1278_v22 = vpop.xlane.xlu1 %1277 }
 0x580   :  { %17271 = vpow2.f32 %v1325_v1  ;;  %v1310_v51 = vsub.f32 %v18387_v21, %v1278_v22  ;;  %v1299_v1 = vpop.xlane.xlu0 %1298 }
 0x581   :  { %17273 = vpow2.f32 %v1331_v61  ;;  %v1317_v22 = vsub.f32 %v18372_v57, %v1299_v1 }
 0x582   :  { %v1333_v2 = vmul.f32 1.442695, %v1310_v51 }
 0x583   :  { %v1290_v38 = vpop.xlane.xlu1 %1289 }
 0x584   :  { %17275 = vpow2.f32 %v1333_v2  ;;  %v1314_v27 = vsub.f32 %v18392_v32, %v1290_v38 }
 0x585   :  { %17277 = vpow2.f32 %v1339_v19  ;;  %v1347_v19 = vmul.f32 1.442695, %v1317_v22 }
 0x586   :  { %v18447_v7 = vpop.eup %17267  ;;  %v1341_v14 = vmul.f32 1.442695, %v1314_v27 }
 0x587   :  { %v1351_v40 = vsel %vm1254_vm3, %v18447_v7, 0.0  ;;  %v18451_v43 = vpop.eup %17269  ;;  %v1302_v61 = vpop.xlane.xlu1 %1301 }
 0x588   :  { %17279 = vpow2.f32 %v1341_v14  ;;  %1352 = vadd.xlane.f32.xlu0 %v1351_v40  ;;  %v1357_v21 = vsel %vm1254_vm3, %v18451_v43, 0.0  ;;  %v1318_v54 = vsub.f32 %v18397_v5, %v1302_v61 }
 0x58a   :  { %v18453_v18 = vpop.eup %17271  ;;  %v1349_v51 = vmul.f32 1.442695, %v1318_v54 }
 0x58b   :  { %v1360_v48 = vsel %vm1254_vm3, %v18453_v18, 0.0  ;;  %v18459_v32 = vpop.eup %17273 }
 0x58c   :  { %1358 = vadd.xlane.f32.xlu0 %v1357_v21  ;;  %1361 = vadd.xlane.f32.xlu1 %v1360_v48  ;;  %v1369_v39 = vsel %vm1254_vm3, %v18459_v32, 0.0  ;;  %17281 = vpow2.f32 %v1349_v51 }
 0x58d   :  { %17283 = vpow2.f32 %v1347_v19 }
 0x58e   :  { %v18461_v56 = vpop.eup %17275 }
 0x58f   :  { %v1372_v10 = vsel %vm1254_vm3, %v18461_v56, 0.0  ;;  %v18467_v35 = vpop.eup %17277 }
 0x590   :  { %1370 = vadd.xlane.f32.xlu0 %v1369_v39  ;;  %1373 = vadd.xlane.f32.xlu1 %v1372_v10  ;;  %v1381_v47 = vsel %vm1254_vm3, %v18467_v35, 0.0 }
 0x592   :  { %v18469_v4 = vpop.eup %17279 }
 0x593   :  { %v1384_v11 = vsel %vm1254_vm3, %v18469_v4, 0.0 }
 0x594   :  { %1382 = vadd.xlane.f32.xlu0 %v1381_v47  ;;  %1385 = vadd.xlane.f32.xlu1 %v1384_v11 }
 0x596   :  { %v18499_v5 = vpop.eup %17281 }
 0x597   :  { %v1396_v57 = vsel %vm1254_vm3, %v18499_v5, 0.0  ;;  %v18505_v2 = vpop.eup %17283 }
 0x598   :  { %v1393_v38 = vsel %vm1254_vm3, %v18505_v2, 0.0 }
 0x5a5   :  { %16957 = vrot.lane.b32.xlu1 %v18037_v30, %s17781_s17 }
 0x5a9   :  { %16967 = vrot.lane.b32.xlu1 %v18105_v55, %s17781_s17 }
 0x5aa   :  { %v18479_v31 = vpop.f32.mrb[22].mxu0  ;;  %16962 = vrot.lane.b32.xlu0 %v18057_v37, %s17781_s17 }
 0x5ab   :  { %21743 = vst [vmem:[#allocation29_spill] sm:$0xff] %v18479_v31  ;;  %v18483_v24 = vpop.f32.mrb[23].mxu0 }
 0x5ac   :  { %21744 = vst [vmem:[#allocation30_spill] sm:$0xff] %v18483_v24 }
 0x5ad   :  { %16972 = vrot.lane.b32.xlu1 %v18149_v9, %s17781_s17 }
 0x5b1   :  { %16977 = vrot.lane.b32.xlu1 %v18193_v8, %s17781_s17 }
 0x5b5   :  { %16987 = vrot.lane.b32.xlu1 %v18105_v55, %s17782_s18 }
 0x5b9   :  { %2220 = vrot.lane.b32.xlu1 %v18053_v36, %s17783_s19 }
 0x5bd   :  { %2400 = vrot.lane.b32.xlu1 %v18091_v49, %s17783_s19 }
 0x5c1   :  { %2582 = vrot.lane.b32.xlu1 %v18135_v3, %s17783_s19 }
 0x5c5   :  { %2584 = vrot.lane.b32.xlu1 %v18143_v6, %s17783_s19 }
 0x5c9   :  { %2766 = vrot.lane.b32.xlu1 %v18187_v23, %s17783_s19  ;;  %1397 = vadd.xlane.f32.xlu0 %v1396_v57 }
 0x5cd   :  { %1394 = vadd.xlane.f32.xlu0 %v1393_v38 }
 0x5df   :  { %v18511_v27 = vpop.f32.mrb[24].mxu0 }
 0x5e0   :  { %21745 = vst [vmem:[#allocation31_spill] sm:$0xff] %v18511_v27  ;;  %v18513_v14 = vpop.f32.mrb[25].mxu0 }
 0x5e1   :  { %21746 = vst [vmem:[#allocation32_spill] sm:$0xff] %v18513_v14 }
 0x5e3   :  { %16982 = vrot.lane.b32.xlu0 %v18057_v37, %s17782_s18 }
 0x5e7   :  { %2218 = vrot.lane.b32.xlu0 %v18047_v33, %s17783_s19 }
 0x5eb   :  { %16992 = vrot.lane.b32.xlu0 %v18149_v9, %s17782_s18 }
 0x5ef   :  { %2402 = vrot.lane.b32.xlu0 %v18099_v52, %s17783_s19 }
 0x5f3   :  { %16997 = vrot.lane.b32.xlu0 %v18193_v8, %s17782_s18 }
 0x5f7   :  { %2764 = vrot.lane.b32.xlu0 %v18179_v20, %s17783_s19 }
 0x5f8   :  { %v1356_v40 = vpop.xlane.xlu1 %1355 }
 0x614   :  { %v18527_v21 = vpop.f32.mrb[26].mxu0 }
 0x615   :  { %21747 = vst [vmem:[#allocation33_spill] sm:$0xff] %v18527_v21  ;;  %v1353_v48 = vpop.xlane.xlu0 %1352  ;;  %v18529_v39 = vpop.f32.mrb[27].mxu0 }
 0x616   :  { %21748 = vst [vmem:[#allocation34_spill] sm:$0xff] %v18529_v39  ;;  %17285 = vrcp.f32 %v1353_v48 }
 0x617   :  { %17287 = vrcp.f32 %v1356_v40 }
 0x619   :  { %v1359_v10 = vpop.xlane.xlu0 %1358  ;;  %v1362_v47 = vpop.xlane.xlu1 %1361 }
 0x61a   :  { %17289 = vrcp.f32 %v1359_v10 }
 0x61b   :  { %17291 = vrcp.f32 %v1362_v47 }
 0x61c   :  { %v15715_v11 = vpop.f32.mrb[28].mxu0 }
 0x61d   :  { %v18531_v61 = vmul.f32 0.35355338, %v15715_v11  ;;  %v2209_v54 = vpop.f32.mrb[29].mxu0  ;;  %v1371_v1 = vpop.xlane.xlu0 %1370 }
 0x61e   :  { %v18533_v22 = vmul.f32 0.35355338, %v2209_v54  ;;  %v1374_v51 = vpop.xlane.xlu1 %1373  ;;  %17293 = vrcp.f32 %v1371_v1 }
 0x61f   :  { %v2874_v19 = vsel %vm1254_vm3, %v18531_v61, -inf  ;;  %17295 = vrcp.f32 %v1374_v51 }
 0x620   :  { %v17286_v57 = vpop.eup %17285  ;;  %2875 = vmax.xlane.f32.xlu1 %v2874_v19  ;;  %v2871_v38 = vsel %vm1254_vm3, %v18533_v22, -inf }
 0x621   :  { %2872 = vmax.xlane.f32.xlu0 %v2871_v38  ;;  %v1383_v48 = vpop.xlane.xlu0 %1382  ;;  %v1415_v11 = vmul.f32 %v17286_v57, %v18447_v7  ;;  %v17288_v57 = vpop.eup %17287 }
 0x622   :  { %v1386_v39 = vpop.xlane.xlu1 %1385  ;;  %17297 = vrcp.f32 %v1383_v48 }
 0x623   :  { %15657 = vmatprep.mubr.msk.f32.mxu1 %vm1254_vm3, %v1415_v11  ;;  %17299 = vrcp.f32 %v1386_v39 }
 0x624   :  { %v15729_v54 = vpop.f32.mrb[30].mxu0  ;;  %v17290_v38 = vpop.eup %17289 }
 0x625   :  { %v2391_v21 = vpop.f32.mrb[31].mxu0  ;;  %v16963_v8 = vpop.permute.xlu0 %16962  ;;  %v18543_v10 = vmul.f32 0.35355338, %v15729_v54 }
 0x626   :  { %v18541_v9 = vmul.f32 0.35355338, %v2391_v21  ;;  %v16958_v40 = vpop.permute.xlu1 %16957  ;;  %v16965_v19 = vunpack.i.h.bf16 %v16963_v8  ;;  %v16964_v37 = vunpack.i.l.bf16 %v16963_v8 }
 0x627   :  { %v16960_v55 = vunpack.i.h.bf16 %v16958_v40  ;;  %v16959_v14 = vunpack.i.l.bf16 %v16958_v40  ;;  %v2886_v51 = vsel %vm1254_vm3, %v18543_v10, -inf }
 0x628   :  { %v2883_v7 = vsel %vm1254_vm3, %v18541_v9, -inf  ;;  %v16541_v27 = vpack.c.bf16 %v16965_v19, %v16964_v37 }
 0x629   :  { %2884 = vmax.xlane.f32.xlu0 %v2883_v7  ;;  %v16537_v47 = vpack.c.bf16 %v16960_v55, %v16959_v14  ;;  %v1416_v55 = vmul.f32 %v17288_v57, %v18436_v53  ;;  %v17292_v14 = vpop.eup %17291 }
 0x62a   :  { %v16968_v1 = vpop.permute.xlu1 %16967  ;;  %v17294_v37 = vpop.eup %17293  ;;  %v1418_v57 = vmul.f32 %v17292_v14, %v18453_v18 }
 0x62b   :  { %v16970_v11 = vunpack.i.h.bf16 %v16968_v1  ;;  %v16969_v21 = vunpack.i.l.bf16 %v16968_v1  ;;  %16538 = vmatprep.subr.bf16.mxu1 %v16537_v47  ;;  %v1417_v1 = vmul.f32 %v17290_v38, %v18451_v43  ;;  %v17296_v43 = vpop.eup %17295 }
 0x62c   :  { %16540 = vmatpush3.bf16.msra.mxu1 %v16537_v47  ;;  %v15743_v8 = vpop.f32.mrb[32].mxu0  ;;  %v1422_v18 = vmul.f32 %v17296_v43, %v18461_v56  ;;  %v21749_v56 = vpack.i.bf16 %v18025_v26, %v18023_v25  ;;  %v21753_v26 = vpack.i.bf16 %v18033_v29, %v18031_v28 }
 0x62d   :  { %v18549_v54 = vmul.f32 0.35355338, %v15743_v8  ;;  %16542 = vmatprep.subr.bf16.mxu1 %v16541_v27  ;;  %2887 = vmax.xlane.f32.xlu0 %v2886_v51  ;;  %v2573_v48 = vpop.f32.mrb[33].mxu0  ;;  %v16549_v47 = vpack.c.bf16 %v16970_v11, %v16969_v21  ;;  %v1421_v51 = vmul.f32 %v17294_v37, %v18459_v32 }
 0x62e   :  { %v18552_v40 = vmul.f32 0.35355338, %v2573_v48  ;;  %v16973_v7 = vpop.permute.xlu1 %16972  ;;  %v17298_v48 = vpop.eup %17297 }
 0x62f   :  { %v16975_v39 = vunpack.i.h.bf16 %v16973_v7  ;;  %v16974_v19 = vunpack.i.l.bf16 %v16973_v7  ;;  %15658 = vmatmul.mubr.msk.f32.vlgmr.msra.gmra.mrb[42].mxu1 %vm1254_vm3, %v1416_v55  ;;  %v2898_v8 = vsel %vm1254_vm3, %v18549_v54, -inf  ;;  %v17300_v14 = vpop.eup %17299 }
 0x630   :  { %16544 = vmatpush3.bf16.msra.mxu1 %v16541_v27  ;;  %15664 = vmatprep.mubr.msk.f32.mxu1 %vm1254_vm3, %v1417_v1  ;;  %v2895_v53 = vsel %vm1254_vm3, %v18552_v40, -inf }
 0x631   :  { %16550 = vmatprep.subr.bf16.mxu1 %v16549_v47  ;;  %2899 = vmax.xlane.f32.xlu0 %v2898_v8  ;;  %v16557_v27 = vpack.c.bf16 %v16975_v39, %v16974_v19  ;;  %v1425_v8 = vmul.f32 %v17298_v48, %v18467_v35  ;;  %v1426_v39 = vmul.f32 %v17300_v14, %v18469_v4 }
 0x632   :  { %2896 = vmax.xlane.f32.xlu1 %v2895_v53  ;;  %v16978_v38 = vpop.permute.xlu1 %16977  ;;  %v21750_v35 = vpack.i.bf16 %v18071_v42, %v18069_v41  ;;  %v21751_v19 = vpack.i.bf16 %v18081_v46, %v18075_v44  ;;  %v21752_v4 = vpack.i.bf16 %v18121_v63, %v18119_v62  ;;  %v21754_v42 = vpack.i.bf16 %v18165_v16, %v18163_v15 }
 0x633   :  { %v16980_v11 = vunpack.i.h.bf16 %v16978_v38  ;;  %v16979_v21 = vunpack.i.l.bf16 %v16978_v38  ;;  %15665 = vmatmul.mubr.msk.f32.vlgmr.msra.gmra.mrb[44].mxu1 %vm1254_vm3, %v1418_v57  ;;  %v21755_v46 = vpack.i.bf16 %v18115_v60, %v18113_v59  ;;  %v21756_v63 = vpack.i.bf16 %v18159_v13, %v18157_v12 }
 0x634   :  { %16552 = vmatpush3.bf16.msra.mxu1 %v16549_v47  ;;  %15678 = vmatprep.mubr.msk.f32.mxu1 %vm1254_vm3, %v1421_v51  ;;  %v15757_v55 = vpop.f32.mrb[34].mxu0 }
 0x635   :  { %v18565_v7 = vmul.f32 0.35355338, %v15757_v55  ;;  %16558 = vmatprep.subr.bf16.mxu1 %v16557_v27  ;;  %v2755_v1 = vpop.f32.mrb[35].mxu0  ;;  %v16565_v37 = vpack.c.bf16 %v16980_v11, %v16979_v21 }
 0x636   :  { %v16988_v16 = vpop.permute.xlu1 %16987 }
 0x637   :  { %15679 = vmatmul.mubr.msk.f32.vlgmr.msra.gmra.mrb[46].mxu1 %vm1254_vm3, %v1422_v18  ;;  %v2910_v32 = vsel %vm1254_vm3, %v18565_v7, -inf  ;;  %v16990_v11 = vunpack.i.h.bf16 %v16988_v16  ;;  %v16989_v21 = vunpack.i.l.bf16 %v16988_v16 }
 0x638   :  { %16560 = vmatpush3.bf16.msra.mxu1 %v16557_v27  ;;  %15692 = vmatprep.mubr.msk.f32.mxu1 %vm1254_vm3, %v1425_v8 }
 0x639   :  { %2911 = vmax.xlane.f32.xlu0 %v2910_v32  ;;  %16566 = vmatprep.subr.bf16.mxu1 %v16565_v37  ;;  %v16587_v18 = vpack.c.bf16 %v16990_v11, %v16989_v21 }
 0x63a   :  { %v2221_v14 = vpop.permute.xlu1 %2220 }
 0x63b   :  { %15693 = vmatmul.mubr.msk.f32.vlgmr.msra.gmra.mrb[48].mxu1 %vm1254_vm3, %v1426_v39 }
 0x63c   :  { %16568 = vmatpush3.bf16.msra.mxu1 %v16565_v37 }
 0x643   :  { %17002 = vrot.lane.b32.xlu1 %v21749_v56, %s17784_s20 }
 0x647   :  { %17012 = vrot.lane.b32.xlu1 %v21750_v35, %s17784_s20 }
 0x64b   :  { %17017 = vrot.lane.b32.xlu1 %v21751_v19, %s17784_s20 }
 0x64f   :  { %17027 = vrot.lane.b32.xlu1 %v21752_v4, %s17784_s20  ;;  %17007 = vrot.lane.b32.xlu0 %v21753_v26, %s17784_s20 }
 0x653   :  { %17037 = vrot.lane.b32.xlu1 %v21754_v42, %s17784_s20  ;;  %17022 = vrot.lane.b32.xlu0 %v21755_v46, %s17784_s20 }
 0x656   :  { %v1398_v47 = vpop.xlane.xlu0 %1397 }
 0x657   :  { %17032 = vrot.lane.b32.xlu0 %v21756_v63, %s17784_s20  ;;  %17301 = vrcp.f32 %v1398_v47 }
 0x65a   :  { %v1395_v53 = vpop.xlane.xlu0 %1394 }
 0x65b   :  { %17303 = vrcp.f32 %v1395_v53 }
 0x65e   :  { %v16983_v29 = vpop.permute.xlu0 %16982 }
 0x65f   :  { %v16985_v57 = vunpack.i.h.bf16 %v16983_v29  ;;  %v16984_v43 = vunpack.i.l.bf16 %v16983_v29 }
 0x661   :  { %v16575_v38 = vpack.c.bf16 %v16985_v57, %v16984_v43  ;;  %v17302_v60 = vpop.eup %17301 }
 0x662   :  { %v2219_v51 = vpop.permute.xlu0 %2218  ;;  %v1430_v55 = vmul.f32 %v17302_v60, %v18499_v5  ;;  %v18619_v5 = vmul.f32 0.35355338, %v2755_v1 }
 0x663   :  { %16577 = vmatprep.subr.msk.bf16.mxu1 %vm18205_vm2, %v16575_v38 }
 0x664   :  { %v2907_v4 = vsel %vm1254_vm3, %v18619_v5, -inf }
 0x665   :  { %v17304_v48 = vpop.eup %17303 }
 0x666   :  { %v16993_v27 = vpop.permute.xlu0 %16992  ;;  %v1429_v13 = vmul.f32 %v17304_v48, %v18505_v2  ;;  %v2401_v2 = vpop.permute.xlu1 %2400 }
 0x667   :  { %v16995_v32 = vunpack.i.h.bf16 %v16993_v27  ;;  %v16994_v37 = vunpack.i.l.bf16 %v16993_v27 }
 0x668   :  { %15706 = vmatprep.mubr.msk.f32.mxu1 %vm1254_vm3, %v1429_v13 }
 0x669   :  { %15707 = vmatmul.mubr.msk.f32.vlgmr.msra.gmra.mrb[50].mxu1 %vm1254_vm3, %v1430_v55  ;;  %v16599_v39 = vpack.c.bf16 %v16995_v32, %v16994_v37 }
 0x66a   :  { %16580 = vmatpush3.bf16.xpose.msk.msra.mxu1 %vm18205_vm2, %v16575_v38  ;;  %15720 = vmatprep.mubr.msk.f32.mxu1 %vm531_vm1, %v2219_v51  ;;  %v2403_v8 = vpop.permute.xlu0 %2402  ;;  %v2583_v26 = vpop.permute.xlu1 %2582 }
 0x66b   :  { %16589 = vmatprep.subr.msk.bf16.mxu1 %vm18205_vm2, %v16587_v18 }
 0x66e   :  { %v16998_v56 = vpop.permute.xlu0 %16997  ;;  %v2585_v1 = vpop.permute.xlu1 %2584 }
 0x66f   :  { %v17000_v35 = vunpack.i.h.bf16 %v16998_v56  ;;  %v16999_v19 = vunpack.i.l.bf16 %v16998_v56 }
 0x671   :  { %15721 = vmatmul.mubr.msk.f32.vlgmr.msra.gmra.mrb[52].mxu1 %vm531_vm1, %v2221_v14  ;;  %v16611_v42 = vpack.c.bf16 %v17000_v35, %v16999_v19 }
 0x672   :  { %16592 = vmatpush3.bf16.xpose.msk.msra.mxu1 %vm18205_vm2, %v16587_v18  ;;  %15734 = vmatprep.mubr.msk.f32.mxu1 %vm531_vm1, %v2401_v2  ;;  %v2765_v46 = vpop.permute.xlu0 %2764  ;;  %v2767_v47 = vpop.permute.xlu1 %2766 }
 0x673   :  { %16601 = vmatprep.subr.msk.bf16.mxu1 %vm18205_vm2, %v16599_v39 }
 0x677   :  { %2908 = vmax.xlane.f32.xlu1 %v2907_v4 }
 0x679   :  { %15735 = vmatmul.mubr.msk.f32.vlgmr.msra.gmra.mrb[54].mxu1 %vm531_vm1, %v2403_v8 }
 0x67a   :  { %16604 = vmatpush3.bf16.xpose.msk.msra.mxu1 %vm18205_vm2, %v16599_v39  ;;  %15748 = vmatprep.mubr.msk.f32.mxu1 %vm531_vm1, %v2583_v26 }
 0x67b   :  { %16613 = vmatprep.subr.msk.bf16.mxu1 %vm18205_vm2, %v16611_v42 }
 0x681   :  { %15749 = vmatmul.mubr.msk.f32.vlgmr.msra.gmra.mrb[56].mxu1 %vm531_vm1, %v2585_v1 }
 0x682   :  { %16616 = vmatpush3.bf16.xpose.msk.msra.mxu1 %vm18205_vm2, %v16611_v42  ;;  %15762 = vmatprep.mubr.msk.f32.mxu1 %vm531_vm1, %v2765_v46 }
 0x689   :  { %15763 = vmatmul.mubr.msk.f32.vlgmr.msra.gmra.mrb[58].mxu1 %vm531_vm1, %v2767_v47 }
 0x6ad   :  { %v2876_v63 = vpop.xlane.xlu1 %2875 }
 0x6ae   :  { %v2920_v53 = vsub.f32 %v18531_v61, %v2876_v63  ;;  %v2873_v29 = vpop.xlane.xlu0 %2872 }
 0x6af   :  { %v2919_v57 = vsub.f32 %v18533_v22, %v2873_v29 }
 0x6b0   :  { %v2937_v43 = vmul.f32 1.442695, %v2920_v53 }
 0x6b1   :  { %v2935_v38 = vmul.f32 1.442695, %v2919_v57 }
 0x6b2   :  { %17305 = vpow2.f32 %v2937_v43 }
 0x6b3   :  { %17307 = vpow2.f32 %v2935_v38 }
 0x6b6   :  { %v2885_v16 = vpop.xlane.xlu0 %2884 }
 0x6b7   :  { %v2923_v51 = vsub.f32 %v18541_v9, %v2885_v16 }
 0x6b9   :  { %v2943_v60 = vmul.f32 1.442695, %v2923_v51 }
 0x6ba   :  { %v2888_v48 = vpop.xlane.xlu0 %2887 }
 0x6bb   :  { %17309 = vpow2.f32 %v2943_v60  ;;  %v2924_v11 = vsub.f32 %v18543_v10, %v2888_v48 }
 0x6bc   :  { %v18643_v21 = vpop.eup %17305 }
 0x6bd   :  { %v18645_v27 = vpop.eup %17307  ;;  %v2945_v61 = vmul.f32 1.442695, %v2924_v11  ;;  %v2970_v22 = vsel %vm1254_vm3, %v18643_v21, 0.0 }
 0x6be   :  { %v2900_v13 = vpop.xlane.xlu0 %2899  ;;  %2971 = vadd.xlane.f32.xlu0 %v2970_v22  ;;  %v2967_v55 = vsel %vm1254_vm3, %v18645_v27, 0.0 }
 0x6bf   :  { %17311 = vpow2.f32 %v2945_v61  ;;  %v2928_v9 = vsub.f32 %v18549_v54, %v2900_v13  ;;  %v2897_v18 = vpop.xlane.xlu1 %2896  ;;  %2968 = vadd.xlane.f32.xlu1 %v2967_v55 }
 0x6c0   :  { %v2927_v10 = vsub.f32 %v18552_v40, %v2897_v18 }
 0x6c1   :  { %v2953_v14 = vmul.f32 1.442695, %v2928_v9 }
 0x6c2   :  { %v2951_v8 = vmul.f32 1.442695, %v2927_v10 }
 0x6c3   :  { %17313 = vpow2.f32 %v2953_v14  ;;  %v17003_v32 = vpop.permute.xlu1 %17002 }
 0x6c4   :  { %17315 = vpow2.f32 %v2951_v8  ;;  %v17005_v19 = vunpack.i.h.bf16 %v17003_v32  ;;  %v17004_v4 = vunpack.i.l.bf16 %v17003_v32 }
 0x6c5   :  { %v18653_v37 = vpop.eup %17309 }
 0x6c6   :  { %v2912_v2 = vpop.xlane.xlu0 %2911  ;;  %v2979_v39 = vsel %vm1254_vm3, %v18653_v37, 0.0  ;;  %v3058_v43 = vsel %vm3057_vm4, %v17004_v4, %v17005_v19 }
 0x6c7   :  { %v2932_v56 = vsub.f32 %v18565_v7, %v2912_v2  ;;  %v17013_v35 = vpop.permute.xlu1 %17012  ;;  %2980 = vadd.xlane.f32.xlu1 %v2979_v39 }
 0x6c8   :  { %v17015_v26 = vunpack.i.h.bf16 %v17013_v35  ;;  %v17014_v42 = vunpack.i.l.bf16 %v17013_v35 }
 0x6c9   :  { %v18658_v54 = vpop.eup %17311  ;;  %v2961_v40 = vmul.f32 1.442695, %v2932_v56 }
 0x6ca   :  { %v17008_v1 = vpop.permute.xlu0 %17007  ;;  %v2982_v46 = vsel %vm1254_vm3, %v18658_v54, 0.0  ;;  %v3248_v48 = vsel %vm3057_vm4, %v17014_v42, %v17015_v26 }
 0x6cb   :  { %17317 = vpow2.f32 %v2961_v40  ;;  %v17010_v47 = vunpack.i.h.bf16 %v17008_v1  ;;  %v17009_v63 = vunpack.i.l.bf16 %v17008_v1  ;;  %v17018_v53 = vpop.permute.xlu1 %17017  ;;  %2983 = vadd.xlane.f32.xlu0 %v2982_v46 }
 0x6cc   :  { %v17020_v7 = vunpack.i.h.bf16 %v17018_v53  ;;  %v17019_v29 = vunpack.i.l.bf16 %v17018_v53 }
 0x6cd   :  { %v18662_v57 = vpop.eup %17313  ;;  %v3059_v38 = vsel %vm3057_vm4, %v17009_v63, %v17010_v47 }
 0x6ce   :  { %v18666_v16 = vpop.eup %17315  ;;  %v2994_v51 = vsel %vm1254_vm3, %v18662_v57, 0.0  ;;  %v16617_v60 = vpack.c.bf16 %v3059_v38, %v3058_v43  ;;  %v3249_v11 = vsel %vm3057_vm4, %v17019_v29, %v17020_v7  ;;  %v17023_v46 = vpop.permute.xlu0 %17022 }
 0x6cf   :  { %2995 = vadd.xlane.f32.xlu0 %v2994_v51  ;;  %v2991_v61 = vsel %vm1254_vm3, %v18666_v16, 0.0  ;;  %v18674_v22 = vpack.c.bf16 %v3249_v11, %v3248_v48  ;;  %v18699_v9 = vpop.permute.xlu1 %17027 }
 0x6d0   :  { %16618 = vmatprep.subr.bf16.mxu0 %v16617_v60  ;;  %2992 = vadd.xlane.f32.xlu1 %v2991_v61 }
 0x6d1   :  { %16620 = vmatpush3.bf16.msra.mxu0 %v16617_v60 }
 0x6d2   :  { %16626 = vmatprep.subr.bf16.mxu0 %v18674_v22  ;;  %v18738_v29 = vpop.permute.xlu0 %17032 }
 0x6d3   :  { %v18703_v18 = vpop.permute.xlu1 %17037 }
 0x6d5   :  { %v18677_v13 = vpop.eup %17317 }
 0x6d6   :  { %v3006_v55 = vsel %vm1254_vm3, %v18677_v13, 0.0 }
 0x6d7   :  { %3007 = vadd.xlane.f32.xlu0 %v3006_v55 }
 0x6e1   :  { %17047 = vrot.lane.b32.xlu1 %v18079_v45, %s17785_s21 }
 0x6e5   :  { %3826 = vrot.lane.b32.xlu1 %v18031_v28, %s17786_s22 }
 0x6e9   :  { %4006 = vrot.lane.b32.xlu1 %v18069_v41, %s17786_s22 }
 0x6ed   :  { %17042 = vrot.lane.b32.xlu0 %v18037_v30, %s17785_s21  ;;  %4188 = vrot.lane.b32.xlu1 %v18113_v59, %s17786_s22 }
 0x6f1   :  { %3824 = vrot.lane.b32.xlu0 %v18023_v25, %s17786_s22  ;;  %4190 = vrot.lane.b32.xlu1 %v18119_v62, %s17786_s22 }
 0x6f5   :  { %17052 = vrot.lane.b32.xlu0 %v18125_v0, %s17785_s21 }
 0x6f9   :  { %4008 = vrot.lane.b32.xlu0 %v18075_v44, %s17786_s22 }
 0x6fd   :  { %17057 = vrot.lane.b32.xlu0 %v18169_v17, %s17785_s21 }
 0x701   :  { %4370 = vrot.lane.b32.xlu0 %v18157_v12, %s17786_s22 }
 0x702   :  { %v18707_v10 = vpop.f32.mrb[42].mxu1 }
 0x703   :  { %21757 = vst [vmem:[#allocation35_spill] sm:$0xff] %v18707_v10  ;;  %v18709_v14 = vpop.f32.mrb[43].mxu1 }
 0x704   :  { %21758 = vst [vmem:[#allocation36_spill] sm:$0xff] %v18709_v14  ;;  %v2909_v8 = vpop.xlane.xlu1 %2908 }
 0x705   :  { %v2931_v32 = vsub.f32 %v18619_v5, %v2909_v8 }
 0x706   :  { %v18712_v2 = vpop.f32.mrb[44].mxu1 }
 0x707   :  { %21759 = vst [vmem:[#allocation37_spill] sm:$0xff] %v18712_v2  ;;  %v2959_v39 = vmul.f32 1.442695, %v2931_v32  ;;  %v18714_v56 = vpop.f32.mrb[45].mxu1  ;;  %v17025_v32 = vunpack.i.h.bf16 %v17023_v46 }
 0x708   :  { %21760 = vst [vmem:[#allocation38_spill] sm:$0xff] %v18714_v56 }
 0x709   :  { %17319 = vpow2.f32 %v2959_v39  ;;  %v17024_v39 = vunpack.i.l.bf16 %v17023_v46 }
 0x70a   :  { %v18716_v35 = vpop.f32.mrb[46].mxu1 }
 0x70b   :  { %21761 = vst [vmem:[#allocation39_spill] sm:$0xff] %v18716_v35  ;;  %v18718_v19 = vpop.f32.mrb[47].mxu1 }
 0x70c   :  { %21762 = vst [vmem:[#allocation40_spill] sm:$0xff] %v18718_v19 }
 0x70e   :  { %v18720_v4 = vpop.f32.mrb[48].mxu1 }
 0x70f   :  { %21763 = vst [vmem:[#allocation41_spill] sm:$0xff] %v18720_v4  ;;  %v18722_v40 = vpop.f32.mrb[49].mxu1 }
 0x710   :  { %21764 = vst [vmem:[#allocation42_spill] sm:$0xff] %v18722_v40 }
 0x713   :  { %v18724_v26 = vpop.eup %17319 }
 0x714   :  { %v3003_v42 = vsel %vm1254_vm3, %v18724_v26, 0.0 }
 0x715   :  { %3004 = vadd.xlane.f32.xlu1 %v3003_v42  ;;  %v17030_v42 = vunpack.i.h.bf16 %v18699_v9 }
 0x726   :  { %4372 = vrot.lane.b32.xlu1 %v18163_v15, %s17786_s22  ;;  %v3438_v15 = vsel %vm3057_vm4, %v17024_v39, %v17025_v32 }
 0x73c   :  { %v18730_v5 = vpop.f32.mrb[50].mxu1 }
 0x73d   :  { %21765 = vst [vmem:[#allocation43_spill] sm:$0xff] %v18730_v5  ;;  %v18732_v1 = vpop.f32.mrb[51].mxu1 }
 0x73e   :  { %21766 = vst [vmem:[#allocation44_spill] sm:$0xff] %v18732_v1 }
 0x744   :  { %v15722_v47 = vpop.f32.mrb[52].mxu1 }
 0x745   :  { %v18734_v63 = vmul.f32 0.35355338, %v15722_v47  ;;  %v2300_v53 = vpop.f32.mrb[53].mxu1  ;;  %v17029_v47 = vunpack.i.l.bf16 %v18699_v9 }
 0x746   :  { %v18736_v7 = vmul.f32 0.35355338, %v2300_v53 }
 0x747   :  { %v2880_v43 = vsel %vm1254_vm3, %v18734_v63, -inf }
 0x748   :  { %v2877_v38 = vsel %vm1254_vm3, %v18736_v7, -inf }
 0x749   :  { %2878 = vmax.xlane.f32.xlu0 %v2877_v38 }
 0x74a   :  { %2881 = vmax.xlane.f32.xlu1 %v2880_v43 }
 0x74b   :  { %v2972_v51 = vpop.xlane.xlu0 %2971 }
 0x74c   :  { %17321 = vrcp.f32 %v2972_v51  ;;  %v15736_v60 = vpop.f32.mrb[54].mxu1  ;;  %v2969_v48 = vpop.xlane.xlu1 %2968 }
 0x74d   :  { %17323 = vrcp.f32 %v2969_v48  ;;  %v2482_v11 = vpop.f32.mrb[55].mxu1  ;;  %v18746_v55 = vmul.f32 0.35355338, %v15736_v60 }
 0x74e   :  { %v18744_v61 = vmul.f32 0.35355338, %v2482_v11 }
 0x74f   :  { %v2892_v38 = vsel %vm1254_vm3, %v18746_v55, -inf }
 0x750   :  { %v2889_v8 = vsel %vm1254_vm3, %v18744_v61, -inf }
 0x751   :  { %2890 = vmax.xlane.f32.xlu0 %v2889_v8 }
 0x754   :  { %v15750_v53 = vpop.f32.mrb[56].mxu1  ;;  %v2981_v43 = vpop.xlane.xlu1 %2980 }
 0x755   :  { %v18754_v51 = vmul.f32 0.35355338, %v15750_v53  ;;  %17325 = vrcp.f32 %v2981_v43  ;;  %v2664_v60 = vpop.f32.mrb[57].mxu1  ;;  %2893 = vmax.xlane.f32.xlu0 %v2892_v38  ;;  %v3439_v53 = vsel %vm3057_vm4, %v17029_v47, %v17030_v42 }
 0x756   :  { %v17322_v48 = vpop.eup %17321  ;;  %v18756_v11 = vmul.f32 0.35355338, %v2664_v60  ;;  %v16633_v38 = vpack.c.bf16 %v3439_v53, %v3438_v15  ;;  %v17040_v15 = vunpack.i.h.bf16 %v18703_v18 }
 0x757   :  { %v17324_v8 = vpop.eup %17323  ;;  %v2904_v46 = vsel %vm1254_vm3, %v18754_v51, -inf  ;;  %v3032_v43 = vmul.f32 %v17322_v48, %v18643_v21 }
 0x758   :  { %v2984_v1 = vpop.xlane.xlu0 %2983  ;;  %v2901_v9 = vsel %vm1254_vm3, %v18756_v11, -inf  ;;  %v3031_v5 = vmul.f32 %v17324_v8, %v18645_v27 }
 0x759   :  { %17327 = vrcp.f32 %v2984_v1  ;;  %2905 = vmax.xlane.f32.xlu0 %v2904_v46  ;;  %2902 = vmax.xlane.f32.xlu1 %v2901_v9  ;;  %v17035_v1 = vunpack.i.h.bf16 %v18738_v29 }
 0x75a   :  { %15769 = vmatprep.mubr.msk.f32.mxu0 %vm1254_vm3, %v3031_v5  ;;  %v17034_v5 = vunpack.i.l.bf16 %v18738_v29 }
 0x75b   :  { %15770 = vmatmul.mubr.msk.f32.vlgmr.msra.gmra.mrb[36].mxu0 %vm1254_vm3, %v3032_v43 }
 0x75c   :  { %16628 = vmatpush3.bf16.msra.mxu0 %v18674_v22  ;;  %v15764_v60 = vpop.f32.mrb[58].mxu1  ;;  %v2996_v62 = vpop.xlane.xlu0 %2995  ;;  %v17039_v22 = vunpack.i.l.bf16 %v18703_v18  ;;  %v3628_v8 = vsel %vm3057_vm4, %v17034_v5, %v17035_v1 }
 0x75d   :  { %v18769_v40 = vmul.f32 0.35355338, %v15764_v60  ;;  %17329 = vrcp.f32 %v2996_v62  ;;  %16634 = vmatprep.subr.bf16.mxu0 %v16633_v38  ;;  %v2993_v27 = vpop.xlane.xlu1 %2992  ;;  %v2846_v32 = vpop.f32.mrb[59].mxu1 }
 0x75e   :  { %17331 = vrcp.f32 %v2993_v27  ;;  %v18772_v39 = vmul.f32 0.35355338, %v2846_v32  ;;  %v3629_v29 = vsel %vm3057_vm4, %v17039_v22, %v17040_v15 }
 0x75f   :  { %v17326_v21 = vpop.eup %17325  ;;  %v2916_v42 = vsel %vm1254_vm3, %v18769_v40, -inf  ;;  %v16641_v9 = vpack.c.bf16 %v3629_v29, %v3628_v8 }
 0x760   :  { %2917 = vmax.xlane.f32.xlu0 %v2916_v42  ;;  %v2913_v62 = vsel %vm1254_vm3, %v18772_v39, -inf  ;;  %v3035_v47 = vmul.f32 %v17326_v21, %v18653_v37 }
 0x761   :  { %2914 = vmax.xlane.f32.xlu1 %v2913_v62 }
 0x762   :  { %15783 = vmatprep.mubr.msk.f32.mxu0 %vm1254_vm3, %v3035_v47 }
 0x763   :  { %v17328_v48 = vpop.eup %17327 }
 0x764   :  { %v3008_v46 = vpop.xlane.xlu0 %3007  ;;  %v3036_v18 = vmul.f32 %v17328_v48, %v18658_v54  ;;  %v17048_v54 = vpop.permute.xlu1 %17047 }
 0x765   :  { %17333 = vrcp.f32 %v3008_v46  ;;  %v17050_v47 = vunpack.i.h.bf16 %v17048_v54  ;;  %v17049_v48 = vunpack.i.l.bf16 %v17048_v54 }
 0x766   :  { %15784 = vmatmul.mubr.msk.f32.vlgmr.msra.gmra.mrb[38].mxu0 %vm1254_vm3, %v3036_v18 }
 0x767   :  { %v17330_v53 = vpop.eup %17329  ;;  %16636 = vmatpush3.bf16.msra.mxu0 %v16633_v38 }
 0x768   :  { %v17332_v43 = vpop.eup %17331  ;;  %v17043_v60 = vpop.permute.xlu0 %17042  ;;  %16642 = vmatprep.subr.bf16.mxu0 %v16641_v9  ;;  %v3040_v37 = vmul.f32 %v17330_v53, %v18662_v57 }
 0x769   :  { %v17045_v27 = vunpack.i.h.bf16 %v17043_v60  ;;  %v17044_v32 = vunpack.i.l.bf16 %v17043_v60  ;;  %v3039_v21 = vmul.f32 %v17332_v43, %v18666_v16  ;;  %v3827_v38 = vpop.permute.xlu1 %3826 }
 0x76b   :  { %v16649_v1 = vpack.c.bf16 %v17045_v27, %v17044_v32  ;;  %15797 = vmatprep.mubr.msk.f32.mxu0 %vm1254_vm3, %v3039_v21 }
 0x76c   :  { %15798 = vmatmul.mubr.msk.f32.vlgmr.msra.gmra.mrb[40].mxu0 %vm1254_vm3, %v3040_v37  ;;  %v3825_v42 = vpop.permute.xlu0 %3824 }
 0x76d   :  { %16644 = vmatpush3.bf16.msra.mxu0 %v16641_v9  ;;  %v4007_v5 = vpop.permute.xlu1 %4006  ;;  %v16661_v9 = vpack.c.bf16 %v17050_v47, %v17049_v48 }
 0x76e   :  { %16651 = vmatprep.subr.msk.bf16.mxu0 %vm18205_vm2, %v16649_v1 }
 0x76f   :  { %v17334_v62 = vpop.eup %17333 }
 0x770   :  { %v17053_v8 = vpop.permute.xlu0 %17052  ;;  %v3044_v18 = vmul.f32 %v17334_v62, %v18677_v13 }
 0x771   :  { %v4189_v15 = vpop.permute.xlu1 %4188  ;;  %v17055_v53 = vunpack.i.h.bf16 %v17053_v8  ;;  %v17054_v43 = vunpack.i.l.bf16 %v17053_v8 }
 0x773   :  { %v16673_v60 = vpack.c.bf16 %v17055_v53, %v17054_v43 }
 0x774   :  { %v4009_v46 = vpop.permute.xlu0 %4008 }
 0x775   :  { %v4191_v22 = vpop.permute.xlu1 %4190 }
 0x778   :  { %v17058_v13 = vpop.permute.xlu0 %17057 }
 0x779   :  { %v17059_v37 = vunpack.i.l.bf16 %v17058_v13 }
 0x77c   :  { %v4371_v32 = vpop.permute.xlu0 %4370 }
 0x7a2   :  { %v3005_v57 = vpop.xlane.xlu1 %3004 }
 0x7a3   :  { %17335 = vrcp.f32 %v3005_v57 }
 0x7a6   :  { %v4373_v21 = vpop.permute.xlu1 %4372 }
 0x7ad   :  { %v17336_v16 = vpop.eup %17335 }
 0x7ae   :  { %v3043_v29 = vmul.f32 %v17336_v16, %v18724_v26  ;;  %v17060_v26 = vunpack.i.h.bf16 %v17058_v13  ;;  %v21767_v13 = vpack.i.bf16 %v18049_v34, %v18047_v33 }
 0x7b0   :  { %15811 = vmatprep.mubr.msk.f32.mxu0 %vm1254_vm3, %v3043_v29  ;;  %v16685_v27 = vpack.c.bf16 %v17060_v26, %v17059_v37  ;;  %v21768_v26 = vpack.i.bf16 %v18093_v50, %v18091_v49  ;;  %v21769_v37 = vld [vmem:[#allocation11_spill] sm:$0xff] }
 0x7b1   :  { %15812 = vmatmul.mubr.msk.f32.vlgmr.msra.gmra.mrb[42].mxu0 %vm1254_vm3, %v3044_v18 }
 0x7b2   :  { %16654 = vmatpush3.bf16.xpose.msk.msra.mxu0 %vm18205_vm2, %v16649_v1  ;;  %15825 = vmatprep.mubr.msk.f32.mxu0 %vm531_vm1, %v3825_v42 }
 0x7b3   :  { %16663 = vmatprep.subr.msk.bf16.mxu0 %vm18205_vm2, %v16661_v9 }
 0x7b9   :  { %15826 = vmatmul.mubr.msk.f32.vlgmr.msra.gmra.mrb[44].mxu0 %vm531_vm1, %v3827_v38 }
 0x7ba   :  { %16666 = vmatpush3.bf16.xpose.msk.msra.mxu0 %vm18205_vm2, %v16661_v9  ;;  %15839 = vmatprep.mubr.msk.f32.mxu0 %vm531_vm1, %v4007_v5 }
 0x7bb   :  { %16675 = vmatprep.subr.msk.bf16.mxu0 %vm18205_vm2, %v16673_v60 }
 0x7c1   :  { %15840 = vmatmul.mubr.msk.f32.vlgmr.msra.gmra.mrb[46].mxu0 %vm531_vm1, %v4009_v46 }
 0x7c2   :  { %16678 = vmatpush3.bf16.xpose.msk.msra.mxu0 %vm18205_vm2, %v16673_v60  ;;  %15853 = vmatprep.mubr.msk.f32.mxu0 %vm531_vm1, %v4189_v15 }
 0x7c3   :  { %16687 = vmatprep.subr.msk.bf16.mxu0 %vm18205_vm2, %v16685_v27 }
 0x7c9   :  { %15854 = vmatmul.mubr.msk.f32.vlgmr.msra.gmra.mrb[48].mxu0 %vm531_vm1, %v4191_v22 }
 0x7ca   :  { %16690 = vmatpush3.bf16.xpose.msk.msra.mxu0 %vm18205_vm2, %v16685_v27  ;;  %15867 = vmatprep.mubr.msk.f32.mxu0 %vm531_vm1, %v4371_v32  ;;  %v21770_v27 = vpack.i.bf16 %v21769_v37, %v18099_v52  ;;  %v21771_v32 = vld [vmem:[#allocation18_spill] sm:$0xff] }
 0x7d1   :  { %15868 = vmatmul.mubr.msk.f32.vlgmr.msra.gmra.mrb[50].mxu0 %vm531_vm1, %v4373_v21  ;;  %v21772_v21 = vpack.i.bf16 %v21771_v32, %v18143_v6 }
 0x7d6   :  { %v2879_v1 = vpop.xlane.xlu0 %2878 }
 0x7d7   :  { %v2921_v54 = vsub.f32 %v18736_v7, %v2879_v1  ;;  %v2882_v38 = vpop.xlane.xlu1 %2881  ;;  %v21773_v1 = vld [vmem:[#allocation8_spill] sm:$0xff] }
 0x7d8   :  { %v2922_v5 = vsub.f32 %v18734_v63, %v2882_v38  ;;  %v21774_v34 = vpack.i.bf16 %v21773_v1, %v18053_v36  ;;  %v21777_v38 = vld [vmem:[#allocation17_spill] sm:$0xff]  ;;  %v21788_v1 = vld [vmem:[#allocation32_spill] sm:$0xff] }
 0x7d9   :  { %v2939_v15 = vmul.f32 1.442695, %v2921_v54  ;;  %v21775_v54 = vld [vmem:[#allocation26_spill] sm:$0xff] }
 0x7da   :  { %v2941_v57 = vmul.f32 1.442695, %v2922_v5  ;;  %v21776_v50 = vpack.i.bf16 %v21775_v54, %v18187_v23  ;;  %v21778_v5 = vpack.i.bf16 %v21777_v38, %v18135_v3  ;;  %v21789_v54 = vld [vmem:[#allocation12_spill] sm:$0xff]  ;;  %v21791_v38 = vld [vmem:[#allocation19_spill] sm:$0xff] }
 0x7db   :  { %17337 = vpow2.f32 %v2939_v15  ;;  %v21779_v15 = vld [vmem:[#allocation24_spill] sm:$0xff] }
 0x7dc   :  { %17339 = vpow2.f32 %v2941_v57  ;;  %v21780_v57 = vpack.i.bf16 %v21779_v15, %v18179_v20 }
 0x7de   :  { %v2891_v42 = vpop.xlane.xlu0 %2890 }
 0x7df   :  { %v2925_v22 = vsub.f32 %v18744_v61, %v2891_v42 }
 0x7e1   :  { %v2947_v62 = vmul.f32 1.442695, %v2925_v22 }
 0x7e2   :  { %v2894_v16 = vpop.xlane.xlu0 %2893 }
 0x7e3   :  { %17341 = vpow2.f32 %v2947_v62  ;;  %v2926_v47 = vsub.f32 %v18746_v55, %v2894_v16 }
 0x7e5   :  { %v18823_v48 = vpop.eup %17337  ;;  %v2949_v8 = vmul.f32 1.442695, %v2926_v47 }
 0x7e6   :  { %v18825_v29 = vpop.eup %17339  ;;  %v2906_v7 = vpop.xlane.xlu0 %2905  ;;  %v2973_v63 = vsel %vm1254_vm3, %v18823_v48, 0.0 }
 0x7e7   :  { %17343 = vpow2.f32 %v2949_v8  ;;  %v2930_v18 = vsub.f32 %v18754_v51, %v2906_v7  ;;  %2974 = vadd.xlane.f32.xlu1 %v2973_v63  ;;  %v2976_v61 = vsel %vm1254_vm3, %v18825_v29, 0.0  ;;  %v2903_v42 = vpop.xlane.xlu1 %2902 }
 0x7e8   :  { %2977 = vadd.xlane.f32.xlu0 %v2976_v61  ;;  %v2929_v62 = vsub.f32 %v18756_v11, %v2903_v42 }
 0x7e9   :  { %v2957_v9 = vmul.f32 1.442695, %v2930_v18 }
 0x7ea   :  { %v2955_v47 = vmul.f32 1.442695, %v2929_v62 }
 0x7eb   :  { %17345 = vpow2.f32 %v2957_v9 }
 0x7ec   :  { %17347 = vpow2.f32 %v2955_v47 }
 0x7ed   :  { %v18832_v55 = vpop.eup %17341  ;;  %v2918_v22 = vpop.xlane.xlu0 %2917 }
 0x7ee   :  { %v2985_v46 = vsel %vm1254_vm3, %v18832_v55, 0.0  ;;  %v2934_v16 = vsub.f32 %v18769_v40, %v2918_v22  ;;  %v2915_v15 = vpop.xlane.xlu1 %2914 }
 0x7ef   :  { %2986 = vadd.xlane.f32.xlu1 %v2985_v46 }
 0x7f0   :  { %v2965_v8 = vmul.f32 1.442695, %v2934_v16 }
 0x7f1   :  { %v18836_v53 = vpop.eup %17343 }
 0x7f2   :  { %v2988_v43 = vsel %vm1254_vm3, %v18836_v53, 0.0  ;;  %17349 = vpow2.f32 %v2965_v8 }
 0x7f3   :  { %2989 = vadd.xlane.f32.xlu0 %v2988_v43 }
 0x7f5   :  { %v18840_v51 = vpop.eup %17345 }
 0x7f6   :  { %v3000_v60 = vsel %vm1254_vm3, %v18840_v51, 0.0  ;;  %v18880_v63 = vpop.eup %17347 }
 0x7f7   :  { %3001 = vadd.xlane.f32.xlu0 %v3000_v60  ;;  %v2997_v46 = vsel %vm1254_vm3, %v18880_v63, 0.0 }
 0x7fc   :  { %v18888_v9 = vpop.eup %17349 }
 0x7fd   :  { %v3012_v40 = vsel %vm1254_vm3, %v18888_v9, 0.0 }
 0x800   :  { %17062 = vrot.lane.b32.xlu1 %v21767_v13, %s17784_s20 }
 0x804   :  { %17072 = vrot.lane.b32.xlu1 %v21768_v26, %s17784_s20 }
 0x808   :  { %17077 = vrot.lane.b32.xlu1 %v21770_v27, %s17784_s20  ;;  %v21786_v27 = vld [vmem:[#allocation31_spill] sm:$0xff] }
 0x80c   :  { %17087 = vrot.lane.b32.xlu1 %v21772_v21, %s17784_s20 }
 0x80d   :  { %17067 = vrot.lane.b32.xlu0 %v21774_v34, %s17784_s20 }
 0x810   :  { %17097 = vrot.lane.b32.xlu1 %v21776_v50, %s17784_s20  ;;  %v21790_v50 = vld [vmem:[#allocation7_spill] sm:$0xff] }
 0x811   :  { %17082 = vrot.lane.b32.xlu0 %v21778_v5, %s17784_s20  ;;  %v21792_v5 = vld [vmem:[#allocation27_spill] sm:$0xff] }
 0x815   :  { %17092 = vrot.lane.b32.xlu0 %v21780_v57, %s17784_s20  ;;  %v2933_v57 = vsub.f32 %v18772_v39, %v2915_v15 }
 0x817   :  { %v2963_v42 = vmul.f32 1.442695, %v2933_v57  ;;  %v21794_v57 = vld [vmem:[#allocation33_spill] sm:$0xff] }
 0x819   :  { %17351 = vpow2.f32 %v2963_v42 }
 0x823   :  { %v18945_v62 = vpop.eup %17351 }
 0x824   :  { %v3009_v16 = vsel %vm1254_vm3, %v18945_v62, 0.0 }
 0x82e   :  { %v18878_v7 = vpop.f32.mrb[36].mxu0 }
 0x82f   :  { %21781 = vst [vmem:[#allocation11_spill] sm:$0xff] %v18878_v7  ;;  %v18884_v18 = vadd.f32 %v18878_v7, %v18707_v10  ;;  %v18886_v61 = vpop.f32.mrb[37].mxu0 }
 0x830   :  { %21782 = vst [vmem:[#allocation18_spill] sm:$0xff] %v18886_v61  ;;  %v18892_v11 = vadd.f32 %v18886_v61, %v18709_v14 }
 0x834   :  { %3013 = vadd.xlane.f32.xlu0 %v3012_v40  ;;  %2998 = vadd.xlane.f32.xlu1 %v2997_v46 }
 0x839   :  { %v18898_v43 = vpop.f32.mrb[38].mxu0 }
 0x83a   :  { %21783 = vst [vmem:[#allocation8_spill] sm:$0xff] %v18898_v43  ;;  %v18902_v60 = vadd.f32 %v18898_v43, %v18479_v31  ;;  %v18904_v13 = vpop.f32.mrb[39].mxu0 }
 0x83b   :  { %21784 = vst [vmem:[#allocation26_spill] sm:$0xff] %v18904_v13  ;;  %v18908_v26 = vadd.f32 %v18904_v13, %v18483_v24 }
 0x83f   :  { %v18910_v37 = vpop.f32.mrb[40].mxu0 }
 0x840   :  { %21785 = vst [vmem:[#allocation17_spill] sm:$0xff] %v18910_v37  ;;  %v18914_v32 = vadd.f32 %v18910_v37, %v21786_v27  ;;  %v18916_v21 = vpop.f32.mrb[41].mxu0  ;;  %v21796_v27 = vld [vmem:[#allocation34_spill] sm:$0xff] }
 0x841   :  { %21787 = vst [vmem:[#allocation24_spill] sm:$0xff] %v18916_v21  ;;  %v18920_v34 = vadd.f32 %v18916_v21, %v21788_v1 }
 0x845   :  { %17107 = vrot.lane.b32.xlu1 %v21789_v54, %s17785_s21 }
 0x849   :  { %3917 = vrot.lane.b32.xlu1 %v18053_v36, %s17786_s22 }
 0x84a   :  { %17102 = vrot.lane.b32.xlu0 %v21790_v50, %s17785_s21 }
 0x84d   :  { %4097 = vrot.lane.b32.xlu1 %v18091_v49, %s17786_s22 }
 0x84e   :  { %3915 = vrot.lane.b32.xlu0 %v18047_v33, %s17786_s22 }
 0x851   :  { %4279 = vrot.lane.b32.xlu1 %v18135_v3, %s17786_s22 }
 0x852   :  { %17112 = vrot.lane.b32.xlu0 %v21791_v38, %s17785_s21 }
 0x855   :  { %4281 = vrot.lane.b32.xlu1 %v18143_v6, %s17786_s22 }
 0x856   :  { %4099 = vrot.lane.b32.xlu0 %v18099_v52, %s17786_s22 }
 0x85a   :  { %17117 = vrot.lane.b32.xlu0 %v21792_v5, %s17785_s21 }
 0x85e   :  { %4461 = vrot.lane.b32.xlu0 %v18179_v20, %s17786_s22 }
 0x874   :  { %v2975_v22 = vpop.xlane.xlu1 %2974 }
 0x875   :  { %17353 = vrcp.f32 %v2975_v22  ;;  %v2978_v47 = vpop.xlane.xlu0 %2977 }
 0x876   :  { %17355 = vrcp.f32 %v2978_v47 }
 0x879   :  { %3010 = vadd.xlane.f32.xlu1 %v3009_v16 }
 0x87c   :  { %v2987_v8 = vpop.xlane.xlu1 %2986 }
 0x87d   :  { %17357 = vrcp.f32 %v2987_v8 }
 0x87f   :  { %v17354_v40 = vpop.eup %17353 }
 0x880   :  { %v2990_v46 = vpop.xlane.xlu0 %2989  ;;  %v17063_v37 = vpop.permute.xlu1 %17062  ;;  %v3033_v21 = vmul.f32 %v17354_v40, %v18823_v48 }
 0x881   :  { %17359 = vrcp.f32 %v2990_v46  ;;  %v17065_v48 = vunpack.i.h.bf16 %v17063_v37  ;;  %v17356_v61 = vpop.eup %17355 }
 0x882   :  { %15776 = vmatprep.mubr.msk.f32.mxu1 %vm1254_vm3, %v3033_v21  ;;  %v17064_v21 = vunpack.i.l.bf16 %v17063_v37 }
 0x884   :  { %v18951_v39 = vpop.f32.mrb[42].mxu0  ;;  %v18953_v15 = vpop.xlane.xlu0 %3001 }
 0x885   :  { %21793 = vst [vmem:[#allocation12_spill] sm:$0xff] %v18951_v39  ;;  %v18957_v42 = vadd.f32 %v18951_v39, %v21794_v57  ;;  %v18959_v22 = vpop.f32.mrb[43].mxu0  ;;  %v17073_v16 = vpop.permute.xlu1 %17072  ;;  %v3153_v39 = vsel %vm3057_vm4, %v17064_v21, %v17065_v48  ;;  %17361 = vrcp.f32 %v18953_v15 }
 0x886   :  { %21795 = vst [vmem:[#allocation7_spill] sm:$0xff] %v18959_v22  ;;  %v18963_v1 = vadd.f32 %v18959_v22, %v21796_v27  ;;  %v17075_v8 = vunpack.i.h.bf16 %v17073_v16  ;;  %v17074_v40 = vunpack.i.l.bf16 %v17073_v16 }
 0x888   :  { %21797 = vst [vmem:[#allocation19_spill] sm:$0xff] %v18963_v1  ;;  %v17068_v47 = vpop.permute.xlu0 %17067  ;;  %v3343_v20 = vsel %vm3057_vm4, %v17074_v40, %v17075_v8 }
 0x889   :  { %v17070_v43 = vunpack.i.h.bf16 %v17068_v47  ;;  %v17069_v13 = vunpack.i.l.bf16 %v17068_v47  ;;  %v17078_v31 = vpop.permute.xlu1 %17077 }
 0x88a   :  { %v17080_v24 = vunpack.i.h.bf16 %v17078_v31  ;;  %v17079_v7 = vunpack.i.l.bf16 %v17078_v31  ;;  %4463 = vrot.lane.b32.xlu1 %v18187_v23, %s17786_s22  ;;  %v17358_v31 = vpop.eup %17357 }
 0x88b   :  { %v3154_v57 = vsel %vm3057_vm4, %v17069_v13, %v17070_v43  ;;  %v3034_v13 = vmul.f32 %v17356_v61, %v18825_v29  ;;  %v3037_v8 = vmul.f32 %v17358_v31, %v18832_v55 }
 0x88c   :  { %v15827_v22 = vpop.f32.mrb[44].mxu0  ;;  %v17083_v27 = vpop.permute.xlu0 %17082  ;;  %v16621_v46 = vpack.c.bf16 %v3154_v57, %v3153_v39  ;;  %v3344_v37 = vsel %vm3057_vm4, %v17079_v7, %v17080_v24 }
 0x88d   :  { %v3906_v10 = vpop.f32.mrb[45].mxu0  ;;  %v17085_v16 = vunpack.i.h.bf16 %v17083_v27  ;;  %v17084_v14 = vunpack.i.l.bf16 %v17083_v27  ;;  %v17088_v47 = vpop.permute.xlu1 %17087  ;;  %v16629_v48 = vpack.c.bf16 %v3344_v37, %v3343_v20 }
 0x88e   :  { %v18971_v3 = vmul.f32 0.35355338, %v3906_v10  ;;  %v17090_v23 = vunpack.i.h.bf16 %v17088_v47  ;;  %v17089_v1 = vunpack.i.l.bf16 %v17088_v47  ;;  %16622 = vmatprep.subr.bf16.mxu1 %v16621_v46  ;;  %v17360_v39 = vpop.eup %17359 }
 0x88f   :  { %16624 = vmatpush3.bf16.msra.mxu1 %v16621_v46  ;;  %v3533_v43 = vsel %vm3057_vm4, %v17084_v14, %v17085_v16 }
 0x890   :  { %v4568_v24 = vsel %vm1254_vm3, %v18971_v3, -inf  ;;  %v17093_v7 = vpop.permute.xlu0 %17092  ;;  %16630 = vmatprep.subr.bf16.mxu1 %v16629_v48  ;;  %v3534_v27 = vsel %vm3057_vm4, %v17089_v1, %v17090_v23  ;;  %v3038_v23 = vmul.f32 %v17360_v39, %v18836_v53 }
 0x891   :  { %4569 = vmax.xlane.f32.xlu0 %v4568_v24  ;;  %v17095_v10 = vunpack.i.h.bf16 %v17093_v7  ;;  %v17094_v57 = vunpack.i.l.bf16 %v17093_v7  ;;  %v17098_v21 = vpop.permute.xlu1 %17097  ;;  %v16637_v14 = vpack.c.bf16 %v3534_v27, %v3533_v43 }
 0x892   :  { %v17100_v20 = vunpack.i.h.bf16 %v17098_v21  ;;  %v17099_v40 = vunpack.i.l.bf16 %v17098_v21  ;;  %15777 = vmatmul.mubr.msk.f32.vlgmr.msra.gmra.mrb[60].mxu1 %vm1254_vm3, %v3034_v13 }
 0x893   :  { %16632 = vmatpush3.bf16.msra.mxu1 %v16629_v48  ;;  %15790 = vmatprep.mubr.msk.f32.mxu1 %vm1254_vm3, %v3037_v8  ;;  %v3723_v46 = vsel %vm3057_vm4, %v17094_v57, %v17095_v10  ;;  %v19001_v10 = vmul.f32 0.35355338, %v15827_v22  ;;  %v21799_v22 = vld [vmem:[#allocation6_spill] sm:$0xff] }
 0x894   :  { %v15841_v29 = vpop.f32.mrb[46].mxu0  ;;  %16638 = vmatprep.subr.bf16.mxu1 %v16637_v14  ;;  %v3724_v61 = vsel %vm3057_vm4, %v17099_v40, %v17100_v20  ;;  %v21798_v20 = vld [vmem:[#allocation10_spill] sm:$0xff] }
 0x895   :  { %v4088_v1 = vpop.f32.mrb[47].mxu0  ;;  %v16645_v55 = vpack.c.bf16 %v3724_v61, %v3723_v46  ;;  %v18987_v16 = vmul.f32 0.35355338, %v15841_v29  ;;  %v4571_v21 = vsel %vm1254_vm3, %v19001_v10, -inf  ;;  %v21800_v46 = vld [vmem:[#allocation15_spill] sm:$0xff] }
 0x896   :  { %v18984_v37 = vmul.f32 0.35355338, %v4088_v1  ;;  %15791 = vmatmul.mubr.msk.f32.vlgmr.msra.gmra.mrb[62].mxu1 %vm1254_vm3, %v3038_v23  ;;  %v17362_v23 = vpop.eup %17361 }
 0x897   :  { %16640 = vmatpush3.bf16.msra.mxu1 %v16637_v14  ;;  %v4583_v53 = vsel %vm1254_vm3, %v18987_v16, -inf }
 0x898   :  { %v4580_v47 = vsel %vm1254_vm3, %v18984_v37, -inf  ;;  %16646 = vmatprep.subr.bf16.mxu1 %v16645_v55 }
 0x899   :  { %4581 = vmax.xlane.f32.xlu0 %v4580_v47 }
 0x89c   :  { %v15855_v31 = vpop.f32.mrb[48].mxu0 }
 0x89d   :  { %v18993_v48 = vmul.f32 0.35355338, %v15855_v31  ;;  %4584 = vmax.xlane.f32.xlu0 %v4583_v53  ;;  %v4270_v43 = vpop.f32.mrb[49].mxu0  ;;  %v3042_v53 = vmul.f32 %v17362_v23, %v18840_v51  ;;  %v21801_v51 = vld [vmem:[#allocation22_spill] sm:$0xff] }
 0x89e   :  { %v19003_v57 = vmul.f32 0.35355338, %v4270_v43 }
 0x89f   :  { %v4595_v24 = vsel %vm1254_vm3, %v18993_v48, -inf }
 0x8a0   :  { %v4592_v8 = vsel %vm1254_vm3, %v19003_v57, -inf }
 0x8a1   :  { %4596 = vmax.xlane.f32.xlu0 %v4595_v24 }
 0x8a4   :  { %v15869_v7 = vpop.f32.mrb[50].mxu0 }
 0x8a5   :  { %v18997_v13 = vmul.f32 0.35355338, %v15869_v7  ;;  %v4452_v27 = vpop.f32.mrb[51].mxu0 }
 0x8a6   :  { %v19022_v43 = vmul.f32 0.35355338, %v4452_v27 }
 0x8a7   :  { %v4607_v39 = vsel %vm1254_vm3, %v18997_v13, -inf }
 0x8a8   :  { %4608 = vmax.xlane.f32.xlu0 %v4607_v39  ;;  %v4604_v7 = vsel %vm1254_vm3, %v19022_v43, -inf }
 0x8ae   :  { %4572 = vmax.xlane.f32.xlu1 %v4571_v21 }
 0x8b2   :  { %4593 = vmax.xlane.f32.xlu1 %v4592_v8 }
 0x8be   :  { %17127 = vrot.lane.b32.xlu0 %v21798_v20, %s17786_s22 }
 0x8c1   :  { %v2999_v40 = vpop.xlane.xlu1 %2998  ;;  %v3014_v14 = vpop.xlane.xlu0 %3013 }
 0x8c2   :  { %17363 = vrcp.f32 %v2999_v40 }
 0x8c3   :  { %17122 = vrot.lane.b32.xlu1 %v21799_v22, %s17786_s22  ;;  %17365 = vrcp.f32 %v3014_v14 }
 0x8c5   :  { %v17103_v29 = vpop.permute.xlu0 %17102  ;;  %v17108_v24 = vpop.permute.xlu1 %17107 }
 0x8c6   :  { %v17105_v1 = vunpack.i.h.bf16 %v17103_v29  ;;  %v17104_v47 = vunpack.i.l.bf16 %v17103_v29 }
 0x8c7   :  { %17132 = vrot.lane.b32.xlu1 %v21800_v46, %s17786_s22 }
 0x8c8   :  { %v16655_v15 = vpack.c.bf16 %v17105_v1, %v17104_v47  ;;  %v17110_v1 = vunpack.i.h.bf16 %v17108_v24  ;;  %v17109_v47 = vunpack.i.l.bf16 %v17108_v24 }
 0x8c9   :  { %v3918_v39 = vpop.permute.xlu1 %3917  ;;  %v3916_v8 = vpop.permute.xlu0 %3915 }
 0x8ca   :  { %v16667_v20 = vpack.c.bf16 %v17110_v1, %v17109_v47 }
 0x8cc   :  { %v17364_v61 = vpop.eup %17363 }
 0x8cd   :  { %v3041_v31 = vmul.f32 %v17364_v61, %v18880_v63  ;;  %v4098_v63 = vpop.permute.xlu1 %4097  ;;  %v17113_v29 = vpop.permute.xlu0 %17112 }
 0x8ce   :  { %v17366_v27 = vpop.eup %17365  ;;  %v17115_v14 = vunpack.i.h.bf16 %v17113_v29  ;;  %v17114_v24 = vunpack.i.l.bf16 %v17113_v29 }
 0x8cf   :  { %15804 = vmatprep.mubr.msk.f32.mxu1 %vm1254_vm3, %v3041_v31 }
 0x8d0   :  { %15805 = vmatmul.mubr.msk.f32.vlgmr.msra.gmra.mrb[64].mxu1 %vm1254_vm3, %v3042_v53  ;;  %v3046_v53 = vmul.f32 %v17366_v27, %v18888_v9 }
 0x8d1   :  { %16648 = vmatpush3.bf16.msra.mxu1 %v16645_v55  ;;  %v4280_v21 = vpop.permute.xlu1 %4279  ;;  %v4100_v23 = vpop.permute.xlu0 %4099 }
 0x8d2   :  { %16657 = vmatprep.subr.msk.bf16.mxu1 %vm18205_vm2, %v16655_v15 }
 0x8d5   :  { %v4282_v40 = vpop.permute.xlu1 %4281 }
 0x8eb   :  { %4605 = vmax.xlane.f32.xlu1 %v4604_v7  ;;  %v17118_v7 = vpop.permute.xlu0 %17117 }
 0x8fc   :  { %17137 = vrot.lane.b32.xlu1 %v21801_v51, %s17786_s22 }
 0x906   :  { %v3011_v55 = vpop.xlane.xlu1 %3010 }
 0x907   :  { %17367 = vrcp.f32 %v3011_v55  ;;  %v4462_v55 = vpop.permute.xlu0 %4461 }
 0x911   :  { %v17368_v61 = vpop.eup %17367 }
 0x912   :  { %v3045_v31 = vmul.f32 %v17368_v61, %v18945_v62  ;;  %v16679_v62 = vpack.c.bf16 %v17115_v14, %v17114_v24 }
 0x914   :  { %15818 = vmatprep.mubr.msk.f32.mxu1 %vm1254_vm3, %v3045_v31 }
 0x915   :  { %15819 = vmatmul.mubr.msk.f32.vlgmr.msra.gmra.mrb[66].mxu1 %vm1254_vm3, %v3046_v53 }
 0x916   :  { %16660 = vmatpush3.bf16.xpose.msk.msra.mxu1 %vm18205_vm2, %v16655_v15  ;;  %15832 = vmatprep.mubr.msk.f32.mxu1 %vm531_vm1, %v3916_v8  ;;  %v17120_v15 = vunpack.i.h.bf16 %v17118_v7  ;;  %v17119_v8 = vunpack.i.l.bf16 %v17118_v7 }
 0x917   :  { %16669 = vmatprep.subr.msk.bf16.mxu1 %vm18205_vm2, %v16667_v20 }
 0x918   :  { %v16691_v29 = vpack.c.bf16 %v17120_v15, %v17119_v8 }
 0x91d   :  { %15833 = vmatmul.mubr.msk.f32.vlgmr.msra.gmra.mrb[68].mxu1 %vm531_vm1, %v3918_v39 }
 0x91e   :  { %v4570_v9 = vpop.xlane.xlu0 %4569  ;;  %16672 = vmatpush3.bf16.xpose.msk.msra.mxu1 %vm18205_vm2, %v16667_v20  ;;  %15846 = vmatprep.mubr.msk.f32.mxu1 %vm531_vm1, %v4098_v63 }
 0x91f   :  { %v4616_v27 = vsub.f32 %v18971_v3, %v4570_v9  ;;  %16681 = vmatprep.subr.msk.bf16.mxu1 %vm18205_vm2, %v16679_v62 }
 0x921   :  { %v4632_v61 = vmul.f32 1.442695, %v4616_v27 }
 0x923   :  { %17369 = vpow2.f32 %v4632_v61 }
 0x925   :  { %15847 = vmatmul.mubr.msk.f32.vlgmr.msra.gmra.mrb[70].mxu1 %vm531_vm1, %v4100_v23 }
 0x926   :  { %v4582_v1 = vpop.xlane.xlu0 %4581  ;;  %16684 = vmatpush3.bf16.xpose.msk.msra.mxu1 %vm18205_vm2, %v16679_v62  ;;  %15860 = vmatprep.mubr.msk.f32.mxu1 %vm531_vm1, %v4280_v21 }
 0x927   :  { %v4620_v20 = vsub.f32 %v18984_v37, %v4582_v1  ;;  %16693 = vmatprep.subr.msk.bf16.mxu1 %vm18205_vm2, %v16691_v29  ;;  %v4464_v37 = vpop.permute.xlu1 %4463 }
 0x929   :  { %v4640_v3 = vmul.f32 1.442695, %v4620_v20 }
 0x92a   :  { %v4585_v21 = vpop.xlane.xlu0 %4584 }
 0x92b   :  { %17371 = vpow2.f32 %v4640_v3 }
 0x92d   :  { %v19051_v39 = vpop.eup %17369  ;;  %15861 = vmatmul.mubr.msk.f32.vlgmr.msra.gmra.mrb[72].mxu1 %vm531_vm1, %v4282_v40  ;;  %v4621_v40 = vsub.f32 %v18987_v16, %v4585_v21 }
 0x92e   :  { %16696 = vmatpush3.bf16.xpose.msk.msra.mxu1 %vm18205_vm2, %v16691_v29  ;;  %15874 = vmatprep.mubr.msk.f32.mxu1 %vm531_vm1, %v4462_v55  ;;  %v4664_v63 = vsel %vm1254_vm3, %v19051_v39, 0.0  ;;  %v4597_v47 = vpop.xlane.xlu0 %4596 }
 0x92f   :  { %4665 = vadd.xlane.f32.xlu1 %v4664_v63  ;;  %v4642_v24 = vmul.f32 1.442695, %v4621_v40  ;;  %v4625_v55 = vsub.f32 %v18993_v48, %v4597_v47 }
 0x931   :  { %v4650_v8 = vmul.f32 1.442695, %v4625_v55 }
 0x935   :  { %v19059_v23 = vpop.eup %17371  ;;  %15875 = vmatmul.mubr.msk.f32.vlgmr.msra.gmra.mrb[74].mxu1 %vm531_vm1, %v4464_v37  ;;  %v4609_v53 = vpop.xlane.xlu0 %4608 }
 0x936   :  { %v4676_v31 = vsel %vm1254_vm3, %v19059_v23, 0.0  ;;  %v4629_v61 = vsub.f32 %v18997_v13, %v4609_v53 }
 0x937   :  { %4677 = vadd.xlane.f32.xlu1 %v4676_v31 }
 0x938   :  { %v4658_v63 = vmul.f32 1.442695, %v4629_v61 }
 0x939   :  { %v17128_v27 = vpop.permute.xlu0 %17127 }
 0x93a   :  { %v17130_v1 = vunpack.i.h.bf16 %v17128_v27  ;;  %v17129_v20 = vunpack.i.l.bf16 %v17128_v27 }
 0x93b   :  { %v4573_v7 = vpop.xlane.xlu1 %4572 }
 0x93c   :  { %v4617_v14 = vsub.f32 %v19001_v10, %v4573_v7  ;;  %v19069_v21 = vpack.c.bf16 %v17130_v1, %v17129_v20 }
 0x93e   :  { %v4634_v62 = vmul.f32 1.442695, %v4617_v14 }
 0x93f   :  { %v4594_v9 = vpop.xlane.xlu1 %4593 }
 0x940   :  { %17373 = vpow2.f32 %v4634_v62  ;;  %v4624_v15 = vsub.f32 %v19003_v57, %v4594_v9 }
 0x941   :  { %17375 = vpow2.f32 %v4642_v24 }
 0x942   :  { %v4648_v29 = vmul.f32 1.442695, %v4624_v15 }
 0x943   :  { %v17123_v16 = vpop.permute.xlu1 %17122 }
 0x944   :  { %17377 = vpow2.f32 %v4648_v29  ;;  %v17125_v3 = vunpack.i.h.bf16 %v17123_v16  ;;  %v17124_v10 = vunpack.i.l.bf16 %v17123_v16 }
 0x945   :  { %17379 = vpow2.f32 %v4650_v8 }
 0x946   :  { %v16697_v48 = vpack.c.bf16 %v17125_v3, %v17124_v10  ;;  %17381 = vpow2.f32 %v4658_v63 }
 0x947   :  { %v17133_v29 = vpop.permute.xlu1 %17132 }
 0x948   :  { %16698 = vmatprep.subr.bf16.mxu0 %v16697_v48 }
 0x949   :  { %16700 = vmatpush3.bf16.msra.mxu0 %v16697_v48 }
 0x94a   :  { %v19071_v37 = vpop.eup %17373  ;;  %16706 = vmatprep.subr.bf16.mxu0 %v19069_v21 }
 0x94b   :  { %v4667_v13 = vsel %vm1254_vm3, %v19071_v37, 0.0  ;;  %v19076_v57 = vpop.eup %17375 }
 0x94c   :  { %4668 = vadd.xlane.f32.xlu0 %v4667_v13  ;;  %v4679_v31 = vsel %vm1254_vm3, %v19076_v57, 0.0 }
 0x94e   :  { %v19078_v47 = vpop.eup %17377 }
 0x94f   :  { %v4688_v40 = vsel %vm1254_vm3, %v19078_v47, 0.0  ;;  %v19084_v53 = vpop.eup %17379 }
 0x950   :  { %4680 = vadd.xlane.f32.xlu0 %v4679_v31  ;;  %4689 = vadd.xlane.f32.xlu1 %v4688_v40  ;;  %v4691_v7 = vsel %vm1254_vm3, %v19084_v53, 0.0  ;;  %v19088_v14 = vpop.eup %17381 }
 0x951   :  { %v4703_v24 = vsel %vm1254_vm3, %v19088_v14, 0.0 }
 0x954   :  { %4692 = vadd.xlane.f32.xlu0 %v4691_v7 }
 0x958   :  { %4704 = vadd.xlane.f32.xlu0 %v4703_v24 }
 0x961   :  { %17147 = vrot.lane.b32.xlu1 %v18079_v45, %s17787_s23 }
 0x965   :  { %v19094_v55 = vpop.f32.mrb[60].mxu1 }
 0x966   :  { %21802 = vst [vmem:[#allocation27_spill] sm:$0xff] %v19094_v55  ;;  %v19098_v62 = vadd.f32 %v19094_v55, %v18712_v2  ;;  %v19100_v9 = vpop.f32.mrb[61].mxu1 }
 0x967   :  { %21803 = vst [vmem:[#allocation6_spill] sm:$0xff] %v19100_v9  ;;  %v19104_v27 = vadd.f32 %v19100_v9, %v18714_v56 }
 0x969   :  { %v19106_v15 = vpop.f32.mrb[62].mxu1 }
 0x96a   :  { %21804 = vst [vmem:[#allocation15_spill] sm:$0xff] %v19106_v15  ;;  %v19110_v8 = vadd.f32 %v19106_v15, %v18716_v35  ;;  %v19112_v61 = vpop.f32.mrb[63].mxu1 }
 0x96b   :  { %21805 = vst [vmem:[#allocation22_spill] sm:$0xff] %v19112_v61  ;;  %v19116_v45 = vadd.f32 %v19112_v61, %v18718_v19 }
 0x96e   :  { %17142 = vrot.lane.b32.xlu0 %v18037_v30, %s17787_s23 }
 0x972   :  { %5456 = vrot.lane.b32.xlu0 %v18023_v25, %s17788_s24 }
 0x976   :  { %17152 = vrot.lane.b32.xlu0 %v18125_v0, %s17787_s23 }
 0x978   :  { %v4606_v1 = vpop.xlane.xlu1 %4605 }
 0x979   :  { %v4628_v16 = vsub.f32 %v19022_v43, %v4606_v1  ;;  %v17135_v1 = vunpack.i.h.bf16 %v17133_v29 }
 0x97a   :  { %5640 = vrot.lane.b32.xlu0 %v18075_v44, %s17788_s24 }
 0x97b   :  { %v4656_v20 = vmul.f32 1.442695, %v4628_v16  ;;  %v17134_v16 = vunpack.i.l.bf16 %v17133_v29 }
 0x97c   :  { %v17138_v3 = vpop.permute.xlu1 %17137 }
 0x97d   :  { %17383 = vpow2.f32 %v4656_v20 }
 0x97e   :  { %5820 = vrot.lane.b32.xlu0 %v18113_v59, %s17788_s24 }
 0x982   :  { %6002 = vrot.lane.b32.xlu0 %v18157_v12, %s17788_s24  ;;  %v21808_v12 = vld [vmem:[#allocation42_spill] sm:$0xff] }
 0x987   :  { %v19131_v30 = vpop.eup %17383 }
 0x988   :  { %v4700_v25 = vsel %vm1254_vm3, %v19131_v30, 0.0 }
 0x989   :  { %4701 = vadd.xlane.f32.xlu1 %v4700_v25 }
 0x99a   :  { %5458 = vrot.lane.b32.xlu1 %v18031_v28, %s17788_s24  ;;  %v21809_v28 = vld [vmem:[#allocation14_spill] sm:$0xff] }
 0x99e   :  { %5638 = vrot.lane.b32.xlu1 %v18069_v41, %s17788_s24  ;;  %v21810_v41 = vld [vmem:[#allocation21_spill] sm:$0xff] }
 0x9a2   :  { %17157 = vrot.lane.b32.xlu1 %v18169_v17, %s17787_s23 }
 0x9a3   :  { %v19141_v44 = vpop.f32.mrb[64].mxu1 }
 0x9a4   :  { %21806 = vst [vmem:[#allocation45_spill] sm:$0xff] %v19141_v44  ;;  %v19145_v59 = vadd.f32 %v19141_v44, %v18720_v4  ;;  %v19147_v0 = vpop.f32.mrb[65].mxu1 }
 0x9a5   :  { %21807 = vst [vmem:[#allocation46_spill] sm:$0xff] %v19147_v0  ;;  %v19151_v43 = vadd.f32 %v19147_v0, %v21808_v12 }
 0x9a6   :  { %5822 = vrot.lane.b32.xlu1 %v21809_v28, %s17788_s24 }
 0x9aa   :  { %6004 = vrot.lane.b32.xlu1 %v21810_v41, %s17788_s24  ;;  %v17140_v41 = vunpack.i.h.bf16 %v17138_v3 }
 0x9bc   :  { %v4666_v17 = vpop.xlane.xlu1 %4665 }
 0x9bd   :  { %17385 = vrcp.f32 %v4666_v17  ;;  %v17139_v17 = vunpack.i.l.bf16 %v17138_v3 }
 0x9c4   :  { %v4678_v48 = vpop.xlane.xlu1 %4677 }
 0x9c5   :  { %17387 = vrcp.f32 %v4678_v48 }
 0x9c7   :  { %v17386_v10 = vpop.eup %17385 }
 0x9c8   :  { %v4728_v63 = vmul.f32 %v17386_v10, %v19051_v39  ;;  %v16713_v10 = vpack.c.bf16 %v17135_v1, %v17134_v16  ;;  %v16721_v16 = vpack.c.bf16 %v17140_v41, %v17139_v17 }
 0x9ca   :  { %15881 = vmatprep.mubr.msk.f32.mxu0 %vm1254_vm3, %v4728_v63 }
 0x9cf   :  { %v17388_v24 = vpop.eup %17387 }
 0x9d0   :  { %v4732_v28 = vmul.f32 %v17388_v24, %v19059_v23 }
 0x9d9   :  { %v4669_v13 = vpop.xlane.xlu0 %4668 }
 0x9da   :  { %17389 = vrcp.f32 %v4669_v13  ;;  %v21812_v13 = vld [vmem:[#allocation43_spill] sm:$0xff] }
 0x9dd   :  { %v4681_v31 = vpop.xlane.xlu0 %4680  ;;  %v4690_v40 = vpop.xlane.xlu1 %4689 }
 0x9de   :  { %17391 = vrcp.f32 %v4681_v31 }
 0x9df   :  { %17393 = vrcp.f32 %v4690_v40  ;;  %v21814_v40 = vld [vmem:[#allocation44_spill] sm:$0xff] }
 0x9e1   :  { %v4693_v7 = vpop.xlane.xlu0 %4692 }
 0x9e2   :  { %17395 = vrcp.f32 %v4693_v7 }
 0x9e4   :  { %v17390_v20 = vpop.eup %17389 }
 0x9e5   :  { %v19159_v25 = vpop.xlane.xlu0 %4704  ;;  %v4729_v39 = vmul.f32 %v17390_v20, %v19071_v37 }
 0x9e6   :  { %17397 = vrcp.f32 %v19159_v25 }
 0x9e7   :  { %15882 = vmatmul.mubr.msk.f32.vlgmr.msra.gmra.mrb[52].mxu0 %vm1254_vm3, %v4729_v39 }
 0x9e8   :  { %v17392_v63 = vpop.eup %17391  ;;  %16708 = vmatpush3.bf16.msra.mxu0 %v19069_v21  ;;  %v19165_v48 = vpop.f32.mrb[66].mxu1  ;;  %15895 = vmatprep.mubr.msk.f32.mxu0 %vm1254_vm3, %v4732_v28 }
 0x9e9   :  { %21811 = vst [vmem:[#allocation14_spill] sm:$0xff] %v19165_v48  ;;  %v17394_v29 = vpop.eup %17393  ;;  %v19170_v31 = vadd.f32 %v19165_v48, %v21812_v13  ;;  %16714 = vmatprep.subr.bf16.mxu0 %v16713_v10  ;;  %v19172_v37 = vpop.f32.mrb[67].mxu1  ;;  %v4733_v3 = vmul.f32 %v17392_v63, %v19076_v57 }
 0x9ea   :  { %21813 = vst [vmem:[#allocation21_spill] sm:$0xff] %v19172_v37  ;;  %v17143_v23 = vpop.permute.xlu0 %17142  ;;  %v19177_v7 = vadd.f32 %v19172_v37, %v21814_v40  ;;  %v4736_v21 = vmul.f32 %v17394_v29, %v19078_v47 }
 0x9eb   :  { %v17145_v24 = vunpack.i.h.bf16 %v17143_v23  ;;  %v17144_v1 = vunpack.i.l.bf16 %v17143_v23  ;;  %15896 = vmatmul.mubr.msk.f32.vlgmr.msra.gmra.mrb[54].mxu0 %vm1254_vm3, %v4733_v3 }
 0x9ec   :  { %v17396_v20 = vpop.eup %17395  ;;  %16716 = vmatpush3.bf16.msra.mxu0 %v16713_v10  ;;  %15909 = vmatprep.mubr.msk.f32.mxu0 %vm1254_vm3, %v4736_v21 }
 0x9ed   :  { %16722 = vmatprep.subr.bf16.mxu0 %v16721_v16  ;;  %v4737_v39 = vmul.f32 %v17396_v20, %v19084_v53  ;;  %v16729_v28 = vpack.c.bf16 %v17145_v24, %v17144_v1 }
 0x9ef   :  { %15910 = vmatmul.mubr.msk.f32.vlgmr.msra.gmra.mrb[56].mxu0 %vm1254_vm3, %v4737_v39 }
 0x9f0   :  { %v15834_v57 = vpop.f32.mrb[68].mxu1  ;;  %16724 = vmatpush3.bf16.msra.mxu0 %v16721_v16 }
 0x9f1   :  { %v19184_v63 = vmul.f32 0.35355338, %v15834_v57  ;;  %v3997_v47 = vpop.f32.mrb[69].mxu1  ;;  %16731 = vmatprep.subr.msk.bf16.mxu0 %vm18205_vm2, %v16729_v28 }
 0x9f2   :  { %v19188_v29 = vmul.f32 0.35355338, %v3997_v47 }
 0x9f3   :  { %v4577_v41 = vsel %vm1254_vm3, %v19184_v63, -inf }
 0x9f4   :  { %4578 = vmax.xlane.f32.xlu1 %v4577_v41  ;;  %v4574_v53 = vsel %vm1254_vm3, %v19188_v29, -inf }
 0x9f5   :  { %4575 = vmax.xlane.f32.xlu0 %v4574_v53 }
 0x9f8   :  { %v15848_v17 = vpop.f32.mrb[70].mxu1 }
 0x9f9   :  { %v4179_v10 = vpop.f32.mrb[71].mxu1  ;;  %v19196_v3 = vmul.f32 0.35355338, %v15848_v17 }
 0x9fa   :  { %v19194_v23 = vmul.f32 0.35355338, %v4179_v10 }
 0x9fb   :  { %v4589_v1 = vsel %vm1254_vm3, %v19196_v3, -inf }
 0x9fc   :  { %v4586_v21 = vsel %vm1254_vm3, %v19194_v23, -inf }
 0x9fd   :  { %4587 = vmax.xlane.f32.xlu0 %v4586_v21 }
 0xa00   :  { %v15862_v24 = vpop.f32.mrb[72].mxu1 }
 0xa01   :  { %v19202_v16 = vmul.f32 0.35355338, %v15862_v24  ;;  %v4361_v20 = vpop.f32.mrb[73].mxu1  ;;  %4590 = vmax.xlane.f32.xlu0 %v4589_v1  ;;  %v17148_v1 = vpop.permute.xlu1 %17147 }
 0xa02   :  { %v19204_v39 = vmul.f32 0.35355338, %v4361_v20  ;;  %v17150_v48 = vunpack.i.h.bf16 %v17148_v1  ;;  %v17149_v37 = vunpack.i.l.bf16 %v17148_v1 }
 0xa03   :  { %v4601_v57 = vsel %vm1254_vm3, %v19202_v16, -inf }
 0xa04   :  { %v4598_v47 = vsel %vm1254_vm3, %v19204_v39, -inf }
 0xa05   :  { %4602 = vmax.xlane.f32.xlu0 %v4601_v57  ;;  %4599 = vmax.xlane.f32.xlu1 %v4598_v47  ;;  %v17398_v57 = vpop.eup %17397  ;;  %v5457_v47 = vpop.permute.xlu0 %5456 }
 0xa06   :  { %v4741_v40 = vmul.f32 %v17398_v57, %v19088_v14 }
 0xa08   :  { %v15876_v41 = vpop.f32.mrb[74].mxu1 }
 0xa09   :  { %v19210_v53 = vmul.f32 0.35355338, %v15876_v41  ;;  %v4543_v17 = vpop.f32.mrb[75].mxu1 }
 0xa0a   :  { %v19212_v10 = vmul.f32 0.35355338, %v4543_v17 }
 0xa0b   :  { %v4613_v21 = vsel %vm1254_vm3, %v19210_v53, -inf }
 0xa0c   :  { %4614 = vmax.xlane.f32.xlu0 %v4613_v21  ;;  %v4610_v24 = vsel %vm1254_vm3, %v19212_v10, -inf  ;;  %v16741_v21 = vpack.c.bf16 %v17150_v48, %v17149_v37 }
 0xa0d   :  { %4611 = vmax.xlane.f32.xlu1 %v4610_v24  ;;  %v17153_v24 = vpop.permute.xlu0 %17152 }
 0xa0e   :  { %v17155_v1 = vunpack.i.h.bf16 %v17153_v24 }
 0xa11   :  { %v5641_v48 = vpop.permute.xlu0 %5640 }
 0xa16   :  { %v4702_v20 = vpop.xlane.xlu1 %4701 }
 0xa17   :  { %17399 = vrcp.f32 %v4702_v20  ;;  %v17154_v20 = vunpack.i.l.bf16 %v17153_v24 }
 0xa1a   :  { %v5459_v17 = vpop.permute.xlu1 %5458 }
 0xa1e   :  { %v5639_v25 = vpop.permute.xlu1 %5638 }
 0xa21   :  { %v17400_v41 = vpop.eup %17399 }
 0xa22   :  { %v4740_v13 = vmul.f32 %v17400_v41, %v19131_v30  ;;  %v16753_v30 = vpack.c.bf16 %v17155_v1, %v17154_v20  ;;  %v17158_v14 = vpop.permute.xlu1 %17157 }
 0xa23   :  { %v17159_v37 = vunpack.i.l.bf16 %v17158_v14 }
 0xa24   :  { %15923 = vmatprep.mubr.msk.f32.mxu0 %vm1254_vm3, %v4740_v13  ;;  %v17160_v13 = vunpack.i.h.bf16 %v17158_v14 }
 0xa25   :  { %15924 = vmatmul.mubr.msk.f32.vlgmr.msra.gmra.mrb[58].mxu0 %vm1254_vm3, %v4741_v40  ;;  %v5821_v40 = vpop.permute.xlu0 %5820 }
 0xa26   :  { %16734 = vmatpush3.bf16.xpose.msk.msra.mxu0 %vm18205_vm2, %v16729_v28  ;;  %15937 = vmatprep.mubr.msk.f32.mxu0 %vm531_vm1, %v5457_v47  ;;  %v16765_v28 = vpack.c.bf16 %v17160_v13, %v17159_v37  ;;  %v5823_v57 = vpop.permute.xlu1 %5822 }
 0xa27   :  { %16743 = vmatprep.subr.msk.bf16.mxu0 %vm18205_vm2, %v16741_v21 }
 0xa29   :  { %v6003_v47 = vpop.permute.xlu0 %6002 }
 0xa2a   :  { %v6005_v41 = vpop.permute.xlu1 %6004 }
 0xa2d   :  { %15938 = vmatmul.mubr.msk.f32.vlgmr.msra.gmra.mrb[60].mxu0 %vm531_vm1, %v5459_v17 }
 0xa2e   :  { %16746 = vmatpush3.bf16.xpose.msk.msra.mxu0 %vm18205_vm2, %v16741_v21  ;;  %15951 = vmatprep.mubr.msk.f32.mxu0 %vm531_vm1, %v5639_v25 }
 0xa2f   :  { %16755 = vmatprep.subr.msk.bf16.mxu0 %vm18205_vm2, %v16753_v30 }
 0xa35   :  { %15952 = vmatmul.mubr.msk.f32.vlgmr.msra.gmra.mrb[62].mxu0 %vm531_vm1, %v5641_v48 }
 0xa36   :  { %16758 = vmatpush3.bf16.xpose.msk.msra.mxu0 %vm18205_vm2, %v16753_v30  ;;  %15965 = vmatprep.mubr.msk.f32.mxu0 %vm531_vm1, %v5821_v40 }
 0xa37   :  { %16767 = vmatprep.subr.msk.bf16.mxu0 %vm18205_vm2, %v16765_v28 }
 0xa3d   :  { %15966 = vmatmul.mubr.msk.f32.vlgmr.msra.gmra.mrb[64].mxu0 %vm531_vm1, %v5823_v57 }
 0xa3e   :  { %16770 = vmatpush3.bf16.xpose.msk.msra.mxu0 %vm18205_vm2, %v16765_v28  ;;  %15979 = vmatprep.mubr.msk.f32.mxu0 %vm531_vm1, %v6003_v47 }
 0xa45   :  { %15980 = vmatmul.mubr.msk.f32.vlgmr.msra.gmra.mrb[66].mxu0 %vm531_vm1, %v6005_v41 }
 0xa81   :  { %v4579_v17 = vpop.xlane.xlu1 %4578 }
 0xa82   :  { %v4619_v21 = vsub.f32 %v19184_v63, %v4579_v17  ;;  %v4576_v24 = vpop.xlane.xlu0 %4575 }
 0xa83   :  { %v4618_v25 = vsub.f32 %v19188_v29, %v4576_v24 }
 0xa84   :  { %v4638_v1 = vmul.f32 1.442695, %v4619_v21 }
 0xa85   :  { %v4636_v20 = vmul.f32 1.442695, %v4618_v25 }
 0xa86   :  { %17401 = vpow2.f32 %v4638_v1  ;;  %v21815_v1 = vld [vmem:[#allocation9_spill] sm:$0xff] }
 0xa87   :  { %17403 = vpow2.f32 %v4636_v20  ;;  %v21816_v20 = vld [vmem:[#allocation20_spill] sm:$0xff] }
 0xa8a   :  { %v4588_v30 = vpop.xlane.xlu0 %4587 }
 0xa8b   :  { %v4622_v14 = vsub.f32 %v19194_v23, %v4588_v30  ;;  %v21817_v30 = vld [vmem:[#allocation28_spill] sm:$0xff] }
 0xa8d   :  { %v4644_v48 = vmul.f32 1.442695, %v4622_v14  ;;  %v21818_v14 = vld [vmem:[#allocation13_spill] sm:$0xff] }
 0xa8e   :  { %v4591_v13 = vpop.xlane.xlu0 %4590 }
 0xa8f   :  { %17405 = vpow2.f32 %v4644_v48  ;;  %v4623_v37 = vsub.f32 %v19196_v3, %v4591_v13 }
 0xa90   :  { %v19249_v40 = vpop.eup %17401 }
 0xa91   :  { %v19251_v28 = vpop.eup %17403  ;;  %v4646_v63 = vmul.f32 1.442695, %v4623_v37  ;;  %v4673_v29 = vsel %vm1254_vm3, %v19249_v40, 0.0 }
 0xa92   :  { %v4603_v57 = vpop.xlane.xlu0 %4602  ;;  %4674 = vadd.xlane.f32.xlu0 %v4673_v29  ;;  %v4670_v47 = vsel %vm1254_vm3, %v19251_v28, 0.0  ;;  %v4600_v29 = vpop.xlane.xlu1 %4599 }
 0xa93   :  { %17407 = vpow2.f32 %v4646_v63  ;;  %v4627_v23 = vsub.f32 %v19202_v16, %v4603_v57  ;;  %4671 = vadd.xlane.f32.xlu1 %v4670_v47 }
 0xa95   :  { %v4654_v41 = vmul.f32 1.442695, %v4627_v23 }
 0xa97   :  { %17409 = vpow2.f32 %v4654_v41 }
 0xa99   :  { %v19258_v3 = vpop.eup %17405  ;;  %v4615_v47 = vpop.xlane.xlu0 %4614 }
 0xa9a   :  { %v4682_v17 = vsel %vm1254_vm3, %v19258_v3, 0.0 }
 0xa9b   :  { %4683 = vadd.xlane.f32.xlu1 %v4682_v17  ;;  %v4626_v17 = vsub.f32 %v19204_v39, %v4600_v29 }
 0xa9d   :  { %v19262_v21 = vpop.eup %17407  ;;  %v4652_v12 = vmul.f32 1.442695, %v4626_v17 }
 0xa9e   :  { %v4685_v24 = vsel %vm1254_vm3, %v19262_v21, 0.0 }
 0xa9f   :  { %4686 = vadd.xlane.f32.xlu0 %v4685_v24  ;;  %v4631_v24 = vsub.f32 %v19210_v53, %v4615_v47  ;;  %17411 = vpow2.f32 %v4652_v12 }
 0xaa1   :  { %v19266_v25 = vpop.eup %17409  ;;  %v4662_v44 = vmul.f32 1.442695, %v4631_v24 }
 0xaa2   :  { %v4697_v16 = vsel %vm1254_vm3, %v19266_v25, 0.0 }
 0xaa3   :  { %4698 = vadd.xlane.f32.xlu0 %v4697_v16  ;;  %17413 = vpow2.f32 %v4662_v44 }
 0xaac   :  { %17162 = vrot.lane.b32.xlu1 %v21815_v1, %s17786_s22 }
 0xab0   :  { %17172 = vrot.lane.b32.xlu1 %v21816_v20, %s17786_s22 }
 0xab4   :  { %17177 = vrot.lane.b32.xlu1 %v21817_v30, %s17786_s22 }
 0xab9   :  { %17167 = vrot.lane.b32.xlu0 %v21818_v14, %s17786_s22 }
 0xaba   :  { %v19278_v48 = vpop.f32.mrb[52].mxu0 }
 0xabb   :  { %21819 = vst [vmem:[#allocation9_spill] sm:$0xff] %v19278_v48  ;;  %v19282_v13 = vadd.f32 %v19278_v48, %v18884_v18  ;;  %v19284_v37 = vpop.f32.mrb[53].mxu0 }
 0xabc   :  { %21820 = vst [vmem:[#allocation20_spill] sm:$0xff] %v19284_v37  ;;  %v19288_v63 = vadd.f32 %v19284_v37, %v18892_v11 }
 0xabe   :  { %v19290_v57 = vpop.f32.mrb[54].mxu0 }
 0xabf   :  { %21821 = vst [vmem:[#allocation28_spill] sm:$0xff] %v19290_v57  ;;  %v19294_v23 = vadd.f32 %v19290_v57, %v18902_v60  ;;  %v19296_v41 = vpop.f32.mrb[55].mxu0 }
 0xac0   :  { %21822 = vst [vmem:[#allocation13_spill] sm:$0xff] %v19296_v41  ;;  %v19300_v18 = vadd.f32 %v19296_v41, %v18908_v26  ;;  %v19316_v26 = vpop.eup %17411 }
 0xac1   :  { %v19318_v39 = vpop.eup %17413 }
 0xac2   :  { %v19304_v11 = vpop.f32.mrb[56].mxu0  ;;  %v4709_v53 = vsel %vm1254_vm3, %v19318_v39, 0.0 }
 0xac3   :  { %21823 = vst [vmem:[#allocation47_spill] sm:$0xff] %v19304_v11  ;;  %v19308_v16 = vadd.f32 %v19304_v11, %v18914_v32  ;;  %v19310_v0 = vpop.f32.mrb[57].mxu0  ;;  %v4694_v32 = vsel %vm1254_vm3, %v19316_v26, 0.0 }
 0xac4   :  { %21824 = vst [vmem:[#allocation48_spill] sm:$0xff] %v19310_v0  ;;  %v19314_v60 = vadd.f32 %v19310_v0, %v18920_v34 }
 0xad8   :  { %4710 = vadd.xlane.f32.xlu0 %v4709_v53  ;;  %4695 = vadd.xlane.f32.xlu1 %v4694_v32 }
 0xae9   :  { %17187 = vrot.lane.b32.xlu1 %v21789_v54, %s17787_s23 }
 0xaed   :  { %5549 = vrot.lane.b32.xlu1 %v18053_v36, %s17788_s24 }
 0xaee   :  { %17182 = vrot.lane.b32.xlu0 %v21790_v50, %s17787_s23  ;;  %v21828_v50 = vld [vmem:[#allocation16_spill] sm:$0xff] }
 0xaf1   :  { %5729 = vrot.lane.b32.xlu1 %v18091_v49, %s17788_s24 }
 0xaf2   :  { %5547 = vrot.lane.b32.xlu0 %v18047_v33, %s17788_s24  ;;  %v21827_v33 = vld [vmem:[#allocation19_spill] sm:$0xff] }
 0xaf5   :  { %17197 = vrot.lane.b32.xlu1 %v21792_v5, %s17787_s23 }
 0xaf6   :  { %17192 = vrot.lane.b32.xlu0 %v21791_v38, %s17787_s23 }
 0xaf8   :  { %v19338_v34 = vpop.f32.mrb[58].mxu0 }
 0xaf9   :  { %21825 = vst [vmem:[#allocation49_spill] sm:$0xff] %v19338_v34  ;;  %5913 = vrot.lane.b32.xlu1 %v18143_v6, %s17788_s24  ;;  %v19344_v36 = vadd.f32 %v19338_v34, %v18957_v42  ;;  %v19346_v54 = vpop.f32.mrb[59].mxu0  ;;  %v21829_v6 = vld [vmem:[#allocation23_spill] sm:$0xff]  ;;  %v4612_v42 = vpop.xlane.xlu1 %4611 }
 0xafa   :  { %21826 = vst [vmem:[#allocation50_spill] sm:$0xff] %v19346_v54  ;;  %5731 = vrot.lane.b32.xlu0 %v18099_v52, %s17788_s24  ;;  %v19352_v49 = vadd.f32 %v19346_v54, %v21827_v33  ;;  %v4630_v44 = vsub.f32 %v19212_v10, %v4612_v42 }
 0xafc   :  { %v4660_v47 = vmul.f32 1.442695, %v4630_v44 }
 0xafe   :  { %5911 = vrot.lane.b32.xlu0 %v21828_v50, %s17788_s24  ;;  %17415 = vpow2.f32 %v4660_v47 }
 0xb00   :  { %v19356_v38 = vpop.f32.mrb[60].mxu0 }
 0xb01   :  { %v5538_v5 = vpop.f32.mrb[61].mxu0 }
 0xb02   :  { %6093 = vrot.lane.b32.xlu0 %v21829_v6, %s17788_s24  ;;  %v19367_v33 = vmul.f32 0.35355338, %v5538_v5 }
 0xb04   :  { %v6200_v42 = vsel %vm1254_vm3, %v19367_v33, -inf }
 0xb08   :  { %v15953_v12 = vpop.f32.mrb[62].mxu0  ;;  %v19363_v53 = vpop.eup %17415 }
 0xb09   :  { %v5720_v29 = vpop.f32.mrb[63].mxu0  ;;  %v4706_v50 = vsel %vm1254_vm3, %v19363_v53, 0.0  ;;  %v19375_v47 = vmul.f32 0.35355338, %v15953_v12 }
 0xb0a   :  { %v19371_v6 = vmul.f32 0.35355338, %v5720_v29 }
 0xb0b   :  { %v6215_v29 = vsel %vm1254_vm3, %v19375_v47, -inf }
 0xb0c   :  { %v6212_v34 = vsel %vm1254_vm3, %v19371_v6, -inf }
 0xb10   :  { %v15967_v52 = vpop.f32.mrb[64].mxu0 }
 0xb11   :  { %v19361_v17 = vpop.f32.mrb[65].mxu0  ;;  %v19379_v5 = vmul.f32 0.35355338, %v15967_v52  ;;  %v21830_v52 = vld [vmem:[#allocation25_spill] sm:$0xff] }
 0xb13   :  { %v6227_v12 = vsel %vm1254_vm3, %v19379_v5, -inf }
 0xb18   :  { %v15981_v24 = vpop.f32.mrb[66].mxu0 }
 0xb19   :  { %v19365_v32 = vpop.f32.mrb[67].mxu0  ;;  %v19383_v4 = vmul.f32 0.35355338, %v15981_v24 }
 0xb1b   :  { %v6239_v15 = vsel %vm1254_vm3, %v19383_v4, -inf }
 0xb1d   :  { %4707 = vadd.xlane.f32.xlu1 %v4706_v50 }
 0xb1f   :  { %v4675_v44 = vpop.xlane.xlu0 %4674 }
 0xb20   :  { %v4672_v10 = vpop.xlane.xlu1 %4671 }
 0xb21   :  { %17417 = vrcp.f32 %v4672_v10  ;;  %6201 = vmax.xlane.f32.xlu0 %v6200_v42 }
 0xb22   :  { %17419 = vrcp.f32 %v4675_v44 }
 0xb25   :  { %6213 = vmax.xlane.f32.xlu0 %v6212_v34 }
 0xb28   :  { %v4684_v54 = vpop.xlane.xlu1 %4683 }
 0xb29   :  { %17421 = vrcp.f32 %v4684_v54  ;;  %6216 = vmax.xlane.f32.xlu0 %v6215_v29 }
 0xb2b   :  { %v17418_v50 = vpop.eup %17417 }
 0xb2c   :  { %v4687_v10 = vpop.xlane.xlu0 %4686  ;;  %v17163_v42 = vpop.permute.xlu1 %17162  ;;  %v4730_v11 = vmul.f32 %v17418_v50, %v19251_v28 }
 0xb2d   :  { %v17165_v34 = vunpack.i.h.bf16 %v17163_v42  ;;  %v17164_v44 = vunpack.i.l.bf16 %v17163_v42  ;;  %6228 = vmax.xlane.f32.xlu0 %v6227_v12  ;;  %17423 = vrcp.f32 %v4687_v10  ;;  %v17420_v29 = vpop.eup %17419 }
 0xb2e   :  { %6095 = vrot.lane.b32.xlu1 %v21830_v52, %s17788_s24  ;;  %15888 = vmatprep.mubr.msk.f32.mxu1 %vm1254_vm3, %v4730_v11  ;;  %v4731_v50 = vmul.f32 %v17420_v29, %v19249_v40  ;;  %v19403_v29 = vmul.f32 0.35355338, %v19361_v17 }
 0xb2f   :  { %v16701_v54 = vpack.c.bf16 %v17165_v34, %v17164_v44 }
 0xb30   :  { %v4699_v24 = vpop.xlane.xlu0 %4698  ;;  %v17173_v0 = vpop.permute.xlu1 %17172 }
 0xb31   :  { %16702 = vmatprep.subr.bf16.mxu1 %v16701_v54  ;;  %6240 = vmax.xlane.f32.xlu0 %v6239_v15  ;;  %v17175_v12 = vunpack.i.h.bf16 %v17173_v0  ;;  %v17174_v52 = vunpack.i.l.bf16 %v17173_v0  ;;  %17425 = vrcp.f32 %v4699_v24 }
 0xb32   :  { %16704 = vmatpush3.bf16.msra.mxu1 %v16701_v54 }
 0xb33   :  { %v17422_v28 = vpop.eup %17421  ;;  %v16717_v54 = vpack.c.bf16 %v17175_v12, %v17174_v52 }
 0xb34   :  { %v17168_v42 = vpop.permute.xlu0 %17167  ;;  %v4734_v10 = vmul.f32 %v17422_v28, %v19258_v3  ;;  %v17178_v34 = vpop.permute.xlu1 %17177  ;;  %v19400_v3 = vmul.f32 0.35355338, %v19356_v38  ;;  %v19408_v28 = vmul.f32 0.35355338, %v19365_v32 }
 0xb35   :  { %v17170_v61 = vunpack.i.h.bf16 %v17168_v42  ;;  %v17169_v11 = vunpack.i.l.bf16 %v17168_v42  ;;  %15889 = vmatmul.mubr.msk.f32.vlgmr.msra.gmra.mrb[76].mxu1 %vm1254_vm3, %v4731_v50  ;;  %v17180_v19 = vunpack.i.h.bf16 %v17178_v34  ;;  %v17179_v15 = vunpack.i.l.bf16 %v17178_v34 }
 0xb36   :  { %15902 = vmatprep.mubr.msk.f32.mxu1 %vm1254_vm3, %v4734_v10 }
 0xb37   :  { %v16709_v44 = vpack.c.bf16 %v17170_v61, %v17169_v11  ;;  %v17424_v35 = vpop.eup %17423  ;;  %v16725_v0 = vpack.c.bf16 %v17180_v19, %v17179_v15  ;;  %v6203_v61 = vsel %vm1254_vm3, %v19400_v3, -inf  ;;  %v6236_v19 = vsel %vm1254_vm3, %v19408_v28, -inf }
 0xb38   :  { %v4735_v40 = vmul.f32 %v17424_v35, %v19262_v21  ;;  %v6224_v35 = vsel %vm1254_vm3, %v19403_v29, -inf }
 0xb39   :  { %16710 = vmatprep.subr.bf16.mxu1 %v16709_v44 }
 0xb3a   :  { %16712 = vmatpush3.bf16.msra.mxu1 %v16709_v44 }
 0xb3b   :  { %16718 = vmatprep.subr.bf16.mxu1 %v16717_v54  ;;  %v17426_v50 = vpop.eup %17425 }
 0xb3c   :  { %v4739_v52 = vmul.f32 %v17426_v50, %v19266_v25 }
 0xb3d   :  { %15903 = vmatmul.mubr.msk.f32.vlgmr.msra.gmra.mrb[78].mxu1 %vm1254_vm3, %v4735_v40 }
 0xb3e   :  { %16720 = vmatpush3.bf16.msra.mxu1 %v16717_v54 }
 0xb3f   :  { %16726 = vmatprep.subr.bf16.mxu1 %v16725_v0 }
 0xb52   :  { %6204 = vmax.xlane.f32.xlu1 %v6203_v61 }
 0xb56   :  { %6225 = vmax.xlane.f32.xlu1 %v6224_v35 }
 0xb5a   :  { %6237 = vmax.xlane.f32.xlu1 %v6236_v19 }
 0xb65   :  { %v4696_v21 = vpop.xlane.xlu1 %4695  ;;  %v4711_v38 = vpop.xlane.xlu0 %4710 }
 0xb66   :  { %17427 = vrcp.f32 %v4696_v21 }
 0xb67   :  { %17429 = vrcp.f32 %v4711_v38 }
 0xb69   :  { %v17183_v17 = vpop.permute.xlu0 %17182  ;;  %v17188_v24 = vpop.permute.xlu1 %17187 }
 0xb6a   :  { %v17185_v32 = vunpack.i.h.bf16 %v17183_v17  ;;  %v17184_v10 = vunpack.i.l.bf16 %v17183_v17 }
 0xb6b   :  { %17202 = vrot.lane.b32.xlu1 %v21799_v22, %s17787_s23 }
 0xb6c   :  { %v16735_v11 = vpack.c.bf16 %v17185_v32, %v17184_v10  ;;  %v17190_v10 = vunpack.i.h.bf16 %v17188_v24 }
 0xb6d   :  { %v5548_v22 = vpop.permute.xlu0 %5547  ;;  %v5550_v34 = vpop.permute.xlu1 %5549 }
 0xb70   :  { %v17428_v42 = vpop.eup %17427 }
 0xb71   :  { %v4738_v12 = vmul.f32 %v17428_v42, %v19316_v26  ;;  %v17193_v44 = vpop.permute.xlu0 %17192  ;;  %v5730_v15 = vpop.permute.xlu1 %5729 }
 0xb72   :  { %v17430_v42 = vpop.eup %17429 }
 0xb73   :  { %15916 = vmatprep.mubr.msk.f32.mxu1 %vm1254_vm3, %v4738_v12  ;;  %v17189_v12 = vunpack.i.l.bf16 %v17188_v24  ;;  %v4743_v38 = vmul.f32 %v17430_v42, %v19318_v39 }
 0xb74   :  { %15917 = vmatmul.mubr.msk.f32.vlgmr.msra.gmra.mrb[80].mxu1 %vm1254_vm3, %v4739_v52 }
 0xb75   :  { %16728 = vmatpush3.bf16.msra.mxu1 %v16725_v0  ;;  %v5732_v54 = vpop.permute.xlu0 %5731  ;;  %v17198_v40 = vpop.permute.xlu1 %17197 }
 0xb76   :  { %16737 = vmatprep.subr.msk.bf16.mxu1 %vm18205_vm2, %v16735_v11 }
 0xb79   :  { %v5912_v61 = vpop.permute.xlu0 %5911  ;;  %v5914_v26 = vpop.permute.xlu1 %5913 }
 0xb7d   :  { %v6094_v25 = vpop.permute.xlu0 %6093 }
 0xbaa   :  { %v4708_v35 = vpop.xlane.xlu1 %4707 }
 0xbab   :  { %17431 = vrcp.f32 %v4708_v35  ;;  %v16747_v35 = vpack.c.bf16 %v17190_v10, %v17189_v12 }
 0xbae   :  { %v6202_v19 = vpop.xlane.xlu0 %6201 }
 0xbaf   :  { %v6248_v21 = vsub.f32 %v19367_v33, %v6202_v19 }
 0xbb1   :  { %v6264_v0 = vmul.f32 1.442695, %v6248_v21 }
 0xbb2   :  { %v6214_v17 = vpop.xlane.xlu0 %6213 }
 0xbb3   :  { %17433 = vpow2.f32 %v6264_v0  ;;  %v6252_v50 = vsub.f32 %v19371_v6, %v6214_v17  ;;  %v17195_v6 = vunpack.i.h.bf16 %v17193_v44 }
 0xbb5   :  { %v17432_v32 = vpop.eup %17431  ;;  %v6272_v52 = vmul.f32 1.442695, %v6252_v50 }
 0xbb6   :  { %v4742_v57 = vmul.f32 %v17432_v32, %v19363_v53  ;;  %v17194_v53 = vunpack.i.l.bf16 %v17193_v44  ;;  %v17199_v44 = vunpack.i.l.bf16 %v17198_v40 }
 0xbb7   :  { %17435 = vpow2.f32 %v6272_v52 }
 0xbb8   :  { %15930 = vmatprep.mubr.msk.f32.mxu1 %vm1254_vm3, %v4742_v57  ;;  %v16759_v24 = vpack.c.bf16 %v17195_v6, %v17194_v53 }
 0xbb9   :  { %15931 = vmatmul.mubr.msk.f32.vlgmr.msra.gmra.mrb[82].mxu1 %vm1254_vm3, %v4743_v38 }
 0xbba   :  { %16740 = vmatpush3.bf16.xpose.msk.msra.mxu1 %vm18205_vm2, %v16735_v11  ;;  %15944 = vmatprep.mubr.msk.f32.mxu1 %vm531_vm1, %v5548_v22  ;;  %v17200_v22 = vunpack.i.h.bf16 %v17198_v40 }
 0xbbb   :  { %16749 = vmatprep.subr.msk.bf16.mxu1 %vm18205_vm2, %v16747_v35 }
 0xbbc   :  { %v16771_v19 = vpack.c.bf16 %v17200_v22, %v17199_v44 }
 0xbbd   :  { %v19433_v33 = vpop.eup %17433 }
 0xbbe   :  { %v6296_v39 = vsel %vm1254_vm3, %v19433_v33, 0.0 }
 0xbbf   :  { %6297 = vadd.xlane.f32.xlu1 %v6296_v39 }
 0xbc1   :  { %v19437_v57 = vpop.eup %17435  ;;  %15945 = vmatmul.mubr.msk.f32.vlgmr.msra.gmra.mrb[84].mxu1 %vm531_vm1, %v5550_v34  ;;  %v6217_v34 = vpop.xlane.xlu0 %6216 }
 0xbc2   :  { %16752 = vmatpush3.bf16.xpose.msk.msra.mxu1 %vm18205_vm2, %v16747_v35  ;;  %15958 = vmatprep.mubr.msk.f32.mxu1 %vm531_vm1, %v5730_v15  ;;  %v6308_v11 = vsel %vm1254_vm3, %v19437_v57, 0.0  ;;  %v6096_v15 = vpop.permute.xlu1 %6095  ;;  %v6253_v40 = vsub.f32 %v19375_v47, %v6217_v34 }
 0xbc3   :  { %16761 = vmatprep.subr.msk.bf16.mxu1 %vm18205_vm2, %v16759_v24  ;;  %6309 = vadd.xlane.f32.xlu1 %v6308_v11 }
 0xbc4   :  { %v6274_v0 = vmul.f32 1.442695, %v6253_v40 }
 0xbc9   :  { %15959 = vmatmul.mubr.msk.f32.vlgmr.msra.gmra.mrb[86].mxu1 %vm531_vm1, %v5732_v54  ;;  %v6229_v54 = vpop.xlane.xlu0 %6228 }
 0xbca   :  { %16764 = vmatpush3.bf16.xpose.msk.msra.mxu1 %vm18205_vm2, %v16759_v24  ;;  %15972 = vmatprep.mubr.msk.f32.mxu1 %vm531_vm1, %v5912_v61  ;;  %v6257_v17 = vsub.f32 %v19379_v5, %v6229_v54 }
 0xbcb   :  { %16773 = vmatprep.subr.msk.bf16.mxu1 %vm18205_vm2, %v16771_v19 }
 0xbd1   :  { %15973 = vmatmul.mubr.msk.f32.vlgmr.msra.gmra.mrb[88].mxu1 %vm531_vm1, %v5914_v26  ;;  %v6241_v26 = vpop.xlane.xlu0 %6240 }
 0xbd2   :  { %16776 = vmatpush3.bf16.xpose.msk.msra.mxu1 %vm18205_vm2, %v16771_v19  ;;  %15986 = vmatprep.mubr.msk.f32.mxu1 %vm531_vm1, %v6094_v25  ;;  %v6282_v25 = vmul.f32 1.442695, %v6257_v17  ;;  %v6261_v32 = vsub.f32 %v19383_v4, %v6241_v26  ;;  %vm13993_vm2 = vcmask 1044484  }
 0xbd4   :  { %v6290_v47 = vmul.f32 1.442695, %v6261_v32  ;;  %v7809_v32 = vld [vmem:[%s21596_s1 + $0x38] sm:$0xff] }
 0xbd9   :  { %15987 = vmatmul.mubr.msk.f32.vlgmr.msra.gmra.mrb[90].mxu1 %vm531_vm1, %v6096_v15 }
 0xbdf   :  { %v6205_v21 = vpop.xlane.xlu1 %6204 }
 0xbe0   :  { %v6249_v61 = vsub.f32 %v19400_v3, %v6205_v21 }
 0xbe2   :  { %v6266_v50 = vmul.f32 1.442695, %v6249_v61 }
 0xbe3   :  { %v6226_v42 = vpop.xlane.xlu1 %6225 }
 0xbe4   :  { %17437 = vpow2.f32 %v6266_v50  ;;  %v6256_v58 = vsub.f32 %v19403_v29, %v6226_v42  ;;  %v7803_v42 = vld [vmem:[%s21596_s1 + $0x8] sm:$0xff] }
 0xbe5   :  { %17439 = vpow2.f32 %v6274_v0 }
 0xbe6   :  { %v6280_v10 = vmul.f32 1.442695, %v6256_v58  ;;  %v7805_v58 = vld [vmem:[%s21596_s1 + $0x18] sm:$0xff] }
 0xbe7   :  { %v6238_v12 = vpop.xlane.xlu1 %6237 }
 0xbe8   :  { %17441 = vpow2.f32 %v6280_v10  ;;  %v6260_v0 = vsub.f32 %v19408_v28, %v6238_v12  ;;  %v7808_v28 = vld [vmem:[%s21596_s1 + $0x30] sm:$0xff] }
 0xbe9   :  { %17443 = vpow2.f32 %v6282_v25  ;;  %v7807_v25 = vld [vmem:[%s21596_s1 + $0x28] sm:$0xff] }
 0xbea   :  { %17445 = vpow2.f32 %v6290_v47  ;;  %v6288_v17 = vmul.f32 1.442695, %v6260_v0 }
 0xbeb   :  { %v17203_v52 = vpop.permute.xlu1 %17202 }
 0xbec   :  { %v17205_v3 = vunpack.i.h.bf16 %v17203_v52  ;;  %v17204_v38 = vunpack.i.l.bf16 %v17203_v52  ;;  %17447 = vpow2.f32 %v6288_v17 }
 0xbee   :  { %v19463_v35 = vpop.eup %17437  ;;  %v16777_v5 = vpack.c.bf16 %v17205_v3, %v17204_v38 }
 0xbef   :  { %v6299_v6 = vsel %vm1254_vm3, %v19463_v35, 0.0  ;;  %v19467_v29 = vpop.eup %17439 }
 0xbf0   :  { %6300 = vadd.xlane.f32.xlu0 %v6299_v6  ;;  %16778 = vmatprep.subr.bf16.mxu0 %v16777_v5  ;;  %v6311_v53 = vsel %vm1254_vm3, %v19467_v29, 0.0 }
 0xbf1   :  { %16780 = vmatpush3.bf16.msra.mxu0 %v16777_v5 }
 0xbf2   :  { %v19469_v4 = vpop.eup %17441 }
 0xbf3   :  { %v6320_v39 = vsel %vm1254_vm3, %v19469_v4, 0.0  ;;  %v19475_v24 = vpop.eup %17443 }
 0xbf4   :  { %6312 = vadd.xlane.f32.xlu0 %v6311_v53  ;;  %6321 = vadd.xlane.f32.xlu1 %v6320_v39  ;;  %v6323_v11 = vsel %vm1254_vm3, %v19475_v24, 0.0  ;;  %v19479_v22 = vpop.eup %17445 }
 0xbf5   :  { %v6335_v44 = vsel %vm1254_vm3, %v19479_v22, 0.0 }
 0xbf6   :  { %v19524_v50 = vpop.eup %17447 }
 0xbf7   :  { %v6332_v26 = vsel %vm1254_vm3, %v19524_v50, 0.0 }
 0xbf8   :  { %6324 = vadd.xlane.f32.xlu0 %v6323_v11 }
 0xbfc   :  { %6336 = vadd.xlane.f32.xlu0 %v6335_v44 }
 0xc05   :  { %17212 = vrot.lane.b32.xlu1 %v21800_v46, %s17787_s23 }
 0xc08   :  { %v19485_v19 = vpop.f32.mrb[76].mxu1 }
 0xc09   :  { %21831 = vst [vmem:[#allocation19_spill] sm:$0xff] %v19485_v19  ;;  %v19489_v34 = vadd.f32 %v19485_v19, %v19098_v62  ;;  %v19491_v15 = vpop.f32.mrb[77].mxu1  ;;  %v21835_v62 = vld [vmem:[#allocation10_spill] sm:$0xff] }
 0xc0a   :  { %21832 = vst [vmem:[#allocation16_spill] sm:$0xff] %v19491_v15  ;;  %v19495_v54 = vadd.f32 %v19491_v15, %v19104_v27  ;;  %v7802_v27 = vld [vmem:[%s21596_s1] sm:$0xff] }
 0xc10   :  { %v19497_v40 = vpop.f32.mrb[78].mxu1 }
 0xc11   :  { %21833 = vst [vmem:[#allocation23_spill] sm:$0xff] %v19497_v40  ;;  %v19501_v21 = vadd.f32 %v19497_v40, %v19110_v8  ;;  %v19503_v61 = vpop.f32.mrb[79].mxu1  ;;  %v7804_v8 = vld [vmem:[%s21596_s1 + $0x10] sm:$0xff] }
 0xc12   :  { %21834 = vst [vmem:[#allocation25_spill] sm:$0xff] %v19503_v61  ;;  %v19507_v46 = vadd.f32 %v19503_v61, %v19116_v45  ;;  %17207 = vrot.lane.b32.xlu0 %v21835_v62, %s17787_s23  ;;  %v7806_v45 = vld [vmem:[%s21596_s1 + $0x20] sm:$0xff] }
 0xc16   :  { %7811 = vperm.xlu0 %16879, %v7802_v27  }
 0xc1a   :  { %7817 = vperm.xlu0 %16879, %v7804_v8  }
 0xc1e   :  { %7823 = vperm.xlu0 %16879, %v7806_v45  }
 0xc22   :  { %7829 = vperm.xlu0 %16879, %v7808_v28  }
 0xc29   :  { %6333 = vadd.xlane.f32.xlu1 %v6332_v26 }
 0xc3a   :  { %17217 = vrot.lane.b32.xlu1 %v21801_v51, %s17787_s23 }
 0xc3e   :  { %7814 = vperm.xlu1 %16880, %v7803_v42  }
 0xc42   :  { %7820 = vperm.xlu1 %16880, %v7805_v58  }
 0xc46   :  { %7826 = vperm.xlu1 %16880, %v7807_v25  }
 0xc47   :  { %v19542_v51 = vpop.f32.mrb[80].mxu1 }
 0xc48   :  { %21836 = vst [vmem:[#allocation10_spill] sm:$0xff] %v19542_v51  ;;  %v19546_v10 = vadd.f32 %v19542_v51, %v19145_v59  ;;  %v19548_v12 = vpop.f32.mrb[81].mxu1 }
 0xc49   :  { %21837 = vst [vmem:[#allocation51_spill] sm:$0xff] %v19548_v12  ;;  %v19552_v47 = vadd.f32 %v19548_v12, %v19151_v43 }
 0xc4a   :  { %7832 = vperm.xlu1 %16880, %v7809_v32  }
 0xc4c   :  { %v6298_v52 = vpop.xlane.xlu1 %6297 }
 0xc4d   :  { %17449 = vrcp.f32 %v6298_v52 }
 0xc50   :  { %v6310_v5 = vpop.xlane.xlu1 %6309 }
 0xc51   :  { %17451 = vrcp.f32 %v6310_v5 }
 0xc57   :  { %v17450_v3 = vpop.eup %17449 }
 0xc58   :  { %v6360_v38 = vmul.f32 %v17450_v3, %v19433_v33 }
 0xc5a   :  { %15993 = vmatprep.mubr.msk.f32.mxu0 %vm1254_vm3, %v6360_v38 }
 0xc5b   :  { %v17452_v11 = vpop.eup %17451 }
 0xc5c   :  { %v6364_v27 = vmul.f32 %v17452_v11, %v19437_v57 }
 0xc7d   :  { %v6301_v6 = vpop.xlane.xlu0 %6300 }
 0xc7e   :  { %17453 = vrcp.f32 %v6301_v6 }
 0xc81   :  { %v6313_v59 = vpop.xlane.xlu0 %6312  ;;  %v6322_v53 = vpop.xlane.xlu1 %6321 }
 0xc82   :  { %17455 = vrcp.f32 %v6313_v59 }
 0xc83   :  { %17457 = vrcp.f32 %v6322_v53 }
 0xc85   :  { %v6325_v39 = vpop.xlane.xlu0 %6324  ;;  %v17213_v0 = vpop.permute.xlu1 %17212 }
 0xc86   :  { %17459 = vrcp.f32 %v6325_v39  ;;  %v17215_v17 = vunpack.i.h.bf16 %v17213_v0  ;;  %v17214_v26 = vunpack.i.l.bf16 %v17213_v0 }
 0xc88   :  { %v17454_v44 = vpop.eup %17453  ;;  %v16793_v52 = vpack.c.bf16 %v17215_v17, %v17214_v26 }
 0xc89   :  { %v6337_v43 = vpop.xlane.xlu0 %6336  ;;  %v6361_v62 = vmul.f32 %v17454_v44, %v19463_v35 }
 0xc8a   :  { %17461 = vrcp.f32 %v6337_v43  ;;  %v7860_v43 = vld [vmem:[%s21598_s3 + $0x10] sm:$0xff] }
 0xc8b   :  { %15994 = vmatmul.mubr.msk.f32.vlgmr.msra.gmra.mrb[68].mxu0 %vm1254_vm3, %v6361_v62 }
 0xc8c   :  { %v19559_v33 = vpop.f32.mrb[82].mxu1  ;;  %16007 = vmatprep.mubr.msk.f32.mxu0 %vm1254_vm3, %v6364_v27  ;;  %v17456_v25 = vpop.eup %17455 }
 0xc8d   :  { %21838 = vst [vmem:[#allocation52_spill] sm:$0xff] %v19559_v33  ;;  %v19564_v8 = vadd.f32 %v19559_v33, %v19170_v31  ;;  %v19566_v45 = vpop.f32.mrb[83].mxu1  ;;  %v17208_v28 = vpop.permute.xlu0 %17207  ;;  %v6365_v31 = vmul.f32 %v17456_v25, %v19467_v29 }
 0xc8e   :  { %21839 = vst [vmem:[#allocation53_spill] sm:$0xff] %v19566_v45  ;;  %v19570_v35 = vadd.f32 %v19566_v45, %v19177_v7  ;;  %v17210_v57 = vunpack.i.h.bf16 %v17208_v28  ;;  %v17209_v42 = vunpack.i.l.bf16 %v17208_v28  ;;  %v17458_v32 = vpop.eup %17457 }
 0xc8f   :  { %v6368_v59 = vmul.f32 %v17458_v32, %v19469_v4 }
 0xc90   :  { %v16785_v58 = vpack.c.bf16 %v17210_v57, %v17209_v42  ;;  %v17460_v38 = vpop.eup %17459 }
 0xc91   :  { %v6369_v39 = vmul.f32 %v17460_v38, %v19475_v24 }
 0xc92   :  { %16786 = vmatprep.subr.bf16.mxu0 %v16785_v58 }
 0xc93   :  { %16788 = vmatpush3.bf16.msra.mxu0 %v16785_v58 }
 0xc94   :  { %v15946_v3 = vpop.f32.mrb[84].mxu1  ;;  %16794 = vmatprep.subr.bf16.mxu0 %v16793_v52 }
 0xc95   :  { %v19573_v5 = vmul.f32 0.35355338, %v15946_v3  ;;  %v5629_v6 = vpop.f32.mrb[85].mxu1 }
 0xc96   :  { %v19576_v7 = vmul.f32 0.35355338, %v5629_v6  ;;  %16008 = vmatmul.mubr.msk.f32.vlgmr.msra.gmra.mrb[70].mxu0 %vm1254_vm3, %v6365_v31 }
 0xc97   :  { %v6209_v53 = vsel %vm1254_vm3, %v19573_v5, -inf  ;;  %16796 = vmatpush3.bf16.msra.mxu0 %v16793_v52  ;;  %16021 = vmatprep.mubr.msk.f32.mxu0 %vm1254_vm3, %v6368_v59  ;;  %v7858_v59 = vld [vmem:[%s21598_s3] sm:$0xff] }
 0xc98   :  { %6210 = vmax.xlane.f32.xlu1 %v6209_v53  ;;  %v6206_v29 = vsel %vm1254_vm3, %v19576_v7, -inf  ;;  %v7859_v53 = vld [vmem:[%s21598_s3 + $0x8] sm:$0xff] }
 0xc99   :  { %6207 = vmax.xlane.f32.xlu0 %v6206_v29 }
 0xc9a   :  { %16022 = vmatmul.mubr.msk.f32.vlgmr.msra.gmra.mrb[72].mxu0 %vm1254_vm3, %v6369_v39 }
 0xc9c   :  { %v15960_v4 = vpop.f32.mrb[86].mxu1 }
 0xc9d   :  { %v5811_v11 = vpop.f32.mrb[87].mxu1  ;;  %v19588_v62 = vmul.f32 0.35355338, %v15960_v4 }
 0xc9e   :  { %v19586_v44 = vmul.f32 0.35355338, %v5811_v11  ;;  %v16809_v11 = vpack.c.bf16 %v7859_v53, %v7858_v59  ;;  %v7866_v53 = vld [vmem:[%s21598_s3 + $0x40] sm:$0xff] }
 0xc9f   :  { %v6221_v17 = vsel %vm1254_vm3, %v19588_v62, -inf }
 0xca0   :  { %v6218_v0 = vsel %vm1254_vm3, %v19586_v44, -inf }
 0xca1   :  { %6219 = vmax.xlane.f32.xlu0 %v6218_v0  ;;  %v17462_v0 = vpop.eup %17461 }
 0xca4   :  { %v15974_v27 = vpop.f32.mrb[88].mxu1 }
 0xca5   :  { %v19594_v28 = vmul.f32 0.35355338, %v15974_v27  ;;  %v5993_v24 = vpop.f32.mrb[89].mxu1  ;;  %6222 = vmax.xlane.f32.xlu0 %v6221_v17  ;;  %v7861_v27 = vld [vmem:[%s21598_s3 + $0x18] sm:$0xff] }
 0xca6   :  { %v19596_v26 = vmul.f32 0.35355338, %v5993_v24  ;;  %v7812_v24 = vpop.permute.xlu0 %7811 }
 0xca7   :  { %v6233_v57 = vsel %vm1254_vm3, %v19594_v28, -inf }
 0xca8   :  { %v6230_v42 = vsel %vm1254_vm3, %v19596_v26, -inf }
 0xca9   :  { %6234 = vmax.xlane.f32.xlu0 %v6233_v57  ;;  %6231 = vmax.xlane.f32.xlu1 %v6230_v42  ;;  %v6373_v42 = vmul.f32 %v17462_v0, %v19479_v22 }
 0xcac   :  { %v15988_v58 = vpop.f32.mrb[90].mxu1 }
 0xcad   :  { %v19602_v25 = vmul.f32 0.35355338, %v15988_v58  ;;  %v6175_v32 = vpop.f32.mrb[91].mxu1  ;;  %v16813_v58 = vpack.c.bf16 %v7861_v27, %v7860_v43  ;;  %v7870_v43 = vld [vmem:[%s21598_s3 + $0x60] sm:$0xff]  ;;  %v7871_v27 = vld [vmem:[%s21598_s3 + $0x68] sm:$0xff] }
 0xcae   :  { %v19604_v52 = vmul.f32 0.35355338, %v6175_v32  ;;  %v7862_v32 = vld [vmem:[%s21598_s3 + $0x20] sm:$0xff] }
 0xcaf   :  { %v6245_v3 = vsel %vm1254_vm3, %v19602_v25, -inf }
 0xcb0   :  { %6246 = vmax.xlane.f32.xlu0 %v6245_v3  ;;  %v6242_v31 = vsel %vm1254_vm3, %v19604_v52, -inf  ;;  %v7863_v3 = vld [vmem:[%s21598_s3 + $0x28] sm:$0xff] }
 0xcb1   :  { %6243 = vmax.xlane.f32.xlu1 %v6242_v31  ;;  %v21840_v31 = vld [vmem:[#allocation5_spill] sm:$0xff]  ;;  %v16817_v22 = vpack.c.bf16 %v7863_v3, %v7862_v32  ;;  %v7818_v32 = vpop.permute.xlu0 %7817 }
 0xcb2   :  { %vm7834_vm5 = vcmp.eq.s32.totalorder %v21840_v31, %v7812_v24  ;;  %v7872_v24 = vld [vmem:[%s21598_s3 + $0x70] sm:$0xff]  ;;  %vm7836_vm7 = vcmp.eq.s32.totalorder %v21840_v31, %v7818_v32 }
 0xcb6   :  { %v6334_v38 = vpop.xlane.xlu1 %6333 }
 0xcb7   :  { %17463 = vrcp.f32 %v6334_v38  ;;  %v21841_v38 = vmov 1.0  }
 0xcba   :  { %v17218_v6 = vpop.permute.xlu1 %17217 }
 0xcbb   :  { %v17220_v29 = vunpack.i.h.bf16 %v17218_v6  ;;  %v17219_v39 = vunpack.i.l.bf16 %v17218_v6  ;;  %v7865_v6 = vld [vmem:[%s21598_s3 + $0x38] sm:$0xff] }
 0xcbd   :  { %v16801_v4 = vpack.c.bf16 %v17220_v29, %v17219_v39  ;;  %v7867_v29 = vld [vmem:[%s21598_s3 + $0x48] sm:$0xff] }
 0xcbe   :  { %v16825_v39 = vpack.c.bf16 %v7867_v29, %v7866_v53 }
 0xcbf   :  { %16802 = vmatprep.subr.bf16.mxu0 %v16801_v4 }
 0xcc0   :  { %16804 = vmatpush3.bf16.msra.mxu0 %v16801_v4  ;;  %v7868_v4 = vld [vmem:[%s21598_s3 + $0x50] sm:$0xff] }
 0xcc1   :  { %v17464_v17 = vpop.eup %17463  ;;  %16810 = vmatprep.subr.bf16.mxu0 %v16809_v11 }
 0xcc2   :  { %v6372_v57 = vmul.f32 %v17464_v17, %v19524_v50  ;;  %v7864_v50 = vld [vmem:[%s21598_s3 + $0x30] sm:$0xff]  ;;  %v16833_v17 = vpack.c.bf16 %v7871_v27, %v7870_v43 }
 0xcc3   :  { %v16821_v59 = vpack.c.bf16 %v7865_v6, %v7864_v50  ;;  %v7824_v50 = vpop.permute.xlu0 %7823 }
 0xcc4   :  { %16035 = vmatprep.mubr.msk.f32.mxu0 %vm1254_vm3, %v6372_v57  ;;  %v7873_v57 = vld [vmem:[%s21598_s3 + $0x78] sm:$0xff]  ;;  %vm7838_vm9 = vcmp.eq.s32.totalorder %v21840_v31, %v7824_v50 }
 0xcc5   :  { %16036 = vmatmul.mubr.msk.f32.vlgmr.msra.gmra.mrb[74].mxu0 %vm1254_vm3, %v6373_v42  ;;  %v7815_v42 = vpop.permute.xlu1 %7814 }
 0xcc6   :  { %16812 = vmatpush3.bf16.msra.mxu0 %v16809_v11  ;;  %16077 = vmatprep.mubr.msk.f32.mxu0 %vm7834_vm5, %v21841_v38  ;;  %v7869_v11 = vld [vmem:[%s21598_s3 + $0x58] sm:$0xff]  ;;  %vm7835_vm6 = vcmp.eq.s32.totalorder %v21840_v31, %v7815_v42  ;;  %vm13999_vm5 = vcmask 1047559  }
 0xcc7   :  { %16814 = vmatprep.subr.bf16.mxu0 %v16813_v58  ;;  %v16829_v0 = vpack.c.bf16 %v7869_v11, %v7868_v4 }
 0xcc9   :  { %v7821_v3 = vpop.permute.xlu1 %7820 }
 0xcca   :  { %16816 = vmatpush3.bf16.msra.mxu0 %v16813_v58  ;;  %v16837_v58 = vpack.c.bf16 %v7873_v57, %v7872_v24  ;;  %vm7837_vm8 = vcmp.eq.s32.totalorder %v21840_v31, %v7821_v3 }
 0xccb   :  { %16818 = vmatprep.subr.bf16.mxu0 %v16817_v22 }
 0xccd   :  { %v7827_v6 = vpop.permute.xlu1 %7826 }
 0xcce   :  { %16820 = vmatpush3.bf16.msra.mxu0 %v16817_v22  ;;  %v21842_v22 = vmov 0.0   ;;  %vm7839_vm10 = vcmp.eq.s32.totalorder %v21840_v31, %v7827_v6 }
 0xccf   :  { %16822 = vmatprep.subr.bf16.mxu0 %v16821_v59 }
 0xcd1   :  { %v7833_v53 = vpop.permute.xlu1 %7832 }
 0xcd2   :  { %16824 = vmatpush3.bf16.msra.mxu0 %v16821_v59  ;;  %v7830_v59 = vpop.permute.xlu0 %7829  ;;  %vm7841_vm12 = vcmp.eq.s32.totalorder %v21840_v31, %v7833_v53 }
 0xcd3   :  { %16826 = vmatprep.subr.bf16.mxu0 %v16825_v39  ;;  %vm7840_vm11 = vcmp.eq.s32.totalorder %v21840_v31, %v7830_v59 }
 0xcd6   :  { %16828 = vmatpush3.bf16.msra.mxu0 %v16825_v39 }
 0xcd7   :  { %16830 = vmatprep.subr.bf16.mxu0 %v16829_v0 }
 0xcda   :  { %16832 = vmatpush3.bf16.msra.mxu0 %v16829_v0 }
 0xcdb   :  { %16834 = vmatprep.subr.bf16.mxu0 %v16833_v17 }
 0xcde   :  { %16836 = vmatpush3.bf16.msra.mxu0 %v16833_v17 }
 0xcdf   :  { %16838 = vmatprep.subr.bf16.mxu0 %v16837_v58 }
 0xce2   :  { %16840 = vmatpush3.bf16.msra.mxu0 %v16837_v58 }
 0xce3   :  { %16099 = vmatprep.subr.mxu0 %v21842_v22 }
 0xce5   :  { %16078 = vmatmul.mubr.msk.f32.vlgmr.msra.gmra.mrb[76].mxu0 %vm7835_vm6, %v21841_v38 }
 0xce6   :  { %16080 = vmatprep.mubr.msk.f32.mxu0 %vm7836_vm7, %v21841_v38 }
 0xce9   :  { %16081 = vmatmul.mubr.msk.f32.gmra.mrb[78].mxu0 %vm7837_vm8, %v21841_v38 }
 0xcea   :  { %16083 = vmatprep.mubr.msk.f32.mxu0 %vm7838_vm9, %v21841_v38 }
 0xced   :  { %16084 = vmatmul.mubr.msk.f32.gmra.mrb[80].mxu0 %vm7839_vm10, %v21841_v38 }
 0xcee   :  { %16086 = vmatprep.mubr.msk.f32.mxu0 %vm7840_vm11, %v21841_v38 }
 0xcf1   :  { %16087 = vmatmul.mubr.msk.f32.gmra.mrb[82].mxu0 %vm7841_vm12, %v21841_v38 }
 0xcf2   :  { %16101 = vmatprep.mubr.msk.f32.mxu0 %vm17789_vm13, %v21842_v22 }
 0xd25   :  { %v6211_v29 = vpop.xlane.xlu1 %6210 }
 0xd26   :  { %v6251_v39 = vsub.f32 %v19573_v5, %v6211_v29  ;;  %v6208_v4 = vpop.xlane.xlu0 %6207 }
 0xd27   :  { %v6250_v11 = vsub.f32 %v19576_v7, %v6208_v4 }
 0xd28   :  { %v6270_v0 = vmul.f32 1.442695, %v6251_v39 }
 0xd29   :  { %v6268_v43 = vmul.f32 1.442695, %v6250_v11 }
 0xd2a   :  { %17465 = vpow2.f32 %v6270_v0 }
 0xd2b   :  { %17467 = vpow2.f32 %v6268_v43 }
 0xd2e   :  { %v6220_v27 = vpop.xlane.xlu0 %6219 }
 0xd2f   :  { %v6254_v17 = vsub.f32 %v19586_v44, %v6220_v27 }
 0xd31   :  { %v6276_v24 = vmul.f32 1.442695, %v6254_v17 }
 0xd32   :  { %v6223_v57 = vpop.xlane.xlu0 %6222 }
 0xd33   :  { %17469 = vpow2.f32 %v6276_v24  ;;  %v6255_v31 = vsub.f32 %v19588_v62, %v6223_v57 }
 0xd34   :  { %v19683_v42 = vpop.eup %17465 }
 0xd35   :  { %v19685_v38 = vpop.eup %17467  ;;  %v6278_v5 = vmul.f32 1.442695, %v6255_v31  ;;  %v6305_v7 = vsel %vm1254_vm3, %v19683_v42, 0.0 }
 0xd36   :  { %v6235_v58 = vpop.xlane.xlu0 %6234  ;;  %6306 = vadd.xlane.f32.xlu0 %v6305_v7  ;;  %v6302_v32 = vsel %vm1254_vm3, %v19685_v38, 0.0  ;;  %v6232_v0 = vpop.xlane.xlu1 %6231 }
 0xd37   :  { %17471 = vpow2.f32 %v6278_v5  ;;  %v6259_v44 = vsub.f32 %v19594_v28, %v6235_v58  ;;  %6303 = vadd.xlane.f32.xlu1 %v6302_v32  ;;  %v6258_v43 = vsub.f32 %v19596_v26, %v6232_v0 }
 0xd39   :  { %v6286_v3 = vmul.f32 1.442695, %v6259_v44  ;;  %v6284_v31 = vmul.f32 1.442695, %v6258_v43 }
 0xd3b   :  { %17473 = vpow2.f32 %v6286_v3 }
 0xd3d   :  { %v19692_v62 = vpop.eup %17469  ;;  %v6247_v50 = vpop.xlane.xlu0 %6246 }
 0xd3e   :  { %v6263_v6 = vsub.f32 %v19602_v25, %v6247_v50  ;;  %v6314_v59 = vsel %vm1254_vm3, %v19692_v62, 0.0 }
 0xd3f   :  { %6315 = vadd.xlane.f32.xlu1 %v6314_v59 }
 0xd40   :  { %v6294_v53 = vmul.f32 1.442695, %v6263_v6 }
 0xd41   :  { %v19697_v29 = vpop.eup %17471 }
 0xd42   :  { %17475 = vpow2.f32 %v6294_v53  ;;  %v6317_v39 = vsel %vm1254_vm3, %v19697_v29, 0.0 }
 0xd43   :  { %6318 = vadd.xlane.f32.xlu0 %v6317_v39  ;;  %17477 = vpow2.f32 %v6284_v31 }
 0xd45   :  { %v19701_v28 = vpop.eup %17473 }
 0xd46   :  { %v6329_v4 = vsel %vm1254_vm3, %v19701_v28, 0.0 }
 0xd47   :  { %6330 = vadd.xlane.f32.xlu0 %v6329_v4 }
 0xd4c   :  { %v19705_v11 = vpop.eup %17475 }
 0xd4d   :  { %v6341_v25 = vsel %vm1254_vm3, %v19705_v11, 0.0 }
 0xd4e   :  { %6342 = vadd.xlane.f32.xlu0 %v6341_v25 }
 0xd50   :  { %17222 = vrot.lane.b32.xlu1 %v21815_v1, %s17787_s23 }
 0xd5e   :  { %v19712_v27 = vpop.f32.mrb[68].mxu0 }
 0xd5f   :  { %21843 = vst [vmem:[#allocation5_spill] sm:$0xff] %v19712_v27  ;;  %v19716_v17 = vadd.f32 %v19712_v27, %v19282_v13  ;;  %v19718_v24 = vpop.f32.mrb[69].mxu0 }
 0xd60   :  { %21844 = vst [vmem:[#allocation54_spill] sm:$0xff] %v19718_v24  ;;  %v19722_v57 = vadd.f32 %v19718_v24, %v19288_v63 }
 0xd64   :  { %17227 = vrot.lane.b32.xlu0 %v21818_v14, %s17787_s23 }
 0xd69   :  { %v19726_v1 = vpop.f32.mrb[70].mxu0 }
 0xd6a   :  { %21845 = vst [vmem:[#allocation55_spill] sm:$0xff] %v19726_v1  ;;  %v19730_v26 = vadd.f32 %v19726_v1, %v19294_v23  ;;  %v19732_v5 = vpop.f32.mrb[71].mxu0  ;;  %v19750_v23 = vpop.eup %17477 }
 0xd6b   :  { %21846 = vst [vmem:[#allocation56_spill] sm:$0xff] %v19732_v5  ;;  %v19736_v13 = vadd.f32 %v19732_v5, %v19300_v18  ;;  %v6326_v32 = vsel %vm1254_vm3, %v19750_v23, 0.0  ;;  %v6244_v18 = vpop.xlane.xlu1 %6243 }
 0xd6c   :  { %v6262_v44 = vsub.f32 %v19604_v52, %v6244_v18 }
 0xd6d   :  { %v19738_v7 = vpop.f32.mrb[72].mxu0 }
 0xd6e   :  { %21847 = vst [vmem:[#allocation57_spill] sm:$0xff] %v19738_v7  ;;  %v19742_v63 = vadd.f32 %v19738_v7, %v19308_v16  ;;  %v19744_v14 = vpop.f32.mrb[73].mxu0  ;;  %v6292_v16 = vmul.f32 1.442695, %v6262_v44 }
 0xd6f   :  { %21849 = vst [vmem:[#allocation59_spill] sm:$0xff] %v19744_v14  ;;  %v19748_v58 = vadd.f32 %v19744_v14, %v19314_v60 }
 0xd70   :  { %21848 = vst [vmem:[#allocation58_spill] sm:$0xff] %v19742_v63  ;;  %17479 = vpow2.f32 %v6292_v16 }
 0xd71   :  { %21850 = vst [vmem:[#allocation60_spill] sm:$0xff] %v19748_v58 }
 0xd74   :  { %6327 = vadd.xlane.f32.xlu1 %v6326_v32 }
 0xd7a   :  { %v19769_v59 = vpop.eup %17479 }
 0xd85   :  { %17232 = vrot.lane.b32.xlu1 %v21816_v20, %s17787_s23  ;;  %v6338_v20 = vsel %vm1254_vm3, %v19769_v59, 0.0 }
 0xd98   :  { %v19757_v3 = vpop.f32.mrb[74].mxu0 }
 0xd99   :  { %21851 = vst [vmem:[#allocation61_spill] sm:$0xff] %v19757_v3  ;;  %v19761_v50 = vadd.f32 %v19757_v3, %v19344_v36  ;;  %v19763_v60 = vpop.f32.mrb[75].mxu0 }
 0xd9a   :  { %21853 = vst [vmem:[#allocation63_spill] sm:$0xff] %v19763_v60  ;;  %v19767_v6 = vadd.f32 %v19763_v60, %v19352_v49 }
 0xd9b   :  { %21852 = vst [vmem:[#allocation62_spill] sm:$0xff] %v19761_v50 }
 0xd9c   :  { %21854 = vst [vmem:[#allocation64_spill] sm:$0xff] %v19767_v6 }
 0xda9   :  { %6339 = vadd.xlane.f32.xlu1 %v6338_v20 }
 0xdb8   :  { %v19773_v52 = vpop.f32.mrb[76].mxu0 }
 0xdb9   :  { %v19775_v53 = vpop.f32.mrb[77].mxu0 }
 0xdba   :  { %17237 = vrot.lane.b32.xlu1 %v21817_v30, %s17787_s23 }
 0xdbc   :  { %v19779_v36 = vpop.f32.mrb[78].mxu0 }
 0xdbd   :  { %v19781_v39 = vpop.f32.mrb[79].mxu0 }
 0xdc0   :  { %v19783_v49 = vpop.f32.mrb[80].mxu0 }
 0xdc1   :  { %v19785_v4 = vpop.f32.mrb[81].mxu0 }
 0xdc3   :  { %v6307_v31 = vpop.xlane.xlu0 %6306 }
 0xdc4   :  { %v6304_v25 = vpop.xlane.xlu1 %6303  ;;  %v19787_v0 = vpop.f32.mrb[82].mxu0 }
 0xdc5   :  { %17481 = vrcp.f32 %v6304_v25  ;;  %v19789_v43 = vpop.f32.mrb[83].mxu0 }
 0xdc6   :  { %17483 = vrcp.f32 %v6307_v31 }
 0xdcc   :  { %v6316_v32 = vpop.xlane.xlu1 %6315 }
 0xdcd   :  { %17485 = vrcp.f32 %v6316_v32 }
 0xdcf   :  { %v17482_v18 = vpop.eup %17481 }
 0xdd0   :  { %v17223_v30 = vpop.permute.xlu1 %17222  ;;  %v6362_v44 = vmul.f32 %v17482_v18, %v19685_v38  ;;  %v6319_v16 = vpop.xlane.xlu0 %6318 }
 0xdd1   :  { %v17225_v20 = vunpack.i.h.bf16 %v17223_v30  ;;  %v17224_v33 = vunpack.i.l.bf16 %v17223_v30  ;;  %v17484_v3 = vpop.eup %17483  ;;  %17487 = vrcp.f32 %v6319_v16 }
 0xdd2   :  { %16000 = vmatprep.mubr.msk.f32.mxu1 %vm1254_vm3, %v6362_v44  ;;  %v6363_v12 = vmul.f32 %v17484_v3, %v19683_v42 }
 0xdd3   :  { %v16781_v45 = vpack.c.bf16 %v17225_v20, %v17224_v33 }
 0xdd4   :  { %v6331_v60 = vpop.xlane.xlu0 %6330 }
 0xdd5   :  { %16782 = vmatprep.subr.bf16.mxu1 %v16781_v45  ;;  %17489 = vrcp.f32 %v6331_v60 }
 0xdd6   :  { %16784 = vmatpush3.bf16.msra.mxu1 %v16781_v45 }
 0xdd7   :  { %v17486_v25 = vpop.eup %17485 }
 0xdd8   :  { %v6366_v31 = vmul.f32 %v17486_v25, %v19692_v62 }
 0xdd9   :  { %16001 = vmatmul.mubr.msk.f32.vlgmr.msra.gmra.mrb[92].mxu1 %vm1254_vm3, %v6363_v12 }
 0xdda   :  { %16014 = vmatprep.mubr.msk.f32.mxu1 %vm1254_vm3, %v6366_v31 }
 0xddb   :  { %v6343_v38 = vpop.xlane.xlu0 %6342  ;;  %v17488_v33 = vpop.eup %17487 }
 0xddc   :  { %v6367_v45 = vmul.f32 %v17488_v33, %v19697_v29 }
 0xddf   :  { %v17228_v32 = vpop.permute.xlu0 %17227  ;;  %v17490_v20 = vpop.eup %17489 }
 0xde0   :  { %v17230_v18 = vunpack.i.h.bf16 %v17228_v32  ;;  %v17229_v30 = vunpack.i.l.bf16 %v17228_v32  ;;  %v6371_v32 = vmul.f32 %v17490_v20, %v19701_v28 }
 0xde2   :  { %v16789_v44 = vpack.c.bf16 %v17230_v18, %v17229_v30  ;;  %v7980_v18 = vld [vmem:[%s21600_s5 + $0x8] sm:$0xff]  ;;  %v7982_v30 = vld [vmem:[%s21600_s5 + $0x18] sm:$0xff] }
 0xde3   :  { %v16841_v28 = vpack.c.bf16 %v7982_v30, %v7980_v18 }
 0xde4   :  { %16790 = vmatprep.subr.bf16.mxu1 %v16789_v44 }
 0xde5   :  { %16792 = vmatpush3.bf16.msra.mxu1 %v16789_v44 }
 0xde8   :  { %16015 = vmatmul.mubr.msk.f32.vlgmr.msra.gmra.mrb[94].mxu1 %vm1254_vm3, %v6367_v45  ;;  %v7981_v45 = vld [vmem:[%s21600_s5 + $0x10] sm:$0xff] }
 0xe01   :  { %v6328_v42 = vpop.xlane.xlu1 %6327 }
 0xe02   :  { %17491 = vrcp.f32 %v6328_v42 }
 0xe03   :  { %17493 = vrcp.f32 %v6343_v38  ;;  %v7979_v38 = vld [vmem:[%s21600_s5] sm:$0xff] }
 0xe04   :  { %v16843_v20 = vpack.c.bf16 %v7981_v45, %v7979_v38 }
 0xe05   :  { %v17233_v62 = vpop.permute.xlu1 %17232 }
 0xe06   :  { %v17235_v3 = vunpack.i.h.bf16 %v17233_v62  ;;  %v17234_v12 = vunpack.i.l.bf16 %v17233_v62  ;;  %v7984_v62 = vld [vmem:[%s21600_s5 + $0x28] sm:$0xff] }
 0xe08   :  { %v16797_v16 = vpack.c.bf16 %v17235_v3, %v17234_v12  ;;  %v7986_v3 = vld [vmem:[%s21600_s5 + $0x38] sm:$0xff] }
 0xe0a   :  { %16798 = vmatprep.subr.bf16.mxu1 %v16797_v16 }
 0xe0b   :  { %16800 = vmatpush3.bf16.msra.mxu1 %v16797_v16 }
 0xe0c   :  { %v17492_v25 = vpop.eup %17491 }
 0xe0d   :  { %v6370_v31 = vmul.f32 %v17492_v25, %v19750_v23  ;;  %v17494_v42 = vpop.eup %17493 }
 0xe0e   :  { %v6375_v25 = vmul.f32 %v17494_v42, %v19705_v11 }
 0xe0f   :  { %16028 = vmatprep.mubr.msk.f32.mxu1 %vm1254_vm3, %v6370_v31  ;;  %v16845_v31 = vpack.c.bf16 %v7986_v3, %v7984_v62 }
 0xe10   :  { %16029 = vmatmul.mubr.msk.f32.vlgmr.msra.gmra.mrb[96].mxu1 %vm1254_vm3, %v6371_v32  ;;  %v7983_v32 = vld [vmem:[%s21600_s5 + $0x20] sm:$0xff] }
 0xe36   :  { %v6340_v29 = vpop.xlane.xlu1 %6339 }
 0xe37   :  { %17495 = vrcp.f32 %v6340_v29  ;;  %v7985_v29 = vld [vmem:[%s21600_s5 + $0x30] sm:$0xff]  ;;  %s17753_s5 = scalar_lea.vmem %s14705_s12, 128 }
 0xe38   :  { %p17754_p0 = scmp.ne.s32.totalorder %s14705_s12, %s17753_s5  ;;  %p17759_p2 = scmp.lt.s32.totalorder %s17753_s5, %s17753_s5 }
 0xe3a   :  { %v17238_v60 = vpop.permute.xlu1 %17237  ;;  %p17760_p3 = por %p17759_p2, %p17758_p1 }
 0xe3b   :  { %v17240_v44 = vunpack.i.h.bf16 %v17238_v60  ;;  %v17239_v23 = vunpack.i.l.bf16 %v17238_v60  ;;  %v16847_v60 = vpack.c.bf16 %v7985_v29, %v7983_v32 }
 0xe3c   :  { %p17761_p4 = pnand %p17760_p3, %p17754_p0 }
 0xe3d   :  { %v16805_v33 = vpack.c.bf16 %v17240_v44, %v17239_v23 }
 0xe3f   :  { %16806 = vmatprep.subr.bf16.mxu1 %v16805_v33 }
 0xe40   :  { %16808 = vmatpush3.bf16.msra.mxu1 %v16805_v33 }
 0xe41   :  { %v17496_v12 = vpop.eup %17495  ;;  %16842 = vmatprep.subr.bf16.mxu1 %v16841_v28 }
 0xe42   :  { %v6374_v16 = vmul.f32 %v17496_v12, %v19769_v59 }
 0xe44   :  { %16042 = vmatprep.mubr.msk.f32.mxu1 %vm1254_vm3, %v6374_v16 }
 0xe45   :  { %16043 = vmatmul.mubr.msk.f32.vlgmr.msra.gmra.mrb[98].mxu1 %vm1254_vm3, %v6375_v25  ;;  %vm13995_vm3 = vcmask 1045509  }
 0xe46   :  { %16844 = vmatpush1.bf16.msra.mxu1 %v16843_v20  ;;  %8075 = vmatprep.mubr.f32.mxu1 %v21842_v22 }
 0xe47   :  { %16846 = vmatprep.subr.bf16.mxu1 %v16845_v31 }
 0xe4a   :  { %16848 = vmatpush1.bf16.msra.mxu1 %v16847_v60 }
 0xe4b   :  { %16089 = vmatprep.subr.mxu1 %v21842_v22 }
 0xe4d   :  { %14970 = vmatmul.mubr.msk.f32.vlgmr.msra.gmra.mrb[100].mxu1 %vm315_vm0, %v19775_v53 }
 0xe4e   :  { %8081 = vmatprep.mubr.f32.mxu1 %v21842_v22 }
 0xe51   :  { %14971 = vmatmul.mubr.msk.f32.gmra.mrb[102].mxu1 %vm315_vm0, %v19773_v52 }
 0xe52   :  { %8087 = vmatprep.mubr.f32.mxu1 %v21842_v22 }
 0xe55   :  { %14972 = vmatmul.mubr.msk.f32.gmra.mrb[104].mxu1 %vm315_vm0, %v19781_v39 }
 0xe56   :  { %8093 = vmatprep.mubr.f32.mxu1 %v21842_v22 }
 0xe59   :  { %14973 = vmatmul.mubr.msk.f32.gmra.mrb[106].mxu1 %vm315_vm0, %v19779_v36 }
 0xe5a   :  { %8099 = vmatprep.mubr.f32.mxu1 %v21842_v22 }
 0xe5d   :  { %14974 = vmatmul.mubr.msk.f32.gmra.mrb[108].mxu1 %vm315_vm0, %v19785_v4 }
 0xe5e   :  { %8105 = vmatprep.mubr.f32.mxu1 %v21842_v22 }
 0xe61   :  { %14975 = vmatmul.mubr.msk.f32.gmra.mrb[110].mxu1 %vm315_vm0, %v19783_v49 }
 0xe62   :  { %8111 = vmatprep.mubr.f32.mxu1 %v21842_v22 }
 0xe65   :  { %14976 = vmatmul.mubr.msk.f32.gmra.mrb[112].mxu1 %vm315_vm0, %v19789_v43 }
 0xe66   :  { %8117 = vmatprep.mubr.f32.mxu1 %v21842_v22 }
 0xe69   :  { %14977 = vmatmul.mubr.msk.f32.gmra.mrb[114].mxu1 %vm315_vm0, %v19787_v0 }
 0xe6a   :  { %16091 = vmatprep.mubr.msk.f32.mxu1 %vm17789_vm13, %v21842_v22 }
 0xeac   :  { %v19856_v11 = vpop.f32.mrb[92].mxu1 }
 0xead   :  { %21855 = vst [vmem:[#allocation65_spill] sm:$0xff] %v19856_v11  ;;  %v19860_v59 = vadd.f32 %v19856_v11, %v19489_v34  ;;  %v19862_v52 = vpop.f32.mrb[93].mxu1 }
 0xeae   :  { %21856 = vst [vmem:[#allocation66_spill] sm:$0xff] %v19862_v52  ;;  %v19866_v53 = vadd.f32 %v19862_v52, %v19495_v54 }
 0xebb   :  { %v19868_v36 = vpop.f32.mrb[94].mxu1 }
 0xebc   :  { %21857 = vst [vmem:[#allocation67_spill] sm:$0xff] %v19868_v36  ;;  %v19872_v39 = vadd.f32 %v19868_v36, %v19501_v21  ;;  %v19874_v49 = vpop.f32.mrb[95].mxu1 }
 0xebd   :  { %21859 = vst [vmem:[#allocation69_spill] sm:$0xff] %v19874_v49  ;;  %v19878_v4 = vadd.f32 %v19874_v49, %v19507_v46 }
 0xebe   :  { %21858 = vst [vmem:[#allocation68_spill] sm:$0xff] %v19872_v39 }
 0xebf   :  { %21860 = vst [vmem:[#allocation70_spill] sm:$0xff] %v19878_v4 }
 0xee3   :  { %v19880_v34 = vpop.f32.mrb[96].mxu1 }
 0xee4   :  { %21861 = vst [vmem:[#allocation71_spill] sm:$0xff] %v19880_v34  ;;  %v19884_v0 = vadd.f32 %v19880_v34, %v19546_v10  ;;  %v19886_v54 = vpop.f32.mrb[97].mxu1 }
 0xee5   :  { %21863 = vst [vmem:[#allocation73_spill] sm:$0xff] %v19886_v54  ;;  %v19890_v43 = vadd.f32 %v19886_v54, %v19552_v47 }
 0xee6   :  { %21862 = vst [vmem:[#allocation72_spill] sm:$0xff] %v19884_v0 }
 0xee7   :  { %21864 = vst [vmem:[#allocation74_spill] sm:$0xff] %v19890_v43 }
 0xf18   :  { %v19896_v21 = vpop.f32.mrb[98].mxu1 }
 0xf19   :  { %21865 = vst [vmem:[#allocation75_spill] sm:$0xff] %v19896_v21  ;;  %v19900_v46 = vadd.f32 %v19896_v21, %v19564_v8  ;;  %v19902_v10 = vpop.f32.mrb[99].mxu1 }
 0xf1a   :  { %21867 = vst [vmem:[#allocation77_spill] sm:$0xff] %v19902_v10  ;;  %v19906_v18 = vadd.f32 %v19902_v10, %v19570_v35 }
 0xf1b   :  { %21866 = vst [vmem:[#allocation76_spill] sm:$0xff] %v19900_v46 }
 0xf1c   :  { %21868 = vst [vmem:[#allocation78_spill] sm:$0xff] %v19906_v18 }
 0xf20   :  { %v19908_v47 = vpop.f32.mrb[100].mxu1 }
 0xf21   :  { %8125 = vrot.lane.b32.xlu0 %v19908_v47, %s17780_s4  ;;  %v19912_v30 = vpop.f32.mrb[101].mxu1 }
 0xf24   :  { %v19914_v44 = vpop.f32.mrb[102].mxu1 }
 0xf25   :  { %8202 = vrot.lane.b32.xlu1 %v19914_v44, %s17780_s4  ;;  %v19918_v8 = vpop.f32.mrb[103].mxu1 }
 0xf28   :  { %v19920_v23 = vpop.f32.mrb[104].mxu1 }
 0xf29   :  { %8279 = vrot.lane.b32.xlu0 %v19920_v23, %s17780_s4  ;;  %v19924_v35 = vpop.f32.mrb[105].mxu1 }
 0xf2c   :  { %v19926_v33 = vpop.f32.mrb[106].mxu1 }
 0xf2d   :  { %8356 = vrot.lane.b32.xlu1 %v19926_v33, %s17780_s4  ;;  %v19930_v28 = vpop.f32.mrb[107].mxu1 }
 0xf30   :  { %v19932_v38 = vpop.f32.mrb[108].mxu1 }
 0xf31   :  { %8433 = vrot.lane.b32.xlu0 %v19932_v38, %s17780_s4  ;;  %v19936_v45 = vpop.f32.mrb[109].mxu1 }
 0xf34   :  { %v19938_v42 = vpop.f32.mrb[110].mxu1 }
 0xf35   :  { %8510 = vrot.lane.b32.xlu1 %v19938_v42, %s17780_s4  ;;  %v19942_v62 = vpop.f32.mrb[111].mxu1 }
 0xf38   :  { %v19944_v3 = vpop.f32.mrb[112].mxu1 }
 0xf39   :  { %8587 = vrot.lane.b32.xlu0 %v19944_v3, %s17780_s4  ;;  %v19948_v12 = vpop.f32.mrb[113].mxu1 }
 0xf3c   :  { %v19950_v16 = vpop.f32.mrb[114].mxu1 }
 0xf3d   :  { %8664 = vrot.lane.b32.xlu1 %v19950_v16, %s17780_s4  ;;  %v19954_v20 = vpop.f32.mrb[115].mxu1 }
 0xf93   :  { %v8126_v25 = vpop.permute.xlu0 %8125 }
 0xf94   :  { %16090 = vmatpush3.xpose.msk.msra.mxu1 %vm531_vm1, %v8126_v25 }
 0xf95   :  { %16094 = vmatprep.subr.mxu1 %v21842_v22 }
 0xf97   :  { %v8203_v31 = vpop.permute.xlu1 %8202  ;;  %16092 = vmatmul.mubr.msk.f32.vlgmr.msra.gmra.mrb[116].mxu1 %vm531_vm1, %v19908_v47 }
 0xf98   :  { %16095 = vmatpush3.xpose.msk.msra.mxu1 %vm531_vm1, %v8203_v31  ;;  %16096 = vmatprep.mubr.msk.f32.mxu1 %vm17789_vm13, %v21842_v22 }
 0xf99   :  { %16104 = vmatprep.subr.mxu1 %v21842_v22 }
 0xf9b   :  { %v8280_v32 = vpop.permute.xlu0 %8279  ;;  %16097 = vmatmul.mubr.msk.f32.vlgmr.msra.gmra.mrb[118].mxu1 %vm531_vm1, %v19914_v44 }
 0xf9c   :  { %16100 = vmatpush3.xpose.msk.msra.mxu0 %vm531_vm1, %v8280_v32  ;;  %16106 = vmatprep.mubr.msk.f32.mxu1 %vm17789_vm13, %v21842_v22 }
 0xf9d   :  { %16109 = vmatprep.subr.mxu0 %v21842_v22 }
 0xf9f   :  { %16102 = vmatmul.mubr.msk.f32.vlgmr.msra.gmra.mrb[84].mxu0 %vm531_vm1, %v19920_v23  ;;  %v8357_v29 = vpop.permute.xlu1 %8356 }
 0xfa0   :  { %16105 = vmatpush3.xpose.msk.msra.mxu1 %vm531_vm1, %v8357_v29  ;;  %16111 = vmatprep.mubr.msk.f32.mxu0 %vm17789_vm13, %v21842_v22 }
 0xfa1   :  { %16114 = vmatprep.subr.mxu1 %v21842_v22 }
 0xfa3   :  { %v8434_v60 = vpop.permute.xlu0 %8433  ;;  %16107 = vmatmul.mubr.msk.f32.vlgmr.msra.gmra.mrb[120].mxu1 %vm531_vm1, %v19926_v33 }
 0xfa4   :  { %16110 = vmatpush3.xpose.msk.msra.mxu0 %vm531_vm1, %v8434_v60  ;;  %16116 = vmatprep.mubr.msk.f32.mxu1 %vm17789_vm13, %v21842_v22 }
 0xfa5   :  { %16119 = vmatprep.subr.mxu0 %v21842_v22 }
 0xfa7   :  { %16112 = vmatmul.mubr.msk.f32.vlgmr.msra.gmra.mrb[86].mxu0 %vm531_vm1, %v19932_v38  ;;  %v8511_v25 = vpop.permute.xlu1 %8510 }
 0xfa8   :  { %16115 = vmatpush3.xpose.msk.msra.mxu1 %vm531_vm1, %v8511_v25  ;;  %16121 = vmatprep.mubr.msk.f32.mxu0 %vm17789_vm13, %v21842_v22 }
 0xfa9   :  { %16124 = vmatprep.subr.mxu1 %v21842_v22 }
 0xfab   :  { %16117 = vmatmul.mubr.msk.f32.vlgmr.msra.gmra.mrb[122].mxu1 %vm531_vm1, %v19938_v42  ;;  %v8588_v31 = vpop.permute.xlu0 %8587 }
 0xfac   :  { %16120 = vmatpush3.xpose.msk.msra.mxu0 %vm531_vm1, %v8588_v31  ;;  %16126 = vmatprep.mubr.msk.f32.mxu1 %vm17789_vm13, %v21842_v22 }
 0xfad   :  { %16129 = vmatprep.subr.mxu0 %v21842_v22 }
 0xfaf   :  { %16122 = vmatmul.mubr.msk.f32.vlgmr.msra.gmra.mrb[88].mxu0 %vm531_vm1, %v19944_v3  ;;  %v8665_v32 = vpop.permute.xlu1 %8664 }
 0xfb0   :  { %16125 = vmatpush3.xpose.msk.msra.mxu1 %vm531_vm1, %v8665_v32  ;;  %16131 = vmatprep.mubr.msk.f32.mxu0 %vm17789_vm13, %v21842_v22 }
 0xfb1   :  { %16134 = vmatprep.subr.mxu1 %v21842_v22 }
 0xfb3   :  { %16127 = vmatmul.mubr.msk.f32.vlgmr.msra.gmra.mrb[124].mxu1 %vm531_vm1, %v19950_v16 }
 0xfb4   :  { %16136 = vmatprep.mubr.msk.f32.mxu1 %vm17789_vm13, %v21842_v22 }
0x106a   :  { %v8197_v29 = vpop.f32.mrb[116].mxu1 }
0x106b   :  { %v8740_v60 = vmul.f32 0.35355338, %v8197_v29  ;;  %v16093_v25 = vpop.f32.mrb[117].mxu1 }
0x106d   :  { %v8748_v31 = vsel %vm531_vm1, %v8740_v60, -inf }
0x106e   :  { %8749 = vmax.xlane.f32.xlu0 %v8748_v31  ;;  %v8274_v21 = vpop.f32.mrb[118].mxu1 }
0x106f   :  { %v8741_v10 = vmul.f32 0.35355338, %v8274_v21  ;;  %v16098_v32 = vpop.f32.mrb[119].mxu1 }
0x1071   :  { %v8751_v54 = vsel %vm531_vm1, %v8741_v10, -inf }
0x1072   :  { %v8351_v34 = vpop.f32.mrb[84].mxu0  ;;  %8752 = vmax.xlane.f32.xlu1 %v8751_v54 }
0x1073   :  { %v8742_v51 = vmul.f32 0.35355338, %v8351_v34  ;;  %v16103_v7 = vpop.f32.mrb[85].mxu0 }
0x1075   :  { %v8754_v14 = vsel %vm531_vm1, %v8742_v51, -inf }
0x1076   :  { %8755 = vmax.xlane.f32.xlu0 %v8754_v14  ;;  %v8428_v36 = vpop.f32.mrb[120].mxu1 }
0x1077   :  { %v8743_v49 = vmul.f32 0.35355338, %v8428_v36  ;;  %v16108_v40 = vpop.f32.mrb[121].mxu1 }
0x1079   :  { %v8757_v29 = vsel %vm531_vm1, %v8743_v49, -inf }
0x107a   :  { %v8505_v25 = vpop.f32.mrb[86].mxu0  ;;  %8758 = vmax.xlane.f32.xlu0 %v8757_v29 }
0x107b   :  { %v8744_v31 = vmul.f32 0.35355338, %v8505_v25  ;;  %v16113_v61 = vpop.f32.mrb[87].mxu0 }
0x107d   :  { %v8760_v21 = vsel %vm531_vm1, %v8744_v31, -inf }
0x107e   :  { %8761 = vmax.xlane.f32.xlu1 %v8760_v21  ;;  %v8582_v32 = vpop.f32.mrb[122].mxu1 }
0x107f   :  { %v8745_v1 = vmul.f32 0.35355338, %v8582_v32  ;;  %v16118_v54 = vpop.f32.mrb[123].mxu1 }
0x1081   :  { %v8763_v7 = vsel %vm531_vm1, %v8745_v1, -inf }
0x1082   :  { %v8659_v34 = vpop.f32.mrb[88].mxu0  ;;  %8764 = vmax.xlane.f32.xlu0 %v8763_v7 }
0x1083   :  { %v16123_v14 = vpop.f32.mrb[89].mxu0  ;;  %v20024_v61 = vmul.f32 0.35355338, %v8659_v34 }
0x1086   :  { %v8736_v5 = vpop.f32.mrb[124].mxu1 }
0x1087   :  { %v20010_v36 = vmul.f32 0.35355338, %v8736_v5  ;;  %v16128_v40 = vpop.f32.mrb[125].mxu1  ;;  %v8766_v5 = vsel %vm531_vm1, %v20024_v61, -inf }
0x1089   :  { %v8769_v29 = vsel %vm531_vm1, %v20010_v36, -inf }
0x108a   :  { %8770 = vmax.xlane.f32.xlu0 %v8769_v29 }
0x108f   :  { %8836 = vrot.lane.b32.xlu1 %v19908_v47, %s17781_s17 }
0x10a0   :  { %8912 = vrot.lane.b32.xlu0 %v19914_v44, %s17781_s17 }
0x10a4   :  { %9140 = vrot.lane.b32.xlu0 %v19932_v38, %s17781_s17 }
0x10a8   :  { %9292 = vrot.lane.b32.xlu0 %v19944_v3, %s17781_s17 }
0x10ac   :  { %9446 = vrot.lane.b32.xlu0 %v19908_v47, %s17782_s18 }
0x10b0   :  { %9444 = vrot.lane.b32.xlu0 %v19908_v47, %s17783_s19 }
0x10b3   :  { %8767 = vmax.xlane.f32.xlu1 %v8766_v5 }
0x10b4   :  { %9602 = vrot.lane.b32.xlu0 %v19920_v23, %s17782_s18 }
0x10c4   :  { %8988 = vrot.lane.b32.xlu1 %v19920_v23, %s17781_s17 }
0x10c8   :  { %9064 = vrot.lane.b32.xlu1 %v19926_v33, %s17781_s17 }
0x10cc   :  { %9216 = vrot.lane.b32.xlu1 %v19938_v42, %s17781_s17 }
0x10d0   :  { %9368 = vrot.lane.b32.xlu1 %v19950_v16, %s17781_s17  ;;  %s17790_s17 = smov 8  }
0x10d4   :  { %9524 = vrot.lane.b32.xlu1 %v19914_v44, %s17782_s18 }
0x10d8   :  { %9522 = vrot.lane.b32.xlu1 %v19914_v44, %s17783_s19 }
0x10dc   :  { %9680 = vrot.lane.b32.xlu1 %v19926_v33, %s17782_s18 }
0x10fb   :  { %v8750_v25 = vpop.xlane.xlu0 %8749 }
0x10fc   :  { %v8772_v21 = vsub.f32 %v8740_v60, %v8750_v25 }
0x10fe   :  { %v8780_v32 = vmul.f32 1.442695, %v8772_v21 }
0x10ff   :  { %v8753_v54 = vpop.xlane.xlu1 %8752 }
0x1100   :  { %17497 = vpow2.f32 %v8780_v32  ;;  %v8773_v7 = vsub.f32 %v8741_v10, %v8753_v54 }
0x1102   :  { %v8782_v34 = vmul.f32 1.442695, %v8773_v7 }
0x1103   :  { %v8756_v14 = vpop.xlane.xlu0 %8755 }
0x1104   :  { %17499 = vpow2.f32 %v8782_v34  ;;  %v8774_v40 = vsub.f32 %v8742_v51, %v8756_v14 }
0x1106   :  { %v8784_v29 = vmul.f32 1.442695, %v8774_v40 }
0x1107   :  { %v8759_v5 = vpop.xlane.xlu0 %8758 }
0x1108   :  { %17501 = vpow2.f32 %v8784_v29  ;;  %v8775_v41 = vsub.f32 %v8743_v49, %v8759_v5 }
0x110a   :  { %v20046_v11 = vpop.eup %17497  ;;  %v8786_v52 = vmul.f32 1.442695, %v8775_v41 }
0x110b   :  { %v8762_v19 = vpop.xlane.xlu1 %8761  ;;  %v8796_v15 = vsel %vm531_vm1, %v20046_v11, 0.0 }
0x110c   :  { %17503 = vpow2.f32 %v8786_v52  ;;  %v8776_v60 = vsub.f32 %v8744_v31, %v8762_v19  ;;  %8797 = vadd.xlane.f32.xlu1 %v8796_v15 }
0x110e   :  { %v20050_v25 = vpop.eup %17499  ;;  %v8788_v10 = vmul.f32 1.442695, %v8776_v60 }
0x110f   :  { %v8837_v21 = vpop.permute.xlu1 %8836  ;;  %v8765_v32 = vpop.xlane.xlu0 %8764  ;;  %v8799_v51 = vsel %vm531_vm1, %v20050_v25, 0.0 }
0x1110   :  { %17505 = vpow2.f32 %v8788_v10  ;;  %v8777_v49 = vsub.f32 %v8745_v1, %v8765_v32  ;;  %16130 = vmatpush3.msra.mxu0 %v8837_v21  ;;  %8800 = vadd.xlane.f32.xlu0 %v8799_v51 }
0x1111   :  { %16139 = vmatprep.subr.mxu0 %v21842_v22 }
0x1112   :  { %v20055_v41 = vpop.eup %17501  ;;  %v8790_v54 = vmul.f32 1.442695, %v8777_v49 }
0x1113   :  { %v8802_v19 = vsel %vm531_vm1, %v20055_v41, 0.0 }
0x1114   :  { %17507 = vpow2.f32 %v8790_v54  ;;  %8803 = vadd.xlane.f32.xlu1 %v8802_v19 }
0x1116   :  { %v20059_v15 = vpop.eup %17503 }
0x1117   :  { %v8771_v52 = vpop.xlane.xlu0 %8770  ;;  %v8805_v31 = vsel %vm531_vm1, %v20059_v15, 0.0 }
0x1118   :  { %v8779_v1 = vsub.f32 %v20010_v36, %v8771_v52  ;;  %8806 = vadd.xlane.f32.xlu0 %v8805_v31 }
0x111a   :  { %v20064_v7 = vpop.eup %17505  ;;  %v8794_v34 = vmul.f32 1.442695, %v8779_v1 }
0x111b   :  { %v8913_v14 = vpop.permute.xlu0 %8912  ;;  %v8808_v40 = vsel %vm531_vm1, %v20064_v7, 0.0 }
0x111c   :  { %17509 = vpow2.f32 %v8794_v34  ;;  %8809 = vadd.xlane.f32.xlu1 %v8808_v40  ;;  %16135 = vmatpush3.msra.mxu1 %v8913_v14 }
0x111d   :  { %16144 = vmatprep.subr.mxu1 %v21842_v22 }
0x111e   :  { %v20069_v29 = vpop.eup %17507 }
0x111f   :  { %v8811_v5 = vsel %vm531_vm1, %v20069_v29, 0.0  ;;  %v9141_v52 = vpop.permute.xlu0 %9140 }
0x1120   :  { %8812 = vadd.xlane.f32.xlu0 %v8811_v5 }
0x1123   :  { %v9293_v1 = vpop.permute.xlu0 %9292 }
0x1126   :  { %v20073_v36 = vpop.eup %17509 }
0x1127   :  { %v8817_v60 = vsel %vm531_vm1, %v20073_v36, 0.0  ;;  %v20118_v14 = vpop.permute.xlu0 %9446 }
0x1128   :  { %8818 = vadd.xlane.f32.xlu0 %v8817_v60 }
0x112b   :  { %v20120_v5 = vpop.permute.xlu0 %9444 }
0x113e   :  { %9600 = vrot.lane.b32.xlu0 %v19920_v23, %s17783_s19 }
0x1140   :  { %v8768_v10 = vpop.xlane.xlu1 %8767 }
0x1141   :  { %v8778_v21 = vsub.f32 %v20024_v61, %v8768_v10  ;;  %v20122_v10 = vpop.permute.xlu0 %9602 }
0x1142   :  { %9758 = vrot.lane.b32.xlu0 %v19932_v38, %s17782_s18 }
0x1143   :  { %v8792_v32 = vmul.f32 1.442695, %v8778_v21 }
0x1144   :  { %v8989_v61 = vpop.permute.xlu1 %8988 }
0x1145   :  { %17511 = vpow2.f32 %v8792_v32 }
0x1146   :  { %9756 = vrot.lane.b32.xlu0 %v19932_v38, %s17783_s19 }
0x1148   :  { %v9065_v54 = vpop.permute.xlu1 %9064 }
0x114a   :  { %9914 = vrot.lane.b32.xlu0 %v19944_v3, %s17782_s18 }
0x114c   :  { %v9217_v19 = vpop.permute.xlu1 %9216 }
0x114e   :  { %9912 = vrot.lane.b32.xlu0 %v19944_v3, %s17783_s19 }
0x114f   :  { %v20088_v51 = vpop.eup %17511 }
0x1150   :  { %v8814_v49 = vsel %vm531_vm1, %v20088_v51, 0.0  ;;  %v9369_v31 = vpop.permute.xlu1 %9368 }
0x1151   :  { %8815 = vadd.xlane.f32.xlu1 %v8814_v49 }
0x1152   :  { %10167 = vrot.lane.b32.xlu0 %v19912_v30, %s17784_s20 }
0x1154   :  { %v9525_v34 = vpop.permute.xlu1 %9524 }
0x1156   :  { %10325 = vrot.lane.b32.xlu0 %v19920_v23, %s17784_s20 }
0x1158   :  { %v9523_v40 = vpop.permute.xlu1 %9522 }
0x115a   :  { %10405 = vrot.lane.b32.xlu0 %v19926_v33, %s17784_s20 }
0x115c   :  { %v9681_v60 = vpop.permute.xlu1 %9680 }
0x1162   :  { %9678 = vrot.lane.b32.xlu1 %v19926_v33, %s17783_s19 }
0x1166   :  { %9836 = vrot.lane.b32.xlu1 %v19938_v42, %s17782_s18 }
0x116a   :  { %9834 = vrot.lane.b32.xlu1 %v19938_v42, %s17783_s19 }
0x116e   :  { %9992 = vrot.lane.b32.xlu1 %v19950_v16, %s17782_s18 }
0x1172   :  { %9990 = vrot.lane.b32.xlu1 %v19950_v16, %s17783_s19 }
0x1176   :  { %10165 = vrot.lane.b32.xlu1 %v19908_v47, %s17784_s20 }
0x117a   :  { %10245 = vrot.lane.b32.xlu1 %v19914_v44, %s17784_s20 }
0x117e   :  { %10247 = vrot.lane.b32.xlu1 %v19918_v8, %s17784_s20 }
0x1182   :  { %10327 = vrot.lane.b32.xlu1 %v19924_v35, %s17784_s20 }
0x1186   :  { %10407 = vrot.lane.b32.xlu1 %v19930_v28, %s17784_s20 }
0x1199   :  { %v8798_v21 = vpop.xlane.xlu1 %8797 }
0x119a   :  { %17513 = vrcp.f32 %v8798_v21 }
0x119d   :  { %v8801_v32 = vpop.xlane.xlu0 %8800 }
0x119e   :  { %17515 = vrcp.f32 %v8801_v32 }
0x11a1   :  { %v8804_v49 = vpop.xlane.xlu1 %8803 }
0x11a2   :  { %17517 = vrcp.f32 %v8804_v49 }
0x11a4   :  { %v17514_v55 = vpop.eup %17513 }
0x11a5   :  { %v8807_v9 = vpop.xlane.xlu0 %8806  ;;  %v8828_v2 = vmul.f32 %v17514_v55, %v20046_v11 }
0x11a6   :  { %17519 = vrcp.f32 %v8807_v9 }
0x11a7   :  { %16132 = vmatmul.mubr.msk.f32.vlgmr.msra.gmra.mrb[90].mxu0 %vm531_vm1, %v8828_v2 }
0x11a8   :  { %v17516_v56 = vpop.eup %17515  ;;  %16140 = vmatpush3.msra.mxu0 %v8989_v61  ;;  %16141 = vmatprep.mubr.msk.f32.mxu0 %vm17789_vm13, %v21842_v22 }
0x11a9   :  { %v8810_v27 = vpop.xlane.xlu1 %8809  ;;  %v8829_v24 = vmul.f32 %v17516_v56, %v20050_v25  ;;  %16149 = vmatprep.subr.mxu0 %v21842_v22 }
0x11aa   :  { %17521 = vrcp.f32 %v8810_v27 }
0x11ab   :  { %16137 = vmatmul.mubr.msk.f32.vlgmr.msra.gmra.mrb[126].mxu1 %vm531_vm1, %v8829_v24 }
0x11ac   :  { %v17518_v21 = vpop.eup %17517  ;;  %16145 = vmatpush3.msra.mxu1 %v9065_v54  ;;  %16146 = vmatprep.mubr.msk.f32.mxu1 %vm17789_vm13, %v21842_v22 }
0x11ad   :  { %v8813_v55 = vpop.xlane.xlu0 %8812  ;;  %v8830_v2 = vmul.f32 %v17518_v21, %v20055_v41  ;;  %16154 = vmatprep.subr.mxu1 %v21842_v22 }
0x11ae   :  { %17523 = vrcp.f32 %v8813_v55 }
0x11af   :  { %16142 = vmatmul.mubr.msk.f32.vlgmr.msra.gmra.mrb[92].mxu0 %vm531_vm1, %v8830_v2 }
0x11b0   :  { %v17520_v9 = vpop.eup %17519  ;;  %16150 = vmatpush3.msra.mxu0 %v9141_v52  ;;  %16151 = vmatprep.mubr.msk.f32.mxu0 %vm17789_vm13, %v21842_v22 }
0x11b1   :  { %v8831_v56 = vmul.f32 %v17520_v9, %v20059_v15  ;;  %16159 = vmatprep.subr.mxu0 %v21842_v22 }
0x11b3   :  { %16147 = vmatmul.mubr.msk.f32.vlgmr.msra.gmra.mrb[128].mxu1 %vm531_vm1, %v8831_v56 }
0x11b4   :  { %v17522_v27 = vpop.eup %17521  ;;  %16155 = vmatpush3.msra.mxu1 %v9217_v19  ;;  %16156 = vmatprep.mubr.msk.f32.mxu1 %vm17789_vm13, %v21842_v22 }
0x11b5   :  { %v8819_v24 = vpop.xlane.xlu0 %8818  ;;  %v8832_v11 = vmul.f32 %v17522_v27, %v20064_v7  ;;  %16164 = vmatprep.subr.mxu1 %v21842_v22 }
0x11b6   :  { %17525 = vrcp.f32 %v8819_v24 }
0x11b7   :  { %16152 = vmatmul.mubr.msk.f32.vlgmr.msra.gmra.mrb[94].mxu0 %vm531_vm1, %v8832_v11 }
0x11b8   :  { %v17524_v25 = vpop.eup %17523  ;;  %16160 = vmatpush3.msra.mxu0 %v9293_v1  ;;  %16161 = vmatprep.mubr.msk.f32.mxu0 %vm17789_vm13, %v21842_v22 }
0x11b9   :  { %v8833_v41 = vmul.f32 %v17524_v25, %v20069_v29  ;;  %16169 = vmatprep.subr.mxu0 %v21842_v22  ;;  %v9601_v29 = vpop.permute.xlu0 %9600 }
0x11bb   :  { %16157 = vmatmul.mubr.msk.f32.vlgmr.msra.gmra.mrb[130].mxu1 %vm531_vm1, %v8833_v41 }
0x11bc   :  { %16165 = vmatpush3.msra.mxu1 %v9369_v31  ;;  %16166 = vmatprep.mubr.msk.f32.mxu1 %vm17789_vm13, %v21842_v22 }
0x11bd   :  { %16174 = vmatprep.subr.mxu1 %v21842_v22  ;;  %v9759_v54 = vpop.permute.xlu0 %9758 }
0x11c0   :  { %v17526_v15 = vpop.eup %17525 }
0x11c1   :  { %v8835_v7 = vmul.f32 %v17526_v15, %v20073_v36  ;;  %v9757_v31 = vpop.permute.xlu0 %9756 }
0x11c3   :  { %16167 = vmatmul.mubr.msk.f32.vlgmr.msra.gmra.mrb[132].mxu1 %vm531_vm1, %v8835_v7 }
0x11c4   :  { %16175 = vmatpush3.xpose.msk.msra.mxu1 %vm531_vm1, %v9525_v34  ;;  %16176 = vmatprep.mubr.msk.f32.mxu1 %vm17789_vm13, %v21842_v22 }
0x11c5   :  { %16184 = vmatprep.subr.mxu1 %v21842_v22 }
0x11c7   :  { %16177 = vmatmul.mubr.msk.f32.vlgmr.msra.gmra.mrb[134].mxu1 %vm531_vm1, %v9523_v40 }
0x11c8   :  { %16185 = vmatpush3.xpose.msk.msra.mxu1 %vm531_vm1, %v9681_v60  ;;  %16186 = vmatprep.mubr.msk.f32.mxu1 %vm17789_vm13, %v21842_v22  ;;  %v9915_v60 = vpop.permute.xlu0 %9914 }
0x11c9   :  { %16194 = vmatprep.subr.mxu1 %v21842_v22 }
0x11de   :  { %v8816_v36 = vpop.xlane.xlu1 %8815 }
0x11df   :  { %17527 = vrcp.f32 %v8816_v36 }
0x11e2   :  { %v9679_v61 = vpop.permute.xlu1 %9678 }
0x11e3   :  { %16187 = vmatmul.mubr.msk.f32.vlgmr.msra.gmra.mrb[136].mxu1 %vm531_vm1, %v9679_v61 }
0x11e4   :  { %16196 = vmatprep.mubr.msk.f32.mxu1 %vm17789_vm13, %v21842_v22 }
0x11e6   :  { %v9837_v19 = vpop.permute.xlu1 %9836 }
0x11e7   :  { %16195 = vmatpush3.xpose.msk.msra.mxu1 %vm531_vm1, %v9837_v19 }
0x11e8   :  { %16204 = vmatprep.subr.mxu1 %v21842_v22 }
0x11e9   :  { %v17528_v52 = vpop.eup %17527 }
0x11ea   :  { %v9835_v1 = vpop.permute.xlu1 %9834  ;;  %v8834_v34 = vmul.f32 %v17528_v52, %v20088_v51 }
0x11eb   :  { %16197 = vmatmul.mubr.msk.f32.vlgmr.msra.gmra.mrb[138].mxu1 %vm531_vm1, %v9835_v1 }
0x11ec   :  { %16162 = vmatmul.mubr.msk.f32.vlgmr.msra.gmra.mrb[96].mxu0 %vm531_vm1, %v8834_v34  ;;  %16206 = vmatprep.mubr.msk.f32.mxu1 %vm17789_vm13, %v21842_v22 }
0x11ed   :  { %16170 = vmatpush3.xpose.msk.msra.mxu0 %vm531_vm1, %v20118_v14  ;;  %16171 = vmatprep.mubr.msk.f32.mxu0 %vm17789_vm13, %v21842_v22  ;;  %v9913_v14 = vpop.permute.xlu0 %9912 }
0x11ee   :  { %v9993_v40 = vpop.permute.xlu1 %9992  ;;  %16179 = vmatprep.subr.mxu0 %v21842_v22 }
0x11ef   :  { %16205 = vmatpush3.xpose.msk.msra.mxu1 %vm531_vm1, %v9993_v40 }
0x11f0   :  { %16172 = vmatmul.mubr.msk.f32.vlgmr.msra.gmra.mrb[98].mxu0 %vm531_vm1, %v20120_v5  ;;  %16214 = vmatprep.subr.mxu1 %v21842_v22 }
0x11f1   :  { %16180 = vmatpush3.xpose.msk.msra.mxu0 %vm531_vm1, %v20122_v10  ;;  %16181 = vmatprep.mubr.msk.f32.mxu0 %vm17789_vm13, %v21842_v22  ;;  %v10168_v32 = vpop.permute.xlu0 %10167 }
0x11f2   :  { %v9991_v51 = vpop.permute.xlu1 %9990  ;;  %16189 = vmatprep.subr.mxu0 %v21842_v22 }
0x11f3   :  { %16207 = vmatmul.mubr.msk.f32.vlgmr.msra.gmra.mrb[140].mxu1 %vm531_vm1, %v9991_v51 }
0x11f4   :  { %16182 = vmatmul.mubr.msk.f32.vlgmr.msra.gmra.mrb[100].mxu0 %vm531_vm1, %v9601_v29  ;;  %16216 = vmatprep.mubr.msk.f32.mxu1 %vm17789_vm13, %v21842_v22 }
0x11f5   :  { %16190 = vmatpush3.xpose.msk.msra.mxu0 %vm531_vm1, %v9759_v54  ;;  %16191 = vmatprep.mubr.msk.f32.mxu0 %vm17789_vm13, %v21842_v22 }
0x11f6   :  { %v10166_v5 = vpop.permute.xlu1 %10165  ;;  %16199 = vmatprep.subr.mxu0 %v21842_v22 }
0x11f7   :  { %v10169_v49 = vsel %vm3057_vm4, %v10166_v5, %v10168_v32 }
0x11f8   :  { %16192 = vmatmul.mubr.msk.f32.vlgmr.msra.gmra.mrb[102].mxu0 %vm531_vm1, %v9757_v31 }
0x11f9   :  { %16200 = vmatpush3.xpose.msk.msra.mxu0 %vm531_vm1, %v9915_v60  ;;  %16201 = vmatprep.mubr.msk.f32.mxu0 %vm17789_vm13, %v21842_v22 }
0x11fa   :  { %v10246_v10 = vpop.permute.xlu1 %10245  ;;  %16209 = vmatprep.subr.mxu0 %v21842_v22 }
0x11fc   :  { %16202 = vmatmul.mubr.msk.f32.vlgmr.msra.gmra.mrb[104].mxu0 %vm531_vm1, %v9913_v14 }
0x11fd   :  { %16210 = vmatpush3.msra.mxu0 %v10169_v49  ;;  %16211 = vmatprep.mubr.msk.f32.mxu0 %vm17789_vm13, %v21842_v22 }
0x11fe   :  { %v10248_v21 = vpop.permute.xlu1 %10247  ;;  %16219 = vmatprep.subr.mxu0 %v21842_v22 }
0x11ff   :  { %v10249_v55 = vsel %vm3057_vm4, %v10246_v10, %v10248_v21 }
0x1200   :  { %16215 = vmatpush3.msra.mxu1 %v10249_v55 }
0x1201   :  { %16224 = vmatprep.subr.mxu1 %v21842_v22 }
0x127a   :  { %v20209_v2 = vpop.f32.mrb[90].mxu0 }
0x127b   :  { %21869 = vst [vmem:[#allocation79_spill] sm:$0xff] %v20209_v2  ;;  %v16133_v9 = vpop.f32.mrb[91].mxu0 }
0x127e   :  { %v20211_v56 = vpop.f32.mrb[126].mxu1 }
0x127f   :  { %21870 = vst [vmem:[#allocation80_spill] sm:$0xff] %v20211_v56  ;;  %v16138_v27 = vpop.f32.mrb[127].mxu1 }
0x1282   :  { %v20213_v24 = vpop.f32.mrb[92].mxu0 }
0x1283   :  { %21871 = vst [vmem:[#allocation81_spill] sm:$0xff] %v20213_v24  ;;  %v16143_v11 = vpop.f32.mrb[93].mxu0 }
0x1286   :  { %v20215_v25 = vpop.f32.mrb[128].mxu1 }
0x1287   :  { %21872 = vst [vmem:[#allocation82_spill] sm:$0xff] %v20215_v25  ;;  %v16148_v41 = vpop.f32.mrb[129].mxu1 }
0x128a   :  { %v20217_v15 = vpop.f32.mrb[94].mxu0 }
0x128b   :  { %21873 = vst [vmem:[#allocation83_spill] sm:$0xff] %v20217_v15  ;;  %v16153_v7 = vpop.f32.mrb[95].mxu0 }
0x128e   :  { %v20219_v29 = vpop.f32.mrb[130].mxu1 }
0x128f   :  { %21874 = vst [vmem:[#allocation84_spill] sm:$0xff] %v20219_v29  ;;  %v16158_v36 = vpop.f32.mrb[131].mxu1 }
0x1296   :  { %v20221_v61 = vpop.f32.mrb[132].mxu1 }
0x1297   :  { %21875 = vst [vmem:[#allocation85_spill] sm:$0xff] %v20221_v61  ;;  %v16168_v54 = vpop.f32.mrb[133].mxu1 }
0x129a   :  { %v9596_v19 = vpop.f32.mrb[134].mxu1 }
0x129b   :  { %v10069_v52 = vmul.f32 0.35355338, %v9596_v19  ;;  %v16178_v31 = vpop.f32.mrb[135].mxu1 }
0x129d   :  { %v10079_v1 = vsel %vm531_vm1, %v10069_v52, -inf }
0x129e   :  { %10080 = vmax.xlane.f32.xlu1 %v10079_v1 }
0x12b6   :  { %v9752_v34 = vpop.f32.mrb[136].mxu1 }
0x12b7   :  { %v16188_v40 = vpop.f32.mrb[137].mxu1  ;;  %v10071_v7 = vmul.f32 0.35355338, %v9752_v34 }
0x12be   :  { %v9908_v60 = vpop.f32.mrb[138].mxu1 }
0x12bf   :  { %v20224_v51 = vpop.f32.mrb[96].mxu0  ;;  %v16198_v14 = vpop.f32.mrb[139].mxu1  ;;  %v10073_v1 = vmul.f32 0.35355338, %v9908_v60 }
0x12c0   :  { %21876 = vst [vmem:[#allocation86_spill] sm:$0xff] %v20224_v51  ;;  %v16163_v5 = vpop.f32.mrb[97].mxu0  ;;  %v10085_v14 = vsel %vm531_vm1, %v10071_v7, -inf }
0x12c3   :  { %v9518_v10 = vpop.f32.mrb[98].mxu0 }
0x12c4   :  { %v10068_v32 = vmul.f32 0.35355338, %v9518_v10  ;;  %v16173_v49 = vpop.f32.mrb[99].mxu0 }
0x12c5   :  { %v10091_v49 = vsel %vm531_vm1, %v10073_v1, -inf }
0x12c6   :  { %v10064_v21 = vpop.f32.mrb[140].mxu1  ;;  %v10076_v55 = vsel %vm531_vm1, %v10068_v32, -inf }
0x12c7   :  { %10077 = vmax.xlane.f32.xlu0 %v10076_v55  ;;  %v9674_v9 = vpop.f32.mrb[100].mxu0  ;;  %v16208_v27 = vpop.f32.mrb[141].mxu1  ;;  %v20237_v60 = vmul.f32 0.35355338, %v10064_v21 }
0x12c8   :  { %v10070_v11 = vmul.f32 0.35355338, %v9674_v9  ;;  %v16183_v41 = vpop.f32.mrb[101].mxu0  ;;  %v20263_v21 = vpop.permute.xlu1 %10327 }
0x12c9   :  { %v10097_v9 = vsel %vm531_vm1, %v20237_v60, -inf }
0x12ca   :  { %v10082_v36 = vsel %vm531_vm1, %v10070_v11, -inf }
0x12cb   :  { %10083 = vmax.xlane.f32.xlu0 %v10082_v36  ;;  %v9830_v54 = vpop.f32.mrb[102].mxu0 }
0x12cc   :  { %v10072_v19 = vmul.f32 0.35355338, %v9830_v54  ;;  %v16193_v31 = vpop.f32.mrb[103].mxu0  ;;  %v20269_v27 = vpop.permute.xlu1 %10407 }
0x12cd   :  { %v20271_v31 = vpop.permute.xlu0 %10325 }
0x12ce   :  { %v10088_v40 = vsel %vm531_vm1, %v10072_v19, -inf }
0x12cf   :  { %v9986_v5 = vpop.f32.mrb[104].mxu0  ;;  %10089 = vmax.xlane.f32.xlu1 %v10088_v40  ;;  %10086 = vmax.xlane.f32.xlu0 %v10085_v14 }
0x12d0   :  { %v16203_v10 = vpop.f32.mrb[105].mxu0  ;;  %v20235_v34 = vmul.f32 0.35355338, %v9986_v5 }
0x12d1   :  { %v20275_v14 = vpop.permute.xlu0 %10405 }
0x12d2   :  { %v10094_v55 = vsel %vm531_vm1, %v20235_v34, -inf  ;;  %v10409_v0 = vsel %vm3057_vm4, %v20275_v14, %v20269_v27 }
0x12d3   :  { %10092 = vmax.xlane.f32.xlu0 %v10091_v49 }
0x12e0   :  { %10487 = vrot.lane.b32.xlu1 %v19936_v45, %s17784_s20 }
0x12e9   :  { %10485 = vrot.lane.b32.xlu0 %v19932_v38, %s17784_s20 }
0x1304   :  { %10095 = vmax.xlane.f32.xlu1 %v10094_v55 }
0x1308   :  { %10098 = vmax.xlane.f32.xlu0 %v10097_v9 }
0x1315   :  { %10567 = vrot.lane.b32.xlu1 %v19942_v62, %s17784_s20 }
0x1319   :  { %10647 = vrot.lane.b32.xlu1 %v19948_v12, %s17784_s20 }
0x131d   :  { %10727 = vrot.lane.b32.xlu1 %v19954_v20, %s17784_s20 }
0x131e   :  { %10565 = vrot.lane.b32.xlu0 %v19938_v42, %s17784_s20 }
0x1321   :  { %10892 = vrot.lane.b32.xlu1 %v19914_v44, %s17785_s21 }
0x1322   :  { %10645 = vrot.lane.b32.xlu0 %v19944_v3, %s17784_s20 }
0x1325   :  { %10890 = vrot.lane.b32.xlu1 %v19914_v44, %s17786_s22 }
0x1326   :  { %10725 = vrot.lane.b32.xlu0 %v19950_v16, %s17784_s20 }
0x1329   :  { %11048 = vrot.lane.b32.xlu1 %v19926_v33, %s17785_s21 }
0x132a   :  { %10814 = vrot.lane.b32.xlu0 %v19908_v47, %s17785_s21 }
0x132b   :  { %v10081_v41 = vpop.xlane.xlu1 %10080 }
0x132c   :  { %v10101_v36 = vsub.f32 %v10069_v52, %v10081_v41 }
0x132e   :  { %10812 = vrot.lane.b32.xlu0 %v19908_v47, %s17786_s22  ;;  %v10110_v54 = vmul.f32 1.442695, %v10101_v36 }
0x1330   :  { %17529 = vpow2.f32 %v10110_v54 }
0x1332   :  { %10970 = vrot.lane.b32.xlu0 %v19920_v23, %s17785_s21 }
0x133a   :  { %v20273_v40 = vpop.eup %17529 }
0x133b   :  { %v10127_v5 = vsel %vm531_vm1, %v20273_v40, 0.0 }
0x1351   :  { %10128 = vadd.xlane.f32.xlu0 %v10127_v5 }
0x1354   :  { %v10078_v10 = vpop.xlane.xlu0 %10077 }
0x1355   :  { %v10100_v49 = vsub.f32 %v10068_v32, %v10078_v10 }
0x1357   :  { %v10108_v55 = vmul.f32 1.442695, %v10100_v49 }
0x1358   :  { %v10084_v9 = vpop.xlane.xlu0 %10083 }
0x1359   :  { %17531 = vpow2.f32 %v10108_v55  ;;  %v10102_v48 = vsub.f32 %v10070_v11, %v10084_v9 }
0x135b   :  { %v10112_v37 = vmul.f32 1.442695, %v10102_v48 }
0x135c   :  { %v10090_v52 = vpop.xlane.xlu1 %10089  ;;  %v10087_v41 = vpop.xlane.xlu0 %10086 }
0x135d   :  { %17533 = vpow2.f32 %v10112_v37  ;;  %v10104_v36 = vsub.f32 %v10072_v19, %v10090_v52  ;;  %v10103_v54 = vsub.f32 %v10071_v7, %v10087_v41 }
0x135f   :  { %v10116_v18 = vmul.f32 1.442695, %v10104_v36  ;;  %v10114_v46 = vmul.f32 1.442695, %v10103_v54 }
0x1360   :  { %v10093_v6 = vpop.xlane.xlu0 %10092  ;;  %v20299_v19 = vpop.permute.xlu1 %10487 }
0x1361   :  { %17535 = vpow2.f32 %v10116_v18  ;;  %v10105_v50 = vsub.f32 %v10073_v1, %v10093_v6 }
0x1362   :  { %17537 = vpow2.f32 %v10114_v46 }
0x1363   :  { %v20279_v43 = vpop.eup %17531  ;;  %v10118_v5 = vmul.f32 1.442695, %v10105_v50 }
0x1364   :  { %v10124_v32 = vsel %vm531_vm1, %v20279_v43, 0.0  ;;  %v20301_v1 = vpop.permute.xlu0 %10485 }
0x1365   :  { %17539 = vpow2.f32 %v10118_v5  ;;  %10125 = vadd.xlane.f32.xlu1 %v10124_v32 }
0x1367   :  { %v20283_v48 = vpop.eup %17533 }
0x1368   :  { %v10130_v37 = vsel %vm531_vm1, %v20283_v48, 0.0 }
0x1369   :  { %10131 = vadd.xlane.f32.xlu1 %v10130_v37 }
0x136b   :  { %v20287_v11 = vpop.eup %17535 }
0x136c   :  { %v20289_v7 = vpop.eup %17537  ;;  %v10136_v6 = vsel %vm531_vm1, %v20287_v11, 0.0 }
0x136d   :  { %10137 = vadd.xlane.f32.xlu1 %v10136_v6  ;;  %v10133_v50 = vsel %vm531_vm1, %v20289_v7, 0.0 }
0x136e   :  { %10134 = vadd.xlane.f32.xlu0 %v10133_v50 }
0x136f   :  { %v20295_v46 = vpop.eup %17539 }
0x1370   :  { %v10139_v18 = vsel %vm531_vm1, %v20295_v46, 0.0 }
0x1372   :  { %10140 = vadd.xlane.f32.xlu0 %v10139_v18 }
0x1391   :  { %v10096_v10 = vpop.xlane.xlu1 %10095 }
0x1392   :  { %v10106_v49 = vsub.f32 %v20235_v34, %v10096_v10 }
0x1394   :  { %v10120_v55 = vmul.f32 1.442695, %v10106_v49 }
0x1395   :  { %v10099_v9 = vpop.xlane.xlu0 %10098  ;;  %v10568_v50 = vpop.permute.xlu1 %10567 }
0x1396   :  { %17541 = vpow2.f32 %v10120_v55  ;;  %v10107_v52 = vsub.f32 %v20237_v60, %v10099_v9 }
0x1398   :  { %v10122_v41 = vmul.f32 1.442695, %v10107_v52 }
0x1399   :  { %v20319_v34 = vpop.permute.xlu0 %10565  ;;  %v10648_v10 = vpop.permute.xlu1 %10647 }
0x139a   :  { %17543 = vpow2.f32 %v10122_v41 }
0x139d   :  { %v20327_v60 = vpop.permute.xlu0 %10645  ;;  %v10728_v55 = vpop.permute.xlu1 %10727 }
0x13a0   :  { %v20305_v36 = vpop.eup %17541 }
0x13a1   :  { %v10142_v54 = vsel %vm531_vm1, %v20305_v36, 0.0  ;;  %v20335_v37 = vpop.permute.xlu0 %10725  ;;  %v20369_v52 = vpop.permute.xlu1 %10892 }
0x13a2   :  { %10143 = vadd.xlane.f32.xlu1 %v10142_v54 }
0x13a4   :  { %v20309_v5 = vpop.eup %17543 }
0x13a5   :  { %v10145_v32 = vsel %vm531_vm1, %v20309_v5, 0.0  ;;  %v20343_v6 = vpop.permute.xlu0 %10814  ;;  %v20371_v41 = vpop.permute.xlu1 %10890 }
0x13a6   :  { %10146 = vadd.xlane.f32.xlu0 %v10145_v32 }
0x13a9   :  { %v20351_v18 = vpop.permute.xlu0 %10812 }
0x13ad   :  { %v20359_v49 = vpop.permute.xlu0 %10970 }
0x13b3   :  { %11046 = vrot.lane.b32.xlu1 %v19926_v33, %s17786_s22 }
0x13b7   :  { %11204 = vrot.lane.b32.xlu1 %v19938_v42, %s17785_s21 }
0x13bb   :  { %11202 = vrot.lane.b32.xlu1 %v19938_v42, %s17786_s22 }
0x13bc   :  { %10968 = vrot.lane.b32.xlu0 %v19920_v23, %s17786_s22 }
0x13bf   :  { %11360 = vrot.lane.b32.xlu1 %v19950_v16, %s17785_s21 }
0x13c0   :  { %11126 = vrot.lane.b32.xlu0 %v19932_v38, %s17785_s21 }
0x13c3   :  { %11358 = vrot.lane.b32.xlu1 %v19950_v16, %s17786_s22 }
0x13c4   :  { %11124 = vrot.lane.b32.xlu0 %v19932_v38, %s17786_s22 }
0x13c7   :  { %11532 = vrot.lane.b32.xlu1 %v19912_v30, %s17786_s22 }
0x13c8   :  { %11282 = vrot.lane.b32.xlu0 %v19944_v3, %s17785_s21 }
0x13cb   :  { %11684 = vrot.lane.b32.xlu1 %v19924_v35, %s17786_s22 }
0x13cc   :  { %11280 = vrot.lane.b32.xlu0 %v19944_v3, %s17786_s22 }
0x13cf   :  { %11760 = vrot.lane.b32.xlu1 %v19930_v28, %s17786_s22 }
0x13d0   :  { %11608 = vrot.lane.b32.xlu0 %v19918_v8, %s17786_s22 }
0x13d3   :  { %11912 = vrot.lane.b32.xlu1 %v19942_v62, %s17786_s22 }
0x13d4   :  { %11836 = vrot.lane.b32.xlu0 %v19936_v45, %s17786_s22 }
0x13d7   :  { %12064 = vrot.lane.b32.xlu1 %v19954_v20, %s17786_s22 }
0x13d8   :  { %11988 = vrot.lane.b32.xlu0 %v19948_v12, %s17786_s22 }
0x13db   :  { %12228 = vrot.lane.b32.xlu1 %v19914_v44, %s17787_s23 }
0x13dc   :  { %12150 = vrot.lane.b32.xlu0 %v19908_v47, %s17787_s23 }
0x13de   :  { %v10129_v9 = vpop.xlane.xlu0 %10128 }
0x13df   :  { %17545 = vrcp.f32 %v10129_v9  ;;  %12226 = vrot.lane.b32.xlu1 %v19914_v44, %s17788_s24  ;;  %v20380_v44 = vpop.permute.xlu1 %11048 }
0x13e0   :  { %12148 = vrot.lane.b32.xlu0 %v19908_v47, %s17788_s24 }
0x13e9   :  { %v17546_v54 = vpop.eup %17545 }
0x13ea   :  { %v10157_v32 = vmul.f32 %v17546_v54, %v20273_v40 }
0x13ec   :  { %16217 = vmatmul.mubr.msk.f32.vlgmr.msra.gmra.mrb[142].mxu1 %vm531_vm1, %v10157_v32 }
0x13ed   :  { %16225 = vmatpush3.msra.mxu1 %v10409_v0  ;;  %16226 = vmatprep.mubr.msk.f32.mxu1 %vm17789_vm13, %v21842_v22  ;;  %v10329_v0 = vsel %vm3057_vm4, %v20271_v31, %v20263_v21 }
0x13ee   :  { %16234 = vmatprep.subr.mxu1 %v21842_v22 }
0x13f2   :  { %v10126_v47 = vpop.xlane.xlu1 %10125 }
0x13f3   :  { %17547 = vrcp.f32 %v10126_v47 }
0x13f6   :  { %v10132_v9 = vpop.xlane.xlu1 %10131 }
0x13f7   :  { %17549 = vrcp.f32 %v10132_v9 }
0x13fa   :  { %v10138_v58 = vpop.xlane.xlu1 %10137 }
0x13fb   :  { %17551 = vrcp.f32 %v10138_v58  ;;  %v10135_v40 = vpop.xlane.xlu0 %10134 }
0x13fc   :  { %17553 = vrcp.f32 %v10135_v40 }
0x13fd   :  { %v17548_v54 = vpop.eup %17547 }
0x13fe   :  { %v10156_v27 = vmul.f32 %v17548_v54, %v20279_v43  ;;  %v10489_v43 = vsel %vm3057_vm4, %v20301_v1, %v20299_v19  ;;  %v10569_v19 = vsel %vm3057_vm4, %v20319_v34, %v10568_v50 }
0x13ff   :  { %v10141_v14 = vpop.xlane.xlu0 %10140 }
0x1400   :  { %17555 = vrcp.f32 %v10141_v14  ;;  %16212 = vmatmul.mubr.msk.f32.vlgmr.msra.gmra.mrb[106].mxu0 %vm531_vm1, %v10156_v27 }
0x1401   :  { %v17550_v32 = vpop.eup %17549  ;;  %16220 = vmatpush3.msra.mxu0 %v10329_v0  ;;  %16221 = vmatprep.mubr.msk.f32.mxu0 %vm17789_vm13, %v21842_v22 }
0x1402   :  { %16229 = vmatprep.subr.mxu0 %v21842_v22  ;;  %v10158_v58 = vmul.f32 %v17550_v32, %v20283_v48  ;;  %v10649_v48 = vsel %vm3057_vm4, %v20327_v60, %v10648_v10 }
0x1404   :  { %16222 = vmatmul.mubr.msk.f32.vlgmr.msra.gmra.mrb[108].mxu0 %vm531_vm1, %v10158_v58 }
0x1405   :  { %v17552_v47 = vpop.eup %17551  ;;  %16230 = vmatpush3.msra.mxu0 %v10489_v43  ;;  %16231 = vmatprep.mubr.msk.f32.mxu0 %vm17789_vm13, %v21842_v22 }
0x1406   :  { %v17554_v21 = vpop.eup %17553  ;;  %16239 = vmatprep.subr.mxu0 %v21842_v22  ;;  %v10160_v31 = vmul.f32 %v17552_v47, %v20287_v11 }
0x1407   :  { %v10159_v9 = vmul.f32 %v17554_v21, %v20289_v7  ;;  %v10729_v7 = vsel %vm3057_vm4, %v20335_v37, %v10728_v55  ;;  %vm13997_vm4 = vcmask 1046534  }
0x1408   :  { %16232 = vmatmul.mubr.msk.f32.vlgmr.msra.gmra.mrb[110].mxu0 %vm531_vm1, %v10160_v31 }
0x1409   :  { %16227 = vmatmul.mubr.msk.f32.vlgmr.msra.gmra.mrb[144].mxu1 %vm531_vm1, %v10159_v9  ;;  %16240 = vmatpush3.msra.mxu0 %v10649_v48 }
0x140a   :  { %v17556_v1 = vpop.eup %17555  ;;  %16235 = vmatpush3.msra.mxu1 %v10569_v19  ;;  %16236 = vmatprep.mubr.msk.f32.mxu1 %vm17789_vm13, %v21842_v22 }
0x140b   :  { %16244 = vmatprep.subr.mxu1 %v21842_v22  ;;  %v10161_v11 = vmul.f32 %v17556_v1, %v20295_v46  ;;  %16241 = vmatprep.mubr.msk.f32.mxu0 %vm17789_vm13, %v21842_v22 }
0x140c   :  { %16249 = vmatprep.subr.mxu0 %v21842_v22 }
0x140d   :  { %16237 = vmatmul.mubr.msk.f32.vlgmr.msra.gmra.mrb[146].mxu1 %vm531_vm1, %v10161_v11 }
0x140e   :  { %16245 = vmatpush3.msra.mxu1 %v10729_v7  ;;  %16246 = vmatprep.mubr.msk.f32.mxu1 %vm17789_vm13, %v21842_v22 }
0x140f   :  { %16254 = vmatprep.subr.mxu1 %v21842_v22 }
0x142f   :  { %v10144_v34 = vpop.xlane.xlu1 %10143 }
0x1430   :  { %17557 = vrcp.f32 %v10144_v34 }
0x1433   :  { %v11047_v60 = vpop.permute.xlu1 %11046  ;;  %v10147_v46 = vpop.xlane.xlu0 %10146 }
0x1434   :  { %17559 = vrcp.f32 %v10147_v46 }
0x1437   :  { %v11205_v50 = vpop.permute.xlu1 %11204  ;;  %v10969_v10 = vpop.permute.xlu0 %10968 }
0x143a   :  { %v17558_v40 = vpop.eup %17557 }
0x143b   :  { %v11203_v54 = vpop.permute.xlu1 %11202  ;;  %v11127_v27 = vpop.permute.xlu0 %11126  ;;  %v10162_v37 = vmul.f32 %v17558_v40, %v20305_v36 }
0x143d   :  { %16242 = vmatmul.mubr.msk.f32.vlgmr.msra.gmra.mrb[112].mxu0 %vm531_vm1, %v10162_v37 }
0x143e   :  { %v17560_v55 = vpop.eup %17559  ;;  %16250 = vmatpush3.xpose.msk.msra.mxu0 %vm531_vm1, %v20343_v6  ;;  %16251 = vmatprep.mubr.msk.f32.mxu0 %vm17789_vm13, %v21842_v22 }
0x143f   :  { %v11125_v14 = vpop.permute.xlu0 %11124  ;;  %16259 = vmatprep.subr.mxu0 %v21842_v22  ;;  %v10163_v0 = vmul.f32 %v17560_v55, %v20309_v5  ;;  %v11361_v32 = vpop.permute.xlu1 %11360 }
0x1441   :  { %16247 = vmatmul.mubr.msk.f32.vlgmr.msra.gmra.mrb[148].mxu1 %vm531_vm1, %v10163_v0  ;;  %16252 = vmatmul.mubr.msk.f32.vlgmr.msra.gmra.mrb[114].mxu0 %vm531_vm1, %v20351_v18 }
0x1442   :  { %16255 = vmatpush3.xpose.msk.msra.mxu1 %vm531_vm1, %v20369_v52  ;;  %16260 = vmatpush3.xpose.msk.msra.mxu0 %vm531_vm1, %v20359_v49 }
0x1443   :  { %16256 = vmatprep.mubr.msk.f32.mxu1 %vm17789_vm13, %v21842_v22  ;;  %16261 = vmatprep.mubr.msk.f32.mxu0 %vm17789_vm13, %v21842_v22  ;;  %v11283_v36 = vpop.permute.xlu0 %11282  ;;  %v11359_v5 = vpop.permute.xlu1 %11358 }
0x1444   :  { %16264 = vmatprep.subr.mxu1 %v21842_v22  ;;  %16269 = vmatprep.subr.mxu0 %v21842_v22 }
0x1445   :  { %16257 = vmatmul.mubr.msk.f32.vlgmr.msra.gmra.mrb[150].mxu1 %vm531_vm1, %v20371_v41  ;;  %16262 = vmatmul.mubr.msk.f32.vlgmr.msra.gmra.mrb[116].mxu0 %vm531_vm1, %v10969_v10 }
0x1446   :  { %16265 = vmatpush3.xpose.msk.msra.mxu1 %vm531_vm1, %v20380_v44  ;;  %16270 = vmatpush3.xpose.msk.msra.mxu0 %vm531_vm1, %v11127_v27 }
0x1447   :  { %16266 = vmatprep.mubr.msk.f32.mxu1 %vm17789_vm13, %v21842_v22  ;;  %16271 = vmatprep.mubr.msk.f32.mxu0 %vm17789_vm13, %v21842_v22  ;;  %v11281_v6 = vpop.permute.xlu0 %11280  ;;  %v11533_v18 = vpop.permute.xlu1 %11532 }
0x1448   :  { %16274 = vmatprep.subr.mxu1 %v21842_v22  ;;  %16279 = vmatprep.subr.mxu0 %v21842_v22 }
0x1449   :  { %16267 = vmatmul.mubr.msk.f32.vlgmr.msra.gmra.mrb[152].mxu1 %vm531_vm1, %v11047_v60  ;;  %16272 = vmatmul.mubr.msk.f32.vlgmr.msra.gmra.mrb[118].mxu0 %vm531_vm1, %v11125_v14 }
0x144a   :  { %16275 = vmatpush3.xpose.msk.msra.mxu1 %vm531_vm1, %v11205_v50  ;;  %16280 = vmatpush3.xpose.msk.msra.mxu0 %vm531_vm1, %v11283_v36 }
0x144b   :  { %16276 = vmatprep.mubr.msk.f32.mxu1 %vm17789_vm13, %v21842_v22  ;;  %16281 = vmatprep.mubr.msk.f32.mxu0 %vm17789_vm13, %v21842_v22  ;;  %v11609_v49 = vpop.permute.xlu0 %11608 }
0x144c   :  { %16284 = vmatprep.subr.mxu1 %v21842_v22  ;;  %16289 = vmatprep.subr.mxu0 %v21842_v22 }
0x144d   :  { %16277 = vmatmul.mubr.msk.f32.vlgmr.msra.gmra.mrb[154].mxu1 %vm531_vm1, %v11203_v54  ;;  %16282 = vmatmul.mubr.msk.f32.vlgmr.msra.gmra.mrb[120].mxu0 %vm531_vm1, %v11281_v6 }
0x144e   :  { %16285 = vmatpush3.xpose.msk.msra.mxu1 %vm531_vm1, %v11361_v32  ;;  %16290 = vmatpush3.msra.mxu0 %v11533_v18 }
0x144f   :  { %16286 = vmatprep.mubr.msk.f32.mxu1 %vm17789_vm13, %v21842_v22  ;;  %16294 = vmatprep.subr.mxu1 %v21842_v22 }
0x1450   :  { %16291 = vmatprep.mubr.msk.f32.mxu0 %vm17789_vm13, %v21842_v22  ;;  %16299 = vmatprep.subr.mxu0 %v21842_v22 }
0x1451   :  { %16287 = vmatmul.mubr.msk.f32.vlgmr.msra.gmra.mrb[156].mxu1 %vm531_vm1, %v11359_v5 }
0x1452   :  { %16295 = vmatpush3.msra.mxu1 %v11609_v49  ;;  %16296 = vmatprep.mubr.msk.f32.mxu1 %vm17789_vm13, %v21842_v22 }
0x1453   :  { %16304 = vmatprep.subr.mxu1 %v21842_v22 }
0x14bf   :  { %v20476_v52 = vpop.f32.mrb[142].mxu1 }
0x14c0   :  { %21877 = vst [vmem:[#allocation87_spill] sm:$0xff] %v20476_v52  ;;  %v20480_v41 = vadd.f32 %v20476_v52, %v20211_v56  ;;  %v16218_v44 = vpop.f32.mrb[143].mxu1 }
0x14d3   :  { %v20482_v58 = vpop.f32.mrb[106].mxu0 }
0x14d4   :  { %21878 = vst [vmem:[#allocation88_spill] sm:$0xff] %v20482_v58  ;;  %v20486_v43 = vadd.f32 %v20482_v58, %v20209_v2  ;;  %v16213_v47 = vpop.f32.mrb[107].mxu0 }
0x14d7   :  { %v20488_v21 = vpop.f32.mrb[108].mxu0 }
0x14d8   :  { %21879 = vst [vmem:[#allocation89_spill] sm:$0xff] %v20488_v21  ;;  %v20492_v31 = vadd.f32 %v20488_v21, %v20213_v24  ;;  %v16223_v9 = vpop.f32.mrb[109].mxu0 }
0x14db   :  { %v20494_v48 = vpop.f32.mrb[110].mxu0 }
0x14dc   :  { %21880 = vst [vmem:[#allocation90_spill] sm:$0xff] %v20494_v48  ;;  %v20496_v19 = vpop.f32.mrb[144].mxu1  ;;  %v20500_v1 = vadd.f32 %v20494_v48, %v20217_v15  ;;  %v16233_v11 = vpop.f32.mrb[111].mxu0 }
0x14dd   :  { %21881 = vst [vmem:[#allocation91_spill] sm:$0xff] %v20496_v19  ;;  %v20504_v7 = vadd.f32 %v20496_v19, %v20215_v25  ;;  %v16228_v34 = vpop.f32.mrb[145].mxu1 }
0x14e0   :  { %v20506_v60 = vpop.f32.mrb[146].mxu1 }
0x14e1   :  { %21882 = vst [vmem:[#allocation92_spill] sm:$0xff] %v20506_v60  ;;  %v20510_v46 = vadd.f32 %v20506_v60, %v20219_v29  ;;  %v16238_v50 = vpop.f32.mrb[147].mxu1 }
0x1510   :  { %v20512_v10 = vpop.f32.mrb[112].mxu0 }
0x1511   :  { %21883 = vst [vmem:[#allocation93_spill] sm:$0xff] %v20512_v10  ;;  %v20516_v40 = vadd.f32 %v20512_v10, %v20224_v51  ;;  %v16243_v54 = vpop.f32.mrb[113].mxu0 }
0x1514   :  { %v20518_v27 = vpop.f32.mrb[148].mxu1  ;;  %v10886_v37 = vpop.f32.mrb[114].mxu0 }
0x1515   :  { %21884 = vst [vmem:[#allocation94_spill] sm:$0xff] %v20518_v27  ;;  %v20522_v55 = vadd.f32 %v20518_v27, %v20221_v61  ;;  %v11436_v14 = vmul.f32 0.35355338, %v10886_v37  ;;  %v16248_v0 = vpop.f32.mrb[149].mxu1  ;;  %v16253_v32 = vpop.f32.mrb[115].mxu0 }
0x1517   :  { %v11444_v36 = vsel %vm531_vm1, %v11436_v14, -inf }
0x1518   :  { %11445 = vmax.xlane.f32.xlu0 %v11444_v36  ;;  %v10964_v5 = vpop.f32.mrb[150].mxu1  ;;  %v11042_v6 = vpop.f32.mrb[116].mxu0 }
0x1519   :  { %v11437_v18 = vmul.f32 0.35355338, %v10964_v5  ;;  %v11438_v49 = vmul.f32 0.35355338, %v11042_v6  ;;  %v16258_v44 = vpop.f32.mrb[151].mxu1  ;;  %v16263_v47 = vpop.f32.mrb[117].mxu0 }
0x151b   :  { %v11450_v9 = vsel %vm531_vm1, %v11438_v49, -inf  ;;  %v11447_v11 = vsel %vm531_vm1, %v11437_v18, -inf }
0x151c   :  { %11451 = vmax.xlane.f32.xlu0 %v11450_v9  ;;  %v11198_v34 = vpop.f32.mrb[118].mxu0  ;;  %11448 = vmax.xlane.f32.xlu1 %v11447_v11  ;;  %v11120_v50 = vpop.f32.mrb[152].mxu1 }
0x151d   :  { %v11440_v54 = vmul.f32 0.35355338, %v11198_v34  ;;  %v11439_v37 = vmul.f32 0.35355338, %v11120_v50  ;;  %v16268_v0 = vpop.f32.mrb[153].mxu1  ;;  %v16273_v32 = vpop.f32.mrb[119].mxu0 }
0x151f   :  { %v11456_v36 = vsel %vm531_vm1, %v11440_v54, -inf  ;;  %v11453_v27 = vsel %vm531_vm1, %v11439_v37, -inf }
0x1520   :  { %v11354_v5 = vpop.f32.mrb[120].mxu0  ;;  %11457 = vmax.xlane.f32.xlu1 %v11456_v36  ;;  %11454 = vmax.xlane.f32.xlu0 %v11453_v27  ;;  %v11276_v6 = vpop.f32.mrb[154].mxu1 }
0x1521   :  { %v20529_v44 = vmul.f32 0.35355338, %v11354_v5  ;;  %v11441_v47 = vmul.f32 0.35355338, %v11276_v6  ;;  %v16278_v10 = vpop.f32.mrb[155].mxu1  ;;  %v16283_v9 = vpop.f32.mrb[121].mxu0 }
0x1522   :  { %v20542_v10 = vpop.permute.xlu1 %11684  ;;  %v20546_v5 = vpop.permute.xlu0 %11836 }
0x1523   :  { %v11462_v11 = vsel %vm531_vm1, %v20529_v44, -inf  ;;  %v11459_v34 = vsel %vm531_vm1, %v11441_v47, -inf }
0x1524   :  { %11463 = vmax.xlane.f32.xlu1 %v11462_v11  ;;  %11460 = vmax.xlane.f32.xlu0 %v11459_v34  ;;  %v11432_v50 = vpop.f32.mrb[156].mxu1 }
0x1525   :  { %v20534_v0 = vmul.f32 0.35355338, %v11432_v50  ;;  %v16288_v32 = vpop.f32.mrb[157].mxu1 }
0x1526   :  { %v20544_v36 = vpop.permute.xlu1 %11760  ;;  %v20550_v9 = vpop.permute.xlu0 %11988 }
0x1527   :  { %v11465_v27 = vsel %vm531_vm1, %v20534_v0, -inf }
0x1528   :  { %11466 = vmax.xlane.f32.xlu0 %v11465_v27 }
0x152a   :  { %v20548_v6 = vpop.permute.xlu1 %11912  ;;  %v20554_v34 = vpop.permute.xlu0 %12150 }
0x152e   :  { %v20552_v11 = vpop.permute.xlu1 %12064  ;;  %v20558_v32 = vpop.permute.xlu0 %12148 }
0x1532   :  { %v20556_v50 = vpop.permute.xlu1 %12228 }
0x1535   :  { %12384 = vrot.lane.b32.xlu1 %v19926_v33, %s17787_s23 }
0x1536   :  { %v20560_v27 = vpop.permute.xlu1 %12226 }
0x153e   :  { %12306 = vrot.lane.b32.xlu0 %v19920_v23, %s17787_s23 }
0x15a5   :  { %v11446_v61 = vpop.xlane.xlu0 %11445 }
0x15a6   :  { %v11468_v51 = vsub.f32 %v11436_v14, %v11446_v61 }
0x15a8   :  { %v11476_v60 = vmul.f32 1.442695, %v11468_v51 }
0x15a9   :  { %v11452_v29 = vpop.xlane.xlu0 %11451  ;;  %v11449_v48 = vpop.xlane.xlu1 %11448 }
0x15aa   :  { %17561 = vpow2.f32 %v11476_v60  ;;  %v11470_v15 = vsub.f32 %v11438_v49, %v11452_v29  ;;  %v11469_v19 = vsub.f32 %v11437_v18, %v11449_v48 }
0x15ac   :  { %v11480_v25 = vmul.f32 1.442695, %v11470_v15  ;;  %v11478_v21 = vmul.f32 1.442695, %v11469_v19 }
0x15ad   :  { %v11458_v24 = vpop.xlane.xlu1 %11457  ;;  %v11455_v52 = vpop.xlane.xlu0 %11454 }
0x15ae   :  { %17563 = vpow2.f32 %v11480_v25  ;;  %v11472_v56 = vsub.f32 %v11440_v54, %v11458_v24  ;;  %v11471_v58 = vsub.f32 %v11439_v37, %v11455_v52 }
0x15af   :  { %17565 = vpow2.f32 %v11478_v21 }
0x15b0   :  { %v11484_v2 = vmul.f32 1.442695, %v11472_v56  ;;  %v11482_v63 = vmul.f32 1.442695, %v11471_v58 }
0x15b1   :  { %v11461_v4 = vpop.xlane.xlu0 %11460  ;;  %v11464_v52 = vpop.xlane.xlu1 %11463 }
0x15b2   :  { %17567 = vpow2.f32 %v11484_v2  ;;  %v11473_v39 = vsub.f32 %v11441_v47, %v11461_v4  ;;  %v11474_v58 = vsub.f32 %v20529_v44, %v11464_v52 }
0x15b3   :  { %17569 = vpow2.f32 %v11482_v63 }
0x15b4   :  { %v17562_v61 = vpop.eup %17561  ;;  %v11486_v51 = vmul.f32 1.442695, %v11473_v39  ;;  %v11488_v19 = vmul.f32 1.442695, %v11474_v58 }
0x15b5   :  { %v11492_v60 = vsel %vm531_vm1, %v17562_v61, 0.0  ;;  %v11467_v21 = vpop.xlane.xlu0 %11466  ;;  %v20604_v37 = vpop.permute.xlu1 %12384 }
0x15b6   :  { %11493 = vadd.xlane.f32.xlu1 %v11492_v60  ;;  %17571 = vpow2.f32 %v11486_v51  ;;  %v11475_v14 = vsub.f32 %v20534_v0, %v11467_v21 }
0x15b7   :  { %17573 = vpow2.f32 %v11488_v19 }
0x15b8   :  { %v17564_v15 = vpop.eup %17563  ;;  %v11490_v18 = vmul.f32 1.442695, %v11475_v14 }
0x15b9   :  { %v17566_v29 = vpop.eup %17565  ;;  %v11498_v48 = vsel %vm531_vm1, %v17564_v15, 0.0  ;;  %v20606_v44 = vpop.permute.xlu0 %12306 }
0x15ba   :  { %11499 = vadd.xlane.f32.xlu1 %v11498_v48  ;;  %v11495_v24 = vsel %vm531_vm1, %v17566_v29, 0.0  ;;  %17575 = vpow2.f32 %v11490_v18 }
0x15bb   :  { %11496 = vadd.xlane.f32.xlu0 %v11495_v24 }
0x15bc   :  { %v17568_v56 = vpop.eup %17567 }
0x15bd   :  { %v20565_v25 = vpop.eup %17569  ;;  %v11504_v4 = vsel %vm531_vm1, %v17568_v56, 0.0 }
0x15be   :  { %11505 = vadd.xlane.f32.xlu1 %v11504_v4  ;;  %v11501_v63 = vsel %vm531_vm1, %v20565_v25, 0.0 }
0x15bf   :  { %11502 = vadd.xlane.f32.xlu0 %v11501_v63 }
0x15c0   :  { %v20570_v39 = vpop.eup %17571 }
0x15c1   :  { %v11507_v2 = vsel %vm531_vm1, %v20570_v39, 0.0  ;;  %v20580_v49 = vpop.eup %17573 }
0x15c2   :  { %v11510_v54 = vsel %vm531_vm1, %v20580_v49, 0.0 }
0x15c3   :  { %11508 = vadd.xlane.f32.xlu0 %v11507_v2 }
0x15cf   :  { %12382 = vrot.lane.b32.xlu1 %v19926_v33, %s17788_s24  ;;  %v20584_v33 = vpop.eup %17575 }
0x15d9   :  { %12304 = vrot.lane.b32.xlu0 %v19920_v23, %s17788_s24  ;;  %v11513_v23 = vsel %vm531_vm1, %v20584_v33, 0.0 }
0x15f3   :  { %11511 = vadd.xlane.f32.xlu1 %v11510_v54 }
0x15f8   :  { %11514 = vadd.xlane.f32.xlu0 %v11513_v23 }
0x1604   :  { %12540 = vrot.lane.b32.xlu1 %v19938_v42, %s17787_s23 }
0x1608   :  { %12538 = vrot.lane.b32.xlu1 %v19938_v42, %s17788_s24 }
0x160c   :  { %12696 = vrot.lane.b32.xlu1 %v19950_v16, %s17787_s23 }
0x160e   :  { %12462 = vrot.lane.b32.xlu0 %v19932_v38, %s17787_s23 }
0x1610   :  { %12694 = vrot.lane.b32.xlu1 %v19950_v16, %s17788_s24 }
0x1612   :  { %12460 = vrot.lane.b32.xlu0 %v19932_v38, %s17788_s24 }
0x1616   :  { %12618 = vrot.lane.b32.xlu0 %v19944_v3, %s17787_s23 }
0x161a   :  { %12616 = vrot.lane.b32.xlu0 %v19944_v3, %s17788_s24 }
0x1643   :  { %v11494_v42 = vpop.xlane.xlu1 %11493 }
0x1644   :  { %17577 = vrcp.f32 %v11494_v42 }
0x1647   :  { %v11500_v47 = vpop.xlane.xlu1 %11499 }
0x1648   :  { %17579 = vrcp.f32 %v11500_v47  ;;  %v11497_v0 = vpop.xlane.xlu0 %11496 }
0x1649   :  { %17581 = vrcp.f32 %v11497_v0 }
0x164b   :  { %v11506_v16 = vpop.xlane.xlu1 %11505 }
0x164c   :  { %17583 = vrcp.f32 %v11506_v16  ;;  %v11503_v51 = vpop.xlane.xlu0 %11502 }
0x164d   :  { %17585 = vrcp.f32 %v11503_v51 }
0x164e   :  { %v17578_v38 = vpop.eup %17577 }
0x164f   :  { %v11524_v60 = vmul.f32 %v17578_v38, %v17562_v61 }
0x1650   :  { %v11509_v48 = vpop.xlane.xlu0 %11508 }
0x1651   :  { %17587 = vrcp.f32 %v11509_v48  ;;  %16292 = vmatmul.mubr.msk.f32.vlgmr.msra.gmra.mrb[122].mxu0 %vm531_vm1, %v11524_v60 }
0x1652   :  { %v17580_v3 = vpop.eup %17579  ;;  %16300 = vmatpush3.msra.mxu0 %v20542_v10  ;;  %16301 = vmatprep.mubr.msk.f32.mxu0 %vm17789_vm13, %v21842_v22 }
0x1653   :  { %v17582_v24 = vpop.eup %17581  ;;  %v11526_v4 = vmul.f32 %v17580_v3, %v17564_v15  ;;  %16309 = vmatprep.subr.mxu0 %v21842_v22 }
0x1654   :  { %v11525_v63 = vmul.f32 %v17582_v24, %v17566_v29  ;;  %v12305_v15 = vpop.permute.xlu0 %12304 }
0x1655   :  { %16302 = vmatmul.mubr.msk.f32.vlgmr.msra.gmra.mrb[124].mxu0 %vm531_vm1, %v11526_v4 }
0x1656   :  { %v17584_v2 = vpop.eup %17583  ;;  %16297 = vmatmul.mubr.msk.f32.vlgmr.msra.gmra.mrb[158].mxu1 %vm531_vm1, %v11525_v63  ;;  %16310 = vmatpush3.msra.mxu0 %v20546_v5 }
0x1657   :  { %v17586_v61 = vpop.eup %17585  ;;  %v11528_v52 = vmul.f32 %v17584_v2, %v17568_v56  ;;  %16305 = vmatpush3.msra.mxu1 %v20544_v36  ;;  %16306 = vmatprep.mubr.msk.f32.mxu1 %vm17789_vm13, %v21842_v22 }
0x1658   :  { %v11527_v10 = vmul.f32 %v17586_v61, %v20565_v25  ;;  %16311 = vmatprep.mubr.msk.f32.mxu0 %vm17789_vm13, %v21842_v22  ;;  %16314 = vmatprep.subr.mxu1 %v21842_v22 }
0x1659   :  { %16319 = vmatprep.subr.mxu0 %v21842_v22  ;;  %16312 = vmatmul.mubr.msk.f32.vlgmr.msra.gmra.mrb[126].mxu0 %vm531_vm1, %v11528_v52 }
0x165a   :  { %16307 = vmatmul.mubr.msk.f32.vlgmr.msra.gmra.mrb[160].mxu1 %vm531_vm1, %v11527_v10  ;;  %16320 = vmatpush3.msra.mxu0 %v20550_v9 }
0x165b   :  { %v17588_v5 = vpop.eup %17587  ;;  %16315 = vmatpush3.msra.mxu1 %v20548_v6  ;;  %16316 = vmatprep.mubr.msk.f32.mxu1 %vm17789_vm13, %v21842_v22  ;;  %v12383_v6 = vpop.permute.xlu1 %12382 }
0x165c   :  { %v11529_v36 = vmul.f32 %v17588_v5, %v20570_v39  ;;  %16324 = vmatprep.subr.mxu1 %v21842_v22  ;;  %16321 = vmatprep.mubr.msk.f32.mxu0 %vm17789_vm13, %v21842_v22 }
0x165d   :  { %16329 = vmatprep.subr.mxu0 %v21842_v22 }
0x165e   :  { %16317 = vmatmul.mubr.msk.f32.vlgmr.msra.gmra.mrb[162].mxu1 %vm531_vm1, %v11529_v36 }
0x165f   :  { %16325 = vmatpush3.msra.mxu1 %v20552_v11  ;;  %16326 = vmatprep.mubr.msk.f32.mxu1 %vm17789_vm13, %v21842_v22 }
0x1660   :  { %16334 = vmatprep.subr.mxu1 %v21842_v22 }
0x1680   :  { %v11512_v9 = vpop.xlane.xlu1 %11511 }
0x1681   :  { %17589 = vrcp.f32 %v11512_v9 }
0x1684   :  { %v12541_v58 = vpop.permute.xlu1 %12540 }
0x1685   :  { %v11515_v29 = vpop.xlane.xlu0 %11514 }
0x1686   :  { %17591 = vrcp.f32 %v11515_v29 }
0x1689   :  { %v12463_v25 = vpop.permute.xlu0 %12462 }
0x168b   :  { %v17590_v56 = vpop.eup %17589 }
0x168c   :  { %v11530_v39 = vmul.f32 %v17590_v56, %v20580_v49 }
0x168d   :  { %v12461_v19 = vpop.permute.xlu0 %12460 }
0x168e   :  { %16322 = vmatmul.mubr.msk.f32.vlgmr.msra.gmra.mrb[128].mxu0 %vm531_vm1, %v11530_v39 }
0x168f   :  { %16330 = vmatpush3.xpose.msk.msra.mxu0 %vm531_vm1, %v20554_v34  ;;  %16331 = vmatprep.mubr.msk.f32.mxu0 %vm17789_vm13, %v21842_v22  ;;  %v12539_v34 = vpop.permute.xlu1 %12538 }
0x1690   :  { %v17592_v11 = vpop.eup %17591  ;;  %16339 = vmatprep.subr.mxu0 %v21842_v22 }
0x1691   :  { %v11531_v21 = vmul.f32 %v17592_v11, %v20584_v33 }
0x1692   :  { %16332 = vmatmul.mubr.msk.f32.vlgmr.msra.gmra.mrb[130].mxu0 %vm531_vm1, %v20558_v32  ;;  %v12619_v32 = vpop.permute.xlu0 %12618 }
0x1693   :  { %16327 = vmatmul.mubr.msk.f32.vlgmr.msra.gmra.mrb[164].mxu1 %vm531_vm1, %v11531_v21  ;;  %16340 = vmatpush3.xpose.msk.msra.mxu0 %vm531_vm1, %v20606_v44 }
0x1694   :  { %16335 = vmatpush3.xpose.msk.msra.mxu1 %vm531_vm1, %v20556_v50  ;;  %16336 = vmatprep.mubr.msk.f32.mxu1 %vm17789_vm13, %v21842_v22  ;;  %v12697_v50 = vpop.permute.xlu1 %12696 }
0x1695   :  { %16341 = vmatprep.mubr.msk.f32.mxu0 %vm17789_vm13, %v21842_v22  ;;  %16344 = vmatprep.subr.mxu1 %v21842_v22 }
0x1696   :  { %16349 = vmatprep.subr.mxu0 %v21842_v22  ;;  %16342 = vmatmul.mubr.msk.f32.vlgmr.msra.gmra.mrb[132].mxu0 %vm531_vm1, %v12305_v15 }
0x1697   :  { %16337 = vmatmul.mubr.msk.f32.vlgmr.msra.gmra.mrb[166].mxu1 %vm531_vm1, %v20560_v27  ;;  %16350 = vmatpush3.xpose.msk.msra.mxu0 %vm531_vm1, %v12463_v25  ;;  %v12617_v27 = vpop.permute.xlu0 %12616 }
0x1698   :  { %16345 = vmatpush3.xpose.msk.msra.mxu1 %vm531_vm1, %v20604_v37  ;;  %16346 = vmatprep.mubr.msk.f32.mxu1 %vm17789_vm13, %v21842_v22  ;;  %v12695_v14 = vpop.permute.xlu1 %12694 }
0x1699   :  { %16351 = vmatprep.mubr.msk.f32.mxu0 %vm17789_vm13, %v21842_v22  ;;  %16354 = vmatprep.subr.mxu1 %v21842_v22 }
0x169a   :  { %16359 = vmatprep.subr.mxu0 %v21842_v22  ;;  %16352 = vmatmul.mubr.msk.f32.vlgmr.msra.gmra.mrb[134].mxu0 %vm531_vm1, %v12461_v19 }
0x169b   :  { %16347 = vmatmul.mubr.msk.f32.vlgmr.msra.gmra.mrb[168].mxu1 %vm531_vm1, %v12383_v6  ;;  %16360 = vmatpush3.xpose.msk.msra.mxu0 %vm531_vm1, %v12619_v32 }
0x169c   :  { %16355 = vmatpush3.xpose.msk.msra.mxu1 %vm531_vm1, %v12541_v58  ;;  %16356 = vmatprep.mubr.msk.f32.mxu1 %vm17789_vm13, %v21842_v22 }
0x169d   :  { %16361 = vmatprep.mubr.msk.f32.mxu0 %vm17789_vm13, %v21842_v22  ;;  %16364 = vmatprep.subr.mxu1 %v21842_v22 }
0x169e   :  { %16362 = vmatmul.mubr.msk.f32.vlgmr.msra.gmra.mrb[136].mxu0 %vm531_vm1, %v12617_v27  ;;  %16369 = vmatprep.subr.mxu0 %v21842_v22 }
0x169f   :  { %16357 = vmatmul.mubr.msk.f32.vlgmr.msra.gmra.mrb[170].mxu1 %vm531_vm1, %v12539_v34  ;;  %16371 = vmatprep.mubr.msk.f32.mxu0 %vm17789_vm13, %v21842_v22 }
0x16a0   :  { %16365 = vmatpush3.xpose.msk.msra.mxu1 %vm531_vm1, %v12697_v50  ;;  %16366 = vmatprep.mubr.msk.f32.mxu1 %vm17789_vm13, %v21842_v22 }
0x16a1   :  { %16374 = vmatprep.subr.mxu1 %v21842_v22 }
0x16a3   :  { %16367 = vmatmul.mubr.msk.f32.vlgmr.msra.gmra.mrb[172].mxu1 %vm531_vm1, %v12695_v14 }
0x16a4   :  { %16376 = vmatprep.mubr.msk.f32.mxu1 %vm17789_vm13, %v21842_v22 }
0x1724   :  { %v20694_v18 = vpop.f32.mrb[122].mxu0 }
0x1725   :  { %v20698_v49 = vadd.f32 %v20694_v18, %v20486_v43  ;;  %v16293_v54 = vpop.f32.mrb[123].mxu0 }
0x1728   :  { %v20700_v33 = vpop.f32.mrb[124].mxu0 }
0x1729   :  { %v20702_v23 = vpop.f32.mrb[158].mxu1  ;;  %v20706_v37 = vadd.f32 %v20700_v33, %v20492_v31  ;;  %v16303_v42 = vpop.f32.mrb[125].mxu0 }
0x172a   :  { %v20710_v44 = vadd.f32 %v20702_v23, %v20480_v41  ;;  %v16298_v47 = vpop.f32.mrb[159].mxu1 }
0x172c   :  { %v20712_v0 = vpop.f32.mrb[126].mxu0 }
0x172d   :  { %v20714_v16 = vpop.f32.mrb[160].mxu1  ;;  %v20718_v43 = vadd.f32 %v20712_v0, %v20500_v1  ;;  %v16313_v51 = vpop.f32.mrb[127].mxu0 }
0x172e   :  { %v20722_v38 = vadd.f32 %v20714_v16, %v20504_v7  ;;  %v16308_v31 = vpop.f32.mrb[161].mxu1 }
0x1731   :  { %v20724_v60 = vpop.f32.mrb[162].mxu1 }
0x1732   :  { %v20728_v41 = vadd.f32 %v20724_v60, %v20510_v46  ;;  %v16318_v48 = vpop.f32.mrb[163].mxu1 }
0x1761   :  { %v20730_v3 = vpop.f32.mrb[128].mxu0 }
0x1762   :  { %v20734_v24 = vadd.f32 %v20730_v3, %v20516_v40  ;;  %v16323_v1 = vpop.f32.mrb[129].mxu0 }
0x1765   :  { %v12222_v4 = vpop.f32.mrb[130].mxu0 }
0x1766   :  { %v20736_v63 = vpop.f32.mrb[164].mxu1  ;;  %v12772_v7 = vmul.f32 0.35355338, %v12222_v4  ;;  %v16333_v2 = vpop.f32.mrb[131].mxu0 }
0x1767   :  { %v20740_v61 = vadd.f32 %v20736_v63, %v20522_v55  ;;  %v16328_v52 = vpop.f32.mrb[165].mxu1 }
0x1768   :  { %v12780_v46 = vsel %vm531_vm1, %v12772_v7, -inf }
0x1769   :  { %12781 = vmax.xlane.f32.xlu0 %v12780_v46  ;;  %v12378_v10 = vpop.f32.mrb[132].mxu0 }
0x176a   :  { %v12300_v5 = vpop.f32.mrb[166].mxu1  ;;  %v12774_v36 = vmul.f32 0.35355338, %v12378_v10  ;;  %v16343_v6 = vpop.f32.mrb[133].mxu0 }
0x176b   :  { %v12773_v40 = vmul.f32 0.35355338, %v12300_v5  ;;  %v16338_v9 = vpop.f32.mrb[167].mxu1 }
0x176c   :  { %v12786_v15 = vsel %vm531_vm1, %v12774_v36, -inf }
0x176d   :  { %12787 = vmax.xlane.f32.xlu0 %v12786_v15  ;;  %v12534_v29 = vpop.f32.mrb[134].mxu0  ;;  %v12783_v56 = vsel %vm531_vm1, %v12773_v40, -inf }
0x176e   :  { %v12776_v25 = vmul.f32 0.35355338, %v12534_v29  ;;  %12784 = vmax.xlane.f32.xlu1 %v12783_v56  ;;  %v12456_v55 = vpop.f32.mrb[168].mxu1  ;;  %v16353_v39 = vpop.f32.mrb[135].mxu0 }
0x176f   :  { %v12775_v11 = vmul.f32 0.35355338, %v12456_v55  ;;  %v16348_v58 = vpop.f32.mrb[169].mxu1 }
0x1770   :  { %v12792_v21 = vsel %vm531_vm1, %v12776_v25, -inf }
0x1771   :  { %v12690_v19 = vpop.f32.mrb[136].mxu0  ;;  %v12789_v34 = vsel %vm531_vm1, %v12775_v11, -inf }
0x1772   :  { %v12778_v32 = vmul.f32 0.35355338, %v12690_v19  ;;  %12793 = vmax.xlane.f32.xlu1 %v12792_v21  ;;  %12790 = vmax.xlane.f32.xlu0 %v12789_v34  ;;  %v12612_v50 = vpop.f32.mrb[170].mxu1  ;;  %v16363_v27 = vpop.f32.mrb[137].mxu0 }
0x1773   :  { %v12777_v14 = vmul.f32 0.35355338, %v12612_v50  ;;  %v16358_v54 = vpop.f32.mrb[171].mxu1 }
0x1774   :  { %v12798_v42 = vsel %vm531_vm1, %v12778_v32, -inf }
0x1775   :  { %v12795_v47 = vsel %vm531_vm1, %v12777_v14, -inf }
0x1776   :  { %12799 = vmax.xlane.f32.xlu1 %v12798_v42  ;;  %12796 = vmax.xlane.f32.xlu0 %v12795_v47  ;;  %v12768_v51 = vpop.f32.mrb[172].mxu1 }
0x1777   :  { %v12779_v31 = vmul.f32 0.35355338, %v12768_v51  ;;  %v16368_v48 = vpop.f32.mrb[173].mxu1 }
0x1779   :  { %v12801_v1 = vsel %vm531_vm1, %v12779_v31, -inf }
0x177a   :  { %12802 = vmax.xlane.f32.xlu0 %v12801_v1 }
0x1787   :  { %12868 = vrot.lane.b32.xlu1 %v19912_v30, %s17787_s23 }
0x178b   :  { %13020 = vrot.lane.b32.xlu1 %v19924_v35, %s17787_s23 }
0x178f   :  { %13096 = vrot.lane.b32.xlu1 %v19930_v28, %s17787_s23 }
0x1790   :  { %12944 = vrot.lane.b32.xlu0 %v19918_v8, %s17787_s23 }
0x1793   :  { %13248 = vrot.lane.b32.xlu1 %v19942_v62, %s17787_s23 }
0x1794   :  { %13172 = vrot.lane.b32.xlu0 %v19936_v45, %s17787_s23 }
0x17f6   :  { %v12782_v4 = vpop.xlane.xlu0 %12781 }
0x17f7   :  { %v12804_v2 = vsub.f32 %v12772_v7, %v12782_v4 }
0x17f9   :  { %v12812_v52 = vmul.f32 1.442695, %v12804_v2 }
0x17fa   :  { %v12788_v46 = vpop.xlane.xlu0 %12787 }
0x17fb   :  { %17593 = vpow2.f32 %v12812_v52  ;;  %v12806_v30 = vsub.f32 %v12774_v36, %v12788_v46  ;;  %v12785_v10 = vpop.xlane.xlu1 %12784  ;;  %v14953_v46 = vld [vmem:[%s21602_s7] ss:$0 sm:$0xff] }
0x17fc   :  { %v12805_v35 = vsub.f32 %v12773_v40, %v12785_v10  ;;  %v15074_v10 = vld [vmem:[%s21602_s7 + $0x3] ss:$0 sm:$0xff] }
0x17fd   :  { %v12816_v5 = vmul.f32 1.442695, %v12806_v30  ;;  %v14952_v30 = vld [vmem:[%s21602_s7 + $0x1] ss:$0 sm:$0xff] }
0x17fe   :  { %v12814_v6 = vmul.f32 1.442695, %v12805_v35 }
0x17ff   :  { %17595 = vpow2.f32 %v12816_v5  ;;  %v12794_v28 = vpop.xlane.xlu1 %12793  ;;  %v12791_v9 = vpop.xlane.xlu0 %12790 }
0x1800   :  { %17597 = vpow2.f32 %v12814_v6  ;;  %v12808_v8 = vsub.f32 %v12776_v25, %v12794_v28  ;;  %v12807_v15 = vsub.f32 %v12775_v11, %v12791_v9 }
0x1802   :  { %v12820_v62 = vmul.f32 1.442695, %v12808_v8  ;;  %v12818_v29 = vmul.f32 1.442695, %v12807_v15 }
0x1803   :  { %v12800_v56 = vpop.xlane.xlu1 %12799  ;;  %v12797_v45 = vpop.xlane.xlu0 %12796 }
0x1804   :  { %17599 = vpow2.f32 %v12820_v62  ;;  %v12810_v7 = vsub.f32 %v12778_v32, %v12800_v56  ;;  %v12809_v55 = vsub.f32 %v12777_v14, %v12797_v45 }
0x1805   :  { %v20762_v39 = vpop.eup %17593  ;;  %17601 = vpow2.f32 %v12818_v29 }
0x1806   :  { %v12824_v36 = vmul.f32 1.442695, %v12810_v7  ;;  %v12822_v40 = vmul.f32 1.442695, %v12809_v55  ;;  %v12828_v58 = vsel %vm531_vm1, %v20762_v39, 0.0 }
0x1807   :  { %v12869_v21 = vpop.permute.xlu1 %12868  ;;  %v12803_v19 = vpop.xlane.xlu0 %12802  ;;  %12829 = vadd.xlane.f32.xlu1 %v12828_v58 }
0x1808   :  { %17603 = vpow2.f32 %v12824_v36  ;;  %v12811_v25 = vsub.f32 %v12779_v31, %v12803_v19  ;;  %16370 = vmatpush3.msra.mxu0 %v12869_v21 }
0x1809   :  { %v20766_v11 = vpop.eup %17595  ;;  %17605 = vpow2.f32 %v12822_v40  ;;  %16379 = vmatprep.subr.mxu0 %v21842_v22 }
0x180a   :  { %v20769_v34 = vpop.eup %17597  ;;  %v12826_v32 = vmul.f32 1.442695, %v12811_v25  ;;  %v12834_v50 = vsel %vm531_vm1, %v20766_v11, 0.0 }
0x180b   :  { %v12945_v27 = vpop.permute.xlu0 %12944  ;;  %12835 = vadd.xlane.f32.xlu1 %v12834_v50  ;;  %v12831_v14 = vsel %vm531_vm1, %v20769_v34, 0.0  ;;  %v13021_v35 = vpop.permute.xlu1 %13020 }
0x180c   :  { %17607 = vpow2.f32 %v12826_v32  ;;  %12832 = vadd.xlane.f32.xlu0 %v12831_v14  ;;  %16375 = vmatpush3.msra.mxu1 %v12945_v27 }
0x180d   :  { %16384 = vmatprep.subr.mxu1 %v21842_v22 }
0x180e   :  { %v20776_v54 = vpop.eup %17599 }
0x180f   :  { %v20778_v42 = vpop.eup %17601  ;;  %v12840_v47 = vsel %vm531_vm1, %v20776_v54, 0.0  ;;  %v13097_v5 = vpop.permute.xlu1 %13096 }
0x1810   :  { %12841 = vadd.xlane.f32.xlu1 %v12840_v47  ;;  %v12837_v51 = vsel %vm531_vm1, %v20778_v42, 0.0 }
0x1811   :  { %12838 = vadd.xlane.f32.xlu0 %v12837_v51 }
0x1812   :  { %v20784_v31 = vpop.eup %17603 }
0x1813   :  { %v20786_v48 = vpop.eup %17605  ;;  %v12846_v1 = vsel %vm531_vm1, %v20784_v31, 0.0  ;;  %v13249_v6 = vpop.permute.xlu1 %13248 }
0x1814   :  { %12847 = vadd.xlane.f32.xlu1 %v12846_v1  ;;  %v12843_v4 = vsel %vm531_vm1, %v20786_v48, 0.0 }
0x1815   :  { %12844 = vadd.xlane.f32.xlu0 %v12843_v4 }
0x1816   :  { %v20792_v2 = vpop.eup %17607 }
0x1817   :  { %v12849_v52 = vsel %vm531_vm1, %v20792_v2, 0.0 }
0x1819   :  { %12850 = vadd.xlane.f32.xlu0 %v12849_v52 }
0x1825   :  { %13400 = vrot.lane.b32.xlu1 %v19954_v20, %s17787_s23  ;;  %v15075_v20 = vld [vmem:[%s21602_s7 + $0x2] ss:$0 sm:$0xff] }
0x1829   :  { %7133 = vrot.lane.b32.xlu1 %v14953_v46, %s17790_s17 }
0x182d   :  { %13513 = vrot.lane.b32.xlu1 %v15075_v20, %s17790_s17 }
0x182f   :  { %13324 = vrot.lane.b32.xlu0 %v19948_v12, %s17787_s23  ;;  %v13173_v12 = vpop.permute.xlu0 %13172 }
0x1833   :  { %7093 = vrot.lane.b32.xlu0 %v14952_v30, %s17790_s17 }
0x1837   :  { %13489 = vrot.lane.b32.xlu0 %v15074_v10, %s17790_s17  ;;  %v21887_v10 = vld [vmem:[#allocation58_spill] sm:$0xff] }
0x1894   :  { %v12830_v28 = vpop.xlane.xlu1 %12829 }
0x1895   :  { %17609 = vrcp.f32 %v12830_v28 }
0x1898   :  { %v12836_v9 = vpop.xlane.xlu1 %12835 }
0x1899   :  { %17611 = vrcp.f32 %v12836_v9  ;;  %v12833_v8 = vpop.xlane.xlu0 %12832  ;;  %v21889_v9 = vld [vmem:[#allocation72_spill] sm:$0xff] }
0x189a   :  { %17613 = vrcp.f32 %v12833_v8 }
0x189d   :  { %v12842_v15 = vpop.xlane.xlu1 %12841 }
0x189e   :  { %17615 = vrcp.f32 %v12842_v15  ;;  %v12839_v62 = vpop.xlane.xlu0 %12838 }
0x189f   :  { %v17610_v29 = vpop.eup %17609  ;;  %17617 = vrcp.f32 %v12839_v62  ;;  %v21890_v62 = vld [vmem:[#allocation74_spill] sm:$0xff] }
0x18a0   :  { %v12860_v56 = vmul.f32 %v17610_v29, %v20762_v39 }
0x18a1   :  { %v12848_v45 = vpop.xlane.xlu1 %12847 }
0x18a2   :  { %17619 = vrcp.f32 %v12848_v45  ;;  %v12845_v7 = vpop.xlane.xlu0 %12844  ;;  %16372 = vmatmul.mubr.msk.f32.vlgmr.msra.gmra.mrb[138].mxu0 %vm531_vm1, %v12860_v56 }
0x18a3   :  { %v17612_v55 = vpop.eup %17611  ;;  %17621 = vrcp.f32 %v12845_v7  ;;  %16380 = vmatpush3.msra.mxu0 %v13021_v35  ;;  %16381 = vmatprep.mubr.msk.f32.mxu0 %vm17789_vm13, %v21842_v22 }
0x18a4   :  { %v17614_v36 = vpop.eup %17613  ;;  %v12862_v40 = vmul.f32 %v17612_v55, %v20766_v11  ;;  %16389 = vmatprep.subr.mxu0 %v21842_v22  ;;  %v21891_v55 = vld [vmem:[#allocation62_spill] sm:$0xff] }
0x18a5   :  { %v12861_v58 = vmul.f32 %v17614_v36, %v20769_v34 }
0x18a6   :  { %v12851_v21 = vpop.xlane.xlu0 %12850  ;;  %16382 = vmatmul.mubr.msk.f32.vlgmr.msra.gmra.mrb[140].mxu0 %vm531_vm1, %v12862_v40 }
0x18a7   :  { %17623 = vrcp.f32 %v12851_v21  ;;  %16377 = vmatmul.mubr.msk.f32.vlgmr.msra.gmra.mrb[174].mxu1 %vm531_vm1, %v12861_v58  ;;  %16390 = vmatpush3.msra.mxu0 %v13173_v12  ;;  %v21892_v58 = vld [vmem:[#allocation64_spill] sm:$0xff] }
0x18a8   :  { %v17616_v39 = vpop.eup %17615  ;;  %16385 = vmatpush3.msra.mxu1 %v13097_v5  ;;  %16386 = vmatprep.mubr.msk.f32.mxu1 %vm17789_vm13, %v21842_v22 }
0x18a9   :  { %v17618_v19 = vpop.eup %17617  ;;  %v12864_v25 = vmul.f32 %v17616_v39, %v20776_v54  ;;  %16391 = vmatprep.mubr.msk.f32.mxu0 %vm17789_vm13, %v21842_v22  ;;  %16394 = vmatprep.subr.mxu1 %v21842_v22 }
0x18aa   :  { %v12863_v11 = vmul.f32 %v17618_v19, %v20778_v42  ;;  %v13325_v34 = vpop.permute.xlu0 %13324  ;;  %16399 = vmatprep.subr.mxu0 %v21842_v22 }
0x18ab   :  { %16392 = vmatmul.mubr.msk.f32.vlgmr.msra.gmra.mrb[142].mxu0 %vm531_vm1, %v12864_v25 }
0x18ac   :  { %v17620_v32 = vpop.eup %17619  ;;  %16387 = vmatmul.mubr.msk.f32.vlgmr.msra.gmra.mrb[176].mxu1 %vm531_vm1, %v12863_v11  ;;  %16400 = vmatpush3.msra.mxu0 %v13325_v34  ;;  %v21893_v11 = vld [vmem:[#allocation76_spill] sm:$0xff] }
0x18ad   :  { %v17622_v50 = vpop.eup %17621  ;;  %v12866_v27 = vmul.f32 %v17620_v32, %v20784_v31  ;;  %16395 = vmatpush3.msra.mxu1 %v13249_v6  ;;  %16396 = vmatprep.mubr.msk.f32.mxu1 %vm17789_vm13, %v21842_v22  ;;  %v13401_v31 = vpop.permute.xlu1 %13400 }
0x18ae   :  { %v12865_v14 = vmul.f32 %v17622_v50, %v20786_v48  ;;  %v20835_v54 = vpop.permute.xlu0 %7093  ;;  %16401 = vmatprep.mubr.msk.f32.mxu0 %vm17789_vm13, %v21842_v22  ;;  %16404 = vmatprep.subr.mxu1 %v21842_v22  ;;  %v21894_v50 = vld [vmem:[#allocation78_spill] sm:$0xff] }
0x18af   :  { %16402 = vmatmul.mubr.msk.f32.vlgmr.msra.gmra.mrb[144].mxu0 %vm531_vm1, %v12866_v27  ;;  %v7097_v42 = vadd.f32 %v20835_v54, %v19716_v17  ;;  %v7096_v47 = vadd.f32 %v20835_v54, %v19722_v57  ;;  %v7099_v51 = vadd.f32 %v20835_v54, %v19860_v59  ;;  %v7098_v48 = vadd.f32 %v20835_v54, %v19866_v53  ;;  %v21885_v53 = vld [vmem:[#allocation68_spill] sm:$0xff] }
0x18b0   :  { %16397 = vmatmul.mubr.msk.f32.vlgmr.msra.gmra.mrb[178].mxu1 %vm531_vm1, %v12865_v14  ;;  %16409 = vmatprep.subr.mxu0 %v21842_v22  ;;  %v7101_v57 = vadd.f32 %v20835_v54, %v19730_v26  ;;  %v7100_v59 = vadd.f32 %v20835_v54, %v19736_v13  ;;  %v7103_v4 = vadd.f32 %v20835_v54, %v21885_v53  ;;  %v21888_v13 = vld [vmem:[#allocation60_spill] sm:$0xff] }
0x18b1   :  { %v17624_v1 = vpop.eup %17623  ;;  %16405 = vmatpush3.msra.mxu1 %v13401_v31  ;;  %16406 = vmatprep.mubr.msk.f32.mxu1 %vm17789_vm13, %v21842_v22  ;;  %17625 = vtanh.f32 %v7097_v42  ;;  %v20865_v46 = vpop.permute.xlu1 %7133  ;;  %v7105_v26 = vadd.f32 %v20835_v54, %v21887_v10  ;;  %v7104_v5 = vadd.f32 %v20835_v54, %v21888_v13  ;;  %v7107_v8 = vadd.f32 %v20835_v54, %v21889_v9 }
0x18b2   :  { %v12867_v17 = vmul.f32 %v17624_v1, %v20792_v2  ;;  %17627 = vtanh.f32 %v7096_v47  ;;  %16411 = vmatprep.mubr.msk.f32.mxu0 %vm17789_vm13, %v21842_v22  ;;  %v21886_v2 = vld [vmem:[#allocation70_spill] sm:$0xff]  ;;  %v7106_v29 = vadd.f32 %v20835_v54, %v21890_v62  ;;  %v7109_v36 = vadd.f32 %v20835_v54, %v21891_v55 }
0x18b3   :  { %17629 = vtanh.f32 %v7099_v51  ;;  %v7102_v52 = vadd.f32 %v20835_v54, %v21886_v2  ;;  %v7108_v21 = vadd.f32 %v20835_v54, %v21892_v58  ;;  %v7111_v34 = vadd.f32 %v20835_v54, %v21893_v11 }
0x18b4   :  { %16407 = vmatmul.mubr.msk.f32.vlgmr.msra.gmra.mrb[180].mxu1 %vm531_vm1, %v12867_v17  ;;  %17631 = vtanh.f32 %v7098_v48  ;;  %v7110_v27 = vadd.f32 %v20835_v54, %v21894_v50 }
0x18b5   :  { %17633 = vtanh.f32 %v7101_v57 }
0x18b6   :  { %17635 = vtanh.f32 %v7100_v59 }
0x18b7   :  { %17637 = vtanh.f32 %v7103_v4 }
0x18b8   :  { %17639 = vtanh.f32 %v7102_v52 }
0x18b9   :  { %17641 = vtanh.f32 %v7105_v26  ;;  %v20915_v26 = vpop.permute.xlu1 %13513 }
0x18ba   :  { %17643 = vtanh.f32 %v7104_v5 }
0x18bb   :  { %v17626_v30 = vpop.eup %17625  ;;  %17645 = vtanh.f32 %v7107_v8 }
0x18bc   :  { %v17628_v20 = vpop.eup %17627  ;;  %v7137_v35 = vmul.f32 %v17626_v30, %v20865_v46  ;;  %17647 = vtanh.f32 %v7106_v29 }
0x18bd   :  { %v17630_v6 = vpop.eup %17629  ;;  %v7136_v28 = vmul.f32 %v17628_v20, %v20865_v46  ;;  %17649 = vtanh.f32 %v7109_v36  ;;  %v20917_v20 = vpop.permute.xlu0 %13489 }
0x18be   :  { %v17632_v12 = vpop.eup %17631  ;;  %7170 = vrot.lane.b32.xlu1 %v7137_v35, %s17783_s19  ;;  %v7139_v15 = vmul.f32 %v17630_v6, %v20865_v46  ;;  %17651 = vtanh.f32 %v7108_v21 }
0x18bf   :  { %7168 = vrot.lane.b32.xlu0 %v7136_v28, %s17783_s19  ;;  %v17634_v56 = vpop.eup %17633  ;;  %v7138_v45 = vmul.f32 %v17632_v12, %v20865_v46  ;;  %17653 = vtanh.f32 %v7111_v34 }
0x18c0   :  { %v17636_v7 = vpop.eup %17635  ;;  %v7141_v40 = vmul.f32 %v17634_v56, %v20865_v46  ;;  %17655 = vtanh.f32 %v7110_v27 }
0x18c1   :  { %v17638_v39 = vpop.eup %17637  ;;  %v7140_v19 = vmul.f32 %v17636_v7, %v20865_v46 }
0x18c2   :  { %7174 = vrot.lane.b32.xlu1 %v7139_v15, %s17783_s19  ;;  %v17640_v25 = vpop.eup %17639  ;;  %v7143_v32 = vmul.f32 %v17638_v39, %v20865_v46 }
0x18c3   :  { %7172 = vrot.lane.b32.xlu0 %v7138_v45, %s17783_s19  ;;  %v17642_v14 = vpop.eup %17641  ;;  %v7142_v42 = vmul.f32 %v17640_v25, %v20865_v46 }
0x18c4   :  { %v17644_v47 = vpop.eup %17643  ;;  %v7145_v51 = vmul.f32 %v17642_v14, %v20865_v46 }
0x18c5   :  { %v17646_v31 = vpop.eup %17645  ;;  %v7144_v48 = vmul.f32 %v17644_v47, %v20865_v46 }
0x18c6   :  { %7178 = vrot.lane.b32.xlu1 %v7141_v40, %s17783_s19  ;;  %v17648_v1 = vpop.eup %17647  ;;  %v7147_v54 = vmul.f32 %v17646_v31, %v20865_v46 }
0x18c7   :  { %7176 = vrot.lane.b32.xlu0 %v7140_v19, %s17783_s19  ;;  %v17650_v17 = vpop.eup %17649  ;;  %v7146_v57 = vmul.f32 %v17648_v1, %v20865_v46 }
0x18c8   :  { %v17652_v59 = vpop.eup %17651  ;;  %v7149_v53 = vmul.f32 %v17650_v17, %v20865_v46 }
0x18c9   :  { %v17654_v4 = vpop.eup %17653  ;;  %v7148_v2 = vmul.f32 %v17652_v59, %v20865_v46 }
0x18ca   :  { %7182 = vrot.lane.b32.xlu1 %v7143_v32, %s17783_s19  ;;  %v17656_v52 = vpop.eup %17655  ;;  %v7151_v30 = vmul.f32 %v17654_v4, %v20865_v46 }
0x18cb   :  { %7180 = vrot.lane.b32.xlu0 %v7142_v42, %s17783_s19  ;;  %v7150_v10 = vmul.f32 %v17656_v52, %v20865_v46 }
0x18ce   :  { %7186 = vrot.lane.b32.xlu1 %v7145_v51, %s17783_s19 }
0x18cf   :  { %7184 = vrot.lane.b32.xlu0 %v7144_v48, %s17783_s19 }
0x18d2   :  { %7190 = vrot.lane.b32.xlu1 %v7147_v54, %s17783_s19 }
0x18d3   :  { %7188 = vrot.lane.b32.xlu0 %v7146_v57, %s17783_s19 }
0x18d6   :  { %7194 = vrot.lane.b32.xlu1 %v7149_v53, %s17783_s19 }
0x18d7   :  { %7192 = vrot.lane.b32.xlu0 %v7148_v2, %s17783_s19 }
0x18da   :  { %7198 = vrot.lane.b32.xlu1 %v7151_v30, %s17783_s19 }
0x18db   :  { %7196 = vrot.lane.b32.xlu0 %v7150_v10, %s17783_s19 }
0x1930   :  { %v7171_v35 = vpop.permute.xlu1 %7170 }
0x1931   :  { %v7169_v13 = vpop.permute.xlu0 %7168  ;;  %v7219_v5 = vsel %vm315_vm0, %v7171_v35, 0.0 }
0x1932   :  { %v7216_v6 = vsel %vm315_vm0, %v7169_v13, 0.0  ;;  %7220 = vadd.xlane.f32.xlu1 %v7219_v5 }
0x1933   :  { %7217 = vadd.xlane.f32.xlu0 %v7216_v6 }
0x1934   :  { %v7175_v28 = vpop.permute.xlu1 %7174 }
0x1935   :  { %v7173_v12 = vpop.permute.xlu0 %7172  ;;  %v7225_v15 = vsel %vm315_vm0, %v7175_v28, 0.0 }
0x1936   :  { %v7222_v46 = vsel %vm315_vm0, %v7173_v12, 0.0 }
0x1937   :  { %7223 = vadd.xlane.f32.xlu0 %v7222_v46 }
0x1938   :  { %v7179_v9 = vpop.permute.xlu1 %7178 }
0x1939   :  { %v7177_v8 = vpop.permute.xlu0 %7176  ;;  %v7231_v45 = vsel %vm315_vm0, %v7179_v9, 0.0 }
0x193a   :  { %v7228_v62 = vsel %vm315_vm0, %v7177_v8, 0.0 }
0x193b   :  { %7229 = vadd.xlane.f32.xlu1 %v7228_v62  ;;  %7226 = vadd.xlane.f32.xlu0 %v7225_v15 }
0x193c   :  { %v7183_v29 = vpop.permute.xlu1 %7182 }
0x193d   :  { %v7181_v56 = vpop.permute.xlu0 %7180  ;;  %v7237_v40 = vsel %vm315_vm0, %v7183_v29, 0.0 }
0x193e   :  { %v7234_v7 = vsel %vm315_vm0, %v7181_v56, 0.0 }
0x193f   :  { %7235 = vadd.xlane.f32.xlu1 %v7234_v7  ;;  %7232 = vadd.xlane.f32.xlu0 %v7231_v45 }
0x1940   :  { %v7187_v36 = vpop.permute.xlu1 %7186 }
0x1941   :  { %v7185_v55 = vpop.permute.xlu0 %7184  ;;  %v7243_v39 = vsel %vm315_vm0, %v7187_v36, 0.0 }
0x1942   :  { %v7240_v58 = vsel %vm315_vm0, %v7185_v55, 0.0 }
0x1943   :  { %7241 = vadd.xlane.f32.xlu1 %v7240_v58  ;;  %7238 = vadd.xlane.f32.xlu0 %v7237_v40 }
0x1944   :  { %v7191_v25 = vpop.permute.xlu1 %7190 }
0x1945   :  { %v7189_v21 = vpop.permute.xlu0 %7188  ;;  %v7249_v11 = vsel %vm315_vm0, %v7191_v25, 0.0 }
0x1946   :  { %v7246_v19 = vsel %vm315_vm0, %v7189_v21, 0.0 }
0x1947   :  { %7247 = vadd.xlane.f32.xlu1 %v7246_v19  ;;  %7244 = vadd.xlane.f32.xlu0 %v7243_v39 }
0x1948   :  { %v7195_v58 = vpop.permute.xlu1 %7194 }
0x1949   :  { %v7255_v21 = vsel %vm315_vm0, %v7195_v58, 0.0  ;;  %v7193_v19 = vpop.permute.xlu0 %7192 }
0x194b   :  { %7250 = vadd.xlane.f32.xlu0 %v7249_v11  ;;  %v7252_v11 = vsel %vm315_vm0, %v7193_v19, 0.0 }
0x194c   :  { %v7199_v39 = vpop.permute.xlu1 %7198 }
0x194d   :  { %v7261_v25 = vsel %vm315_vm0, %v7199_v39, 0.0 }
0x1975   :  { %v20931_v34 = vpop.f32.mrb[138].mxu0 }
0x1976   :  { %v13476_v32 = vadd.f32 %v20931_v34, %v20698_v49  ;;  %v16373_v50 = vpop.f32.mrb[139].mxu0 }
0x1978   :  { %v13492_v27 = vadd.f32 %v20917_v20, %v13476_v32  ;;  %v7197_v32 = vpop.permute.xlu0 %7196 }
0x1979   :  { %v20936_v14 = vpop.f32.mrb[140].mxu0 }
0x197a   :  { %17657 = vtanh.f32 %v13492_v27  ;;  %v20938_v42 = vpop.f32.mrb[174].mxu1  ;;  %v13478_v47 = vadd.f32 %v20936_v14, %v20706_v37  ;;  %v16383_v51 = vpop.f32.mrb[141].mxu0  ;;  %v7258_v27 = vsel %vm315_vm0, %v7197_v32, 0.0 }
0x197b   :  { %v13477_v31 = vadd.f32 %v20938_v42, %v20710_v44  ;;  %v16378_v48 = vpop.f32.mrb[175].mxu1 }
0x197c   :  { %v13494_v1 = vadd.f32 %v20917_v20, %v13478_v47 }
0x197d   :  { %v13493_v49 = vadd.f32 %v20917_v20, %v13477_v31 }
0x197e   :  { %17659 = vtanh.f32 %v13494_v1  ;;  %v20946_v54 = vpop.f32.mrb[142].mxu0 }
0x197f   :  { %17661 = vtanh.f32 %v13493_v49  ;;  %v20948_v17 = vpop.f32.mrb[176].mxu1  ;;  %v13480_v57 = vadd.f32 %v20946_v54, %v20718_v43  ;;  %v16393_v59 = vpop.f32.mrb[143].mxu0 }
0x1980   :  { %v13479_v37 = vadd.f32 %v20948_v17, %v20722_v38  ;;  %v16388_v53 = vpop.f32.mrb[177].mxu1 }
0x1981   :  { %v13496_v44 = vadd.f32 %v20917_v20, %v13480_v57 }
0x1982   :  { %v13495_v4 = vadd.f32 %v20917_v20, %v13479_v37  ;;  %v20956_v2 = vpop.f32.mrb[144].mxu0 }
0x1983   :  { %17663 = vtanh.f32 %v13496_v44  ;;  %v20958_v52 = vpop.f32.mrb[178].mxu1  ;;  %v13482_v30 = vadd.f32 %v20956_v2, %v20734_v24  ;;  %v16403_v10 = vpop.f32.mrb[145].mxu0 }
0x1984   :  { %v17658_v35 = vpop.eup %17657  ;;  %17665 = vtanh.f32 %v13495_v4  ;;  %v13481_v43 = vadd.f32 %v20958_v52, %v20728_v41  ;;  %v16398_v38 = vpop.f32.mrb[179].mxu1 }
0x1985   :  { %v13498_v13 = vadd.f32 %v20917_v20, %v13482_v30  ;;  %v13516_v5 = vmul.f32 %v17658_v35, %v20915_v26 }
0x1986   :  { %v13497_v6 = vadd.f32 %v20917_v20, %v13481_v43 }
0x1987   :  { %17667 = vtanh.f32 %v13498_v13  ;;  %v20967_v28 = vpop.f32.mrb[180].mxu1  ;;  %13532 = vrot.lane.b32.xlu0 %v13516_v5, %s17783_s19 }
0x1988   :  { %v17660_v12 = vpop.eup %17659  ;;  %17669 = vtanh.f32 %v13497_v6  ;;  %v13483_v24 = vadd.f32 %v20967_v28, %v20740_v61  ;;  %v16408_v46 = vpop.f32.mrb[181].mxu1 }
0x1989   :  { %v17662_v9 = vpop.eup %17661  ;;  %v13518_v41 = vmul.f32 %v17660_v12, %v20915_v26 }
0x198a   :  { %v13499_v8 = vadd.f32 %v20917_v20, %v13483_v24  ;;  %v13517_v15 = vmul.f32 %v17662_v9, %v20915_v26 }
0x198b   :  { %13536 = vrot.lane.b32.xlu0 %v13518_v41, %s17783_s19 }
0x198c   :  { %17671 = vtanh.f32 %v13499_v8  ;;  %13534 = vrot.lane.b32.xlu1 %v13517_v15, %s17783_s19 }
0x198d   :  { %v17664_v62 = vpop.eup %17663 }
0x198e   :  { %v17666_v29 = vpop.eup %17665  ;;  %v13520_v56 = vmul.f32 %v17664_v62, %v20915_v26 }
0x198f   :  { %v13519_v45 = vmul.f32 %v17666_v29, %v20915_v26 }
0x1990   :  { %13540 = vrot.lane.b32.xlu0 %v13520_v56, %s17783_s19 }
0x1991   :  { %v17668_v61 = vpop.eup %17667  ;;  %13538 = vrot.lane.b32.xlu1 %v13519_v45, %s17783_s19 }
0x1992   :  { %v17670_v7 = vpop.eup %17669  ;;  %v13522_v20 = vmul.f32 %v17668_v61, %v20915_v26 }
0x1993   :  { %v13521_v55 = vmul.f32 %v17670_v7, %v20915_v26 }
0x1994   :  { %13544 = vrot.lane.b32.xlu0 %v13522_v20, %s17783_s19 }
0x1995   :  { %13542 = vrot.lane.b32.xlu1 %v13521_v55, %s17783_s19 }
0x1996   :  { %v17672_v36 = vpop.eup %17671 }
0x1997   :  { %v13523_v40 = vmul.f32 %v17672_v36, %v20915_v26 }
0x1999   :  { %13546 = vrot.lane.b32.xlu1 %v13523_v40, %s17783_s19 }
0x19b3   :  { %7256 = vadd.xlane.f32.xlu0 %v7255_v21 }
0x19b7   :  { %7262 = vadd.xlane.f32.xlu0 %v7261_v25 }
0x19bd   :  { %7253 = vadd.xlane.f32.xlu1 %v7252_v11 }
0x19bf   :  { %v7221_v50 = vpop.xlane.xlu1 %7220 }
0x19c0   :  { %v7218_v47 = vpop.xlane.xlu0 %7217 }
0x19c1   :  { %v7264_v26 = vmax.f32 %v7218_v47, %v7221_v50  ;;  %7259 = vadd.xlane.f32.xlu1 %v7258_v27 }
0x19c3   :  { %v7265_v51 = vrot.slane %v7264_v26, 4 }
0x19c4   :  { %v7224_v31 = vpop.xlane.xlu0 %7223 }
0x19c5   :  { %v7266_v48 = vmax.f32 %v7264_v26, %v7265_v51 }
0x19c7   :  { %v7267_v1 = vrot.slane %v7266_v48, 2 }
0x19c8   :  { %v7227_v49 = vpop.xlane.xlu0 %7226  ;;  %v7230_v57 = vpop.xlane.xlu1 %7229 }
0x19c9   :  { %v7268_v59 = vmax.f32 %v7266_v48, %v7267_v1  ;;  %v7271_v37 = vmax.f32 %v7224_v31, %v7227_v49 }
0x19cb   :  { %v7269_v53 = vrot.slane %v7268_v59, 1  ;;  %v7272_v44 = vrot.slane %v7271_v37, 4 }
0x19cc   :  { %v7233_v4 = vpop.xlane.xlu0 %7232  ;;  %v7236_v43 = vpop.xlane.xlu1 %7235 }
0x19cd   :  { %v7270_v30 = vmax.f32 %v7268_v59, %v7269_v53  ;;  %v7273_v10 = vmax.f32 %v7271_v37, %v7272_v44  ;;  %v7278_v35 = vmax.f32 %v7230_v57, %v7233_v4 }
0x19cf   :  { %v7320_v38 = vsub.f32 %v7218_v47, %v7270_v30  ;;  %v7321_v13 = vsub.f32 %v7221_v50, %v7270_v30  ;;  %v7274_v5 = vrot.slane %v7273_v10, 2  ;;  %v7279_v6 = vrot.slane %v7278_v35, 4 }
0x19d0   :  { %v7239_v12 = vpop.xlane.xlu0 %7238  ;;  %v7242_v29 = vpop.xlane.xlu1 %7241 }
0x19d1   :  { %v7336_v24 = vmul.f32 1.442695, %v7320_v38  ;;  %v7338_v46 = vmul.f32 1.442695, %v7321_v13  ;;  %v7275_v9 = vmax.f32 %v7273_v10, %v7274_v5  ;;  %v7280_v41 = vmax.f32 %v7278_v35, %v7279_v6 }
0x19d2   :  { %v7285_v8 = vmax.f32 %v7236_v43, %v7239_v12 }
0x19d3   :  { %17673 = vpow2.f32 %v7336_v24  ;;  %v7276_v15 = vrot.slane %v7275_v9, 1  ;;  %v7281_v62 = vrot.slane %v7280_v41, 2 }
0x19d4   :  { %17675 = vpow2.f32 %v7338_v46  ;;  %v7286_v56 = vrot.slane %v7285_v8, 4  ;;  %v7245_v45 = vpop.xlane.xlu0 %7244  ;;  %v7248_v27 = vpop.xlane.xlu1 %7247 }
0x19d5   :  { %v7277_v61 = vmax.f32 %v7275_v9, %v7276_v15  ;;  %v7282_v7 = vmax.f32 %v7280_v41, %v7281_v62  ;;  %v7292_v20 = vmax.f32 %v7242_v29, %v7245_v45 }
0x19d6   :  { %v7287_v55 = vmax.f32 %v7285_v8, %v7286_v56 }
0x19d7   :  { %v7322_v36 = vsub.f32 %v7224_v31, %v7277_v61  ;;  %v7323_v40 = vsub.f32 %v7227_v49, %v7277_v61  ;;  %v7283_v58 = vrot.slane %v7282_v7, 1  ;;  %v7293_v21 = vrot.slane %v7292_v20, 4 }
0x19d8   :  { %v7288_v39 = vrot.slane %v7287_v55, 2  ;;  %v7251_v19 = vpop.xlane.xlu0 %7250 }
0x19d9   :  { %v7340_v25 = vmul.f32 1.442695, %v7322_v36  ;;  %v7342_v11 = vmul.f32 1.442695, %v7323_v40  ;;  %v7284_v32 = vmax.f32 %v7282_v7, %v7283_v58  ;;  %v7294_v50 = vmax.f32 %v7292_v20, %v7293_v21 }
0x19da   :  { %v7289_v47 = vmax.f32 %v7287_v55, %v7288_v39  ;;  %v7299_v26 = vmax.f32 %v7248_v27, %v7251_v19 }
0x19db   :  { %17677 = vpow2.f32 %v7340_v25  ;;  %v7324_v51 = vsub.f32 %v7230_v57, %v7284_v32  ;;  %v7325_v48 = vsub.f32 %v7233_v4, %v7284_v32  ;;  %v7295_v1 = vrot.slane %v7294_v50, 2 }
0x19dc   :  { %17679 = vpow2.f32 %v7342_v11  ;;  %v7290_v59 = vrot.slane %v7289_v47, 1  ;;  %v7300_v37 = vrot.slane %v7299_v26, 4 }
0x19dd   :  { %v20991_v31 = vpop.eup %17673  ;;  %v7344_v49 = vmul.f32 1.442695, %v7324_v51  ;;  %v7346_v53 = vmul.f32 1.442695, %v7325_v48  ;;  %v7296_v44 = vmax.f32 %v7294_v50, %v7295_v1 }
0x19de   :  { %v20993_v30 = vpop.eup %17675  ;;  %v7291_v10 = vmax.f32 %v7289_v47, %v7290_v59  ;;  %v7301_v35 = vmax.f32 %v7299_v26, %v7300_v37 }
0x19df   :  { %v7368_v38 = vadd.f32 %v20993_v30, %v20991_v31  ;;  %17681 = vpow2.f32 %v7344_v49  ;;  %v7297_v13 = vrot.slane %v7296_v44, 1 }
0x19e0   :  { %17683 = vpow2.f32 %v7346_v53  ;;  %v7326_v57 = vsub.f32 %v7236_v43, %v7291_v10  ;;  %v7327_v4 = vsub.f32 %v7239_v12, %v7291_v10  ;;  %v7302_v5 = vrot.slane %v7301_v35, 2 }
0x19e1   :  { %v7369_v6 = vrot.slane %v7368_v38, 4  ;;  %v7298_v24 = vmax.f32 %v7296_v44, %v7297_v13 }
0x19e2   :  { %v7348_v46 = vmul.f32 1.442695, %v7326_v57  ;;  %v7350_v9 = vmul.f32 1.442695, %v7327_v4  ;;  %v7303_v41 = vmax.f32 %v7301_v35, %v7302_v5 }
0x19e3   :  { %v7370_v8 = vadd.f32 %v7369_v6, %v7368_v38  ;;  %v7328_v15 = vsub.f32 %v7242_v29, %v7298_v24  ;;  %v7329_v62 = vsub.f32 %v7245_v45, %v7298_v24 }
0x19e4   :  { %17685 = vpow2.f32 %v7348_v46  ;;  %v7304_v56 = vrot.slane %v7303_v41, 1 }
0x19e5   :  { %v20997_v61 = vpop.eup %17677  ;;  %v7371_v7 = vrot.slane %v7370_v8, 2  ;;  %17687 = vpow2.f32 %v7350_v9  ;;  %v7352_v20 = vmul.f32 1.442695, %v7328_v15  ;;  %v7354_v55 = vmul.f32 1.442695, %v7329_v62 }
0x19e6   :  { %v20999_v36 = vpop.eup %17679  ;;  %v7305_v43 = vmax.f32 %v7303_v41, %v7304_v56 }
0x19e7   :  { %v7372_v12 = vadd.f32 %v7371_v7, %v7370_v8  ;;  %v7375_v40 = vadd.f32 %v20999_v36, %v20997_v61  ;;  %17689 = vpow2.f32 %v7352_v20 }
0x19e8   :  { %17691 = vpow2.f32 %v7354_v55  ;;  %v7330_v58 = vsub.f32 %v7248_v27, %v7305_v43  ;;  %v7331_v29 = vsub.f32 %v7251_v19, %v7305_v43  ;;  %v21895_v43 = vld [vmem:[#allocation36_spill] sm:$0xff] }
0x19e9   :  { %v21003_v45 = vpop.eup %17681  ;;  %v7373_v21 = vrot.slane %v7372_v12, 1  ;;  %v7376_v39 = vrot.slane %v7375_v40, 4 }
0x19ea   :  { %v21005_v25 = vpop.eup %17683  ;;  %v7356_v11 = vmul.f32 1.442695, %v7330_v58  ;;  %v7358_v32 = vmul.f32 1.442695, %v7331_v29  ;;  %v21897_v29 = vld [vmem:[#allocation18_spill] sm:$0xff] }
0x19eb   :  { %v7374_v50 = vadd.f32 %v7373_v21, %v7372_v12  ;;  %v7377_v47 = vadd.f32 %v7376_v39, %v7375_v40  ;;  %v7382_v26 = vadd.f32 %v21005_v25, %v21003_v45  ;;  %v21896_v40 = vld [vmem:[#allocation35_spill] sm:$0xff] }
0x19ec   :  { %17693 = vpow2.f32 %v7356_v11  ;;  %v21898_v39 = vld [vmem:[#allocation11_spill] sm:$0xff] }
0x19ed   :  { %17695 = vrcp.f32 %v7374_v50  ;;  %v7378_v51 = vrot.slane %v7377_v47, 2  ;;  %v7383_v48 = vrot.slane %v7382_v26, 4 }
0x19ee   :  { %v21009_v1 = vpop.eup %17685  ;;  %17697 = vpow2.f32 %v7358_v32  ;;  %v21899_v32 = vld [vmem:[#allocation20_spill] sm:$0xff] }
0x19ef   :  { %v21011_v19 = vpop.eup %17687  ;;  %v7379_v27 = vadd.f32 %v7378_v51, %v7377_v47  ;;  %v7384_v59 = vadd.f32 %v7383_v48, %v7382_v26  ;;  %v21902_v51 = vld [vmem:[#allocation5_spill] sm:$0xff] }
0x19f0   :  { %v7389_v37 = vadd.f32 %v21011_v19, %v21009_v1 }
0x19f1   :  { %v21015_v49 = vpop.eup %17689  ;;  %v7380_v53 = vrot.slane %v7379_v27, 1  ;;  %v7385_v44 = vrot.slane %v7384_v59, 2 }
0x19f2   :  { %v21017_v10 = vpop.eup %17691  ;;  %v7390_v35 = vrot.slane %v7389_v37, 4 }
0x19f3   :  { %v7381_v38 = vadd.f32 %v7380_v53, %v7379_v27  ;;  %v7386_v13 = vadd.f32 %v7385_v44, %v7384_v59  ;;  %v7396_v57 = vadd.f32 %v21017_v10, %v21015_v49 }
0x19f4   :  { %v7391_v4 = vadd.f32 %v7390_v35, %v7389_v37 }
0x19f5   :  { %17699 = vrcp.f32 %v7381_v38  ;;  %v7387_v5 = vrot.slane %v7386_v13, 1  ;;  %v7397_v6 = vrot.slane %v7396_v57, 4 }
0x19f6   :  { %v21021_v24 = vpop.eup %17693  ;;  %v7392_v46 = vrot.slane %v7391_v4, 2 }
0x19f7   :  { %v17696_v9 = vpop.eup %17695  ;;  %v7388_v41 = vadd.f32 %v7387_v5, %v7386_v13  ;;  %v7398_v8 = vadd.f32 %v7397_v6, %v7396_v57 }
0x19f8   :  { %v21023_v15 = vpop.eup %17697  ;;  %v7432_v62 = vmul.f32 %v17696_v9, %v20991_v31  ;;  %v7433_v56 = vmul.f32 %v17696_v9, %v20993_v30  ;;  %v7393_v7 = vadd.f32 %v7392_v46, %v7391_v4  ;;  %v21900_v31 = vld [vmem:[#allocation9_spill] sm:$0xff]  ;;  %v21901_v30 = vld [vmem:[#allocation54_spill] sm:$0xff] }
0x19f9   :  { %17701 = vrcp.f32 %v7388_v41  ;;  %v7399_v20 = vrot.slane %v7398_v8, 2  ;;  %v21029_v55 = vadd.f32 %v21023_v15, %v21021_v24  ;;  %v21047_v46 = vpop.permute.xlu0 %13532 }
0x19fa   :  { %v7448_v12 = vmul.f32 %v7432_v62, %v21895_v43  ;;  %v7449_v58 = vmul.f32 %v21896_v40, %v7433_v56  ;;  %v7536_v21 = vmul.f32 %v7432_v62, %v21897_v29  ;;  %v7537_v11 = vmul.f32 %v21898_v39, %v7433_v56 }
0x19fb   :  { %v7624_v50 = vmul.f32 %v7432_v62, %v21899_v32  ;;  %v7625_v47 = vmul.f32 %v21900_v31, %v7433_v56  ;;  %v7712_v26 = vmul.f32 %v7432_v62, %v21901_v30  ;;  %v7713_v48 = vmul.f32 %v21902_v51, %v7433_v56 }
0x19fc   :  { %v7464_v27 = vsel %vm531_vm1, %v7448_v12, 0.0  ;;  %v7465_v59 = vsel %vm531_vm1, %v7449_v58, 0.0  ;;  %v7552_v37 = vsel %vm531_vm1, %v7536_v21, 0.0  ;;  %v7553_v53 = vsel %vm531_vm1, %v7537_v11, 0.0 }
0x19fd   :  { %v7466_v44 = vadd.f32 %v7465_v59, %v7464_v27  ;;  %v7554_v35 = vadd.f32 %v7553_v53, %v7552_v37  ;;  %v7640_v38 = vsel %vm531_vm1, %v7624_v50, 0.0  ;;  %v7641_v13 = vsel %vm531_vm1, %v7625_v47, 0.0  ;;  %v21903_v50 = vld [vmem:[#allocation38_spill] sm:$0xff]  ;;  %v21904_v47 = vld [vmem:[#allocation37_spill] sm:$0xff]  ;;  %v21906_v27 = vld [vmem:[#allocation27_spill] sm:$0xff] }
0x19fe   :  { %v7642_v57 = vadd.f32 %v7641_v13, %v7640_v38  ;;  %v7728_v4 = vsel %vm531_vm1, %v7712_v26, 0.0  ;;  %v7729_v5 = vsel %vm531_vm1, %v7713_v48, 0.0  ;;  %v7394_v6 = vrot.slane %v7393_v7, 1  ;;  %v21049_v9 = vpop.permute.xlu1 %13534  ;;  %v21905_v26 = vld [vmem:[#allocation6_spill] sm:$0xff]  ;;  %v21908_v59 = vld [vmem:[#allocation19_spill] sm:$0xff]  ;;  %v13537_v13 = vpop.permute.xlu0 %13536 }
0x19ff   :  { %v17700_v41 = vpop.eup %17699  ;;  %v7467_v62 = vrot.slane %v7466_v44, 4  ;;  %v7555_v56 = vrot.slane %v7554_v35, 4  ;;  %v7730_v43 = vadd.f32 %v7729_v5, %v7728_v4  ;;  %v7400_v12 = vadd.f32 %v7399_v20, %v7398_v8  ;;  %v21907_v20 = vld [vmem:[#allocation16_spill] sm:$0xff] }
0x1a00   :  { %v7434_v40 = vmul.f32 %v17700_v41, %v20997_v61  ;;  %v7435_v58 = vmul.f32 %v17700_v41, %v20999_v36  ;;  %v7643_v39 = vrot.slane %v7642_v57, 4  ;;  %v7395_v11 = vadd.f32 %v7394_v6, %v7393_v7 }
0x1a01   :  { %v21053_v29 = vadd.f32 %v7467_v62, %v7466_v44  ;;  %v21055_v21 = vadd.f32 %v7555_v56, %v7554_v35  ;;  %v7731_v32 = vrot.slane %v7730_v43, 4  ;;  %v7401_v37 = vrot.slane %v7400_v12, 1  ;;  %v21909_v35 = vld [vmem:[#allocation66_spill] sm:$0xff] }
0x1a02   :  { %v7450_v31 = vmul.f32 %v7434_v40, %v21903_v50  ;;  %v7451_v30 = vmul.f32 %v21904_v47, %v7435_v58  ;;  %v7538_v51 = vmul.f32 %v7434_v40, %v21905_v26  ;;  %v7539_v8 = vmul.f32 %v21906_v27, %v7435_v58  ;;  %v21910_v47 = vld [vmem:[#allocation65_spill] sm:$0xff] }
0x1a03   :  { %v17702_v48 = vpop.eup %17701  ;;  %v7626_v61 = vmul.f32 %v7434_v40, %v21907_v20  ;;  %v7627_v36 = vmul.f32 %v21908_v59, %v7435_v58  ;;  %v7714_v38 = vmul.f32 %v7434_v40, %v21909_v35  ;;  %v21067_v4 = vpop.permute.xlu1 %13538  ;;  %17703 = vrcp.f32 %v7395_v11 }
0x1a04   :  { %v7473_v53 = vsel %vm531_vm1, %v7450_v31, 0.0  ;;  %v7474_v44 = vsel %vm531_vm1, %v7451_v30, 0.0  ;;  %v7561_v7 = vsel %vm531_vm1, %v7538_v51, 0.0  ;;  %v7562_v6 = vsel %vm531_vm1, %v7539_v8, 0.0 }
0x1a05   :  { %v7475_v5 = vadd.f32 %v7474_v44, %v7473_v53  ;;  %v7649_v41 = vsel %vm531_vm1, %v7626_v61, 0.0  ;;  %v7650_v62 = vsel %vm531_vm1, %v7627_v36, 0.0  ;;  %v7563_v56 = vadd.f32 %v7562_v6, %v7561_v7  ;;  %v21911_v53 = vld [vmem:[#allocation30_spill] sm:$0xff]  ;;  %v21914_v6 = vld [vmem:[#allocation8_spill] sm:$0xff] }
0x1a06   :  { %v7651_v50 = vadd.f32 %v7650_v62, %v7649_v41  ;;  %v7715_v31 = vmul.f32 %v21910_v47, %v7435_v58  ;;  %v7737_v30 = vsel %vm531_vm1, %v7714_v38, 0.0  ;;  %v7436_v51 = vmul.f32 %v17702_v48, %v21003_v45  ;;  %v21912_v58 = vld [vmem:[#allocation29_spill] sm:$0xff]  ;;  %v21913_v38 = vld [vmem:[#allocation26_spill] sm:$0xff] }
0x1a07   :  { %v7476_v26 = vrot.slane %v7475_v5, 4  ;;  %v7437_v40 = vmul.f32 %v17702_v48, %v21005_v25  ;;  %v21076_v27 = vadd.f32 %v7643_v39, %v7642_v57  ;;  %v21078_v20 = vadd.f32 %v7731_v32, %v7730_v43  ;;  %v13541_v57 = vpop.permute.xlu0 %13540  ;;  %v13543_v39 = vpop.permute.xlu1 %13542  ;;  %v21915_v41 = vld [vmem:[#allocation13_spill] sm:$0xff] }
0x1a08   :  { %v7564_v8 = vrot.slane %v7563_v56, 4  ;;  %v7738_v61 = vsel %vm531_vm1, %v7715_v31, 0.0  ;;  %v7652_v59 = vrot.slane %v7651_v50, 4  ;;  %v7452_v44 = vmul.f32 %v7436_v51, %v21911_v53  ;;  %v21917_v53 = vld [vmem:[#allocation56_spill] sm:$0xff] }
0x1a09   :  { %v7739_v36 = vadd.f32 %v7738_v61, %v7737_v30  ;;  %v7453_v7 = vmul.f32 %v21912_v58, %v7437_v40  ;;  %v21083_v35 = vadd.f32 %v7476_v26, %v7475_v5  ;;  %v7540_v45 = vmul.f32 %v7436_v51, %v21913_v38  ;;  %v21916_v30 = vld [vmem:[#allocation28_spill] sm:$0xff]  ;;  %v21918_v38 = vld [vmem:[#allocation55_spill] sm:$0xff] }
0x1a0a   :  { %v7541_v25 = vmul.f32 %v21914_v6, %v7437_v40  ;;  %v7402_v11 = vadd.f32 %v7401_v37, %v7400_v12  ;;  %v7482_v32 = vsel %vm531_vm1, %v7452_v44, 0.0  ;;  %v7628_v62 = vmul.f32 %v7436_v51, %v21915_v41 }
0x1a0b   :  { %v7740_v43 = vrot.slane %v7739_v36, 4  ;;  %v7483_v48 = vsel %vm531_vm1, %v7453_v7, 0.0  ;;  %v7570_v31 = vsel %vm531_vm1, %v7540_v45, 0.0  ;;  %v7629_v26 = vmul.f32 %v21916_v30, %v7437_v40 }
0x1a0c   :  { %v21090_v47 = vadd.f32 %v7483_v48, %v7482_v32  ;;  %v7571_v5 = vsel %vm531_vm1, %v7541_v25, 0.0  ;;  %v21095_v61 = vadd.f32 %v7564_v8, %v7563_v56  ;;  %v7658_v37 = vsel %vm531_vm1, %v7628_v62, 0.0 }
0x1a0d   :  { %v21097_v12 = vadd.f32 %v7571_v5, %v7570_v31  ;;  %v7716_v44 = vmul.f32 %v7436_v51, %v21917_v53  ;;  %v21101_v58 = vadd.f32 %v7652_v59, %v7651_v50  ;;  %v7659_v7 = vsel %vm531_vm1, %v7629_v26, 0.0  ;;  %v13547_v59 = vpop.permute.xlu1 %13546  ;;  %v21919_v53 = vld [vmem:[#allocation40_spill] sm:$0xff] }
0x1a0e   :  { %v7717_v6 = vmul.f32 %v21918_v38, %v7437_v40  ;;  %17705 = vrcp.f32 %v7402_v11  ;;  %v21105_v45 = vadd.f32 %v7740_v43, %v7739_v36  ;;  %v21107_v25 = vadd.f32 %v7659_v7, %v7658_v37  ;;  %v13545_v40 = vpop.permute.xlu0 %13544  ;;  %v17704_v36 = vpop.eup %17703  ;;  %v21921_v38 = vld [vmem:[#allocation22_spill] sm:$0xff] }
0x1a0f   :  { %v7746_v56 = vsel %vm531_vm1, %v7716_v44, 0.0  ;;  %v7404_v8 = vrot.slane %v21029_v55, 4  ;;  %v7485_v32 = vrot.slane %v21090_v47, 4  ;;  %v13556_v50 = vsel %vm315_vm0, %v21047_v46, 0.0 }
0x1a10   :  { %v7747_v48 = vsel %vm531_vm1, %v7717_v6, 0.0  ;;  %v13559_v51 = vsel %vm315_vm0, %v21049_v9, 0.0  ;;  %v7573_v11 = vrot.slane %v21097_v12, 4  ;;  %13557 = vadd.xlane.f32.xlu1 %v13556_v50  ;;  %v13562_v62 = vsel %vm315_vm0, %v13537_v13, 0.0  ;;  %v21920_v13 = vld [vmem:[#allocation39_spill] sm:$0xff] }
0x1a11   :  { %v21118_v43 = vadd.f32 %v7747_v48, %v7746_v56  ;;  %v7405_v41 = vadd.f32 %v7404_v8, %v21029_v55  ;;  %13560 = vadd.xlane.f32.xlu0 %v13559_v51  ;;  %v7438_v31 = vmul.f32 %v17704_v36, %v21009_v1  ;;  %v7439_v46 = vmul.f32 %v17704_v36, %v21011_v19  ;;  %v21922_v6 = vld [vmem:[#allocation15_spill] sm:$0xff]  ;;  %v21923_v56 = vld [vmem:[#allocation25_spill] sm:$0xff] }
0x1a12   :  { %v13568_v5 = vsel %vm315_vm0, %v13541_v57, 0.0  ;;  %v13565_v9 = vsel %vm315_vm0, %v21067_v4, 0.0  ;;  %v13574_v26 = vsel %vm315_vm0, %v13545_v40, 0.0  ;;  %v13571_v37 = vsel %vm315_vm0, %v13543_v39, 0.0  ;;  %v21924_v8 = vld [vmem:[#allocation23_spill] sm:$0xff]  ;;  %v21925_v4 = vld [vmem:[#allocation69_spill] sm:$0xff] }
0x1a13   :  { %v7406_v30 = vrot.slane %v7405_v41, 2  ;;  %v13577_v55 = vsel %vm315_vm0, %v13547_v59, 0.0  ;;  %v7454_v44 = vmul.f32 %v7438_v31, %v21919_v53  ;;  %v7455_v7 = vmul.f32 %v21920_v13, %v7439_v46  ;;  %v21926_v51 = vld [vmem:[#allocation67_spill] sm:$0xff] }
0x1a14   :  { %v7542_v1 = vmul.f32 %v7438_v31, %v21921_v38  ;;  %v7543_v19 = vmul.f32 %v21922_v6, %v7439_v46  ;;  %v7630_v57 = vmul.f32 %v7438_v31, %v21923_v56  ;;  %v7631_v48 = vmul.f32 %v21924_v8, %v7439_v46  ;;  %13563 = vadd.xlane.f32.xlu1 %v13562_v62 }
0x1a15   :  { %v7718_v50 = vmul.f32 %v7438_v31, %v21925_v4  ;;  %v7719_v40 = vmul.f32 %v21926_v51, %v7439_v46  ;;  %v7491_v39 = vsel %vm531_vm1, %v7454_v44, 0.0  ;;  %v7492_v59 = vsel %vm531_vm1, %v7455_v7, 0.0  ;;  %13566 = vadd.xlane.f32.xlu0 %v13565_v9  ;;  %v21927_v51 = vld [vmem:[#allocation32_spill] sm:$0xff] }
0x1a16   :  { %v7579_v36 = vsel %vm531_vm1, %v7542_v1, 0.0  ;;  %v7580_v53 = vsel %vm531_vm1, %v7543_v19, 0.0  ;;  %v7493_v13 = vadd.f32 %v7492_v59, %v7491_v39  ;;  %v7667_v6 = vsel %vm531_vm1, %v7630_v57, 0.0  ;;  %v21929_v39 = vld [vmem:[#allocation24_spill] sm:$0xff] }
0x1a17   :  { %v21142_v38 = vadd.f32 %v7580_v53, %v7579_v36  ;;  %v7668_v56 = vsel %vm531_vm1, %v7631_v48, 0.0  ;;  %v7755_v62 = vsel %vm531_vm1, %v7718_v50, 0.0  ;;  %v7756_v46 = vsel %vm531_vm1, %v7719_v40, 0.0  ;;  %v21932_v53 = vld [vmem:[#allocation47_spill] sm:$0xff] }
0x1a18   :  { %v17706_v31 = vpop.eup %17705  ;;  %v21146_v8 = vadd.f32 %v7668_v56, %v7667_v6  ;;  %v7407_v44 = vadd.f32 %v7406_v30, %v7405_v41  ;;  %v21150_v7 = vadd.f32 %v7756_v46, %v7755_v62  ;;  %13569 = vadd.xlane.f32.xlu1 %v13568_v5  ;;  %v7469_v19 = vrot.slane %v21053_v29, 2  ;;  %v21928_v41 = vld [vmem:[#allocation31_spill] sm:$0xff] }
0x1a19   :  { %v7440_v1 = vmul.f32 %v17706_v31, %v21015_v49  ;;  %v7441_v9 = vmul.f32 %v17706_v31, %v21017_v10  ;;  %13572 = vadd.xlane.f32.xlu0 %v13571_v37  ;;  %v7478_v48 = vrot.slane %v21083_v35, 2  ;;  %v7486_v4 = vadd.f32 %v7485_v32, %v21090_v47  ;;  %v21930_v49 = vld [vmem:[#allocation17_spill] sm:$0xff]  ;;  %v21931_v10 = vld [vmem:[#allocation48_spill] sm:$0xff]  ;;  %v21933_v37 = vld [vmem:[#allocation59_spill] sm:$0xff] }
0x1a1a   :  { %v7408_v57 = vrot.slane %v7407_v44, 1  ;;  %v7494_v50 = vrot.slane %v7493_v13, 4  ;;  %v21934_v47 = vld [vmem:[#allocation57_spill] sm:$0xff]  ;;  %v7661_v31 = vrot.slane %v21107_v25, 4  ;;  %vm13991_vm0 = vcmask 1043459  }
0x1a1b   :  { %v7456_v40 = vmul.f32 %v7440_v1, %v21927_v51  ;;  %v7457_v30 = vmul.f32 %v21928_v41, %v7441_v9  ;;  %v7544_v59 = vmul.f32 %v7440_v1, %v21929_v39  ;;  %v7545_v36 = vmul.f32 %v21930_v49, %v7441_v9 }
0x1a1c   :  { %v21162_v5 = vmul.f32 %v7440_v1, %v21931_v10  ;;  %v21165_v6 = vmul.f32 %v21932_v53, %v7441_v9  ;;  %v21168_v56 = vmul.f32 %v7440_v1, %v21933_v37  ;;  %v21171_v32 = vmul.f32 %v21934_v47, %v7441_v9  ;;  %13575 = vadd.xlane.f32.xlu1 %v13574_v26 }
0x1a1d   :  { %v7501_v62 = vsel %vm531_vm1, %v7457_v30, 0.0  ;;  %v7409_v46 = vadd.f32 %v7408_v57, %v7407_v44  ;;  %v7470_v51 = vadd.f32 %v7469_v19, %v21053_v29  ;;  %v7749_v41 = vrot.slane %v21118_v43, 4  ;;  %13578 = vadd.xlane.f32.xlu0 %v13577_v55 }
0x1a1e   :  { %v7589_v39 = vsel %vm531_vm1, %v7545_v36, 0.0  ;;  %v7479_v49 = vadd.f32 %v7478_v48, %v21083_v35  ;;  %v7487_v1 = vrot.slane %v7486_v4, 2  ;;  %v7495_v10 = vadd.f32 %v7494_v50, %v7493_v13 }
0x1a1f   :  { %17707 = vrcp.f32 %v7409_v46  ;;  %v7471_v9 = vrot.slane %v7470_v51, 1  ;;  %v7500_v53 = vsel %vm531_vm1, %v7456_v40, 0.0  ;;  %v7557_v26 = vrot.slane %v21055_v21, 2 }
0x1a20   :  { %v7480_v37 = vrot.slane %v7479_v49, 1  ;;  %v7488_v30 = vadd.f32 %v7487_v1, %v7486_v4  ;;  %v7502_v44 = vadd.f32 %v7501_v62, %v7500_v53  ;;  %v7496_v19 = vrot.slane %v7495_v10, 2 }
0x1a21   :  { %v7472_v29 = vadd.f32 %v7471_v9, %v7470_v51  ;;  %v7566_v57 = vrot.slane %v21095_v61, 2  ;;  %v7574_v35 = vadd.f32 %v7573_v11, %v21097_v12  ;;  %v7558_v13 = vadd.f32 %v7557_v26, %v21055_v21 }
0x1a22   :  { %v7481_v55 = vadd.f32 %v7480_v37, %v7479_v49  ;;  %v7489_v48 = vrot.slane %v7488_v30, 1  ;;  %v7503_v36 = vrot.slane %v7502_v44, 4  ;;  %v7497_v50 = vadd.f32 %v7496_v19, %v7495_v10 }
0x1a23   :  { %v7567_v40 = vadd.f32 %v7566_v57, %v21095_v61  ;;  %v7575_v4 = vrot.slane %v7574_v35, 2  ;;  %v7582_v47 = vrot.slane %v21142_v38, 4  ;;  %v7559_v1 = vrot.slane %v7558_v13, 1 }
0x1a24   :  { %v7490_v62 = vadd.f32 %v7489_v48, %v7488_v30  ;;  %v7504_v46 = vadd.f32 %v7503_v36, %v7502_v44  ;;  %v13988_v51 = vsel %vm13987_vm14, %v7481_v55, %v7472_v29  ;;  %v7498_v9 = vrot.slane %v7497_v50, 1 }
0x1a25   :  { %v7568_v53 = vrot.slane %v7567_v40, 1  ;;  %v7576_v12 = vadd.f32 %v7575_v4, %v7574_v35  ;;  %v7583_v11 = vadd.f32 %v7582_v47, %v21142_v38  ;;  %v7560_v10 = vadd.f32 %v7559_v1, %v7558_v13 }
0x1a26   :  { %v7505_v49 = vrot.slane %v7504_v46, 2  ;;  %v13990_v21 = vsel %vm13989_vm15, %v7490_v62, %v13988_v51  ;;  %v7588_v61 = vsel %vm531_vm1, %v7544_v59, 0.0  ;;  %v7499_v37 = vadd.f32 %v7498_v9, %v7497_v50  ;;  %v21935_v51 = vld [vmem:[#allocation41_spill] sm:$0xff] }
0x1a27   :  { %v7569_v26 = vadd.f32 %v7568_v53, %v7567_v40  ;;  %v7577_v19 = vrot.slane %v7576_v12, 1  ;;  %v7584_v30 = vrot.slane %v7583_v11, 2  ;;  %v7590_v57 = vadd.f32 %v7589_v39, %v7588_v61  ;;  %v21936_v9 = vld [vmem:[#allocation45_spill] sm:$0xff]  ;;  %v21940_v61 = vld [vmem:[#allocation46_spill] sm:$0xff] }
0x1a28   :  { %v7506_v44 = vadd.f32 %v7505_v49, %v7504_v46  ;;  %v7645_v29 = vrot.slane %v21076_v27, 2  ;;  %v7654_v55 = vrot.slane %v21101_v58, 2  ;;  %v13992_v35 = vsel %vm13991_vm0, %v7499_v37, %v13990_v21  ;;  %v21938_v49 = vld [vmem:[#allocation71_spill] sm:$0xff]  ;;  %v21939_v21 = vld [vmem:[#allocation42_spill] sm:$0xff] }
0x1a29   :  { %v17708_v48 = vpop.eup %17707  ;;  %v7578_v38 = vadd.f32 %v7577_v19, %v7576_v12  ;;  %v7585_v36 = vadd.f32 %v7584_v30, %v7583_v11  ;;  %v14083_v4 = vsel %vm13987_vm14, %v7569_v26, %v7560_v10  ;;  %v7591_v40 = vrot.slane %v7590_v57, 4  ;;  %v21937_v12 = vld [vmem:[#allocation10_spill] sm:$0xff]  ;;  %v21941_v30 = vld [vmem:[#allocation51_spill] sm:$0xff] }
0x1a2a   :  { %v21197_v13 = vmul.f32 %v17708_v48, %v21021_v24  ;;  %v7443_v59 = vmul.f32 %v17708_v48, %v21023_v15  ;;  %v7507_v50 = vrot.slane %v7506_v44, 1  ;;  %v7646_v62 = vadd.f32 %v7645_v29, %v21076_v27 }
0x1a2b   :  { %v7586_v47 = vrot.slane %v7585_v36, 1  ;;  %v14084_v39 = vsel %vm13989_vm15, %v7578_v38, %v14083_v4  ;;  %v7655_v46 = vadd.f32 %v7654_v55, %v21101_v58  ;;  %v7592_v58 = vadd.f32 %v7591_v40, %v7590_v57 }
0x1a2c   :  { %v7459_v1 = vmul.f32 %v21935_v51, %v7443_v59  ;;  %v7547_v53 = vmul.f32 %v21936_v9, %v7443_v59  ;;  %v7635_v11 = vmul.f32 %v21937_v12, %v7443_v59  ;;  %v21207_v24 = vmul.f32 %v21938_v49, %v7443_v59 }
0x1a2d   :  { %v7458_v15 = vmul.f32 %v21197_v13, %v21939_v21  ;;  %v7508_v10 = vadd.f32 %v7507_v50, %v7506_v44  ;;  %v7546_v37 = vmul.f32 %v21197_v13, %v21940_v61  ;;  %v7587_v26 = vadd.f32 %v7586_v47, %v7585_v36 }
0x1a2e   :  { %v7510_v27 = vsel %vm531_vm1, %v7459_v1, 0.0  ;;  %v7598_v19 = vsel %vm531_vm1, %v7547_v53, 0.0  ;;  %v7634_v29 = vmul.f32 %v21197_v13, %v21941_v30  ;;  %v7677_v36 = vsel %vm531_vm1, %v21165_v6, 0.0  ;;  %v13978_v53 = vld [vmem:[%s21601_s6] sm:$0xff] }
0x1a2f   :  { %v7509_v55 = vsel %vm531_vm1, %v7458_v15, 0.0  ;;  %v21219_v48 = vsel %vm13993_vm2, %v7508_v10, %v13992_v35  ;;  %v7597_v38 = vsel %vm531_vm1, %v7546_v37, 0.0  ;;  %v14085_v44 = vsel %vm13991_vm0, %v7587_v26, %v14084_v39  ;;  %16410 = vmatpush3.msra.mxu0 %v13978_v53 }
0x1a30   :  { %v7511_v4 = vadd.f32 %v7510_v27, %v7509_v55  ;;  %v7593_v59 = vrot.slane %v7592_v58, 2  ;;  %v7599_v57 = vadd.f32 %v7598_v19, %v7597_v38  ;;  %v7647_v50 = vrot.slane %v7646_v62, 1  ;;  %16414 = vmatprep.subr.mxu0 %v21842_v22 }
0x1a31   :  { %v7656_v40 = vrot.slane %v7655_v46, 1  ;;  %v7662_v47 = vadd.f32 %v7661_v31, %v21107_v25  ;;  %v7670_v51 = vrot.slane %v21146_v8, 4  ;;  %v7676_v39 = vsel %vm531_vm1, %v21162_v5, 0.0 }
0x1a32   :  { %v7512_v35 = vrot.slane %v7511_v4, 4  ;;  %v7594_v1 = vadd.f32 %v7593_v59, %v7592_v58  ;;  %v7600_v9 = vrot.slane %v7599_v57, 4  ;;  %v21233_v6 = vsel %vm531_vm1, %v21171_v32, 0.0 }
0x1a33   :  { %v7648_v12 = vadd.f32 %v7647_v50, %v7646_v62  ;;  %v7663_v49 = vrot.slane %v7662_v47, 2  ;;  %v7671_v25 = vadd.f32 %v7670_v51, %v21146_v8  ;;  %v7657_v10 = vadd.f32 %v7656_v40, %v7655_v46  ;;  %v21942_v51 = vld [vmem:[#allocation73_spill] sm:$0xff] }
0x1a34   :  { %v7513_v31 = vadd.f32 %v7512_v35, %v7511_v4  ;;  %v7595_v21 = vrot.slane %v7594_v1, 1  ;;  %v7601_v15 = vadd.f32 %v7600_v9, %v7599_v57  ;;  %v7678_v32 = vadd.f32 %v7677_v36, %v7676_v39 }
0x1a35   :  { %v7664_v5 = vadd.f32 %v7663_v49, %v7662_v47  ;;  %v7672_v61 = vrot.slane %v7671_v25, 2  ;;  %v7685_v37 = vsel %vm531_vm1, %v7634_v29, 0.0  ;;  %v7686_v62 = vsel %vm531_vm1, %v7635_v11, 0.0 }
0x1a36   :  { %v7514_v26 = vrot.slane %v7513_v31, 2  ;;  %v7596_v27 = vadd.f32 %v7595_v21, %v7594_v1  ;;  %v7602_v58 = vrot.slane %v7601_v15, 2  ;;  %v7679_v8 = vrot.slane %v7678_v32, 4 }
0x1a37   :  { %v7665_v19 = vrot.slane %v7664_v5, 1  ;;  %v7673_v30 = vadd.f32 %v7672_v61, %v7671_v25  ;;  %v7687_v55 = vadd.f32 %v7686_v62, %v7685_v37  ;;  %v14172_v59 = vsel %vm13987_vm14, %v7657_v10, %v7648_v12 }
0x1a38   :  { %v7515_v38 = vadd.f32 %v7514_v26, %v7513_v31  ;;  %v7603_v4 = vadd.f32 %v7602_v58, %v7601_v15  ;;  %v14086_v46 = vsel %vm13993_vm2, %v7596_v27, %v14085_v44  ;;  %v7680_v36 = vadd.f32 %v7679_v8, %v7678_v32 }
0x1a39   :  { %v7666_v57 = vadd.f32 %v7665_v19, %v7664_v5  ;;  %v7674_v50 = vrot.slane %v7673_v30, 1  ;;  %v7688_v40 = vrot.slane %v7687_v55, 4  ;;  %v7722_v35 = vmul.f32 %v21197_v13, %v21942_v51 }
0x1a3a   :  { %v7516_v29 = vrot.slane %v7515_v38, 1  ;;  %v7604_v47 = vrot.slane %v7603_v4, 1  ;;  %v7733_v11 = vrot.slane %v21078_v20, 2  ;;  %v7681_v9 = vrot.slane %v7680_v36, 2 }
0x1a3b   :  { %v7675_v1 = vadd.f32 %v7674_v50, %v7673_v30  ;;  %v7689_v39 = vadd.f32 %v7688_v40, %v7687_v55  ;;  %v14173_v53 = vsel %vm13989_vm15, %v7666_v57, %v14172_v59  ;;  %v7742_v25 = vrot.slane %v21105_v45, 2 }
0x1a3c   :  { %v7517_v49 = vadd.f32 %v7516_v29, %v7515_v38  ;;  %v7605_v44 = vadd.f32 %v7604_v47, %v7603_v4  ;;  %v7734_v12 = vadd.f32 %v7733_v11, %v21078_v20  ;;  %v7682_v31 = vadd.f32 %v7681_v9, %v7680_v36 }
0x1a3d   :  { %v7690_v21 = vrot.slane %v7689_v39, 2  ;;  %v14174_v15 = vsel %vm13991_vm0, %v7675_v1, %v14173_v53  ;;  %v7750_v13 = vadd.f32 %v7749_v41, %v21118_v43  ;;  %v7743_v20 = vadd.f32 %v7742_v25, %v21105_v45 }
0x1a3e   :  { %v21256_v10 = vsel %vm13995_vm3, %v7517_v49, %v21219_v48  ;;  %v21259_v5 = vsel %vm13995_vm3, %v7605_v44, %v14086_v46  ;;  %v7735_v61 = vrot.slane %v7734_v12, 1  ;;  %v7683_v32 = vrot.slane %v7682_v31, 1 }
0x1a3f   :  { %v7691_v37 = vadd.f32 %v7690_v21, %v7689_v39  ;;  %v7751_v26 = vrot.slane %v7750_v13, 2  ;;  %v7758_v27 = vrot.slane %v21150_v7, 4  ;;  %v7744_v58 = vrot.slane %v7743_v20, 1 }
0x1a40   :  { %v7764_v62 = vsel %vm531_vm1, %v21168_v56, 0.0  ;;  %v7773_v43 = vsel %vm531_vm1, %v7722_v35, 0.0  ;;  %v7684_v41 = vadd.f32 %v7683_v32, %v7682_v31  ;;  %v7736_v8 = vadd.f32 %v7735_v61, %v7734_v12 }
0x1a41   :  { %v7692_v48 = vrot.slane %v7691_v37, 1  ;;  %v7752_v19 = vadd.f32 %v7751_v26, %v7750_v13  ;;  %v7759_v30 = vadd.f32 %v7758_v27, %v21150_v7  ;;  %v7745_v55 = vadd.f32 %v7744_v58, %v7743_v20 }
0x1a42   :  { %v7766_v45 = vadd.f32 %v21233_v6, %v7764_v62  ;;  %v7774_v38 = vsel %vm531_vm1, %v21207_v24, 0.0  ;;  %v14175_v46 = vsel %vm13993_vm2, %v7684_v41, %v14174_v15  ;;  %v7257_v24 = vpop.xlane.xlu0 %7256 }
0x1a43   :  { %v7693_v4 = vadd.f32 %v7692_v48, %v7691_v37  ;;  %v7753_v59 = vrot.slane %v7752_v19, 1  ;;  %v7760_v57 = vrot.slane %v7759_v30, 2  ;;  %v7775_v50 = vadd.f32 %v7774_v38, %v7773_v43 }
0x1a44   :  { %v7767_v56 = vrot.slane %v7766_v45, 4  ;;  %v14261_v36 = vsel %vm13987_vm14, %v7745_v55, %v7736_v8 }
0x1a45   :  { %v21273_v40 = vsel %vm13995_vm3, %v7693_v4, %v14175_v46  ;;  %v7754_v7 = vadd.f32 %v7753_v59, %v7752_v19  ;;  %v7761_v29 = vadd.f32 %v7760_v57, %v7759_v30  ;;  %v7776_v51 = vrot.slane %v7775_v50, 4 }
0x1a46   :  { %v7768_v47 = vadd.f32 %v7767_v56, %v7766_v45  ;;  %v7263_v15 = vpop.xlane.xlu0 %7262 }
0x1a47   :  { %v7762_v6 = vrot.slane %v7761_v29, 1  ;;  %v14262_v35 = vsel %vm13989_vm15, %v7754_v7, %v14261_v36  ;;  %v7777_v1 = vadd.f32 %v7776_v51, %v7775_v50 }
0x1a48   :  { %v7769_v11 = vrot.slane %v7768_v47, 2 }
0x1a49   :  { %v7763_v9 = vadd.f32 %v7762_v6, %v7761_v29  ;;  %v7778_v49 = vrot.slane %v7777_v1, 2 }
0x1a4a   :  { %v7254_v39 = vpop.xlane.xlu1 %7253  ;;  %v7770_v53 = vadd.f32 %v7769_v11, %v7768_v47 }
0x1a4b   :  { %v7306_v44 = vmax.f32 %v7254_v39, %v7257_v24  ;;  %v14263_v12 = vsel %vm13991_vm0, %v7763_v9, %v14262_v35  ;;  %v7779_v31 = vadd.f32 %v7778_v49, %v7777_v1 }
0x1a4c   :  { %v7771_v25 = vrot.slane %v7770_v53, 1 }
0x1a4d   :  { %v7307_v21 = vrot.slane %v7306_v44, 4  ;;  %v7780_v20 = vrot.slane %v7779_v31, 1 }
0x1a4e   :  { %v7260_v13 = vpop.xlane.xlu1 %7259  ;;  %v7772_v61 = vadd.f32 %v7771_v25, %v7770_v53 }
0x1a4f   :  { %v7308_v32 = vmax.f32 %v7306_v44, %v7307_v21  ;;  %v7313_v37 = vmax.f32 %v7260_v13, %v7263_v15  ;;  %v7781_v26 = vadd.f32 %v7780_v20, %v7779_v31 }
0x1a50   :  { %v14264_v27 = vsel %vm13993_vm2, %v7772_v61, %v14263_v12 }
0x1a51   :  { %v7309_v58 = vrot.slane %v7308_v32, 2  ;;  %v7314_v62 = vrot.slane %v7313_v37, 4  ;;  %v21279_v43 = vsel %vm13995_vm3, %v7781_v26, %v14264_v27  ;;  %v21944_v26 = vld [vmem:[#allocation33_spill] sm:$0xff] }
0x1a53   :  { %v7310_v41 = vmax.f32 %v7308_v32, %v7309_v58  ;;  %v7315_v48 = vmax.f32 %v7313_v37, %v7314_v62  ;;  %v21943_v32 = vld [vmem:[#allocation34_spill] sm:$0xff]  ;;  %v21945_v58 = vld [vmem:[#allocation7_spill] sm:$0xff] }
0x1a55   :  { %v7311_v19 = vrot.slane %v7310_v41, 1  ;;  %v7316_v30 = vrot.slane %v7315_v48, 2 }
0x1a57   :  { %v7312_v8 = vmax.f32 %v7310_v41, %v7311_v19  ;;  %v7317_v55 = vmax.f32 %v7315_v48, %v7316_v30  ;;  %v21946_v41 = vld [vmem:[#allocation12_spill] sm:$0xff]  ;;  %v21947_v30 = vld [vmem:[#allocation50_spill] sm:$0xff] }
0x1a59   :  { %v7332_v45 = vsub.f32 %v7254_v39, %v7312_v8  ;;  %v7333_v38 = vsub.f32 %v7257_v24, %v7312_v8  ;;  %v7318_v4 = vrot.slane %v7317_v55, 1 }
0x1a5b   :  { %v7360_v46 = vmul.f32 1.442695, %v7332_v45  ;;  %v7362_v59 = vmul.f32 1.442695, %v7333_v38  ;;  %v7319_v57 = vmax.f32 %v7317_v55, %v7318_v4  ;;  %v21948_v55 = vld [vmem:[#allocation49_spill] sm:$0xff]  ;;  %v21949_v38 = vld [vmem:[#allocation63_spill] sm:$0xff] }
0x1a5d   :  { %17709 = vpow2.f32 %v7360_v46  ;;  %v7334_v56 = vsub.f32 %v7260_v13, %v7319_v57  ;;  %v7335_v50 = vsub.f32 %v7263_v15, %v7319_v57  ;;  %v21950_v46 = vld [vmem:[#allocation61_spill] sm:$0xff] }
0x1a5e   :  { %17711 = vpow2.f32 %v7362_v59 }
0x1a5f   :  { %v7364_v36 = vmul.f32 1.442695, %v7334_v56  ;;  %v7366_v7 = vmul.f32 1.442695, %v7335_v50 }
0x1a61   :  { %17713 = vpow2.f32 %v7364_v36 }
0x1a62   :  { %17715 = vpow2.f32 %v7366_v7 }
0x1a67   :  { %v17710_v29 = vpop.eup %17709 }
0x1a68   :  { %v17712_v47 = vpop.eup %17711 }
0x1a69   :  { %v7410_v51 = vadd.f32 %v17712_v47, %v17710_v29 }
0x1a6b   :  { %v17714_v6 = vpop.eup %17713  ;;  %v7411_v35 = vrot.slane %v7410_v51, 4 }
0x1a6c   :  { %v17716_v11 = vpop.eup %17715 }
0x1a6d   :  { %v7412_v1 = vadd.f32 %v7411_v35, %v7410_v51  ;;  %v7417_v24 = vadd.f32 %v17716_v11, %v17714_v6  ;;  %v21951_v35 = vld [vmem:[#allocation44_spill] sm:$0xff] }
0x1a6f   :  { %v7413_v9 = vrot.slane %v7412_v1, 2  ;;  %v7418_v39 = vrot.slane %v7417_v24, 4 }
0x1a71   :  { %v7414_v53 = vadd.f32 %v7413_v9, %v7412_v1  ;;  %v7419_v49 = vadd.f32 %v7418_v39, %v7417_v24  ;;  %v21952_v24 = vld [vmem:[#allocation43_spill] sm:$0xff]  ;;  %v21953_v39 = vld [vmem:[#allocation21_spill] sm:$0xff] }
0x1a73   :  { %v7415_v44 = vrot.slane %v7414_v53, 1  ;;  %v7420_v12 = vrot.slane %v7419_v49, 2 }
0x1a75   :  { %v7416_v25 = vadd.f32 %v7415_v44, %v7414_v53  ;;  %v7421_v31 = vadd.f32 %v7420_v12, %v7419_v49  ;;  %v21954_v49 = vld [vmem:[#allocation14_spill] sm:$0xff]  ;;  %v21955_v12 = vld [vmem:[#allocation53_spill] sm:$0xff] }
0x1a77   :  { %17717 = vrcp.f32 %v7416_v25  ;;  %v7422_v21 = vrot.slane %v7421_v31, 1 }
0x1a79   :  { %v7423_v15 = vadd.f32 %v7422_v21, %v7421_v31  ;;  %v21956_v31 = vld [vmem:[#allocation52_spill] sm:$0xff] }
0x1a7b   :  { %17719 = vrcp.f32 %v7423_v15 }
0x1a81   :  { %v17718_v13 = vpop.eup %17717 }
0x1a82   :  { %v7444_v61 = vmul.f32 %v17718_v13, %v17710_v29  ;;  %v7445_v20 = vmul.f32 %v17718_v13, %v17712_v47 }
0x1a84   :  { %v7460_v37 = vmul.f32 %v7444_v61, %v21943_v32  ;;  %v7461_v27 = vmul.f32 %v21944_v26, %v7445_v20  ;;  %v7548_v62 = vmul.f32 %v7444_v61, %v21945_v58  ;;  %v7549_v48 = vmul.f32 %v21946_v41, %v7445_v20 }
0x1a85   :  { %v17720_v19 = vpop.eup %17719  ;;  %v7636_v8 = vmul.f32 %v7444_v61, %v21947_v30  ;;  %v7637_v45 = vmul.f32 %v21948_v55, %v7445_v20  ;;  %v7724_v4 = vmul.f32 %v7444_v61, %v21949_v38  ;;  %v7725_v59 = vmul.f32 %v21950_v46, %v7445_v20 }
0x1a86   :  { %v7446_v57 = vmul.f32 %v17720_v19, %v17714_v6  ;;  %v7447_v56 = vmul.f32 %v17720_v19, %v17716_v11  ;;  %v7518_v50 = vsel %vm531_vm1, %v7460_v37, 0.0  ;;  %v7519_v36 = vsel %vm531_vm1, %v7461_v27, 0.0 }
0x1a87   :  { %v7520_v7 = vadd.f32 %v7519_v36, %v7518_v50  ;;  %v7606_v29 = vsel %vm531_vm1, %v7548_v62, 0.0  ;;  %v7607_v47 = vsel %vm531_vm1, %v7549_v48, 0.0  ;;  %v7694_v51 = vsel %vm531_vm1, %v7636_v8, 0.0  ;;  %v21957_v48 = vld [vmem:[#allocation77_spill] sm:$0xff]  ;;  %v21958_v36 = vld [vmem:[#allocation75_spill] sm:$0xff] }
0x1a88   :  { %v7462_v1 = vmul.f32 %v7446_v57, %v21951_v35  ;;  %v7463_v9 = vmul.f32 %v21952_v24, %v7447_v56  ;;  %v7550_v53 = vmul.f32 %v7446_v57, %v21953_v39  ;;  %v7551_v6 = vmul.f32 %v21954_v49, %v7447_v56 }
0x1a89   :  { %v7521_v11 = vrot.slane %v7520_v7, 4  ;;  %v7608_v44 = vadd.f32 %v7607_v47, %v7606_v29  ;;  %v7638_v25 = vmul.f32 %v7446_v57, %v21955_v12  ;;  %v7639_v21 = vmul.f32 %v21956_v31, %v7447_v56 }
0x1a8a   :  { %v7527_v15 = vsel %vm531_vm1, %v7462_v1, 0.0  ;;  %v7528_v13 = vsel %vm531_vm1, %v7463_v9, 0.0  ;;  %v7615_v61 = vsel %vm531_vm1, %v7550_v53, 0.0  ;;  %v7616_v20 = vsel %vm531_vm1, %v7551_v6, 0.0 }
0x1a8b   :  { %v7522_v32 = vadd.f32 %v7521_v11, %v7520_v7  ;;  %v7529_v37 = vadd.f32 %v7528_v13, %v7527_v15  ;;  %v7609_v26 = vrot.slane %v7608_v44, 4  ;;  %v7617_v27 = vadd.f32 %v7616_v20, %v7615_v61 }
0x1a8c   :  { %v7695_v58 = vsel %vm531_vm1, %v7637_v45, 0.0  ;;  %v7703_v62 = vsel %vm531_vm1, %v7638_v25, 0.0  ;;  %v7704_v41 = vsel %vm531_vm1, %v7639_v21, 0.0  ;;  %v7726_v19 = vmul.f32 %v7446_v57, %v21957_v48 }
0x1a8d   :  { %v7523_v30 = vrot.slane %v7522_v32, 2  ;;  %v7530_v8 = vrot.slane %v7529_v37, 4  ;;  %v7610_v55 = vadd.f32 %v7609_v26, %v7608_v44  ;;  %v7618_v38 = vrot.slane %v7617_v27, 4 }
0x1a8e   :  { %v7696_v46 = vadd.f32 %v7695_v58, %v7694_v51  ;;  %v7705_v50 = vadd.f32 %v7704_v41, %v7703_v62  ;;  %v7727_v7 = vmul.f32 %v21958_v36, %v7447_v56  ;;  %v7782_v29 = vsel %vm531_vm1, %v7724_v4, 0.0 }
0x1a8f   :  { %v7524_v47 = vadd.f32 %v7523_v30, %v7522_v32  ;;  %v7531_v35 = vadd.f32 %v7530_v8, %v7529_v37  ;;  %v7611_v45 = vrot.slane %v7610_v55, 2  ;;  %v7619_v1 = vadd.f32 %v7618_v38, %v7617_v27  ;;  %v14074_v8 = vld [vmem:[%s21601_s6 + $0x8] sm:$0xff] }
0x1a90   :  { %v7697_v24 = vrot.slane %v7696_v46, 4  ;;  %v7706_v9 = vrot.slane %v7705_v50, 4  ;;  %v7783_v39 = vsel %vm531_vm1, %v7725_v59, 0.0  ;;  %v7791_v57 = vsel %vm531_vm1, %v7726_v19, 0.0 }
0x1a91   :  { %v7525_v53 = vrot.slane %v7524_v47, 1  ;;  %v7532_v49 = vrot.slane %v7531_v35, 2  ;;  %v7612_v6 = vadd.f32 %v7611_v45, %v7610_v55  ;;  %v7620_v11 = vrot.slane %v7619_v1, 2 }
0x1a92   :  { %v7698_v51 = vadd.f32 %v7697_v24, %v7696_v46  ;;  %v7707_v44 = vadd.f32 %v7706_v9, %v7705_v50  ;;  %v7784_v12 = vadd.f32 %v7783_v39, %v7782_v29  ;;  %v7792_v56 = vsel %vm531_vm1, %v7727_v7, 0.0 }
0x1a93   :  { %v7526_v4 = vadd.f32 %v7525_v53, %v7524_v47  ;;  %v7533_v25 = vadd.f32 %v7532_v49, %v7531_v35  ;;  %v7613_v31 = vrot.slane %v7612_v6, 1  ;;  %v7621_v21 = vadd.f32 %v7620_v11, %v7619_v1  ;;  %v14163_v11 = vld [vmem:[%s21601_s6 + $0x10] sm:$0xff] }
0x1a94   :  { %v7699_v15 = vrot.slane %v7698_v51, 2  ;;  %v7708_v13 = vrot.slane %v7707_v44, 2  ;;  %v7785_v61 = vrot.slane %v7784_v12, 4  ;;  %v7793_v20 = vadd.f32 %v7792_v56, %v7791_v57 }
0x1a95   :  { %v7534_v59 = vrot.slane %v7533_v25, 1  ;;  %v13998_v32 = vsel %vm13997_vm4, %v7526_v4, %v21256_v10  ;;  %v7614_v37 = vadd.f32 %v7613_v31, %v7612_v6  ;;  %v7622_v26 = vrot.slane %v7621_v21, 1 }
0x1a96   :  { %v7700_v27 = vadd.f32 %v7699_v15, %v7698_v51  ;;  %v7709_v58 = vadd.f32 %v7708_v13, %v7707_v44  ;;  %v7786_v62 = vadd.f32 %v7785_v61, %v7784_v12  ;;  %v7794_v41 = vrot.slane %v7793_v20, 4 }
0x1a97   :  { %v7535_v48 = vadd.f32 %v7534_v59, %v7533_v25  ;;  %v7623_v19 = vadd.f32 %v7622_v26, %v7621_v21  ;;  %v14088_v30 = vsel %vm13997_vm4, %v7614_v37, %v21259_v5 }
0x1a98   :  { %v7701_v55 = vrot.slane %v7700_v27, 1  ;;  %v7710_v38 = vrot.slane %v7709_v58, 1  ;;  %v7787_v46 = vrot.slane %v7786_v62, 2  ;;  %v7795_v50 = vadd.f32 %v7794_v41, %v7793_v20 }
0x1a99   :  { %v14000_v10 = vsel %vm13999_vm5, %v7535_v48, %v13998_v32  ;;  %v14089_v36 = vsel %vm13999_vm5, %v7623_v19, %v14088_v30  ;;  %v14252_v19 = vld [vmem:[%s21601_s6 + $0x18] sm:$0xff] }
0x1a9a   :  { %16412 = vmatmul.mubr.msk.f32.vlgmr.msra.gmra.mrb[146].mxu0 %vm531_vm1, %v14000_v10  ;;  %v7702_v7 = vadd.f32 %v7701_v55, %v7700_v27  ;;  %v7711_v29 = vadd.f32 %v7710_v38, %v7709_v58  ;;  %v7788_v47 = vadd.f32 %v7787_v46, %v7786_v62  ;;  %v7796_v35 = vrot.slane %v7795_v50, 2 }
0x1a9b   :  { %16415 = vmatpush3.msra.mxu0 %v14074_v8  ;;  %16416 = vmatprep.mubr.msk.f32.mxu0 %vm17789_vm13, %v21842_v22 }
0x1a9c   :  { %16419 = vmatprep.subr.mxu0 %v21842_v22  ;;  %v14177_v5 = vsel %vm13997_vm4, %v7702_v7, %v21273_v40  ;;  %v7789_v45 = vrot.slane %v7788_v47, 1  ;;  %v7797_v1 = vadd.f32 %v7796_v35, %v7795_v50 }
0x1a9d   :  { %v14178_v24 = vsel %vm13999_vm5, %v7711_v29, %v14177_v5  ;;  %v13558_v9 = vpop.xlane.xlu1 %13557 }
0x1a9e   :  { %v13561_v39 = vpop.xlane.xlu0 %13560  ;;  %v7790_v57 = vadd.f32 %v7789_v45, %v7788_v47  ;;  %v7798_v53 = vrot.slane %v7797_v1, 1  ;;  %v13580_v49 = vrot.slane %v13558_v9, 4 }
0x1a9f   :  { %v13586_v6 = vrot.slane %v13561_v39, 4 }
0x1aa0   :  { %v7799_v51 = vadd.f32 %v7798_v53, %v7797_v1  ;;  %v14266_v44 = vsel %vm13997_vm4, %v7790_v57, %v21279_v43  ;;  %v13581_v12 = vmax.f32 %v13558_v9, %v13580_v49 }
0x1aa1   :  { %v13587_v40 = vmax.f32 %v13561_v39, %v13586_v6  ;;  %v13564_v56 = vpop.xlane.xlu1 %13563 }
0x1aa2   :  { %16417 = vmatmul.mubr.msk.f32.vlgmr.msra.gmra.mrb[146].mxu0 %vm531_vm1, %v14089_v36  ;;  %v21336_v4 = vsel %vm13999_vm5, %v7799_v51, %v14266_v44  ;;  %v13582_v25 = vrot.slane %v13581_v12, 2  ;;  %v13592_v21 = vrot.slane %v13564_v56, 4  ;;  %v13567_v15 = vpop.xlane.xlu0 %13566 }
0x1aa3   :  { %v13588_v31 = vrot.slane %v13587_v40, 2  ;;  %16420 = vmatpush3.msra.mxu0 %v14163_v11  ;;  %16421 = vmatprep.mubr.msk.f32.mxu0 %vm17789_vm13, %v21842_v22  ;;  %v13598_v13 = vrot.slane %v13567_v15, 4 }
0x1aa4   :  { %16424 = vmatprep.subr.mxu0 %v21842_v22  ;;  %v13583_v43 = vmax.f32 %v13581_v12, %v13582_v25  ;;  %v13593_v20 = vmax.f32 %v13564_v56, %v13592_v21  ;;  %v14341_v21 = vld [vmem:[%s21601_s6 + $0x20] sm:$0xff] }
0x1aa5   :  { %v13589_v61 = vmax.f32 %v13587_v40, %v13588_v31  ;;  %v13599_v59 = vmax.f32 %v13567_v15, %v13598_v13  ;;  %v13570_v32 = vpop.xlane.xlu1 %13569 }
0x1aa6   :  { %v13584_v37 = vrot.slane %v13583_v43, 1  ;;  %v13594_v27 = vrot.slane %v13593_v20, 2  ;;  %v13604_v58 = vrot.slane %v13570_v32, 4  ;;  %v13573_v62 = vpop.xlane.xlu0 %13572 }
0x1aa7   :  { %v13590_v26 = vrot.slane %v13589_v61, 1  ;;  %v13600_v41 = vrot.slane %v13599_v59, 2  ;;  %v13610_v48 = vrot.slane %v13573_v62, 4 }
0x1aa8   :  { %v13585_v30 = vmax.f32 %v13583_v43, %v13584_v37  ;;  %v13595_v55 = vmax.f32 %v13593_v20, %v13594_v27  ;;  %v13605_v38 = vmax.f32 %v13570_v32, %v13604_v58 }
0x1aa9   :  { %v13591_v8 = vmax.f32 %v13589_v61, %v13590_v26  ;;  %v13601_v46 = vmax.f32 %v13599_v59, %v13600_v41  ;;  %v13611_v50 = vmax.f32 %v13573_v62, %v13610_v48  ;;  %v13576_v10 = vpop.xlane.xlu1 %13575 }
0x1aaa   :  { %16422 = vmatmul.mubr.msk.f32.vlgmr.msra.gmra.mrb[146].mxu0 %vm531_vm1, %v14178_v24  ;;  %v13628_v36 = vsub.f32 %v13558_v9, %v13585_v30  ;;  %v13596_v29 = vrot.slane %v13595_v55, 1  ;;  %v13606_v47 = vrot.slane %v13605_v38, 2  ;;  %v13579_v35 = vpop.xlane.xlu0 %13578  ;;  %v13616_v1 = vrot.slane %v13576_v10, 4 }
0x1aab   :  { %v13629_v7 = vsub.f32 %v13561_v39, %v13591_v8  ;;  %16425 = vmatpush3.msra.mxu0 %v14252_v19  ;;  %16426 = vmatprep.mubr.msk.f32.mxu0 %vm17789_vm13, %v21842_v22  ;;  %v13602_v5 = vrot.slane %v13601_v46, 1  ;;  %v13612_v45 = vrot.slane %v13611_v50, 2  ;;  %v13622_v57 = vrot.slane %v13579_v35, 4 }
0x1aac   :  { %16429 = vmatprep.subr.mxu0 %v21842_v22  ;;  %v13636_v53 = vmul.f32 1.442695, %v13628_v36  ;;  %v13597_v6 = vmax.f32 %v13595_v55, %v13596_v29  ;;  %v13607_v11 = vmax.f32 %v13605_v38, %v13606_v47  ;;  %v13617_v39 = vmax.f32 %v13576_v10, %v13616_v1 }
0x1aad   :  { %v13638_v49 = vmul.f32 1.442695, %v13629_v7  ;;  %v13603_v24 = vmax.f32 %v13601_v46, %v13602_v5  ;;  %v13613_v9 = vmax.f32 %v13611_v50, %v13612_v45  ;;  %v13623_v51 = vmax.f32 %v13579_v35, %v13622_v57 }
0x1aae   :  { %17721 = vpow2.f32 %v13636_v53  ;;  %v13630_v44 = vsub.f32 %v13564_v56, %v13597_v6  ;;  %v13608_v12 = vrot.slane %v13607_v11, 1  ;;  %v13618_v31 = vrot.slane %v13617_v39, 2 }
0x1aaf   :  { %17723 = vpow2.f32 %v13638_v49  ;;  %v13631_v40 = vsub.f32 %v13567_v15, %v13603_v24  ;;  %v13614_v25 = vrot.slane %v13613_v9, 1  ;;  %v13624_v61 = vrot.slane %v13623_v51, 2 }
0x1ab0   :  { %v13640_v13 = vmul.f32 1.442695, %v13630_v44  ;;  %v13609_v43 = vmax.f32 %v13607_v11, %v13608_v12  ;;  %v13619_v37 = vmax.f32 %v13617_v39, %v13618_v31 }
0x1ab1   :  { %v13642_v20 = vmul.f32 1.442695, %v13631_v40  ;;  %v13615_v59 = vmax.f32 %v13613_v9, %v13614_v25  ;;  %v13625_v26 = vmax.f32 %v13623_v51, %v13624_v61 }
0x1ab2   :  { %16427 = vmatmul.mubr.msk.f32.vlgmr.msra.gmra.mrb[146].mxu0 %vm531_vm1, %v21336_v4  ;;  %17725 = vpow2.f32 %v13640_v13  ;;  %v13632_v56 = vsub.f32 %v13570_v32, %v13609_v43  ;;  %v13620_v27 = vrot.slane %v13619_v37, 1 }
0x1ab3   :  { %16430 = vmatpush3.msra.mxu0 %v14341_v21  ;;  %16431 = vmatprep.mubr.msk.f32.mxu0 %vm17789_vm13, %v21842_v22  ;;  %17727 = vpow2.f32 %v13642_v20  ;;  %v13633_v15 = vsub.f32 %v13573_v62, %v13615_v59  ;;  %v13626_v41 = vrot.slane %v13625_v26, 1 }
0x1ab4   :  { %16434 = vmatprep.subr.mxu0 %v21842_v22  ;;  %v13644_v58 = vmul.f32 1.442695, %v13632_v56  ;;  %v13621_v19 = vmax.f32 %v13619_v37, %v13620_v27 }
0x1ab5   :  { %v13646_v48 = vmul.f32 1.442695, %v13633_v15  ;;  %v13627_v30 = vmax.f32 %v13625_v26, %v13626_v41 }
0x1ab6   :  { %17729 = vpow2.f32 %v13644_v58  ;;  %v13634_v4 = vsub.f32 %v13576_v10, %v13621_v19 }
0x1ab7   :  { %17731 = vpow2.f32 %v13646_v48  ;;  %v13635_v32 = vsub.f32 %v13579_v35, %v13627_v30 }
0x1ab8   :  { %v21356_v8 = vpop.eup %17721  ;;  %v13648_v46 = vmul.f32 1.442695, %v13634_v4 }
0x1ab9   :  { %v21358_v55 = vpop.eup %17723  ;;  %v13652_v38 = vrot.slane %v21356_v8, 4  ;;  %v13650_v50 = vmul.f32 1.442695, %v13635_v32 }
0x1aba   :  { %v13658_v62 = vrot.slane %v21358_v55, 4  ;;  %17733 = vpow2.f32 %v13648_v46 }
0x1abb   :  { %v13653_v36 = vadd.f32 %v21356_v8, %v13652_v38  ;;  %17735 = vpow2.f32 %v13650_v50 }
0x1abc   :  { %v21363_v7 = vpop.eup %17725  ;;  %v13659_v29 = vadd.f32 %v21358_v55, %v13658_v62 }
0x1abd   :  { %v21366_v10 = vpop.eup %17727  ;;  %v13654_v47 = vrot.slane %v13653_v36, 2  ;;  %v13664_v35 = vrot.slane %v21363_v7, 4 }
0x1abe   :  { %v13660_v5 = vrot.slane %v13659_v29, 2  ;;  %v13670_v45 = vrot.slane %v21366_v10, 4 }
0x1abf   :  { %v13655_v1 = vadd.f32 %v13654_v47, %v13653_v36  ;;  %v13665_v57 = vadd.f32 %v21363_v7, %v13664_v35 }
0x1ac0   :  { %v21371_v53 = vpop.eup %17729  ;;  %v13661_v49 = vadd.f32 %v13660_v5, %v13659_v29  ;;  %v13671_v6 = vadd.f32 %v21366_v10, %v13670_v45 }
0x1ac1   :  { %v21374_v11 = vpop.eup %17731  ;;  %v13656_v24 = vrot.slane %v13655_v1, 1  ;;  %v13666_v9 = vrot.slane %v13665_v57, 2  ;;  %v13676_v39 = vrot.slane %v21371_v53, 4 }
0x1ac2   :  { %v13662_v51 = vrot.slane %v13661_v49, 1  ;;  %v13672_v44 = vrot.slane %v13671_v6, 2  ;;  %v13682_v12 = vrot.slane %v21374_v11, 4 }
0x1ac3   :  { %v13657_v40 = vadd.f32 %v13656_v24, %v13655_v1  ;;  %v13667_v25 = vadd.f32 %v13666_v9, %v13665_v57  ;;  %v13677_v31 = vadd.f32 %v21371_v53, %v13676_v39  ;;  %v21959_v9 = vld [vmem:[#allocation79_spill] sm:$0xff] }
0x1ac4   :  { %v13663_v21 = vadd.f32 %v13662_v51, %v13661_v49  ;;  %v13673_v13 = vadd.f32 %v13672_v44, %v13671_v6  ;;  %v13683_v43 = vadd.f32 %v21374_v11, %v13682_v12  ;;  %v21380_v61 = vpop.eup %17733  ;;  %v21960_v51 = vld [vmem:[#allocation88_spill] sm:$0xff] }
0x1ac5   :  { %17737 = vrcp.f32 %v13657_v40  ;;  %v13668_v20 = vrot.slane %v13667_v25, 1  ;;  %v13678_v59 = vrot.slane %v13677_v31, 2  ;;  %v21382_v37 = vpop.eup %17735  ;;  %v13688_v15 = vrot.slane %v21380_v61, 4 }
0x1ac6   :  { %17739 = vrcp.f32 %v13663_v21  ;;  %v13674_v56 = vrot.slane %v13673_v13, 1  ;;  %v13684_v26 = vrot.slane %v13683_v43, 2  ;;  %v13694_v41 = vrot.slane %v21382_v37, 4 }
0x1ac7   :  { %v13669_v27 = vadd.f32 %v13668_v20, %v13667_v25  ;;  %v13679_v58 = vadd.f32 %v13678_v59, %v13677_v31  ;;  %v13689_v30 = vadd.f32 %v21380_v61, %v13688_v15  ;;  %v21961_v25 = vld [vmem:[#allocation80_spill] sm:$0xff]  ;;  %v21962_v31 = vld [vmem:[#allocation87_spill] sm:$0xff] }
0x1ac8   :  { %v13675_v48 = vadd.f32 %v13674_v56, %v13673_v13  ;;  %v13685_v19 = vadd.f32 %v13684_v26, %v13683_v43  ;;  %v13695_v32 = vadd.f32 %v21382_v37, %v13694_v41 }
0x1ac9   :  { %17741 = vrcp.f32 %v13669_v27  ;;  %v13680_v4 = vrot.slane %v13679_v58, 1  ;;  %v13690_v46 = vrot.slane %v13689_v30, 2 }
0x1aca   :  { %17743 = vrcp.f32 %v13675_v48  ;;  %v13686_v38 = vrot.slane %v13685_v19, 1  ;;  %v13696_v50 = vrot.slane %v13695_v32, 2 }
0x1acb   :  { %v13681_v62 = vadd.f32 %v13680_v4, %v13679_v58  ;;  %v13691_v29 = vadd.f32 %v13690_v46, %v13689_v30  ;;  %v21965_v4 = vld [vmem:[#allocation82_spill] sm:$0xff] }
0x1acc   :  { %v13687_v36 = vadd.f32 %v13686_v38, %v13685_v19  ;;  %v13697_v47 = vadd.f32 %v13696_v50, %v13695_v32  ;;  %v21966_v38 = vld [vmem:[#allocation91_spill] sm:$0xff] }
0x1acd   :  { %17745 = vrcp.f32 %v13681_v62  ;;  %v13692_v35 = vrot.slane %v13691_v29, 1 }
0x1ace   :  { %17747 = vrcp.f32 %v13687_v36  ;;  %v13698_v45 = vrot.slane %v13697_v47, 1 }
0x1acf   :  { %v17738_v5 = vpop.eup %17737  ;;  %v13693_v49 = vadd.f32 %v13692_v35, %v13691_v29 }
0x1ad0   :  { %v17740_v1 = vpop.eup %17739  ;;  %v21389_v57 = vmul.f32 %v17738_v5, %v21356_v8  ;;  %v13699_v24 = vadd.f32 %v13698_v45, %v13697_v47 }
0x1ad1   :  { %v21392_v6 = vmul.f32 %v17740_v1, %v21358_v55  ;;  %17749 = vrcp.f32 %v13693_v49 }
0x1ad2   :  { %v13716_v39 = vmul.f32 %v21389_v57, %v21959_v9  ;;  %v13780_v44 = vmul.f32 %v21389_v57, %v21960_v51  ;;  %v13844_v12 = vmul.f32 %v21389_v57, %v20694_v18  ;;  %17751 = vrcp.f32 %v13699_v24  ;;  %v21967_v24 = vld [vmem:[#allocation83_spill] sm:$0xff] }
0x1ad3   :  { %v17742_v40 = vpop.eup %17741  ;;  %v13717_v8 = vmul.f32 %v21392_v6, %v21961_v25  ;;  %v13781_v55 = vmul.f32 %v21392_v6, %v21962_v31  ;;  %v21406_v21 = vmul.f32 %v21392_v6, %v20702_v23  ;;  %v21963_v23 = vld [vmem:[#allocation81_spill] sm:$0xff] }
0x1ad4   :  { %v17744_v13 = vpop.eup %17743  ;;  %v21409_v43 = vmul.f32 %v17742_v40, %v21363_v7  ;;  %v13724_v20 = vsel %vm531_vm1, %v13716_v39, 0.0  ;;  %v13788_v18 = vsel %vm531_vm1, %v13780_v44, 0.0  ;;  %v21414_v59 = vsel %vm531_vm1, %v13844_v12, 0.0  ;;  %v21964_v7 = vld [vmem:[#allocation89_spill] sm:$0xff]  ;;  %v21968_v44 = vld [vmem:[#allocation90_spill] sm:$0xff]  ;;  %v21969_v12 = vld [vmem:[#allocation84_spill] sm:$0xff] }
0x1ad5   :  { %v21417_v56 = vmul.f32 %v17744_v13, %v21366_v10  ;;  %v13725_v26 = vrot.slane %v13724_v20, 4  ;;  %v13731_v15 = vsel %vm531_vm1, %v13717_v8, 0.0  ;;  %v13789_v27 = vrot.slane %v13788_v18, 4 }
0x1ad6   :  { %v13718_v58 = vmul.f32 %v21409_v43, %v21963_v23  ;;  %v13732_v41 = vrot.slane %v13731_v15, 4  ;;  %v21424_v48 = vmul.f32 %v21409_v43, %v21964_v7  ;;  %v21427_v19 = vsel %vm531_vm1, %v13781_v55, 0.0 }
0x1ad7   :  { %v17746_v30 = vpop.eup %17745  ;;  %v13719_v10 = vmul.f32 %v21417_v56, %v21965_v4  ;;  %v13726_v32 = vadd.f32 %v13725_v26, %v13724_v20  ;;  %v21433_v46 = vmul.f32 %v21417_v56, %v21966_v38  ;;  %v13790_v62 = vadd.f32 %v13789_v27, %v13788_v18 }
0x1ad8   :  { %v17748_v50 = vpop.eup %17747  ;;  %v21436_v36 = vmul.f32 %v17746_v30, %v21371_v53  ;;  %v13733_v29 = vadd.f32 %v13732_v41, %v13731_v15  ;;  %v13738_v47 = vsel %vm531_vm1, %v13718_v58, 0.0  ;;  %v13796_v35 = vrot.slane %v21427_v19, 4 }
0x1ad9   :  { %v21441_v5 = vmul.f32 %v17748_v50, %v21374_v11  ;;  %v13727_v45 = vrot.slane %v13726_v32, 2  ;;  %v13739_v1 = vrot.slane %v13738_v47, 4  ;;  %v13745_v49 = vsel %vm531_vm1, %v13719_v10, 0.0  ;;  %v21970_v11 = vld [vmem:[#allocation92_spill] sm:$0xff] }
0x1ada   :  { %v13720_v9 = vmul.f32 %v21436_v36, %v21967_v24  ;;  %v13734_v39 = vrot.slane %v13733_v29, 2  ;;  %v13746_v51 = vrot.slane %v13745_v49, 4  ;;  %v21448_v53 = vmul.f32 %v21436_v36, %v21968_v44 }
0x1adb   :  { %v13721_v40 = vmul.f32 %v21441_v5, %v21969_v12  ;;  %v13728_v25 = vadd.f32 %v13727_v45, %v13726_v32  ;;  %v13740_v8 = vadd.f32 %v13739_v1, %v13738_v47  ;;  %v21454_v31 = vmul.f32 %v21441_v5, %v21970_v11  ;;  %v17750_v55 = vpop.eup %17749  ;;  %v21971_v32 = vld [vmem:[#allocation86_spill] sm:$0xff]  ;;  %v21972_v45 = vld [vmem:[#allocation85_spill] sm:$0xff] }
0x1adc   :  { %v13735_v13 = vadd.f32 %v13734_v39, %v13733_v29  ;;  %v13747_v20 = vadd.f32 %v13746_v51, %v13745_v49  ;;  %v13752_v18 = vsel %vm531_vm1, %v13720_v9, 0.0  ;;  %v13791_v26 = vrot.slane %v13790_v62, 2  ;;  %v17752_v15 = vpop.eup %17751  ;;  %v21973_v51 = vld [vmem:[#allocation93_spill] sm:$0xff] }
0x1add   :  { %v21458_v27 = vmul.f32 %v17750_v55, %v21380_v61  ;;  %v13729_v23 = vrot.slane %v13728_v25, 1  ;;  %v13741_v58 = vrot.slane %v13740_v8, 2  ;;  %v13753_v41 = vrot.slane %v13752_v18, 4 }
0x1ade   :  { %v21461_v7 = vmul.f32 %v17752_v15, %v21382_v37  ;;  %v13736_v30 = vrot.slane %v13735_v13, 1  ;;  %v13748_v4 = vrot.slane %v13747_v20, 2  ;;  %v13759_v10 = vsel %vm531_vm1, %v13721_v40, 0.0 }
0x1adf   :  { %v13722_v38 = vmul.f32 %v21458_v27, %v21971_v32  ;;  %v13730_v50 = vadd.f32 %v13729_v23, %v13728_v25  ;;  %v13742_v29 = vadd.f32 %v13741_v58, %v13740_v8  ;;  %v13754_v47 = vadd.f32 %v13753_v41, %v13752_v18  ;;  %v21974_v58 = vld [vmem:[#allocation94_spill] sm:$0xff] }
0x1ae0   :  { %v13723_v61 = vmul.f32 %v21461_v7, %v21972_v45  ;;  %v13737_v1 = vadd.f32 %v13736_v30, %v13735_v13  ;;  %v13749_v49 = vadd.f32 %v13748_v4, %v13747_v20  ;;  %v13760_v24 = vrot.slane %v13759_v10, 4 }
0x1ae1   :  { %v13743_v9 = vrot.slane %v13742_v29, 1  ;;  %v13755_v39 = vrot.slane %v13754_v47, 2  ;;  %v13766_v37 = vsel %vm531_vm1, %v13722_v38, 0.0  ;;  %v13786_v44 = vmul.f32 %v21458_v27, %v21973_v51 }
0x1ae2   :  { %v13750_v12 = vrot.slane %v13749_v49, 1  ;;  %v13761_v40 = vadd.f32 %v13760_v24, %v13759_v10  ;;  %v13767_v11 = vrot.slane %v13766_v37, 4  ;;  %v13773_v25 = vsel %vm531_vm1, %v13723_v61, 0.0 }
0x1ae3   :  { %v13744_v8 = vadd.f32 %v13743_v9, %v13742_v29  ;;  %v13756_v55 = vadd.f32 %v13755_v39, %v13754_v47  ;;  %v13774_v18 = vrot.slane %v13773_v25, 4  ;;  %v14350_v15 = vsel %vm13987_vm14, %v13737_v1, %v13730_v50 }
0x1ae4   :  { %v13751_v13 = vadd.f32 %v13750_v12, %v13749_v49  ;;  %v13762_v20 = vrot.slane %v13761_v40, 2  ;;  %v13768_v23 = vadd.f32 %v13767_v11, %v13766_v37  ;;  %v13787_v41 = vmul.f32 %v21461_v7, %v21974_v58 }
0x1ae5   :  { %v13757_v30 = vrot.slane %v13756_v55, 1  ;;  %v13775_v4 = vadd.f32 %v13774_v18, %v13773_v25  ;;  %v14351_v32 = vsel %vm13989_vm15, %v13744_v8, %v14350_v15  ;;  %v13792_v38 = vadd.f32 %v13791_v26, %v13790_v62 }
0x1ae6   :  { %v13763_v10 = vadd.f32 %v13762_v20, %v13761_v40  ;;  %v13769_v45 = vrot.slane %v13768_v23, 2  ;;  %v14352_v61 = vsel %vm13991_vm0, %v13751_v13, %v14351_v32  ;;  %v13797_v29 = vadd.f32 %v13796_v35, %v21427_v19  ;;  %v14430_v32 = vld [vmem:[%s21601_s6 + $0x28] sm:$0xff] }
0x1ae7   :  { %v13758_v47 = vadd.f32 %v13757_v30, %v13756_v55  ;;  %v13776_v24 = vrot.slane %v13775_v4, 2  ;;  %v13793_v50 = vrot.slane %v13792_v38, 1  ;;  %v13802_v1 = vsel %vm531_vm1, %v21424_v48, 0.0 }
0x1ae8   :  { %v13764_v49 = vrot.slane %v13763_v10, 1  ;;  %v13770_v9 = vadd.f32 %v13769_v45, %v13768_v23  ;;  %v13798_v39 = vrot.slane %v13797_v29, 2  ;;  %v13803_v37 = vrot.slane %v13802_v1, 4 }
0x1ae9   :  { %v13777_v51 = vadd.f32 %v13776_v24, %v13775_v4  ;;  %v14353_v12 = vsel %vm13993_vm2, %v13758_v47, %v14352_v61  ;;  %v13794_v62 = vadd.f32 %v13793_v50, %v13792_v38  ;;  %v13809_v26 = vsel %vm531_vm1, %v21433_v46, 0.0 }
0x1aea   :  { %v13765_v40 = vadd.f32 %v13764_v49, %v13763_v10  ;;  %v13771_v11 = vrot.slane %v13770_v9, 1  ;;  %v13799_v19 = vadd.f32 %v13798_v39, %v13797_v29  ;;  %v13804_v35 = vadd.f32 %v13803_v37, %v13802_v1 }
0x1aeb   :  { %v13778_v25 = vrot.slane %v13777_v51, 1  ;;  %v13810_v8 = vrot.slane %v13809_v26, 4  ;;  %v13816_v48 = vsel %vm531_vm1, %v21448_v53, 0.0  ;;  %v13823_v55 = vsel %vm531_vm1, %v21454_v31, 0.0 }
0x1aec   :  { %v13772_v18 = vadd.f32 %v13771_v11, %v13770_v9  ;;  %v14354_v15 = vsel %vm13995_vm3, %v13765_v40, %v14353_v12  ;;  %v13800_v13 = vrot.slane %v13799_v19, 1  ;;  %v13805_v20 = vrot.slane %v13804_v35, 2 }
0x1aed   :  { %v13779_v23 = vadd.f32 %v13778_v25, %v13777_v51  ;;  %v13811_v58 = vadd.f32 %v13810_v8, %v13809_v26  ;;  %v13817_v46 = vrot.slane %v13816_v48, 4  ;;  %v13824_v30 = vrot.slane %v13823_v55, 4 }
0x1aee   :  { %v14355_v4 = vsel %vm13997_vm4, %v13772_v18, %v14354_v15  ;;  %v13801_v38 = vadd.f32 %v13800_v13, %v13799_v19  ;;  %v13806_v53 = vadd.f32 %v13805_v20, %v13804_v35  ;;  %v13830_v10 = vsel %vm531_vm1, %v13786_v44, 0.0 }
0x1aef   :  { %v14356_v31 = vsel %vm13999_vm5, %v13779_v23, %v14355_v4  ;;  %v13812_v45 = vrot.slane %v13811_v58, 2  ;;  %v13818_v61 = vadd.f32 %v13817_v46, %v13816_v48  ;;  %v13825_v29 = vadd.f32 %v13824_v30, %v13823_v55 }
0x1af0   :  { %16432 = vmatmul.mubr.msk.f32.vlgmr.msra.gmra.mrb[146].mxu0 %vm531_vm1, %v14356_v31  ;;  %v13807_v47 = vrot.slane %v13806_v53, 1  ;;  %v13831_v24 = vrot.slane %v13830_v10, 4  ;;  %v13837_v50 = vsel %vm531_vm1, %v13787_v41, 0.0  ;;  %v14439_v1 = vsel %vm13987_vm14, %v13801_v38, %v13794_v62 }
0x1af1   :  { %16435 = vmatpush3.msra.mxu0 %v14430_v32  ;;  %16436 = vmatprep.mubr.msk.f32.mxu0 %vm17789_vm13, %v21842_v22  ;;  %v13813_v49 = vadd.f32 %v13812_v45, %v13811_v58  ;;  %v13819_v9 = vrot.slane %v13818_v61, 2  ;;  %v13826_v44 = vrot.slane %v13825_v29, 2  ;;  %v13838_v39 = vrot.slane %v13837_v50, 4 }
0x1af2   :  { %v13808_v37 = vadd.f32 %v13807_v47, %v13806_v53  ;;  %v13832_v51 = vadd.f32 %v13831_v24, %v13830_v10  ;;  %16439 = vmatprep.subr.mxu0 %v21842_v22  ;;  %v13846_v12 = vmul.f32 %v21409_v43, %v20700_v33  ;;  %v13847_v41 = vmul.f32 %v21417_v56, %v20714_v16 }
0x1af3   :  { %v13814_v26 = vrot.slane %v13813_v49, 1  ;;  %v13820_v62 = vadd.f32 %v13819_v9, %v13818_v61  ;;  %v13827_v40 = vadd.f32 %v13826_v44, %v13825_v29  ;;  %v13839_v11 = vadd.f32 %v13838_v39, %v13837_v50 }
0x1af4   :  { %v13833_v19 = vrot.slane %v13832_v51, 2  ;;  %v14440_v35 = vsel %vm13989_vm15, %v13808_v37, %v14439_v1  ;;  %v13848_v25 = vmul.f32 %v21436_v36, %v20712_v0  ;;  %v13849_v8 = vmul.f32 %v21441_v5, %v20724_v60 }
0x1af5   :  { %v13815_v48 = vadd.f32 %v13814_v26, %v13813_v49  ;;  %v13821_v55 = vrot.slane %v13820_v62, 1  ;;  %v13828_v18 = vrot.slane %v13827_v40, 1  ;;  %v13840_v33 = vrot.slane %v13839_v11, 2 }
0x1af6   :  { %v13834_v15 = vadd.f32 %v13833_v19, %v13832_v51  ;;  %v13850_v16 = vmul.f32 %v21458_v27, %v20730_v3  ;;  %v13851_v13 = vmul.f32 %v21461_v7, %v20736_v63  ;;  %v13853_v20 = vrot.slane %v21414_v59, 4 }
0x1af7   :  { %v13822_v23 = vadd.f32 %v13821_v55, %v13820_v62  ;;  %v13829_v58 = vadd.f32 %v13828_v18, %v13827_v40  ;;  %v13841_v46 = vadd.f32 %v13840_v33, %v13839_v11  ;;  %v14441_v0 = vsel %vm13991_vm0, %v13815_v48, %v14440_v35 }
0x1af8   :  { %v13835_v30 = vrot.slane %v13834_v15, 1  ;;  %v13854_v60 = vadd.f32 %v13853_v20, %v21414_v59  ;;  %v13859_v4 = vsel %vm531_vm1, %v21406_v21, 0.0  ;;  %v13866_v32 = vsel %vm531_vm1, %v13846_v12, 0.0  ;;  %v14519_v21 = vld [vmem:[%s21601_s6 + $0x30] sm:$0xff] }
0x1af9   :  { %v13842_v38 = vrot.slane %v13841_v46, 1  ;;  %v14442_v3 = vsel %vm13993_vm2, %v13822_v23, %v14441_v0  ;;  %v13860_v53 = vrot.slane %v13859_v4, 4  ;;  %v13867_v63 = vrot.slane %v13866_v32, 4 }
0x1afa   :  { %v13836_v10 = vadd.f32 %v13835_v30, %v13834_v15  ;;  %v14443_v31 = vsel %vm13995_vm3, %v13829_v58, %v14442_v3  ;;  %v13855_v45 = vrot.slane %v13854_v60, 2  ;;  %v13873_v61 = vsel %vm531_vm1, %v13847_v41, 0.0 }
0x1afb   :  { %v13843_v29 = vadd.f32 %v13842_v38, %v13841_v46  ;;  %v13861_v47 = vadd.f32 %v13860_v53, %v13859_v4  ;;  %v13868_v24 = vadd.f32 %v13867_v63, %v13866_v32  ;;  %v13874_v59 = vrot.slane %v13873_v61, 4 }
0x1afc   :  { %v14444_v50 = vsel %vm13997_vm4, %v13836_v10, %v14443_v31  ;;  %v13856_v1 = vadd.f32 %v13855_v45, %v13854_v60  ;;  %v13880_v49 = vsel %vm531_vm1, %v13848_v25, 0.0  ;;  %v13887_v9 = vsel %vm531_vm1, %v13849_v8, 0.0 }
0x1afd   :  { %v14445_v44 = vsel %vm13999_vm5, %v13843_v29, %v14444_v50  ;;  %v13862_v39 = vrot.slane %v13861_v47, 2  ;;  %v13869_v37 = vrot.slane %v13868_v24, 2  ;;  %v13875_v51 = vadd.f32 %v13874_v59, %v13873_v61 }
0x1afe   :  { %16437 = vmatmul.mubr.msk.f32.vlgmr.msra.gmra.mrb[146].mxu0 %vm531_vm1, %v14445_v44  ;;  %v13857_v12 = vrot.slane %v13856_v1, 1  ;;  %v13881_v41 = vrot.slane %v13880_v49, 4  ;;  %v13888_v26 = vrot.slane %v13887_v9, 4  ;;  %v13894_v62 = vsel %vm531_vm1, %v13850_v16, 0.0 }
0x1aff   :  { %16440 = vmatpush3.msra.mxu0 %v14519_v21  ;;  %16441 = vmatprep.mubr.msk.f32.mxu0 %vm17789_vm13, %v21842_v22  ;;  %v13863_v40 = vadd.f32 %v13862_v39, %v13861_v47  ;;  %v13870_v11 = vadd.f32 %v13869_v37, %v13868_v24  ;;  %v13876_v19 = vrot.slane %v13875_v51, 2  ;;  %v13895_v35 = vrot.slane %v13894_v62, 4 }
0x1b00   :  { %v13858_v25 = vadd.f32 %v13857_v12, %v13856_v1  ;;  %v13882_v8 = vadd.f32 %v13881_v41, %v13880_v49  ;;  %v13889_v48 = vadd.f32 %v13888_v26, %v13887_v9  ;;  %v13901_v55 = vsel %vm531_vm1, %v13851_v13, 0.0  ;;  %16444 = vmatprep.subr.mxu0 %v21842_v22 }
0x1b01   :  { %v13864_v18 = vrot.slane %v13863_v40, 1  ;;  %v13871_v33 = vrot.slane %v13870_v11, 1  ;;  %v13877_v15 = vadd.f32 %v13876_v19, %v13875_v51  ;;  %v13896_v20 = vadd.f32 %v13895_v35, %v13894_v62 }
0x1b02   :  { %v13883_v16 = vrot.slane %v13882_v8, 2  ;;  %v13890_v23 = vrot.slane %v13889_v48, 2  ;;  %v13902_v58 = vrot.slane %v13901_v55, 4  ;;  %v13908_v46 = vmul.f32 %v21389_v57, %v20931_v34 }
0x1b03   :  { %v13865_v0 = vadd.f32 %v13864_v18, %v13863_v40  ;;  %v13872_v30 = vadd.f32 %v13871_v33, %v13870_v11  ;;  %v13878_v60 = vrot.slane %v13877_v15, 1  ;;  %v13897_v4 = vrot.slane %v13896_v20, 2 }
0x1b04   :  { %v13884_v32 = vadd.f32 %v13883_v16, %v13882_v8  ;;  %v13891_v38 = vadd.f32 %v13890_v23, %v13889_v48  ;;  %v13903_v3 = vadd.f32 %v13902_v58, %v13901_v55  ;;  %v13909_v13 = vmul.f32 %v21392_v6, %v20938_v42 }
0x1b05   :  { %v13879_v53 = vadd.f32 %v13878_v60, %v13877_v15  ;;  %v13898_v63 = vadd.f32 %v13897_v4, %v13896_v20  ;;  %v14528_v10 = vsel %vm13987_vm14, %v13865_v0, %v13858_v25  ;;  %v13910_v31 = vmul.f32 %v21409_v43, %v20936_v14 }
0x1b06   :  { %v13885_v45 = vrot.slane %v13884_v32, 1  ;;  %v13892_v61 = vrot.slane %v13891_v38, 1  ;;  %v13904_v34 = vrot.slane %v13903_v3, 2  ;;  %v14529_v57 = vsel %vm13989_vm15, %v13872_v30, %v14528_v10 }
0x1b07   :  { %v13899_v29 = vrot.slane %v13898_v63, 1  ;;  %v14530_v47 = vsel %vm13991_vm0, %v13879_v53, %v14529_v57  ;;  %v13911_v24 = vmul.f32 %v21417_v56, %v20948_v17  ;;  %v13912_v42 = vmul.f32 %v21436_v36, %v20946_v54 }
0x1b08   :  { %v13886_v6 = vadd.f32 %v13885_v45, %v13884_v32  ;;  %v13893_v59 = vadd.f32 %v13892_v61, %v13891_v38  ;;  %v13905_v50 = vadd.f32 %v13904_v34, %v13903_v3  ;;  %v13913_v14 = vmul.f32 %v21441_v5, %v20958_v52 }
0x1b09   :  { %v13900_v43 = vadd.f32 %v13899_v29, %v13898_v63  ;;  %v13914_v21 = vmul.f32 %v21458_v27, %v20956_v2  ;;  %v13915_v1 = vmul.f32 %v21461_v7, %v20967_v28  ;;  %v13916_v49 = vsel %vm531_vm1, %v13908_v46, 0.0  ;;  %v14608_v7 = vld [vmem:[%s21601_s6 + $0x38] sm:$0xff] }
0x1b0a   :  { %v13906_v9 = vrot.slane %v13905_v50, 1  ;;  %v14531_v17 = vsel %vm13993_vm2, %v13886_v6, %v14530_v47  ;;  %v13917_v56 = vrot.slane %v13916_v49, 4  ;;  %v13923_v54 = vsel %vm531_vm1, %v13909_v13, 0.0 }
0x1b0b   :  { %v14532_v36 = vsel %vm13995_vm3, %v13893_v59, %v14531_v17  ;;  %v13924_v44 = vrot.slane %v13923_v54, 4  ;;  %v13930_v52 = vsel %vm531_vm1, %v13910_v31, 0.0  ;;  %v13937_v5 = vsel %vm531_vm1, %v13911_v24, 0.0 }
0x1b0c   :  { %v13907_v39 = vadd.f32 %v13906_v9, %v13905_v50  ;;  %v14533_v2 = vsel %vm13997_vm4, %v13900_v43, %v14532_v36  ;;  %v13918_v27 = vadd.f32 %v13917_v56, %v13916_v49  ;;  %v13931_v28 = vrot.slane %v13930_v52, 4 }
0x1b0d   :  { %v13925_v37 = vadd.f32 %v13924_v44, %v13923_v54  ;;  %v13938_v51 = vrot.slane %v13937_v5, 4  ;;  %v13944_v12 = vsel %vm531_vm1, %v13912_v42, 0.0  ;;  %v13951_v41 = vsel %vm531_vm1, %v13913_v14, 0.0  ;;  %v15076_v44 = vld [vmem:[%s21602_s7 + $0x4] ss:$0 sm:$0xff] }
0x1b0e   :  { %v14534_v26 = vsel %vm13999_vm5, %v13907_v39, %v14533_v2  ;;  %v13919_v62 = vrot.slane %v13918_v27, 2  ;;  %v13932_v40 = vadd.f32 %v13931_v28, %v13930_v52  ;;  %v13945_v11 = vrot.slane %v13944_v12, 4 }
0x1b0f   :  { %16442 = vmatmul.mubr.msk.f32.vlgmr.msra.gmra.mrb[146].mxu0 %vm531_vm1, %v14534_v26  ;;  %v13926_v19 = vrot.slane %v13925_v37, 2  ;;  %v13939_v35 = vadd.f32 %v13938_v51, %v13937_v5  ;;  %v13952_v25 = vrot.slane %v13951_v41, 4  ;;  %v13958_v8 = vsel %vm531_vm1, %v13914_v21, 0.0 }
0x1b10   :  { %16445 = vmatpush3.msra.mxu0 %v14608_v7  ;;  %16446 = vmatprep.mubr.msk.f32.mxu0 %vm17789_vm13, %v21842_v22  ;;  %v13920_v48 = vadd.f32 %v13919_v62, %v13918_v27  ;;  %v13933_v55 = vrot.slane %v13932_v40, 2  ;;  %v13946_v18 = vadd.f32 %v13945_v11, %v13944_v12  ;;  %v13959_v33 = vrot.slane %v13958_v8, 4 }
0x1b11   :  { %v13927_v15 = vadd.f32 %v13926_v19, %v13925_v37  ;;  %v13940_v20 = vrot.slane %v13939_v35, 2  ;;  %v13953_v16 = vadd.f32 %v13952_v25, %v13951_v41  ;;  %v13965_v23 = vsel %vm531_vm1, %v13915_v1, 0.0 }
0x1b12   :  { %v13921_v58 = vrot.slane %v13920_v48, 1  ;;  %v13934_v46 = vadd.f32 %v13933_v55, %v13932_v40  ;;  %v13947_v0 = vrot.slane %v13946_v18, 2  ;;  %v13960_v30 = vadd.f32 %v13959_v33, %v13958_v8 }
0x1b13   :  { %v13928_v60 = vrot.slane %v13927_v15, 1  ;;  %v13941_v4 = vadd.f32 %v13940_v20, %v13939_v35  ;;  %v13954_v32 = vrot.slane %v13953_v16, 2  ;;  %v13966_v38 = vrot.slane %v13965_v23, 4 }
0x1b14   :  { %v13922_v3 = vadd.f32 %v13921_v58, %v13920_v48  ;;  %v13935_v13 = vrot.slane %v13934_v46, 1  ;;  %v13948_v22 = vadd.f32 %v13947_v0, %v13946_v18  ;;  %v13961_v53 = vrot.slane %v13960_v30, 2 }
0x1b15   :  { %v13929_v63 = vadd.f32 %v13928_v60, %v13927_v15  ;;  %v13942_v10 = vrot.slane %v13941_v4, 1  ;;  %v13955_v31 = vadd.f32 %v13954_v32, %v13953_v16  ;;  %v13967_v45 = vadd.f32 %v13966_v38, %v13965_v23 }
0x1b16   :  { %v13936_v61 = vadd.f32 %v13935_v13, %v13934_v46  ;;  %v13949_v34 = vrot.slane %v13948_v22, 1  ;;  %v13962_v57 = vadd.f32 %v13961_v53, %v13960_v30 }
0x1b17   :  { %v13943_v29 = vadd.f32 %v13942_v10, %v13941_v4  ;;  %v13956_v47 = vrot.slane %v13955_v31, 1  ;;  %v13968_v24 = vrot.slane %v13967_v45, 2  ;;  %v14617_v42 = vsel %vm13987_vm14, %v13929_v63, %v13922_v3 }
0x1b18   :  { %v13950_v6 = vadd.f32 %v13949_v34, %v13948_v22  ;;  %v13963_v59 = vrot.slane %v13962_v57, 1  ;;  %v14618_v50 = vsel %vm13989_vm15, %v13936_v61, %v14617_v42 }
0x1b19   :  { %v13957_v14 = vadd.f32 %v13956_v47, %v13955_v31  ;;  %v13969_v43 = vadd.f32 %v13968_v24, %v13967_v45  ;;  %v14619_v21 = vsel %vm13991_vm0, %v13943_v29, %v14618_v50 }
0x1b1a   :  { %v13964_v1 = vadd.f32 %v13963_v59, %v13962_v57  ;;  %v14620_v49 = vsel %vm13993_vm2, %v13950_v6, %v14619_v21 }
0x1b1b   :  { %v13970_v9 = vrot.slane %v13969_v43, 1  ;;  %v14621_v17 = vsel %vm13995_vm3, %v13957_v14, %v14620_v49 }
0x1b1c   :  { %v14622_v56 = vsel %vm13997_vm4, %v13964_v1, %v14621_v17 }
0x1b1d   :  { %v13971_v54 = vadd.f32 %v13970_v9, %v13969_v43 }
0x1b1f   :  { %v14623_v36 = vsel %vm13999_vm5, %v13971_v54, %v14622_v56 }
0x1b20   :  { %16447 = vmatmul.mubr.msk.f32.vlgmr.msra.gmra.mrb[146].mxu0 %vm531_vm1, %v14623_v36 }
0x1bf3   :  { %v14692_v52 = vpop.f32.mrb[146].mxu0 }
0x1bf4   :  { %v16849_v5 = vadd.f32 %v15076_v44, %v14692_v52  ;;  %v16448_v39 = vpop.f32.mrb[147].mxu0 }
0x1bf6   :  { %14697 = vst [vmem:[#allocation2] sm:$0xff] %v16849_v5 }
0x1bf7   :  { %17764 = shalt.err (!%p17761_p4)
}
0x1bf8   :  { %s17765_s18 = scalar_lea.hbm %s21603_s8, 128 }
0x1bf9   :  { %p17766_p5 = scmp.ne.s32.totalorder %s21603_s8, %s17765_s18  ;;  %p17769_p6 = scmp.lt.u32.totalorder %s17765_s18, %s21603_s8 }
0x1bfb   :  { %p17771_p7 = pnand %p17769_p6, %p17766_p5 }
0x1bfd   :  { %17774 = shalt.err (!%p17771_p7)
}
0x1bfe   :  { %14707 = dma.vmem_to_hbm [thread:$0]  %s14705_s12, 128, %s21603_s8, [#allocation3]  }
0x1bff   :  { %17775 = dma.done.wait [#allocation3], 128  }
0x1c00   :  { %17776 = vsyncadd [#allocation3], 4294967168 }
0x1c01   :  { %14711 = vsyncpa [#allocation3], 1 }

</bundles_post_ra>
